<compile_context>
chip_gen: v6e
topology: v6e:2x2x1
jax: 0.10.0
libtpu: 0.0.40
codegen_flags: <defaults>
</compile_context>

<pallas_src>
import math
from functools import partial

import jax
import jax.numpy as jnp
from jax import lax
from jax.experimental import pallas as pl
from jax.experimental.pallas import tpu as pltpu

HID_DIM = 128          # D  (torch module uses 768; scaled down, same structure)
D = HID_DIM
Nh = 4
Dk = D // Nh
Dv = D // Nh
LENGTH = 128           # sequence length
CONV_NUM = 2
K = 5                  # depthwise kernel size (odd -> 'same' padding k//2)
BATCH = 2
EPS = 1e-5             # nn.LayerNorm default eps


# ----------------------------------------------------------------------------
# Pallas kernel: full EncoderBlock forward for ONE batch element.
# ----------------------------------------------------------------------------
def encoder_block_kernel(x_ref, pos_ref,
                         nb_w_ref, nb_b_ref,
                         dw_w_ref, pw_w_ref, pw_b_ref,
                         ns_w_ref, ns_b_ref,
                         wqT_ref, wkT_ref, wvT_ref, woT_ref,
                         ne_w_ref, ne_b_ref,
                         fc_w_ref, fc_b_ref,
                         out_ref,
                         *, conv_num, k, nh, dk, dv):
    f32 = jnp.float32

    x = x_ref[0]                                   # (D, L) f32
    Dd, L = x.shape
    pad = k // 2
    inv_n = 1.0 / (Dd * L)

    def layer_norm(o, w, b):
        # nn.LayerNorm([D, L]): normalize jointly over both trailing dims.
        # Single pass: sum and sum-of-squares, var = E[x^2] - mu^2.
        s = jnp.sum(o)
        ss = jnp.sum(o * o)
        mu = s * inv_n
        var = ss * inv_n - mu * mu
        return (o - mu) * (lax.rsqrt(var + EPS) * w) + b

    # PosEncoder + pre-norm
    out = x + pos_ref[...]
    res = out
    out = layer_norm(out, nb_w_ref[...], nb_b_ref[...])

    # Hoisted per-tap validity masks for the 'same'-padded depthwise conv
    # (built once, reused by every conv layer).
    lane = lax.broadcasted_iota(jnp.int32, (1, L), 1)
    tap_mask = [((lane + (j - pad) >= 0) & (lane + (j - pad) < L)).astype(f32)
                for j in range(k)]

    # -------- conv stack: DepthwiseSeparableConv -> ReLU -> residual -> LN ---
    for i in range(conv_num):
        wd = dw_w_ref[i]                           # (D, k)  f32
        wp = pw_w_ref[i]                           # (D, D)  f32
        bp = pw_b_ref[i]                           # (D, 1)  f32 (dw bias folded in)

        cin = out
        # depthwise conv1d with zero 'same' padding: shift-and-mask along L.
        acc = jnp.zeros((Dd, L), f32)
        for j in range(k):
            s = j - pad
            shifted = cin if s == 0 else pltpu.roll(cin, shift=(-s) % L, axis=1)
            w_eff = wd[:, j:j + 1] if s == 0 else wd[:, j:j + 1] * tap_mask[j]
            acc = acc + shifted * w_eff
        # pointwise conv1d == matmul over the channel dim (MXU, f32 acc).
        out = jnp.dot(wp, acc, preferred_element_type=f32) + bp
        out = jnp.maximum(out, 0.0)
        out = out + res
        # TODO(synk): training-mode F.dropout(p=0.1*(i+1)/L) inside the conv
        #             loop omitted (deterministic inference semantics).
        res = out
        out = layer_norm(out, ns_w_ref[i], ns_b_ref[i])

    # ----------------------------- self-attention ---------------------------
    # Channel-first, head-fused projections (scale 1/sqrt(Dk) folded into wqT).
    qT = jnp.dot(wqT_ref[...], out, preferred_element_type=f32)      # (Nh*Dk, L)
    kT = jnp.dot(wkT_ref[...], out, preferred_element_type=f32)      # (Nh*Dk, L)
    vT = jnp.dot(wvT_ref[...], out, preferred_element_type=f32)      # (Nh*Dv, L)

    q_lh = qT.T                                    # (L, Nh*Dk) -- the ONLY transpose

    heads_t = []
    for h in range(nh):
        q_h = q_lh[:, h * dk:(h + 1) * dk]          # (L, Dk)   lane slice
        kt_h = kT[h * dk:(h + 1) * dk, :]           # (Dk, L)   sublane slice
        vt_h = vT[h * dv:(h + 1) * dv, :]           # (Dv, L)   sublane slice

        s = jnp.dot(q_h, kt_h, preferred_element_type=f32)           # (L, L)
        s = s - jnp.max(s, axis=-1, keepdims=True)
        p = jnp.exp(s)
        p = p / jnp.sum(p, axis=-1, keepdims=True)
        # head_h^T = V_h^T @ P^T  : contract the key axis (last dim of both).
        head_t_h = lax.dot_general(vt_h, p,
                                   (((1,), (1,)), ((), ())),
                                   preferred_element_type=f32)       # (Dv, L)
        heads_t.append(head_t_h)

    head_t = jnp.concatenate(heads_t, axis=0)                        # (Nh*Dv, L)
    # Single fused output projection, directly in (D, L) layout.
    out = jnp.dot(woT_ref[...], head_t, preferred_element_type=f32)  # (D, L)

    out = out + res
    # TODO(synk): F.dropout(p=0.1) after attention omitted (deterministic).
    res = out

    # ----------------------------- final FC block ---------------------------
    out = layer_norm(out, ne_w_ref[...], ne_b_ref[...])
    # fc on transposed input == W @ out (contraction over channel dim) + bias
    out = jnp.dot(fc_w_ref[...], out, preferred_element_type=f32) + fc_b_ref[...]
    out = jnp.maximum(out, 0.0)
    out = out + res
    # TODO(synk): trailing F.dropout(p=0.1) omitted (deterministic).
    out_ref[0] = out


# ----------------------------------------------------------------------------
# Wrapper
# ----------------------------------------------------------------------------
def encoder_block(x, params):
    (pos, nb_w, nb_b, dw_w, dw_b, pw_w, pw_b, ns_w, ns_b,
     wq, wk, wv, wo, ne_w, ne_b, fc_w, fc_b) = params
    B, Dd, L = x.shape
    scale = 1.0 / math.sqrt(Dk)

    # Head-fused, pre-transposed projection weights (channel-first layout).
    #   wqT[h*Dk + c, d] = wq[h, d, c]   (attention scale folded into wqT)
    wqT = jnp.transpose(wq, (0, 2, 1)).reshape(Nh * Dk, Dd) * scale
    wkT = jnp.transpose(wk, (0, 2, 1)).reshape(Nh * Dk, Dd)
    wvT = jnp.transpose(wv, (0, 2, 1)).reshape(Nh * Dv, Dd)
    #   woT[d_out, h*Dv + c] = wo[h, c, d_out]
    woT = wo.reshape(Nh * Dv, Dd).T

    # Fold the depthwise bias into the pointwise bias: Wp @ (y + bd) + bp.
    pw_b_eff = jnp.einsum('nod,ndk->nok', pw_w, dw_b) + pw_b           # (N, D, 1)

    kparams = [pos, nb_w, nb_b, dw_w, pw_w, pw_b_eff, ns_w, ns_b,
               wqT, wkT, wvT, woT, ne_w, ne_b, fc_w, fc_b]

    def full(a):
        n = a.ndim
        return pl.BlockSpec(a.shape, lambda b, _n=n: (0,) * _n)

    in_specs = ([pl.BlockSpec((1, Dd, L), lambda b: (b, 0, 0))]
                + [full(p) for p in kparams])
    out_spec = pl.BlockSpec((1, Dd, L), lambda b: (b, 0, 0))

    kern = partial(encoder_block_kernel, conv_num=CONV_NUM, k=K,
                   nh=Nh, dk=Dk, dv=Dv)
    # TODO(synk): at the real HID_DIM=768 / long L, set vmem_limit_bytes
    #             explicitly and block the attention over L (flash-style);
    #             at these toy sizes the resident footprint is ~1 MiB.
    return pl.pallas_call(
        kern,
        out_shape=jax.ShapeDtypeStruct((B, Dd, L), jnp.float32),
        grid_spec=pltpu.PrefetchScalarGridSpec(
            num_scalar_prefetch=0,
            grid=(B,),
            in_specs=in_specs,
            out_specs=out_spec,
        ),
        compiler_params=pltpu.CompilerParams(
            dimension_semantics=("parallel",)),
    )(x, *kparams)


# ----------------------------------------------------------------------------
# Deterministic parameter construction (synthetic init, shapes from __init__)
# ----------------------------------------------------------------------------
def make_pos_encoding(length):
    i = jnp.arange(D, dtype=jnp.float32)
    even = (jnp.arange(D) % 2) == 0
    freqs = jnp.where(even, 10000.0 ** (-i / D), -(10000.0 ** ((1.0 - i) / D)))
    phases = jnp.where(even, 0.0, math.pi / 2)
    pos = jnp.arange(length, dtype=jnp.float32)
    return jnp.sin(pos[None, :] * freqs[:, None] + phases[:, None])   # (D, L)


def make_params(key):
    ks = jax.random.split(key, 8)
    f32 = jnp.float32
    pos = make_pos_encoding(LENGTH).astype(f32)
    normb_w = jnp.ones((D, LENGTH), f32)
    normb_b = jnp.zeros((D, LENGTH), f32)
    dw_w = (jax.random.normal(ks[0], (CONV_NUM, D, K), f32)
            * math.sqrt(2.0 / K))                               # kaiming-normal-ish
    dw_b = jnp.zeros((CONV_NUM, D, 1), f32)
    pw_w = (jax.random.normal(ks[1], (CONV_NUM, D, D), f32)
            * math.sqrt(2.0 / D))
    pw_b = jnp.zeros((CONV_NUM, D, 1), f32)
    ns_w = jnp.ones((CONV_NUM, D, LENGTH), f32)
    ns_b = jnp.zeros((CONV_NUM, D, LENGTH), f32)
    xav = math.sqrt(2.0 / (D + Dk))
    wq = jax.random.normal(ks[2], (Nh, D, Dk), f32) * xav
    wk = jax.random.normal(ks[3], (Nh, D, Dk), f32) * xav
    wv = jax.random.normal(ks[4], (Nh, D, Dv), f32) * xav
    wo = jax.random.normal(ks[5], (Nh, Dv, D), f32) * math.sqrt(2.0 / D)
    ne_w = jnp.ones((D, LENGTH), f32)
    ne_b = jnp.zeros((D, LENGTH), f32)
    fc_w = jax.random.normal(ks[6], (D, D), f32) * math.sqrt(1.0 / D)
    fc_b = jax.random.normal(ks[7], (D, 1), f32) * 0.01
    return [pos, normb_w, normb_b, dw_w, dw_b, pw_w, pw_b, ns_w, ns_b,
            wq, wk, wv, wo, ne_w, ne_b, fc_w, fc_b]


# ----------------------------------------------------------------------------
# Pure-JAX f32 reference (same math, eval/deterministic semantics)
# ----------------------------------------------------------------------------
def reference_forward(x, params):
    (pos, nb_w, nb_b, dw_w, dw_b, pw_w, pw_b, ns_w, ns_b,
     wq, wk, wv, wo, ne_w, ne_b, fc_w, fc_b) = params
    B, Dd, L = x.shape
    pad = K // 2

    def ln(o, w, b):
        mu = jnp.mean(o, axis=(1, 2), keepdims=True)
        var = jnp.mean((o - mu) ** 2, axis=(1, 2), keepdims=True)
        return (o - mu) / jnp.sqrt(var + EPS) * w + b

    out = x + pos[None]
    res = out
    out = ln(out, nb_w, nb_b)
    for i in range(CONV_NUM):
        xp = jnp.pad(out, ((0, 0), (0, 0), (pad, pad)))
        dw = sum(xp[:, :, j:j + L] * dw_w[i][:, j][None, :, None]
                 for j in range(K)) + dw_b[i][None]
        out = jnp.einsum('cd,bdl->bcl', pw_w[i], dw) + pw_b[i][None]
        out = jnp.maximum(out, 0.0) + res
        res = out
        out = ln(out, ns_w[i], ns_b[i])
    xT = jnp.swapaxes(out, 1, 2)                   # (B, L, D)
    att = jnp.zeros((B, L, Dd), jnp.float32)
    for h in range(Nh):
        q = xT @ wq[h]
        kk = xT @ wk[h]
        v = xT @ wv[h]
        s = (q @ jnp.swapaxes(kk, 1, 2)) / math.sqrt(Dk)
        p = jax.nn.softmax(s, axis=-1)
        att = att + (p @ v) @ wo[h].reshape(Dv, Dd)
    out = jnp.swapaxes(att, 1, 2) + res
    res = out
    out = ln(out, ne_w, ne_b)
    out = jnp.einsum('cd,bdl->bcl', fc_w, out) + fc_b[None]
    out = jnp.maximum(out, 0.0) + res
    return out


if __name__ == "__main__":
    key = jax.random.PRNGKey(0)
    kx, kp = jax.random.split(key)
    x = jax.random.normal(kx, (BATCH, D, LENGTH), jnp.float32)
    params = make_params(kp)

    out = encoder_block(x, params)
    out = jax.block_until_ready(out)

    ref = jax.block_until_ready(reference_forward(x, params))
    assert out.shape == (BATCH, D, LENGTH)
    assert jnp.isfinite(out).all()
    # f32 matmuls throughout; differences vs. the reference come only from
    # reduction-order / single-pass-LayerNorm rounding.
    max_err = float(jnp.max(jnp.abs(out - ref)))
    mean_err = float(jnp.mean(jnp.abs(out - ref)))
    assert max_err < 5e-2, f"mismatch vs reference: max abs err {max_err}"
    assert mean_err < 1e-2, f"mismatch vs reference: mean abs err {mean_err}"

    print("KERNEL_OK")
</pallas_src>

<mosaic_0001>
module attributes {stable_mosaic.version = 11 : i64} {
  func.func @encoder_block_kernel(%arg0: i32, %arg1: memref<1x128x128xf32, #tpu.memory_space<vmem>>, %arg2: memref<128x128xf32, #tpu.memory_space<vmem>>, %arg3: memref<128x128xf32, #tpu.memory_space<vmem>>, %arg4: memref<128x128xf32, #tpu.memory_space<vmem>>, %arg5: memref<2x128x5xf32, #tpu.memory_space<vmem>>, %arg6: memref<2x128x128xf32, #tpu.memory_space<vmem>>, %arg7: memref<2x128x1xf32, #tpu.memory_space<vmem>>, %arg8: memref<2x128x128xf32, #tpu.memory_space<vmem>>, %arg9: memref<2x128x128xf32, #tpu.memory_space<vmem>>, %arg10: memref<128x128xf32, #tpu.memory_space<vmem>>, %arg11: memref<128x128xf32, #tpu.memory_space<vmem>>, %arg12: memref<128x128xf32, #tpu.memory_space<vmem>>, %arg13: memref<128x128xf32, #tpu.memory_space<vmem>>, %arg14: memref<128x128xf32, #tpu.memory_space<vmem>>, %arg15: memref<128x128xf32, #tpu.memory_space<vmem>>, %arg16: memref<128x128xf32, #tpu.memory_space<vmem>>, %arg17: memref<128x1xf32, #tpu.memory_space<vmem>>, %arg18: memref<1x128x128xf32, #tpu.memory_space<vmem>>) attributes {dimension_semantics = [#tpu.dimension_semantics<parallel>], iteration_bounds = array<i64: 2>, scalar_prefetch = 0 : i64, scratch_operands = 0 : i64, tpu.core_type = #tpu.core_type<tc>, window_params = [{transform_indices = @transform_0, window_bounds = array<i64: 1, 128, 128>}, {pipeline_mode = #tpu.pipeline_mode<synchronous>, transform_indices = @transform_1, window_bounds = array<i64: 128, 128>}, {pipeline_mode = #tpu.pipeline_mode<synchronous>, transform_indices = @transform_2, window_bounds = array<i64: 128, 128>}, {pipeline_mode = #tpu.pipeline_mode<synchronous>, transform_indices = @transform_3, window_bounds = array<i64: 128, 128>}, {pipeline_mode = #tpu.pipeline_mode<synchronous>, transform_indices = @transform_4, window_bounds = array<i64: 2, 128, 5>}, {pipeline_mode = #tpu.pipeline_mode<synchronous>, transform_indices = @transform_5, window_bounds = array<i64: 2, 128, 128>}, {pipeline_mode = #tpu.pipeline_mode<synchronous>, transform_indices = @transform_6, window_bounds = array<i64: 2, 128, 1>}, {pipeline_mode = #tpu.pipeline_mode<synchronous>, transform_indices = @transform_7, window_bounds = array<i64: 2, 128, 128>}, {pipeline_mode = #tpu.pipeline_mode<synchronous>, transform_indices = @transform_8, window_bounds = array<i64: 2, 128, 128>}, {pipeline_mode = #tpu.pipeline_mode<synchronous>, transform_indices = @transform_9, window_bounds = array<i64: 128, 128>}, {pipeline_mode = #tpu.pipeline_mode<synchronous>, transform_indices = @transform_10, window_bounds = array<i64: 128, 128>}, {pipeline_mode = #tpu.pipeline_mode<synchronous>, transform_indices = @transform_11, window_bounds = array<i64: 128, 128>}, {pipeline_mode = #tpu.pipeline_mode<synchronous>, transform_indices = @transform_12, window_bounds = array<i64: 128, 128>}, {pipeline_mode = #tpu.pipeline_mode<synchronous>, transform_indices = @transform_13, window_bounds = array<i64: 128, 128>}, {pipeline_mode = #tpu.pipeline_mode<synchronous>, transform_indices = @transform_14, window_bounds = array<i64: 128, 128>}, {pipeline_mode = #tpu.pipeline_mode<synchronous>, transform_indices = @transform_15, window_bounds = array<i64: 128, 128>}, {pipeline_mode = #tpu.pipeline_mode<synchronous>, transform_indices = @transform_16, window_bounds = array<i64: 128, 1>}, {transform_indices = @transform_17, window_bounds = array<i64: 1, 128, 128>}]} {
    %c0 = arith.constant 0 : index
    %c0_0 = arith.constant 0 : index
    %c0_1 = arith.constant 0 : index
    %0 = vector.load %arg1[%c0, %c0_0, %c0_1] : memref<1x128x128xf32, #tpu.memory_space<vmem>>, vector<1x128x128xf32>
    %1 = vector.shape_cast %0 : vector<1x128x128xf32> to vector<128x128xf32>
    %c0_2 = arith.constant 0 : index
    %c0_3 = arith.constant 0 : index
    %2 = vector.load %arg2[%c0_2, %c0_3] : memref<128x128xf32, #tpu.memory_space<vmem>>, vector<128x128xf32>
    %3 = arith.addf %1, %2 : vector<128x128xf32>
    %c0_4 = arith.constant 0 : index
    %c0_5 = arith.constant 0 : index
    %4 = vector.load %arg3[%c0_4, %c0_5] : memref<128x128xf32, #tpu.memory_space<vmem>>, vector<128x128xf32>
    %c0_6 = arith.constant 0 : index
    %c0_7 = arith.constant 0 : index
    %5 = vector.load %arg4[%c0_6, %c0_7] : memref<128x128xf32, #tpu.memory_space<vmem>>, vector<128x128xf32>
    %6 = vector.shape_cast %3 : vector<128x128xf32> to vector<1x128x128xf32>
    %cst = arith.constant dense<0.000000e+00> : vector<1xf32>
    %7 = vector.multi_reduction <add>, %6, %cst [1, 2] : vector<1x128x128xf32> to vector<1xf32>
    %8 = vector.shape_cast %7 : vector<1xf32> to vector<1x1x1xf32>
    %9 = vector.extract %8[0, 0, 0] : f32 from vector<1x1x1xf32>
    %10 = arith.mulf %3, %3 : vector<128x128xf32>
    %11 = vector.shape_cast %10 : vector<128x128xf32> to vector<1x128x128xf32>
    %cst_8 = arith.constant dense<0.000000e+00> : vector<1xf32>
    %12 = vector.multi_reduction <add>, %11, %cst_8 [1, 2] : vector<1x128x128xf32> to vector<1xf32>
    %13 = vector.shape_cast %12 : vector<1xf32> to vector<1x1x1xf32>
    %14 = vector.extract %13[0, 0, 0] : f32 from vector<1x1x1xf32>
    %cst_9 = arith.constant 6.10351563E-5 : f32
    %15 = arith.mulf %9, %cst_9 : f32
    %cst_10 = arith.constant 6.10351563E-5 : f32
    %16 = arith.mulf %14, %cst_10 : f32
    %17 = arith.mulf %15, %15 : f32
    %18 = arith.subf %16, %17 : f32
    %19 = vector.broadcast %15 : f32 to vector<128x128xf32>
    %20 = arith.subf %3, %19 : vector<128x128xf32>
    %cst_11 = arith.constant 9.99999974E-6 : f32
    %21 = arith.addf %18, %cst_11 : f32
    %22 = math.rsqrt %21 : f32
    %23 = vector.broadcast %22 : f32 to vector<128x128xf32>
    %24 = arith.mulf %23, %4 : vector<128x128xf32>
    %25 = arith.mulf %20, %24 : vector<128x128xf32>
    %26 = arith.addf %25, %5 : vector<128x128xf32>
    %27 = tpu.iota {dimensions = array<i32: 1>} : vector<1x128xi32>
    %c-2_i32 = arith.constant -2 : i32
    %28 = vector.broadcast %c-2_i32 : i32 to vector<1x128xi32>
    %29 = arith.addi %27, %28 : vector<1x128xi32>
    %c0_i32 = arith.constant 0 : i32
    %30 = vector.broadcast %c0_i32 : i32 to vector<1x128xi32>
    %31 = arith.cmpi sge, %29, %30 : vector<1x128xi32>
    %c-2_i32_12 = arith.constant -2 : i32
    %32 = vector.broadcast %c-2_i32_12 : i32 to vector<1x128xi32>
    %33 = arith.addi %27, %32 : vector<1x128xi32>
    %c128_i32 = arith.constant 128 : i32
    %34 = vector.broadcast %c128_i32 : i32 to vector<1x128xi32>
    %35 = arith.cmpi slt, %33, %34 : vector<1x128xi32>
    %36 = arith.andi %31, %35 : vector<1x128xi1>
    %37 = arith.extui %36 : vector<1x128xi1> to vector<1x128xi32>
    %38 = arith.sitofp %37 : vector<1x128xi32> to vector<1x128xf32>
    %c-1_i32 = arith.constant -1 : i32
    %39 = vector.broadcast %c-1_i32 : i32 to vector<1x128xi32>
    %40 = arith.addi %27, %39 : vector<1x128xi32>
    %c0_i32_13 = arith.constant 0 : i32
    %41 = vector.broadcast %c0_i32_13 : i32 to vector<1x128xi32>
    %42 = arith.cmpi sge, %40, %41 : vector<1x128xi32>
    %c-1_i32_14 = arith.constant -1 : i32
    %43 = vector.broadcast %c-1_i32_14 : i32 to vector<1x128xi32>
    %44 = arith.addi %27, %43 : vector<1x128xi32>
    %c128_i32_15 = arith.constant 128 : i32
    %45 = vector.broadcast %c128_i32_15 : i32 to vector<1x128xi32>
    %46 = arith.cmpi slt, %44, %45 : vector<1x128xi32>
    %47 = arith.andi %42, %46 : vector<1x128xi1>
    %48 = arith.extui %47 : vector<1x128xi1> to vector<1x128xi32>
    %49 = arith.sitofp %48 : vector<1x128xi32> to vector<1x128xf32>
    %c1_i32 = arith.constant 1 : i32
    %50 = vector.broadcast %c1_i32 : i32 to vector<1x128xi32>
    %51 = arith.addi %27, %50 : vector<1x128xi32>
    %c0_i32_16 = arith.constant 0 : i32
    %52 = vector.broadcast %c0_i32_16 : i32 to vector<1x128xi32>
    %53 = arith.cmpi sge, %51, %52 : vector<1x128xi32>
    %c1_i32_17 = arith.constant 1 : i32
    %54 = vector.broadcast %c1_i32_17 : i32 to vector<1x128xi32>
    %55 = arith.addi %27, %54 : vector<1x128xi32>
    %c128_i32_18 = arith.constant 128 : i32
    %56 = vector.broadcast %c128_i32_18 : i32 to vector<1x128xi32>
    %57 = arith.cmpi slt, %55, %56 : vector<1x128xi32>
    %58 = arith.andi %53, %57 : vector<1x128xi1>
    %59 = arith.extui %58 : vector<1x128xi1> to vector<1x128xi32>
    %60 = arith.sitofp %59 : vector<1x128xi32> to vector<1x128xf32>
    %c2_i32 = arith.constant 2 : i32
    %61 = vector.broadcast %c2_i32 : i32 to vector<1x128xi32>
    %62 = arith.addi %27, %61 : vector<1x128xi32>
    %c0_i32_19 = arith.constant 0 : i32
    %63 = vector.broadcast %c0_i32_19 : i32 to vector<1x128xi32>
    %64 = arith.cmpi sge, %62, %63 : vector<1x128xi32>
    %c2_i32_20 = arith.constant 2 : i32
    %65 = vector.broadcast %c2_i32_20 : i32 to vector<1x128xi32>
    %66 = arith.addi %27, %65 : vector<1x128xi32>
    %c128_i32_21 = arith.constant 128 : i32
    %67 = vector.broadcast %c128_i32_21 : i32 to vector<1x128xi32>
    %68 = arith.cmpi slt, %66, %67 : vector<1x128xi32>
    %69 = arith.andi %64, %68 : vector<1x128xi1>
    %70 = arith.extui %69 : vector<1x128xi1> to vector<1x128xi32>
    %71 = arith.sitofp %70 : vector<1x128xi32> to vector<1x128xf32>
    %c0_22 = arith.constant 0 : index
    %c0_23 = arith.constant 0 : index
    %c0_24 = arith.constant 0 : index
    %72 = vector.load %arg5[%c0_22, %c0_23, %c0_24] : memref<2x128x5xf32, #tpu.memory_space<vmem>>, vector<1x128x5xf32>
    %73 = vector.shape_cast %72 : vector<1x128x5xf32> to vector<128x5xf32>
    %c0_25 = arith.constant 0 : index
    %c0_26 = arith.constant 0 : index
    %c0_27 = arith.constant 0 : index
    %74 = vector.load %arg6[%c0_25, %c0_26, %c0_27] : memref<2x128x128xf32, #tpu.memory_space<vmem>>, vector<1x128x128xf32>
    %75 = vector.shape_cast %74 : vector<1x128x128xf32> to vector<128x128xf32>
    %c0_28 = arith.constant 0 : index
    %c0_29 = arith.constant 0 : index
    %c0_30 = arith.constant 0 : index
    %76 = vector.load %arg7[%c0_28, %c0_29, %c0_30] : memref<2x128x1xf32, #tpu.memory_space<vmem>>, vector<1x128x1xf32>
    %77 = vector.shape_cast %76 : vector<1x128x1xf32> to vector<128x1xf32>
    %cst_31 = arith.constant 0.000000e+00 : f32
    %78 = vector.broadcast %cst_31 : f32 to vector<128x128xf32>
    %c2_i32_32 = arith.constant 2 : i32
    %79 = tpu.dynamic_rotate %26 by %c2_i32_32 dim 1 : vector<128x128xf32>, i32 -> vector<128x128xf32>
    %80 = vector.extract_strided_slice %73 {offsets = [0, 0], sizes = [128, 1], strides = [1, 1]} : vector<128x5xf32> to vector<128x1xf32>
    %81 = vector.broadcast %80 : vector<128x1xf32> to vector<128x128xf32>
    %82 = vector.broadcast %38 : vector<1x128xf32> to vector<128x128xf32>
    %83 = arith.mulf %81, %82 : vector<128x128xf32>
    %84 = arith.mulf %79, %83 : vector<128x128xf32>
    %85 = arith.addf %78, %84 : vector<128x128xf32>
    %c1_i32_33 = arith.constant 1 : i32
    %86 = tpu.dynamic_rotate %26 by %c1_i32_33 dim 1 : vector<128x128xf32>, i32 -> vector<128x128xf32>
    %87 = vector.extract_strided_slice %73 {offsets = [0, 1], sizes = [128, 1], strides = [1, 1]} : vector<128x5xf32> to vector<128x1xf32>
    %88 = vector.broadcast %87 : vector<128x1xf32> to vector<128x128xf32>
    %89 = vector.broadcast %49 : vector<1x128xf32> to vector<128x128xf32>
    %90 = arith.mulf %88, %89 : vector<128x128xf32>
    %91 = arith.mulf %86, %90 : vector<128x128xf32>
    %92 = arith.addf %85, %91 : vector<128x128xf32>
    %93 = vector.extract_strided_slice %73 {offsets = [0, 2], sizes = [128, 1], strides = [1, 1]} : vector<128x5xf32> to vector<128x1xf32>
    %94 = vector.broadcast %93 : vector<128x1xf32> to vector<128x128xf32>
    %95 = arith.mulf %26, %94 : vector<128x128xf32>
    %96 = arith.addf %92, %95 : vector<128x128xf32>
    %c127_i32 = arith.constant 127 : i32
    %97 = tpu.dynamic_rotate %26 by %c127_i32 dim 1 : vector<128x128xf32>, i32 -> vector<128x128xf32>
    %98 = vector.extract_strided_slice %73 {offsets = [0, 3], sizes = [128, 1], strides = [1, 1]} : vector<128x5xf32> to vector<128x1xf32>
    %99 = vector.broadcast %98 : vector<128x1xf32> to vector<128x128xf32>
    %100 = vector.broadcast %60 : vector<1x128xf32> to vector<128x128xf32>
    %101 = arith.mulf %99, %100 : vector<128x128xf32>
    %102 = arith.mulf %97, %101 : vector<128x128xf32>
    %103 = arith.addf %96, %102 : vector<128x128xf32>
    %c126_i32 = arith.constant 126 : i32
    %104 = tpu.dynamic_rotate %26 by %c126_i32 dim 1 : vector<128x128xf32>, i32 -> vector<128x128xf32>
    %105 = vector.extract_strided_slice %73 {offsets = [0, 4], sizes = [128, 1], strides = [1, 1]} : vector<128x5xf32> to vector<128x1xf32>
    %106 = vector.broadcast %105 : vector<128x1xf32> to vector<128x128xf32>
    %107 = vector.broadcast %71 : vector<1x128xf32> to vector<128x128xf32>
    %108 = arith.mulf %106, %107 : vector<128x128xf32>
    %109 = arith.mulf %104, %108 : vector<128x128xf32>
    %110 = arith.addf %103, %109 : vector<128x128xf32>
    %cst_34 = arith.constant dense<0.000000e+00> : vector<128x128xf32>
    %111 = tpu.matmul %75, %110, %cst_34 {dimension_numbers = #tpu.dot_dimension_numbers<[1], [0], [0], [1], [0, 0, 1, 1], [], []>} : vector<128x128xf32>, vector<128x128xf32>, vector<128x128xf32> -> vector<128x128xf32>
    %112 = vector.broadcast %77 : vector<128x1xf32> to vector<128x128xf32>
    %113 = arith.addf %111, %112 : vector<128x128xf32>
    %cst_35 = arith.constant 0.000000e+00 : f32
    %114 = vector.broadcast %cst_35 : f32 to vector<128x128xf32>
    %115 = arith.maximumf %113, %114 : vector<128x128xf32>
    %116 = arith.addf %115, %3 : vector<128x128xf32>
    %c0_36 = arith.constant 0 : index
    %c0_37 = arith.constant 0 : index
    %c0_38 = arith.constant 0 : index
    %117 = vector.load %arg8[%c0_36, %c0_37, %c0_38] : memref<2x128x128xf32, #tpu.memory_space<vmem>>, vector<1x128x128xf32>
    %118 = vector.shape_cast %117 : vector<1x128x128xf32> to vector<128x128xf32>
    %c0_39 = arith.constant 0 : index
    %c0_40 = arith.constant 0 : index
    %c0_41 = arith.constant 0 : index
    %119 = vector.load %arg9[%c0_39, %c0_40, %c0_41] : memref<2x128x128xf32, #tpu.memory_space<vmem>>, vector<1x128x128xf32>
    %120 = vector.shape_cast %119 : vector<1x128x128xf32> to vector<128x128xf32>
    %121 = vector.shape_cast %116 : vector<128x128xf32> to vector<1x128x128xf32>
    %cst_42 = arith.constant dense<0.000000e+00> : vector<1xf32>
    %122 = vector.multi_reduction <add>, %121, %cst_42 [1, 2] : vector<1x128x128xf32> to vector<1xf32>
    %123 = vector.shape_cast %122 : vector<1xf32> to vector<1x1x1xf32>
    %124 = vector.extract %123[0, 0, 0] : f32 from vector<1x1x1xf32>
    %125 = arith.mulf %116, %116 : vector<128x128xf32>
    %126 = vector.shape_cast %125 : vector<128x128xf32> to vector<1x128x128xf32>
    %cst_43 = arith.constant dense<0.000000e+00> : vector<1xf32>
    %127 = vector.multi_reduction <add>, %126, %cst_43 [1, 2] : vector<1x128x128xf32> to vector<1xf32>
    %128 = vector.shape_cast %127 : vector<1xf32> to vector<1x1x1xf32>
    %129 = vector.extract %128[0, 0, 0] : f32 from vector<1x1x1xf32>
    %cst_44 = arith.constant 6.10351563E-5 : f32
    %130 = arith.mulf %124, %cst_44 : f32
    %cst_45 = arith.constant 6.10351563E-5 : f32
    %131 = arith.mulf %129, %cst_45 : f32
    %132 = arith.mulf %130, %130 : f32
    %133 = arith.subf %131, %132 : f32
    %134 = vector.broadcast %130 : f32 to vector<128x128xf32>
    %135 = arith.subf %116, %134 : vector<128x128xf32>
    %cst_46 = arith.constant 9.99999974E-6 : f32
    %136 = arith.addf %133, %cst_46 : f32
    %137 = math.rsqrt %136 : f32
    %138 = vector.broadcast %137 : f32 to vector<128x128xf32>
    %139 = arith.mulf %138, %118 : vector<128x128xf32>
    %140 = arith.mulf %135, %139 : vector<128x128xf32>
    %141 = arith.addf %140, %120 : vector<128x128xf32>
    %c1 = arith.constant 1 : index
    %c0_47 = arith.constant 0 : index
    %c0_48 = arith.constant 0 : index
    %142 = vector.load %arg5[%c1, %c0_47, %c0_48] : memref<2x128x5xf32, #tpu.memory_space<vmem>>, vector<1x128x5xf32>
    %143 = vector.shape_cast %142 : vector<1x128x5xf32> to vector<128x5xf32>
    %c1_49 = arith.constant 1 : index
    %c0_50 = arith.constant 0 : index
    %c0_51 = arith.constant 0 : index
    %144 = vector.load %arg6[%c1_49, %c0_50, %c0_51] : memref<2x128x128xf32, #tpu.memory_space<vmem>>, vector<1x128x128xf32>
    %145 = vector.shape_cast %144 : vector<1x128x128xf32> to vector<128x128xf32>
    %c1_52 = arith.constant 1 : index
    %c0_53 = arith.constant 0 : index
    %c0_54 = arith.constant 0 : index
    %146 = vector.load %arg7[%c1_52, %c0_53, %c0_54] : memref<2x128x1xf32, #tpu.memory_space<vmem>>, vector<1x128x1xf32>
    %147 = vector.shape_cast %146 : vector<1x128x1xf32> to vector<128x1xf32>
    %cst_55 = arith.constant 0.000000e+00 : f32
    %148 = vector.broadcast %cst_55 : f32 to vector<128x128xf32>
    %c2_i32_56 = arith.constant 2 : i32
    %149 = tpu.dynamic_rotate %141 by %c2_i32_56 dim 1 : vector<128x128xf32>, i32 -> vector<128x128xf32>
    %150 = vector.extract_strided_slice %143 {offsets = [0, 0], sizes = [128, 1], strides = [1, 1]} : vector<128x5xf32> to vector<128x1xf32>
    %151 = vector.broadcast %150 : vector<128x1xf32> to vector<128x128xf32>
    %152 = vector.broadcast %38 : vector<1x128xf32> to vector<128x128xf32>
    %153 = arith.mulf %151, %152 : vector<128x128xf32>
    %154 = arith.mulf %149, %153 : vector<128x128xf32>
    %155 = arith.addf %148, %154 : vector<128x128xf32>
    %c1_i32_57 = arith.constant 1 : i32
    %156 = tpu.dynamic_rotate %141 by %c1_i32_57 dim 1 : vector<128x128xf32>, i32 -> vector<128x128xf32>
    %157 = vector.extract_strided_slice %143 {offsets = [0, 1], sizes = [128, 1], strides = [1, 1]} : vector<128x5xf32> to vector<128x1xf32>
    %158 = vector.broadcast %157 : vector<128x1xf32> to vector<128x128xf32>
    %159 = vector.broadcast %49 : vector<1x128xf32> to vector<128x128xf32>
    %160 = arith.mulf %158, %159 : vector<128x128xf32>
    %161 = arith.mulf %156, %160 : vector<128x128xf32>
    %162 = arith.addf %155, %161 : vector<128x128xf32>
    %163 = vector.extract_strided_slice %143 {offsets = [0, 2], sizes = [128, 1], strides = [1, 1]} : vector<128x5xf32> to vector<128x1xf32>
    %164 = vector.broadcast %163 : vector<128x1xf32> to vector<128x128xf32>
    %165 = arith.mulf %141, %164 : vector<128x128xf32>
    %166 = arith.addf %162, %165 : vector<128x128xf32>
    %c127_i32_58 = arith.constant 127 : i32
    %167 = tpu.dynamic_rotate %141 by %c127_i32_58 dim 1 : vector<128x128xf32>, i32 -> vector<128x128xf32>
    %168 = vector.extract_strided_slice %143 {offsets = [0, 3], sizes = [128, 1], strides = [1, 1]} : vector<128x5xf32> to vector<128x1xf32>
    %169 = vector.broadcast %168 : vector<128x1xf32> to vector<128x128xf32>
    %170 = vector.broadcast %60 : vector<1x128xf32> to vector<128x128xf32>
    %171 = arith.mulf %169, %170 : vector<128x128xf32>
    %172 = arith.mulf %167, %171 : vector<128x128xf32>
    %173 = arith.addf %166, %172 : vector<128x128xf32>
    %c126_i32_59 = arith.constant 126 : i32
    %174 = tpu.dynamic_rotate %141 by %c126_i32_59 dim 1 : vector<128x128xf32>, i32 -> vector<128x128xf32>
    %175 = vector.extract_strided_slice %143 {offsets = [0, 4], sizes = [128, 1], strides = [1, 1]} : vector<128x5xf32> to vector<128x1xf32>
    %176 = vector.broadcast %175 : vector<128x1xf32> to vector<128x128xf32>
    %177 = vector.broadcast %71 : vector<1x128xf32> to vector<128x128xf32>
    %178 = arith.mulf %176, %177 : vector<128x128xf32>
    %179 = arith.mulf %174, %178 : vector<128x128xf32>
    %180 = arith.addf %173, %179 : vector<128x128xf32>
    %cst_60 = arith.constant dense<0.000000e+00> : vector<128x128xf32>
    %181 = tpu.matmul %145, %180, %cst_60 {dimension_numbers = #tpu.dot_dimension_numbers<[1], [0], [0], [1], [0, 0, 1, 1], [], []>} : vector<128x128xf32>, vector<128x128xf32>, vector<128x128xf32> -> vector<128x128xf32>
    %182 = vector.broadcast %147 : vector<128x1xf32> to vector<128x128xf32>
    %183 = arith.addf %181, %182 : vector<128x128xf32>
    %cst_61 = arith.constant 0.000000e+00 : f32
    %184 = vector.broadcast %cst_61 : f32 to vector<128x128xf32>
    %185 = arith.maximumf %183, %184 : vector<128x128xf32>
    %186 = arith.addf %185, %116 : vector<128x128xf32>
    %c1_62 = arith.constant 1 : index
    %c0_63 = arith.constant 0 : index
    %c0_64 = arith.constant 0 : index
    %187 = vector.load %arg8[%c1_62, %c0_63, %c0_64] : memref<2x128x128xf32, #tpu.memory_space<vmem>>, vector<1x128x128xf32>
    %188 = vector.shape_cast %187 : vector<1x128x128xf32> to vector<128x128xf32>
    %c1_65 = arith.constant 1 : index
    %c0_66 = arith.constant 0 : index
    %c0_67 = arith.constant 0 : index
    %189 = vector.load %arg9[%c1_65, %c0_66, %c0_67] : memref<2x128x128xf32, #tpu.memory_space<vmem>>, vector<1x128x128xf32>
    %190 = vector.shape_cast %189 : vector<1x128x128xf32> to vector<128x128xf32>
    %191 = vector.shape_cast %186 : vector<128x128xf32> to vector<1x128x128xf32>
    %cst_68 = arith.constant dense<0.000000e+00> : vector<1xf32>
    %192 = vector.multi_reduction <add>, %191, %cst_68 [1, 2] : vector<1x128x128xf32> to vector<1xf32>
    %193 = vector.shape_cast %192 : vector<1xf32> to vector<1x1x1xf32>
    %194 = vector.extract %193[0, 0, 0] : f32 from vector<1x1x1xf32>
    %195 = arith.mulf %186, %186 : vector<128x128xf32>
    %196 = vector.shape_cast %195 : vector<128x128xf32> to vector<1x128x128xf32>
    %cst_69 = arith.constant dense<0.000000e+00> : vector<1xf32>
    %197 = vector.multi_reduction <add>, %196, %cst_69 [1, 2] : vector<1x128x128xf32> to vector<1xf32>
    %198 = vector.shape_cast %197 : vector<1xf32> to vector<1x1x1xf32>
    %199 = vector.extract %198[0, 0, 0] : f32 from vector<1x1x1xf32>
    %cst_70 = arith.constant 6.10351563E-5 : f32
    %200 = arith.mulf %194, %cst_70 : f32
    %cst_71 = arith.constant 6.10351563E-5 : f32
    %201 = arith.mulf %199, %cst_71 : f32
    %202 = arith.mulf %200, %200 : f32
    %203 = arith.subf %201, %202 : f32
    %204 = vector.broadcast %200 : f32 to vector<128x128xf32>
    %205 = arith.subf %186, %204 : vector<128x128xf32>
    %cst_72 = arith.constant 9.99999974E-6 : f32
    %206 = arith.addf %203, %cst_72 : f32
    %207 = math.rsqrt %206 : f32
    %208 = vector.broadcast %207 : f32 to vector<128x128xf32>
    %209 = arith.mulf %208, %188 : vector<128x128xf32>
    %210 = arith.mulf %205, %209 : vector<128x128xf32>
    %211 = arith.addf %210, %190 : vector<128x128xf32>
    %c0_73 = arith.constant 0 : index
    %c0_74 = arith.constant 0 : index
    %212 = vector.load %arg10[%c0_73, %c0_74] : memref<128x128xf32, #tpu.memory_space<vmem>>, vector<128x128xf32>
    %cst_75 = arith.constant dense<0.000000e+00> : vector<128x128xf32>
    %213 = tpu.matmul %212, %211, %cst_75 {dimension_numbers = #tpu.dot_dimension_numbers<[1], [0], [0], [1], [0, 0, 1, 1], [], []>} : vector<128x128xf32>, vector<128x128xf32>, vector<128x128xf32> -> vector<128x128xf32>
    %c0_76 = arith.constant 0 : index
    %c0_77 = arith.constant 0 : index
    %214 = vector.load %arg11[%c0_76, %c0_77] : memref<128x128xf32, #tpu.memory_space<vmem>>, vector<128x128xf32>
    %cst_78 = arith.constant dense<0.000000e+00> : vector<128x128xf32>
    %215 = tpu.matmul %214, %211, %cst_78 {dimension_numbers = #tpu.dot_dimension_numbers<[1], [0], [0], [1], [0, 0, 1, 1], [], []>} : vector<128x128xf32>, vector<128x128xf32>, vector<128x128xf32> -> vector<128x128xf32>
    %c0_79 = arith.constant 0 : index
    %c0_80 = arith.constant 0 : index
    %216 = vector.load %arg12[%c0_79, %c0_80] : memref<128x128xf32, #tpu.memory_space<vmem>>, vector<128x128xf32>
    %cst_81 = arith.constant dense<0.000000e+00> : vector<128x128xf32>
    %217 = tpu.matmul %216, %211, %cst_81 {dimension_numbers = #tpu.dot_dimension_numbers<[1], [0], [0], [1], [0, 0, 1, 1], [], []>} : vector<128x128xf32>, vector<128x128xf32>, vector<128x128xf32> -> vector<128x128xf32>
    %218 = tpu.transpose %213, [1, 0] : vector<128x128xf32> -> vector<128x128xf32>
    %219 = vector.extract_strided_slice %218 {offsets = [0, 0], sizes = [128, 32], strides = [1, 1]} : vector<128x128xf32> to vector<128x32xf32>
    %220 = vector.extract_strided_slice %215 {offsets = [0, 0], sizes = [32, 128], strides = [1, 1]} : vector<128x128xf32> to vector<32x128xf32>
    %221 = vector.extract_strided_slice %217 {offsets = [0, 0], sizes = [32, 128], strides = [1, 1]} : vector<128x128xf32> to vector<32x128xf32>
    %cst_82 = arith.constant dense<0.000000e+00> : vector<128x128xf32>
    %222 = tpu.matmul %219, %220, %cst_82 {dimension_numbers = #tpu.dot_dimension_numbers<[1], [0], [0], [1], [0, 0, 1, 1], [], []>} : vector<128x32xf32>, vector<32x128xf32>, vector<128x128xf32> -> vector<128x128xf32>
    %cst_83 = arith.constant dense<0xFF800000> : vector<128xf32>
    %223 = vector.multi_reduction <maximumf>, %222, %cst_83 [1] : vector<128x128xf32> to vector<128xf32>
    %224 = vector.shape_cast %223 : vector<128xf32> to vector<128x1xf32>
    %225 = vector.broadcast %224 : vector<128x1xf32> to vector<128x128xf32>
    %226 = arith.subf %222, %225 : vector<128x128xf32>
    %227 = math.exp %226 : vector<128x128xf32>
    %cst_84 = arith.constant dense<0.000000e+00> : vector<128xf32>
    %228 = vector.multi_reduction <add>, %227, %cst_84 [1] : vector<128x128xf32> to vector<128xf32>
    %229 = vector.shape_cast %228 : vector<128xf32> to vector<128x1xf32>
    %230 = vector.broadcast %229 : vector<128x1xf32> to vector<128x128xf32>
    %231 = arith.divf %227, %230 : vector<128x128xf32>
    %cst_85 = arith.constant dense<0.000000e+00> : vector<32x128xf32>
    %232 = tpu.matmul %221, %231, %cst_85 {dimension_numbers = #tpu.dot_dimension_numbers<[1], [1], [0], [0], [0, 0, 1, 0], [], []>} : vector<32x128xf32>, vector<128x128xf32>, vector<32x128xf32> -> vector<32x128xf32>
    %233 = vector.extract_strided_slice %218 {offsets = [0, 32], sizes = [128, 32], strides = [1, 1]} : vector<128x128xf32> to vector<128x32xf32>
    %234 = vector.extract_strided_slice %215 {offsets = [32, 0], sizes = [32, 128], strides = [1, 1]} : vector<128x128xf32> to vector<32x128xf32>
    %235 = vector.extract_strided_slice %217 {offsets = [32, 0], sizes = [32, 128], strides = [1, 1]} : vector<128x128xf32> to vector<32x128xf32>
    %cst_86 = arith.constant dense<0.000000e+00> : vector<128x128xf32>
    %236 = tpu.matmul %233, %234, %cst_86 {dimension_numbers = #tpu.dot_dimension_numbers<[1], [0], [0], [1], [0, 0, 1, 1], [], []>} : vector<128x32xf32>, vector<32x128xf32>, vector<128x128xf32> -> vector<128x128xf32>
    %cst_87 = arith.constant dense<0xFF800000> : vector<128xf32>
    %237 = vector.multi_reduction <maximumf>, %236, %cst_87 [1] : vector<128x128xf32> to vector<128xf32>
    %238 = vector.shape_cast %237 : vector<128xf32> to vector<128x1xf32>
    %239 = vector.broadcast %238 : vector<128x1xf32> to vector<128x128xf32>
    %240 = arith.subf %236, %239 : vector<128x128xf32>
    %241 = math.exp %240 : vector<128x128xf32>
    %cst_88 = arith.constant dense<0.000000e+00> : vector<128xf32>
    %242 = vector.multi_reduction <add>, %241, %cst_88 [1] : vector<128x128xf32> to vector<128xf32>
    %243 = vector.shape_cast %242 : vector<128xf32> to vector<128x1xf32>
    %244 = vector.broadcast %243 : vector<128x1xf32> to vector<128x128xf32>
    %245 = arith.divf %241, %244 : vector<128x128xf32>
    %cst_89 = arith.constant dense<0.000000e+00> : vector<32x128xf32>
    %246 = tpu.matmul %235, %245, %cst_89 {dimension_numbers = #tpu.dot_dimension_numbers<[1], [1], [0], [0], [0, 0, 1, 0], [], []>} : vector<32x128xf32>, vector<128x128xf32>, vector<32x128xf32> -> vector<32x128xf32>
    %247 = vector.extract_strided_slice %218 {offsets = [0, 64], sizes = [128, 32], strides = [1, 1]} : vector<128x128xf32> to vector<128x32xf32>
    %248 = vector.extract_strided_slice %215 {offsets = [64, 0], sizes = [32, 128], strides = [1, 1]} : vector<128x128xf32> to vector<32x128xf32>
    %249 = vector.extract_strided_slice %217 {offsets = [64, 0], sizes = [32, 128], strides = [1, 1]} : vector<128x128xf32> to vector<32x128xf32>
    %cst_90 = arith.constant dense<0.000000e+00> : vector<128x128xf32>
    %250 = tpu.matmul %247, %248, %cst_90 {dimension_numbers = #tpu.dot_dimension_numbers<[1], [0], [0], [1], [0, 0, 1, 1], [], []>} : vector<128x32xf32>, vector<32x128xf32>, vector<128x128xf32> -> vector<128x128xf32>
    %cst_91 = arith.constant dense<0xFF800000> : vector<128xf32>
    %251 = vector.multi_reduction <maximumf>, %250, %cst_91 [1] : vector<128x128xf32> to vector<128xf32>
    %252 = vector.shape_cast %251 : vector<128xf32> to vector<128x1xf32>
    %253 = vector.broadcast %252 : vector<128x1xf32> to vector<128x128xf32>
    %254 = arith.subf %250, %253 : vector<128x128xf32>
    %255 = math.exp %254 : vector<128x128xf32>
    %cst_92 = arith.constant dense<0.000000e+00> : vector<128xf32>
    %256 = vector.multi_reduction <add>, %255, %cst_92 [1] : vector<128x128xf32> to vector<128xf32>
    %257 = vector.shape_cast %256 : vector<128xf32> to vector<128x1xf32>
    %258 = vector.broadcast %257 : vector<128x1xf32> to vector<128x128xf32>
    %259 = arith.divf %255, %258 : vector<128x128xf32>
    %cst_93 = arith.constant dense<0.000000e+00> : vector<32x128xf32>
    %260 = tpu.matmul %249, %259, %cst_93 {dimension_numbers = #tpu.dot_dimension_numbers<[1], [1], [0], [0], [0, 0, 1, 0], [], []>} : vector<32x128xf32>, vector<128x128xf32>, vector<32x128xf32> -> vector<32x128xf32>
    %261 = vector.extract_strided_slice %218 {offsets = [0, 96], sizes = [128, 32], strides = [1, 1]} : vector<128x128xf32> to vector<128x32xf32>
    %262 = vector.extract_strided_slice %215 {offsets = [96, 0], sizes = [32, 128], strides = [1, 1]} : vector<128x128xf32> to vector<32x128xf32>
    %263 = vector.extract_strided_slice %217 {offsets = [96, 0], sizes = [32, 128], strides = [1, 1]} : vector<128x128xf32> to vector<32x128xf32>
    %cst_94 = arith.constant dense<0.000000e+00> : vector<128x128xf32>
    %264 = tpu.matmul %261, %262, %cst_94 {dimension_numbers = #tpu.dot_dimension_numbers<[1], [0], [0], [1], [0, 0, 1, 1], [], []>} : vector<128x32xf32>, vector<32x128xf32>, vector<128x128xf32> -> vector<128x128xf32>
    %cst_95 = arith.constant dense<0xFF800000> : vector<128xf32>
    %265 = vector.multi_reduction <maximumf>, %264, %cst_95 [1] : vector<128x128xf32> to vector<128xf32>
    %266 = vector.shape_cast %265 : vector<128xf32> to vector<128x1xf32>
    %267 = vector.broadcast %266 : vector<128x1xf32> to vector<128x128xf32>
    %268 = arith.subf %264, %267 : vector<128x128xf32>
    %269 = math.exp %268 : vector<128x128xf32>
    %cst_96 = arith.constant dense<0.000000e+00> : vector<128xf32>
    %270 = vector.multi_reduction <add>, %269, %cst_96 [1] : vector<128x128xf32> to vector<128xf32>
    %271 = vector.shape_cast %270 : vector<128xf32> to vector<128x1xf32>
    %272 = vector.broadcast %271 : vector<128x1xf32> to vector<128x128xf32>
    %273 = arith.divf %269, %272 : vector<128x128xf32>
    %cst_97 = arith.constant dense<0.000000e+00> : vector<32x128xf32>
    %274 = tpu.matmul %263, %273, %cst_97 {dimension_numbers = #tpu.dot_dimension_numbers<[1], [1], [0], [0], [0, 0, 1, 0], [], []>} : vector<32x128xf32>, vector<128x128xf32>, vector<32x128xf32> -> vector<32x128xf32>
    %275 = tpu.concatenate %232, %246, %260, %274 in 0 : vector<32x128xf32>, vector<32x128xf32>, vector<32x128xf32>, vector<32x128xf32> -> vector<128x128xf32>
    %c0_98 = arith.constant 0 : index
    %c0_99 = arith.constant 0 : index
    %276 = vector.load %arg13[%c0_98, %c0_99] : memref<128x128xf32, #tpu.memory_space<vmem>>, vector<128x128xf32>
    %cst_100 = arith.constant dense<0.000000e+00> : vector<128x128xf32>
    %277 = tpu.matmul %276, %275, %cst_100 {dimension_numbers = #tpu.dot_dimension_numbers<[1], [0], [0], [1], [0, 0, 1, 1], [], []>} : vector<128x128xf32>, vector<128x128xf32>, vector<128x128xf32> -> vector<128x128xf32>
    %278 = arith.addf %277, %186 : vector<128x128xf32>
    %c0_101 = arith.constant 0 : index
    %c0_102 = arith.constant 0 : index
    %279 = vector.load %arg14[%c0_101, %c0_102] : memref<128x128xf32, #tpu.memory_space<vmem>>, vector<128x128xf32>
    %c0_103 = arith.constant 0 : index
    %c0_104 = arith.constant 0 : index
    %280 = vector.load %arg15[%c0_103, %c0_104] : memref<128x128xf32, #tpu.memory_space<vmem>>, vector<128x128xf32>
    %281 = vector.shape_cast %278 : vector<128x128xf32> to vector<1x128x128xf32>
    %cst_105 = arith.constant dense<0.000000e+00> : vector<1xf32>
    %282 = vector.multi_reduction <add>, %281, %cst_105 [1, 2] : vector<1x128x128xf32> to vector<1xf32>
    %283 = vector.shape_cast %282 : vector<1xf32> to vector<1x1x1xf32>
    %284 = vector.extract %283[0, 0, 0] : f32 from vector<1x1x1xf32>
    %285 = arith.mulf %278, %278 : vector<128x128xf32>
    %286 = vector.shape_cast %285 : vector<128x128xf32> to vector<1x128x128xf32>
    %cst_106 = arith.constant dense<0.000000e+00> : vector<1xf32>
    %287 = vector.multi_reduction <add>, %286, %cst_106 [1, 2] : vector<1x128x128xf32> to vector<1xf32>
    %288 = vector.shape_cast %287 : vector<1xf32> to vector<1x1x1xf32>
    %289 = vector.extract %288[0, 0, 0] : f32 from vector<1x1x1xf32>
    %cst_107 = arith.constant 6.10351563E-5 : f32
    %290 = arith.mulf %284, %cst_107 : f32
    %cst_108 = arith.constant 6.10351563E-5 : f32
    %291 = arith.mulf %289, %cst_108 : f32
    %292 = arith.mulf %290, %290 : f32
    %293 = arith.subf %291, %292 : f32
    %294 = vector.broadcast %290 : f32 to vector<128x128xf32>
    %295 = arith.subf %278, %294 : vector<128x128xf32>
    %cst_109 = arith.constant 9.99999974E-6 : f32
    %296 = arith.addf %293, %cst_109 : f32
    %297 = math.rsqrt %296 : f32
    %298 = vector.broadcast %297 : f32 to vector<128x128xf32>
    %299 = arith.mulf %298, %279 : vector<128x128xf32>
    %300 = arith.mulf %295, %299 : vector<128x128xf32>
    %301 = arith.addf %300, %280 : vector<128x128xf32>
    %c0_110 = arith.constant 0 : index
    %c0_111 = arith.constant 0 : index
    %302 = vector.load %arg16[%c0_110, %c0_111] : memref<128x128xf32, #tpu.memory_space<vmem>>, vector<128x128xf32>
    %cst_112 = arith.constant dense<0.000000e+00> : vector<128x128xf32>
    %303 = tpu.matmul %302, %301, %cst_112 {dimension_numbers = #tpu.dot_dimension_numbers<[1], [0], [0], [1], [0, 0, 1, 1], [], []>} : vector<128x128xf32>, vector<128x128xf32>, vector<128x128xf32> -> vector<128x128xf32>
    %c0_113 = arith.constant 0 : index
    %c0_114 = arith.constant 0 : index
    %304 = vector.load %arg17[%c0_113, %c0_114] : memref<128x1xf32, #tpu.memory_space<vmem>>, vector<128x1xf32>
    %305 = vector.broadcast %304 : vector<128x1xf32> to vector<128x128xf32>
    %306 = arith.addf %303, %305 : vector<128x128xf32>
    %cst_115 = arith.constant 0.000000e+00 : f32
    %307 = vector.broadcast %cst_115 : f32 to vector<128x128xf32>
    %308 = arith.maximumf %306, %307 : vector<128x128xf32>
    %309 = arith.addf %308, %278 : vector<128x128xf32>
    %c0_116 = arith.constant 0 : index
    %c0_117 = arith.constant 0 : index
    %c0_118 = arith.constant 0 : index
    %310 = vector.load %arg18[%c0_116, %c0_117, %c0_118] : memref<1x128x128xf32, #tpu.memory_space<vmem>>, vector<1x128x128xf32>
    %311 = vector.shape_cast %310 : vector<1x128x128xf32> to vector<128x128xf32>
    %312 = vector.shape_cast %309 : vector<128x128xf32> to vector<1x128x128xf32>
    tpu.vector_store %arg18[%c0_116, %c0_117, %c0_118], %312 {strides = array<i32>} : memref<1x128x128xf32, #tpu.memory_space<vmem>>, vector<1x128x128xf32>,
    return
  }
  func.func @transform_0(%arg0: i32) -> (i32, i32, i32) {
    %c0_i32 = arith.constant 0 : i32
    %c0_i32_0 = arith.constant 0 : i32
    %c0_i32_1 = arith.constant 0 : i32
    return %arg0, %c0_i32, %c0_i32_0 : i32, i32, i32
  }
  func.func @transform_1(%arg0: i32) -> (i32, i32) {
    %c0_i32 = arith.constant 0 : i32
    %c0_i32_0 = arith.constant 0 : i32
    %c0_i32_1 = arith.constant 0 : i32
    return %c0_i32, %c0_i32_0 : i32, i32
  }
  func.func @transform_2(%arg0: i32) -> (i32, i32) {
    %c0_i32 = arith.constant 0 : i32
    %c0_i32_0 = arith.constant 0 : i32
    %c0_i32_1 = arith.constant 0 : i32
    return %c0_i32, %c0_i32_0 : i32, i32
  }
  func.func @transform_3(%arg0: i32) -> (i32, i32) {
    %c0_i32 = arith.constant 0 : i32
    %c0_i32_0 = arith.constant 0 : i32
    %c0_i32_1 = arith.constant 0 : i32
    return %c0_i32, %c0_i32_0 : i32, i32
  }
  func.func @transform_4(%arg0: i32) -> (i32, i32, i32) {
    %c0_i32 = arith.constant 0 : i32
    %c0_i32_0 = arith.constant 0 : i32
    %c0_i32_1 = arith.constant 0 : i32
    %c0_i32_2 = arith.constant 0 : i32
    return %c0_i32, %c0_i32_0, %c0_i32_1 : i32, i32, i32
  }
  func.func @transform_5(%arg0: i32) -> (i32, i32, i32) {
    %c0_i32 = arith.constant 0 : i32
    %c0_i32_0 = arith.constant 0 : i32
    %c0_i32_1 = arith.constant 0 : i32
    %c0_i32_2 = arith.constant 0 : i32
    return %c0_i32, %c0_i32_0, %c0_i32_1 : i32, i32, i32
  }
  func.func @transform_6(%arg0: i32) -> (i32, i32, i32) {
    %c0_i32 = arith.constant 0 : i32
    %c0_i32_0 = arith.constant 0 : i32
    %c0_i32_1 = arith.constant 0 : i32
    %c0_i32_2 = arith.constant 0 : i32
    return %c0_i32, %c0_i32_0, %c0_i32_1 : i32, i32, i32
  }
  func.func @transform_7(%arg0: i32) -> (i32, i32, i32) {
    %c0_i32 = arith.constant 0 : i32
    %c0_i32_0 = arith.constant 0 : i32
    %c0_i32_1 = arith.constant 0 : i32
    %c0_i32_2 = arith.constant 0 : i32
    return %c0_i32, %c0_i32_0, %c0_i32_1 : i32, i32, i32
  }
  func.func @transform_8(%arg0: i32) -> (i32, i32, i32) {
    %c0_i32 = arith.constant 0 : i32
    %c0_i32_0 = arith.constant 0 : i32
    %c0_i32_1 = arith.constant 0 : i32
    %c0_i32_2 = arith.constant 0 : i32
    return %c0_i32, %c0_i32_0, %c0_i32_1 : i32, i32, i32
  }
  func.func @transform_9(%arg0: i32) -> (i32, i32) {
    %c0_i32 = arith.constant 0 : i32
    %c0_i32_0 = arith.constant 0 : i32
    %c0_i32_1 = arith.constant 0 : i32
    return %c0_i32, %c0_i32_0 : i32, i32
  }
  func.func @transform_10(%arg0: i32) -> (i32, i32) {
    %c0_i32 = arith.constant 0 : i32
    %c0_i32_0 = arith.constant 0 : i32
    %c0_i32_1 = arith.constant 0 : i32
    return %c0_i32, %c0_i32_0 : i32, i32
  }
  func.func @transform_11(%arg0: i32) -> (i32, i32) {
    %c0_i32 = arith.constant 0 : i32
    %c0_i32_0 = arith.constant 0 : i32
    %c0_i32_1 = arith.constant 0 : i32
    return %c0_i32, %c0_i32_0 : i32, i32
  }
  func.func @transform_12(%arg0: i32) -> (i32, i32) {
    %c0_i32 = arith.constant 0 : i32
    %c0_i32_0 = arith.constant 0 : i32
    %c0_i32_1 = arith.constant 0 : i32
    return %c0_i32, %c0_i32_0 : i32, i32
  }
  func.func @transform_13(%arg0: i32) -> (i32, i32) {
    %c0_i32 = arith.constant 0 : i32
    %c0_i32_0 = arith.constant 0 : i32
    %c0_i32_1 = arith.constant 0 : i32
    return %c0_i32, %c0_i32_0 : i32, i32
  }
  func.func @transform_14(%arg0: i32) -> (i32, i32) {
    %c0_i32 = arith.constant 0 : i32
    %c0_i32_0 = arith.constant 0 : i32
    %c0_i32_1 = arith.constant 0 : i32
    return %c0_i32, %c0_i32_0 : i32, i32
  }
  func.func @transform_15(%arg0: i32) -> (i32, i32) {
    %c0_i32 = arith.constant 0 : i32
    %c0_i32_0 = arith.constant 0 : i32
    %c0_i32_1 = arith.constant 0 : i32
    return %c0_i32, %c0_i32_0 : i32, i32
  }
  func.func @transform_16(%arg0: i32) -> (i32, i32) {
    %c0_i32 = arith.constant 0 : i32
    %c0_i32_0 = arith.constant 0 : i32
    %c0_i32_1 = arith.constant 0 : i32
    return %c0_i32, %c0_i32_0 : i32, i32
  }
  func.func @transform_17(%arg0: i32) -> (i32, i32, i32) {
    %c0_i32 = arith.constant 0 : i32
    %c0_i32_0 = arith.constant 0 : i32
    %c0_i32_1 = arith.constant 0 : i32
    return %arg0, %c0_i32, %c0_i32_0 : i32, i32, i32
  }
}

</mosaic_0001>

<bundles_post_ra>
// kernel: tpu_custom_call.1
= control target key start
LH: loop header
LB: loop body
LE: loop exit
PB: predicated region body
PF: predicated region fallthrough
CT: control target
= control target key end

     0   :  { %s12432_s0 = inlined_call_operand.vmem [shape: f32[2,128,128], index: 0, kind: input, shape index: {}]   ;;  %s12433_s1 = inlined_call_operand.vmem [shape: f32[128,128], index: 1, kind: input, shape index: {}]   ;;  %s12434_s2 = inlined_call_operand.hbm [shape: f32[128,128], index: 2, kind: input, shape index: {}]   ;;  %s12435_s3 = inlined_call_operand.hbm [shape: f32[128,128], index: 3, kind: input, shape index: {}]   ;;  %s12436_s4 = inlined_call_operand.vmem [shape: f32[2,128,5], index: 4, kind: input, shape index: {}]   ;;  %s12437_s5 = inlined_call_operand.vmem [shape: f32[2,128,128], index: 5, kind: input, shape index: {}]   ;;  %s12438_s6 = inlined_call_operand.vmem [shape: f32[2,128,1], index: 6, kind: input, shape index: {}]   ;;  %s12439_s7 = inlined_call_operand.hbm [shape: f32[2,128,128], index: 7, kind: input, shape index: {}]   ;;  %s12440_s8 = inlined_call_operand.hbm [shape: f32[2,128,128], index: 8, kind: input, shape index: {}]   ;;  %s12441_s9 = inlined_call_operand.hbm [shape: f32[128,128], index: 9, kind: input, shape index: {}]   ;;  %s12442_s10 = inlined_call_operand.hbm [shape: f32[128,128], index: 10, kind: input, shape index: {}]   ;;  %s12443_s11 = inlined_call_operand.hbm [shape: f32[128,128], index: 11, kind: input, shape index: {}]   ;;  %s12444_s12 = inlined_call_operand.hbm [shape: f32[128,128], index: 12, kind: input, shape index: {}]   ;;  %s12445_s13 = inlined_call_operand.hbm [shape: f32[128,128], index: 13, kind: input, shape index: {}]   ;;  %s12446_s14 = inlined_call_operand.hbm [shape: f32[128,128], index: 14, kind: input, shape index: {}]   ;;  %s12447_s15 = inlined_call_operand.hbm [shape: f32[128,128], index: 15, kind: input, shape index: {}]   ;;  %s12448_s16 = inlined_call_operand.vmem [shape: f32[128,1], index: 16, kind: input, shape index: {}]   ;;  %s12449_s17 = inlined_call_operand.hbm [shape: f32[2,128,128], index: 17, kind: output, shape index: {}]  }
   0x1   :  { %12570 = sst [smem:[#allocation140_spill]] %s12432_s0 }
   0x2   :  { %12571 = sst [smem:[#allocation141_spill]] %s12433_s1 }
   0x3   :  { %12572 = sst [smem:[#allocation142_spill]] %s12435_s3 }
   0x4   :  { %12573 = sst [smem:[#allocation143_spill]] %s12449_s17 }
   0x5   :  { %22 = vsyncpa [#allocation3], 0 }
   0x6   :  { %23 = vsyncpa [#allocation6], 0 }
   0x7   :  { %24 = vsyncpa [#allocation9], 0 }
   0x8   :  { %25 = vsyncpa [#allocation12], 0 }
   0x9   :  { %26 = vsyncpa [#allocation15], 0 }
   0xa   :  { %27 = vsyncpa [#allocation18], 0 }
   0xb   :  { %28 = vsyncpa [#allocation4], 0 }
   0xc   :  { %30 = vsyncpa [#allocation4 + $0x1], 0  ;;  %s8621_s24 = smov 0   ;;  %s8623_s25 = smov 0  }
   0xd   :  { %s8625_s26 = smov 0   ;;  %s8627_s27 = smov 0  }
   0xe LB: > { %12574 = sst [smem:[#allocation28_spill]] %s8488_s24  ;;  %s8642_s28 = sadd.s32 4294967295, %s8500_s27   ;;  %s8500_s27 = sphi %s8627_s27, %s13042_s27   ;;  %s8496_s26 = sphi %s8625_s26, %s13044_s26   ;;  %s8492_s25 = sphi %s8623_s25, %s13046_s25   ;;  %s8488_s24 = sphi %s8621_s24, %s13045_s24  }
   0xf   : > { %12575 = sst [smem:[#allocation29_spill]] %s8496_s26  ;;  %s6353_s29 = sadd.s32 4294967294, %s8500_s27  }
  0x10   : > { %12576 = sst [smem:[#allocation30_spill]] %s8500_s27  ;;  %s8646_s0 = sadd.s32 1, %s8500_s27  }
  0x11   : > { %12577 = sst [smem:[#allocation31_spill]] %s8646_s0  ;;  %s405_s30 = sadd.s32 1, %s8496_s26 }
  0x12   : > { %s402_s18 = ssub.s32 %s8500_s27, %s8646_s0  ;;  %p415_p0 = scmp.ne.s32.totalorder %s8496_s26, %s8492_s25 }
  0x13   : > { %p403_p1 = scmp.eq.s32.totalorder %s402_s18, 0  ;;  %p416_p2 = scmp.eq.s32.totalorder %s8642_s28, 1 }
  0x14   : > { %p421_p3 = scmp.ne.s32.totalorder %s8492_s25, %s8488_s24  ;;  %p422_p4 = scmp.eq.s32.totalorder %s6353_s29, 1 }
  0x15   : > { %s8657_s19 = scalar_select %p403_p1, %s8496_s26, %s405_s30  }
  0x16   : > { %p8659_p5 = por %p416_p2, %p415_p0  ;;  %p8663_p6 = por %p422_p4, %p421_p3 }
  0x17   : > { %12578 = sst [smem:[#allocation32_spill]] %s8657_s19  ;;  %p6354_p7 = scmp.ge.s32.totalorder %s8500_s27, 1 }
  0x18   : > { %s12580_s20 = scalar_select %p8663_p6, 1, 0 }
  0x19   : > { %p429_p8 = scmp.lt.s32.totalorder %s8500_s27, 3  ;;  %p12458_p9 = scmp.eq.s32.totalorder %s8642_s28, 0 }
  0x1a   : > { %12581 = sst [smem:[#allocation33_spill]] %s12580_s20  ;;  %s8502_s22 = smov [#allocation5]  }
  0x1b   : > { %p8670_p10 = pnand %p6354_p7, %p429_p8  ;;  %s457_s23 = sshll.u32 %s8502_s22, 4  ;;  %s458_s23 = int_to_ptr.vmem [resolvable:$true] %s457_s23 }
  0x1c   : > { %s8503_s30 = smov [#allocation8]   ;;  %s8504_s19 = smov [#allocation11]  }
  0x1d   : > { %p7631_p11 = pneg %p8670_p10  ;;  %s492_s18 = sshll.u32 %s8503_s30, 4  ;;  %s493_s18 = int_to_ptr.vmem [resolvable:$true] %s492_s18 }
  0x1e   : > { %s518_s26 = sshll.u32 %s8504_s19, 4  ;;  %s8141_s20 = scalar_lea.vmem %s458_s23, 2048  ;;  %s519_s26 = int_to_ptr.vmem [resolvable:$true] %s518_s26 }
  0x1f   : > { %p8678_p12 = pnand %p12458_p9, %p7631_p11  ;;  %p8142_p0 = scmp.ne.s32.totalorder %s458_s23, %s8141_s20 }
  0x20   : > { %p8149_p3 = scmp.lt.s32.totalorder %s458_s23, %s458_s23  ;;  %p8150_p4 = scmp.lt.s32.totalorder %s8141_s20, %s8141_s20 }
  0x21   : > { %p8684_p13 = pneg %p8678_p12 }
  0x22   : > { %p8151_p7 = por %p8150_p4, %p8149_p3 }
  0x23   : > { %p8144_p1 = pnand %p8142_p0, %p8684_p13 }
  0x25   : > { %p8145_p2 = pneg %p8144_p1 }
  0x27   : > { %p8152_p8 = pnand %p8151_p7, %p8145_p2 }
  0x29   : > { %8155 = shalt.err (!%p8152_p8)
}
  0x2a   : > { %s8505_s22 = smov 128   ;;  %s8506_s19 = smov 8  }
  0x2b   : > { %s12585_s3 = sld [smem:[#allocation142_spill]]  ;;  %s8167_s27 = scalar_lea.vmem %s493_s18, 4096 }
  0x2c   : > { %p8168_p11 = scmp.ne.s32.totalorder %s493_s18, %s8167_s27  ;;  %p8175_p3 = scmp.lt.s32.totalorder %s493_s18, %s493_s18 }
  0x2d   : > { %p8176_p2 = scmp.lt.s32.totalorder %s8167_s27, %s8167_s27 }
  0x2e   : > { %p8170_p0 = pnand %p8168_p11, %p8684_p13 }
  0x2f   : > { %p8177_p4 = por %p8176_p2, %p8175_p3 }
  0x30   : > { %p8171_p1 = pneg %p8170_p0 }
  0x31   : > { %7637 = dma.hbm_to_vmem [thread:$0]  (!%p8678_p12), %s12585_s3, 2048, %s458_s23, [#allocation6], %s8505_s22, %s8505_s22, %s8506_s19  }
  0x32   : > { %p8178_p7 = pnand %p8177_p4, %p8171_p1 }
  0x34   : > { %8181 = shalt.err (!%p8178_p7)
}
  0x35   : > { %7643 = dma.hbm_to_vmem [thread:$0]  (!%p8678_p12), %s12440_s8, 4096, %s493_s18, [#allocation9], %s8505_s22, %s8505_s22, %s8506_s19  }
  0x36   : > { %s8193_s24 = scalar_lea.vmem %s519_s26, 2048  ;;  %p8201_p9 = scmp.lt.s32.totalorder %s519_s26, %s519_s26 }
  0x37   : > { %p8194_p8 = scmp.ne.s32.totalorder %s519_s26, %s8193_s24  ;;  %p8202_p3 = scmp.lt.s32.totalorder %s8193_s24, %s8193_s24 }
  0x39   : > { %p8196_p11 = pnand %p8194_p8, %p8684_p13  ;;  %p8203_p1 = por %p8202_p3, %p8201_p9 }
  0x3b   : > { %p8197_p0 = pneg %p8196_p11 }
  0x3d   : > { %p8204_p2 = pnand %p8203_p1, %p8197_p0 }
  0x3f   : > { %8207 = shalt.err (!%p8204_p2)
}
  0x40   : > { %7649 = dma.hbm_to_vmem [thread:$0]  (!%p8678_p12), %s12442_s10, 2048, %s519_s26, [#allocation12], %s8505_s22, %s8505_s22, %s8506_s19  }
  0x41   : > { %s8507_s23 = smov [#allocation14]   ;;  %s8508_s30 = smov [#allocation17]  }
  0x42   : > { %s544_s18 = sshll.u32 %s8507_s23, 4  ;;  %s570_s20 = sshll.u32 %s8508_s30, 4  ;;  %s545_s18 = int_to_ptr.vmem [resolvable:$true] %s544_s18  ;;  %s571_s20 = int_to_ptr.vmem [resolvable:$true] %s570_s20 }
  0x43   : > { %s8219_s3 = scalar_lea.vmem %s545_s18, 2048  ;;  %p8227_p8 = scmp.lt.s32.totalorder %s545_s18, %s545_s18 }
  0x44   : > { %p8220_p4 = scmp.ne.s32.totalorder %s545_s18, %s8219_s3  ;;  %p8228_p11 = scmp.lt.s32.totalorder %s8219_s3, %s8219_s3 }
  0x46   : > { %p8222_p9 = pnand %p8220_p4, %p8684_p13  ;;  %p8229_p0 = por %p8228_p11, %p8227_p8 }
  0x48   : > { %p8223_p7 = pneg %p8222_p9 }
  0x4a   : > { %p8230_p3 = pnand %p8229_p0, %p8223_p7 }
  0x4c   : > { %8233 = shalt.err (!%p8230_p3)
}
  0x4d   : > { %7655 = dma.hbm_to_vmem [thread:$0]  (!%p8678_p12), %s12444_s12, 2048, %s545_s18, [#allocation15], %s8505_s22, %s8505_s22, %s8506_s19  }
  0x4e   : > { %s8245_s27 = scalar_lea.vmem %s571_s20, 2048  ;;  %p8253_p9 = scmp.lt.s32.totalorder %s571_s20, %s571_s20 }
  0x4f   : > { %p8246_p1 = scmp.ne.s32.totalorder %s571_s20, %s8245_s27  ;;  %p8254_p8 = scmp.lt.s32.totalorder %s8245_s27, %s8245_s27 }
  0x51   : > { %p8248_p2 = pnand %p8246_p1, %p8684_p13  ;;  %p8255_p7 = por %p8254_p8, %p8253_p9 }
  0x53   : > { %p8249_p4 = pneg %p8248_p2 }
  0x55   : > { %p8256_p11 = pnand %p8255_p7, %p8249_p4 }
  0x57   : > { %8259 = shalt.err (!%p8256_p11)
}
  0x58   : > { %7661 = dma.hbm_to_vmem [thread:$0]  (!%p8678_p12), %s12446_s14, 2048, %s571_s20, [#allocation18], %s8505_s22, %s8505_s22, %s8506_s19  }
  0x59   : > { %s8509_s23 = smov [#allocation2]   ;;  %s8510_s30 = smov [#allocation7]  }
  0x5a   : > { %s444_s18 = sshll.u32 %s8509_s23, 4  ;;  %s479_s26 = sshll.u32 %s8510_s30, 4  ;;  %s445_s18 = int_to_ptr.vmem [resolvable:$true] %s444_s18  ;;  %s480_s26 = int_to_ptr.vmem [resolvable:$true] %s479_s26 }
  0x5b   : > { %s8271_s24 = scalar_lea.vmem %s445_s18, 2048  ;;  %p8279_p2 = scmp.lt.s32.totalorder %s445_s18, %s445_s18 }
  0x5c   : > { %p8272_p0 = scmp.ne.s32.totalorder %s445_s18, %s8271_s24  ;;  %p8280_p4 = scmp.lt.s32.totalorder %s8271_s24, %s8271_s24 }
  0x5e   : > { %p8274_p3 = pnand %p8272_p0, %p8684_p13  ;;  %p8281_p9 = por %p8280_p4, %p8279_p2 }
  0x60   : > { %p8275_p1 = pneg %p8274_p3 }
  0x62   : > { %p8282_p8 = pnand %p8281_p9, %p8275_p1 }
  0x64   : > { %8285 = shalt.err (!%p8282_p8)
}
  0x65   : > { %7634 = dma.hbm_to_vmem [thread:$0]  (!%p8678_p12), %s12434_s2, 2048, %s445_s18, [#allocation3], %s8505_s22, %s8505_s22, %s8506_s19  }
  0x66   : > { %s8297_s3 = scalar_lea.vmem %s480_s26, 4096  ;;  %p8305_p3 = scmp.lt.s32.totalorder %s480_s26, %s480_s26 }
  0x67   : > { %p8298_p7 = scmp.ne.s32.totalorder %s480_s26, %s8297_s3  ;;  %p8306_p2 = scmp.lt.s32.totalorder %s8297_s3, %s8297_s3 }
  0x69   : > { %p8300_p11 = pnand %p8298_p7, %p8684_p13  ;;  %p8307_p1 = por %p8306_p2, %p8305_p3 }
  0x6b   : > { %p8301_p0 = pneg %p8300_p11 }
  0x6d   : > { %p8308_p4 = pnand %p8307_p1, %p8301_p0 }
  0x6f   : > { %8311 = shalt.err (!%p8308_p4)
}
  0x70   : > { %7640 = dma.hbm_to_vmem [thread:$0]  (!%p8678_p12), %s12439_s7, 4096, %s480_s26, [#allocation6], %s8505_s22, %s8505_s22, %s8506_s19  }
  0x71   : > { %s8511_s18 = smov [#allocation10]   ;;  %s8512_s24 = smov [#allocation13]  }
  0x72   : > { %s505_s30 = sshll.u32 %s8511_s18, 4  ;;  %s531_s20 = sshll.u32 %s8512_s24, 4  ;;  %s506_s30 = int_to_ptr.vmem [resolvable:$true] %s505_s30  ;;  %s532_s20 = int_to_ptr.vmem [resolvable:$true] %s531_s20 }
  0x73   : > { %s8323_s27 = scalar_lea.vmem %s506_s30, 2048  ;;  %p8331_p11 = scmp.lt.s32.totalorder %s506_s30, %s506_s30 }
  0x74   : > { %p8324_p9 = scmp.ne.s32.totalorder %s506_s30, %s8323_s27  ;;  %p8332_p0 = scmp.lt.s32.totalorder %s8323_s27, %s8323_s27 }
  0x76   : > { %p8326_p8 = pnand %p8324_p9, %p8684_p13  ;;  %p8333_p3 = por %p8332_p0, %p8331_p11 }
  0x78   : > { %p8327_p7 = pneg %p8326_p8 }
  0x7a   : > { %p8334_p2 = pnand %p8333_p3, %p8327_p7 }
  0x7c   : > { %8337 = shalt.err (!%p8334_p2)
}
  0x7d   : > { %7646 = dma.hbm_to_vmem [thread:$0]  (!%p8678_p12), %s12441_s9, 2048, %s506_s30, [#allocation9], %s8505_s22, %s8505_s22, %s8506_s19  }
  0x7e   : > { %s8349_s17 = scalar_lea.vmem %s532_s20, 2048  ;;  %p8357_p8 = scmp.lt.s32.totalorder %s532_s20, %s532_s20 }
  0x7f   : > { %p8350_p1 = scmp.ne.s32.totalorder %s532_s20, %s8349_s17  ;;  %p8358_p11 = scmp.lt.s32.totalorder %s8349_s17, %s8349_s17 }
  0x81   : > { %p8352_p4 = pnand %p8350_p1, %p8684_p13  ;;  %p8359_p7 = por %p8358_p11, %p8357_p8 }
  0x83   : > { %p8353_p9 = pneg %p8352_p4 }
  0x85   : > { %p8360_p0 = pnand %p8359_p7, %p8353_p9 }
  0x87   : > { %8363 = shalt.err (!%p8360_p0)
}
  0x88   : > { %7652 = dma.hbm_to_vmem [thread:$0]  (!%p8678_p12), %s12443_s11, 2048, %s532_s20, [#allocation12], %s8505_s22, %s8505_s22, %s8506_s19  }
  0x89   : > { %s8513_s30 = smov [#allocation16]   ;;  %s8514_s27 = smov [#allocation19]  }
  0x8a   : > { %s557_s24 = sshll.u32 %s8513_s30, 4  ;;  %s583_s26 = sshll.u32 %s8514_s27, 4  ;;  %s558_s24 = int_to_ptr.vmem [resolvable:$true] %s557_s24  ;;  %s584_s26 = int_to_ptr.vmem [resolvable:$true] %s583_s26 }
  0x8b   : > { %s8375_s3 = scalar_lea.vmem %s558_s24, 2048  ;;  %p8383_p4 = scmp.lt.s32.totalorder %s558_s24, %s558_s24 }
  0x8c   : > { %p8376_p3 = scmp.ne.s32.totalorder %s558_s24, %s8375_s3  ;;  %p8384_p9 = scmp.lt.s32.totalorder %s8375_s3, %s8375_s3 }
  0x8e   : > { %p8378_p2 = pnand %p8376_p3, %p8684_p13  ;;  %p8385_p8 = por %p8384_p9, %p8383_p4 }
  0x90   : > { %p8379_p1 = pneg %p8378_p2 }
  0x92   : > { %p8386_p11 = pnand %p8385_p8, %p8379_p1 }
  0x94   : > { %8389 = shalt.err (!%p8386_p11)
}
  0x95   : > { %7658 = dma.hbm_to_vmem [thread:$0]  (!%p8678_p12), %s12445_s13, 2048, %s558_s24, [#allocation15], %s8505_s22, %s8505_s22, %s8506_s19  }
  0x96   : > { %s8401_s23 = scalar_lea.vmem %s584_s26, 2048  ;;  %p8409_p2 = scmp.lt.s32.totalorder %s584_s26, %s584_s26 }
  0x97   : > { %p8402_p7 = scmp.ne.s32.totalorder %s584_s26, %s8401_s23  ;;  %p8410_p4 = scmp.lt.s32.totalorder %s8401_s23, %s8401_s23 }
  0x99   : > { %p8404_p0 = pnand %p8402_p7, %p8684_p13  ;;  %p8411_p1 = por %p8410_p4, %p8409_p2 }
  0x9b   : > { %p8405_p3 = pneg %p8404_p0 }
  0x9d   : > { %p8412_p9 = pnand %p8411_p1, %p8405_p3 }
  0x9f   : > { %8415 = shalt.err (!%p8412_p9)
}
  0xa0   : > { %7664 = dma.hbm_to_vmem [thread:$0]  (!%p8678_p12), %s12447_s15, 2048, %s584_s26, [#allocation18], %s8505_s22, %s8505_s22, %s8506_s19  }
  0xa1   : > { %610 = sbr.rel (%p8670_p10) target bundleno = 4866 (0x1302), region = 88 }
  0xa6   : > { %p12586_p13 = scmp.eq.s32.totalorder %s8642_s28, 0 }
  0xa8   : > { %8459 = dma.done.wait (%p12586_p13), [#allocation3], 2048   ;;  %p12587_p8 = pmov %p12586_p13 }
  0xaa   : > { %8461 = vsyncadd (%p12587_p8), [#allocation3], 4294965248  ;;  %p12588_p11 = pmov %p12587_p8 }
  0xab   : > { %p12589_p7 = pmov %p12587_p8 }
  0xac   : > { %8463 = dma.done.wait (%p12588_p11), [#allocation6], 6144  }
  0xad   : > { %8465 = vsyncadd (%p12589_p7), [#allocation6], 4294961152  ;;  %p12590_p0 = pmov %p12589_p7 }
  0xaf   : > { %8467 = dma.done.wait (%p12590_p0), [#allocation9], 6144   ;;  %p12591_p12 = pmov %p12590_p0 }
  0xb0   : > { %p12592_p10 = pmov %p12590_p0 }
  0xb1   : > { %8469 = vsyncadd (%p12591_p12), [#allocation9], 4294961152 }
  0xb2   : > { %8471 = dma.done.wait (%p12592_p10), [#allocation12], 4096   ;;  %p12593_p3 = pmov %p12590_p0 }
  0xb3   : > { %p12594_p2 = pmov %p12590_p0 }
  0xb4   : > { %8473 = vsyncadd (%p12593_p3), [#allocation12], 4294963200 }
  0xb5   : > { %8475 = dma.done.wait (%p12594_p2), [#allocation15], 4096   ;;  %p12595_p4 = pmov %p12590_p0 }
  0xb6   : > { %p12596_p1 = pmov %p12590_p0 }
  0xb7   : > { %8477 = vsyncadd (%p12595_p4), [#allocation15], 4294963200 }
  0xb8   : > { %8479 = dma.done.wait (%p12596_p1), [#allocation18], 4096   ;;  %p12597_p9 = pmov %p12590_p0 }
  0xb9   : > { %v12461_v0 = vmov 3   ;;  %v12465_v1 = vmov 0   ;;  %p702_p13 = scmp.lt.s32.totalorder %s8642_s28, 1  ;;  %v8831_v2 = vld [vmem:[%s12436_s4 + $0x78] sm:$0xff]  ;;  %v8836_v3 = vld [vmem:[%s12436_s4 + $0x60] sm:$0xff]  ;;  %s12598_s17 = sld [smem:[#allocation140_spill]] }
  0xba   : > { %8481 = vsyncadd (%p12597_p9), [#allocation18], 4294963200  ;;  %7768 = vset.pattern.permute.xlu0 %v12461_v0  ;;  %7752 = vset.pattern.permute.xlu1 %v12465_v1  ;;  %v8843_v4 = vld [vmem:[%s12436_s4 + $0x58] sm:$0xff]  ;;  %v12463_v5 = vmov 1   ;;  %v8859_v9 = vld [vmem:[%s12436_s4 + $0x70] sm:$0xff]  ;;  %s12599_s29 = sld [smem:[#allocation141_spill]] }
  0xbb   : > { %s703_s0 = scalar_select %p702_p13, %s8642_s28, 1  ;;  %1108 = vperm.xlu1 %7752, %v8831_v2   ;;  %1480 = vperm.xlu0 %7768, %v8836_v3   ;;  %v8896_v24 = vld [vmem:[%s12436_s4 + $0x68] sm:$0xff]  ;;  %v12459_v60 = vmov 2   ;;  %vm3797_vm4 = vcmask 261120  }
  0xbc   : > { %s8521_s22 = smov 2   ;;  %s8522_s19 = smov 126  }
  0xbd   : > { %s6503_s21 = sshll.u32 %s703_s0, 7  ;;  %s8523_s24 = smov 127  }
  0xbf   : > { %s8848_s23 = scalar_lea.vmem %s12598_s17, %s6503_s21  ;;  %7753 = vset.pattern.permute.xlu1 %v12463_v5  ;;  %1476 = vperm.xlu0 %7768, %v8843_v4   ;;  %s8520_s21 = smov 1  }
  0xc0   : > { %v707_v6 = vld [vmem:[%s8848_s23] sm:$0xff]  ;;  %v708_v7 = vld [vmem:[%s8848_s23 + $0x8] sm:$0xff]  ;;  %v709_v8 = vld [vmem:[%s8848_s23 + $0x10] sm:$0xff]  ;;  %1252 = vperm.xlu1 %7753, %v8831_v2  }
  0xc1   : > { %v710_v10 = vld [vmem:[%s8848_s23 + $0x18] sm:$0xff]  ;;  %v723_v11 = vld [vmem:[%s12599_s29] sm:$0xff]  ;;  %v724_v12 = vld [vmem:[%s12599_s29 + $0x8] sm:$0xff] }
  0xc2   : > { %v725_v13 = vld [vmem:[%s12599_s29 + $0x10] sm:$0xff]  ;;  %v726_v14 = vld [vmem:[%s12599_s29 + $0x18] sm:$0xff]  ;;  %v8874_v15 = vadd.f32 %v723_v11, %v707_v6  ;;  %v8876_v16 = vadd.f32 %v724_v12, %v708_v7  ;;  %v711_v18 = vld [vmem:[%s8848_s23 + $0x20] sm:$0xff] }
  0xc3   : > { %v8878_v17 = vadd.f32 %v725_v13, %v709_v8  ;;  %v727_v19 = vld [vmem:[%s12599_s29 + $0x20] sm:$0xff]  ;;  %v8885_v20 = vadd.f32 %v726_v14, %v710_v10  ;;  %v712_v22 = vld [vmem:[%s8848_s23 + $0x28] sm:$0xff]  ;;  %v713_v27 = vld [vmem:[%s8848_s23 + $0x30] sm:$0xff] }
  0xc4   : > { %12600 = vst [vmem:[#allocation34_spill] sm:$0xff] %v8874_v15  ;;  %12601 = vst [vmem:[#allocation35_spill] sm:$0xff] %v8876_v16  ;;  %1248 = vperm.xlu1 %7753, %v8859_v9   ;;  %v787_v21 = vadd.f32 %v8876_v16, %v8874_v15  ;;  %v728_v23 = vld [vmem:[%s12599_s29 + $0x28] sm:$0xff]  ;;  %v8898_v25 = vadd.f32 %v727_v19, %v711_v18  ;;  %v729_v28 = vld [vmem:[%s12599_s29 + $0x30] sm:$0xff]  ;;  %v811_v29 = vmul.f32 %v8874_v15, %v8874_v15 }
  0xc5   : > { %12602 = vst [vmem:[#allocation36_spill] sm:$0xff] %v8878_v17  ;;  %12603 = vst [vmem:[#allocation37_spill] sm:$0xff] %v8885_v20  ;;  %v812_v30 = vmul.f32 %v8876_v16, %v8876_v16  ;;  %v8910_v31 = vadd.f32 %v728_v23, %v712_v22  ;;  %v714_v33 = vld [vmem:[%s8848_s23 + $0x38] sm:$0xff]  ;;  %v813_v35 = vmul.f32 %v8878_v17, %v8878_v17  ;;  %v715_v38 = vld [vmem:[%s8848_s23 + $0x40] sm:$0xff] }
  0xc6   : > { %12604 = vst [vmem:[#allocation38_spill] sm:$0xff] %v8898_v25  ;;  %v788_v26 = vadd.f32 %v787_v21, %v8878_v17  ;;  %v730_v34 = vld [vmem:[%s12599_s29 + $0x38] sm:$0xff]  ;;  %v8920_v36 = vadd.f32 %v729_v28, %v713_v27  ;;  %v731_v39 = vld [vmem:[%s12599_s29 + $0x40] sm:$0xff]  ;;  %v814_v40 = vmul.f32 %v8885_v20, %v8885_v20  ;;  %v716_v44 = vld [vmem:[%s8848_s23 + $0x48] sm:$0xff]  ;;  %v815_v46 = vmul.f32 %v8898_v25, %v8898_v25 }
  0xc7   : > { %12605 = vst [vmem:[#allocation39_spill] sm:$0xff] %v8910_v31  ;;  %v827_v41 = vadd.f32 %v812_v30, %v811_v29  ;;  %v8929_v42 = vadd.f32 %v730_v34, %v714_v33  ;;  %v732_v45 = vld [vmem:[%s12599_s29 + $0x48] sm:$0xff]  ;;  %v8940_v48 = vadd.f32 %v731_v39, %v715_v38  ;;  %v717_v50 = vld [vmem:[%s8848_s23 + $0x50] sm:$0xff]  ;;  %v816_v52 = vmul.f32 %v8910_v31, %v8910_v31  ;;  %v718_v56 = vld [vmem:[%s8848_s23 + $0x58] sm:$0xff] }
  0xc8   : > { %7754 = vset.pattern.permute.xlu1 %v12465_v1  ;;  %v789_v32 = vadd.f32 %v788_v26, %v8885_v20  ;;  %12606 = vst [vmem:[#allocation40_spill] sm:$0xff] %v8920_v36  ;;  %v733_v51 = vld [vmem:[%s12599_s29 + $0x50] sm:$0xff]  ;;  %v8949_v54 = vadd.f32 %v732_v45, %v716_v44  ;;  %v734_v57 = vld [vmem:[%s12599_s29 + $0x58] sm:$0xff]  ;;  %v817_v58 = vmul.f32 %v8920_v36, %v8920_v36  ;;  %v719_v63 = vld [vmem:[%s8848_s23 + $0x60] sm:$0xff] }
  0xc9   : > { %1098 = vperm.xlu1 %7754, %v8896_v24   ;;  %12607 = vst [vmem:[#allocation41_spill] sm:$0xff] %v8929_v42  ;;  %v828_v47 = vadd.f32 %v827_v41, %v813_v35  ;;  %12608 = vst [vmem:[#allocation42_spill] sm:$0xff] %v8940_v48  ;;  %v8959_v61 = vadd.f32 %v733_v51, %v717_v50  ;;  %v735_v6 = vld [vmem:[%s12599_s29 + $0x60] sm:$0xff]  ;;  %v818_v7 = vmul.f32 %v8929_v42, %v8929_v42  ;;  %v720_v12 = vld [vmem:[%s8848_s23 + $0x68] sm:$0xff] }
  0xca   : > { %v790_v37 = vadd.f32 %v789_v32, %v8898_v25  ;;  %12609 = vst [vmem:[#allocation43_spill] sm:$0xff] %v8949_v54  ;;  %v8969_v10 = vadd.f32 %v734_v57, %v718_v56  ;;  %v736_v13 = vld [vmem:[%s12599_s29 + $0x68] sm:$0xff]  ;;  %v819_v14 = vmul.f32 %v8940_v48, %v8940_v48  ;;  %v8978_v19 = vadd.f32 %v735_v6, %v719_v63  ;;  %v721_v22 = vld [vmem:[%s8848_s23 + $0x70] sm:$0xff]  ;;  %v722_v30 = vld [vmem:[%s8848_s23 + $0x78] sm:$0xff] }
  0xcb   : > { %v829_v53 = vadd.f32 %v828_v47, %v814_v40  ;;  %12610 = vst [vmem:[#allocation44_spill] sm:$0xff] %v8959_v61  ;;  %v737_v23 = vld [vmem:[%s12599_s29 + $0x70] sm:$0xff]  ;;  %v820_v26 = vmul.f32 %v8949_v54, %v8949_v54  ;;  %v8989_v28 = vadd.f32 %v736_v13, %v720_v12  ;;  %v738_v32 = vld [vmem:[%s12599_s29 + $0x78] sm:$0xff]  ;;  %v821_v33 = vmul.f32 %v8959_v61, %v8959_v61  ;;  %v959_v6 = vld [vmem:[%s12436_s4 + $0x40] sm:$0xff] }
  0xcc   : > { %v791_v43 = vadd.f32 %v790_v37, %v8910_v31  ;;  %12611 = vst [vmem:[#allocation45_spill] sm:$0xff] %v8969_v10  ;;  %12612 = vst [vmem:[#allocation46_spill] sm:$0xff] %v8978_v19  ;;  %v8998_v35 = vadd.f32 %v737_v23, %v721_v22  ;;  %v822_v38 = vmul.f32 %v8969_v10, %v8969_v10  ;;  %v12467_v57 = vmov 4   ;;  %v9060_v63 = vld [vmem:[%s12436_s4 + $0x18] sm:$0xff]  ;;  %v9106_v12 = vld [vmem:[%s12436_s4 + $0x8] sm:$0xff] }
  0xcd   : > { %7755 = vset.pattern.permute.xlu1 %v12463_v5  ;;  %v830_v59 = vadd.f32 %v829_v53, %v815_v46  ;;  %12613 = vst [vmem:[#allocation47_spill] sm:$0xff] %v8989_v28  ;;  %v9004_v40 = vadd.f32 %v738_v32, %v722_v30  ;;  %v824_v46 = vmul.f32 %v8989_v28, %v8989_v28 }
  0xce   : > { %1244 = vperm.xlu1 %7755, %v8896_v24   ;;  %v792_v49 = vadd.f32 %v791_v43, %v8920_v36  ;;  %12614 = vst [vmem:[#allocation48_spill] sm:$0xff] %v8998_v35  ;;  %v823_v43 = vmul.f32 %v8978_v19, %v8978_v19  ;;  %v825_v50 = vmul.f32 %v8998_v35, %v8998_v35 }
  0xcf   : > { %v831_v8 = vadd.f32 %v830_v59, %v816_v52  ;;  %12615 = vst [vmem:[#allocation49_spill] sm:$0xff] %v9004_v40  ;;  %v826_v52 = vmul.f32 %v9004_v40, %v9004_v40  ;;  %v9046_v59 = vld [vmem:[%s12436_s4 + $0x50] sm:$0xff] }
  0xd0   : > { %v793_v55 = vadd.f32 %v792_v49, %v8929_v42 }
  0xd1   : > { %v832_v18 = vadd.f32 %v831_v8, %v817_v58  ;;  %v9033_v58 = vld [vmem:[%s12436_s4 + $0x48] sm:$0xff]  ;;  %v9092_v8 = vld [vmem:[%s12436_s4 + $0x10] sm:$0xff] }
  0xd2   : > { %7756 = vset.pattern.permute.xlu1 %v12459_v60  ;;  %v794_v62 = vadd.f32 %v793_v55, %v8940_v48 }
  0xd3   : > { %1364 = vperm.xlu1 %7756, %v8831_v2   ;;  %v833_v27 = vadd.f32 %v832_v18, %v818_v7  ;;  %v9077_v7 = vld [vmem:[%s12436_s4 + $0x30] sm:$0xff] }
  0xd4   : > { %v795_v11 = vadd.f32 %v794_v62, %v8949_v54  ;;  %v9052_v62 = vld [vmem:[%s12436_s4 + $0x28] sm:$0xff] }
  0xd5   : > { %v834_v34 = vadd.f32 %v833_v27, %v819_v14 }
  0xd6   : > { %v796_v21 = vadd.f32 %v795_v11, %v8959_v61  ;;  %v9099_v11 = vld [vmem:[%s12436_s4] sm:$0xff] }
  0xd7   : > { %7757 = vset.pattern.permute.xlu1 %v12461_v0  ;;  %v835_v39 = vadd.f32 %v834_v34, %v820_v26 }
  0xd8   : > { %1492 = vperm.xlu1 %7757, %v8831_v2   ;;  %v797_v29 = vadd.f32 %v796_v21, %v8969_v10 }
  0xd9   : > { %v836_v44 = vadd.f32 %v835_v39, %v821_v33 }
  0xda   : > { %v798_v37 = vadd.f32 %v797_v29, %v8978_v19 }
  0xdb   : > { %v837_v47 = vadd.f32 %v836_v44, %v822_v38 }
  0xdc   : > { %7758 = vset.pattern.permute.xlu1 %v12465_v1  ;;  %v799_v41 = vadd.f32 %v798_v37, %v8989_v28 }
  0xdd   : > { %1093 = vperm.xlu1 %7758, %v8836_v3   ;;  %v838_v51 = vadd.f32 %v837_v47, %v823_v43 }
  0xde   : > { %v800_v45 = vadd.f32 %v799_v41, %v8998_v35 }
  0xdf   : > { %v839_v53 = vadd.f32 %v838_v51, %v824_v46 }
  0xe0   : > { %v801_v49 = vadd.f32 %v800_v45, %v9004_v40 }
  0xe1   : > { %7759 = vset.pattern.permute.xlu1 %v12463_v5  ;;  %v840_v55 = vadd.f32 %v839_v53, %v825_v50 }
  0xe2   : > { %802 = vadd.xlane.f32.xlu0 %v801_v49  ;;  %1240 = vperm.xlu1 %7759, %v8836_v3  }
  0xe3   : > { %v841_v56 = vadd.f32 %v840_v55, %v826_v52 }
  0xe6   : > { %7760 = vset.pattern.permute.xlu1 %v12459_v60  ;;  %842 = vadd.xlane.f32.xlu0 %v841_v56 }
  0xe7   : > { %1360 = vperm.xlu1 %7760, %v8859_v9  }
  0xeb   : > { %7761 = vset.pattern.permute.xlu1 %v12461_v0 }
  0xec   : > { %1488 = vperm.xlu1 %7761, %v8859_v9  }
  0xf0   : > { %7762 = vset.pattern.permute.xlu1 %v12467_v57 }
  0xf1   : > { %1636 = vperm.xlu1 %7762, %v8831_v2   ;;  %v9040_v2 = vld [vmem:[%s12436_s4 + $0x38] sm:$0xff] }
  0xf5   : > { %7763 = vset.pattern.permute.xlu1 %v12465_v1 }
  0xf6   : > { %1088 = vperm.xlu1 %7763, %v8843_v4  }
  0xfa   : > { %7764 = vset.pattern.permute.xlu1 %v12459_v60 }
  0xfb   : > { %1356 = vperm.xlu1 %7764, %v8896_v24  }
  0xfc   : > { %1468 = vperm.xlu0 %7768, %v9033_v58  }
  0xff   : > { %7765 = vset.pattern.permute.xlu1 %v12461_v0 }
 0x100   : > { %1484 = vperm.xlu1 %7765, %v8896_v24   ;;  %1460 = vperm.xlu0 %7768, %v9040_v2  }
 0x104   : > { %7766 = vset.pattern.permute.xlu1 %v12463_v5  ;;  %1452 = vperm.xlu0 %7768, %v9052_v62  }
 0x105   : > { %1232 = vperm.xlu1 %7766, %v9046_v59  }
 0x108   : > { %1444 = vperm.xlu0 %7768, %v9060_v63  }
 0x109   : > { %7767 = vset.pattern.permute.xlu1 %v12459_v60 }
 0x10a   : > { %1352 = vperm.xlu1 %7767, %v8836_v3  }
 0x10c   : > { %7796 = vset.pattern.permute.xlu0 %v12463_v5 }
 0x10d   : > { %1236 = vperm.xlu0 %7796, %v8843_v4  }
 0x10e   : > { %7769 = vset.pattern.permute.xlu1 %v12467_v57 }
 0x10f   : > { %1628 = vperm.xlu1 %7769, %v8896_v24   ;;  %v9085_v24 = vld [vmem:[%s12436_s4 + $0x20] sm:$0xff] }
 0x111   : > { %1224 = vperm.xlu0 %7796, %v959_v6  }
 0x113   : > { %7770 = vset.pattern.permute.xlu1 %v12463_v5 }
 0x114   : > { %1228 = vperm.xlu1 %7770, %v9033_v58  }
 0x115   : > { %1216 = vperm.xlu0 %7796, %v9077_v7  }
 0x118   : > { %7771 = vset.pattern.permute.xlu1 %v12459_v60 }
 0x119   : > { %1348 = vperm.xlu1 %7771, %v8843_v4   ;;  %1208 = vperm.xlu0 %7796, %v9085_v24  }
 0x11d   : > { %7772 = vset.pattern.permute.xlu1 %v12467_v57  ;;  %1200 = vperm.xlu0 %7796, %v9092_v8  }
 0x11e   : > { %1624 = vperm.xlu1 %7772, %v8836_v3  }
 0x121   : > { %1192 = vperm.xlu0 %7796, %v9099_v11  }
 0x122   : > { %7773 = vset.pattern.permute.xlu1 %v12465_v1 }
 0x123   : > { %1073 = vperm.xlu1 %7773, %v959_v6  }
 0x125   : > { %7801 = vset.pattern.permute.xlu0 %v12459_v60 }
 0x126   : > { %1308 = vperm.xlu0 %7801, %v9106_v12  }
 0x127   : > { %7774 = vset.pattern.permute.xlu1 %v12459_v60 }
 0x128   : > { %1344 = vperm.xlu1 %7774, %v9046_v59  }
 0x12c   : > { %7775 = vset.pattern.permute.xlu1 %v12461_v0 }
 0x12d   : > { %1472 = vperm.xlu1 %7775, %v9046_v59  }
 0x131   : > { %7776 = vset.pattern.permute.xlu1 %v12463_v5 }
 0x132   : > { %1220 = vperm.xlu1 %7776, %v9040_v2  }
 0x136   : > { %7777 = vset.pattern.permute.xlu1 %v12459_v60  ;;  %v9124_v3 = vpop.permute.xlu1 %1108  ;;  %v9139_v21 = vpop.permute.xlu0 %1480 }
 0x137   : > { %1340 = vperm.xlu1 %7777, %v9033_v58  }
 0x13a   : > { %v9145_v23 = vpop.permute.xlu0 %1476 }
 0x13b   : > { %7778 = vset.pattern.permute.xlu1 %v12467_v57  ;;  %v9128_v13 = vpop.permute.xlu1 %1252 }
 0x13c   : > { %1616 = vperm.xlu1 %7778, %v9046_v59  }
 0x13f   : > { %v9132_v14 = vpop.permute.xlu1 %1248 }
 0x140   : > { %7779 = vset.pattern.permute.xlu1 %v12465_v1 }
 0x141   : > { %1063 = vperm.xlu1 %7779, %v9077_v7  }
 0x144   : > { %v9135_v18 = vpop.permute.xlu1 %1098 }
 0x145   : > { %7780 = vset.pattern.permute.xlu1 %v12459_v60 }
 0x146   : > { %1336 = vperm.xlu1 %7780, %v959_v6  }
 0x149   : > { %v9142_v22 = vpop.permute.xlu1 %1244 }
 0x14a   : > { %7781 = vset.pattern.permute.xlu1 %v12461_v0 }
 0x14b   : > { %1464 = vperm.xlu1 %7781, %v959_v6  }
 0x14e   : > { %v9149_v26 = vpop.permute.xlu1 %1364 }
 0x14f   : > { %7782 = vset.pattern.permute.xlu1 %v12463_v5 }
 0x150   : > { %1212 = vperm.xlu1 %7782, %v9052_v62  }
 0x153   : > { %v9153_v32 = vpop.permute.xlu1 %1492 }
 0x154   : > { %7783 = vset.pattern.permute.xlu1 %v12459_v60 }
 0x155   : > { %1332 = vperm.xlu1 %7783, %v9040_v2  }
 0x158   : > { %v9157_v43 = vpop.permute.xlu1 %1093 }
 0x159   : > { %7784 = vset.pattern.permute.xlu1 %v12467_v57 }
 0x15a   : > { %1608 = vperm.xlu1 %7784, %v959_v6  }
 0x15d   : > { %v9161_v49 = vpop.permute.xlu1 %1240 }
 0x15e   : > { %7785 = vset.pattern.permute.xlu1 %v12465_v1 }
 0x15f   : > { %1053 = vperm.xlu1 %7785, %v9085_v24  }
 0x162   : > { %v9165_v51 = vpop.permute.xlu1 %1360 }
 0x163   : > { %7786 = vset.pattern.permute.xlu1 %v12459_v60  ;;  %12616 = vst [vmem:[#allocation50_spill] sm:$0xff] %v9165_v51  ;;  %v758_v51 = vld [vmem:[#allocation2 + $0x18] sm:$0xff] }
 0x164   : > { %1328 = vperm.xlu1 %7786, %v9077_v7  }
 0x167   : > { %v9170_v52 = vpop.permute.xlu1 %1488 }
 0x168   : > { %7787 = vset.pattern.permute.xlu1 %v12461_v0 }
 0x169   : > { %1456 = vperm.xlu1 %7787, %v9077_v7  }
 0x16b   : > { %v803_v27 = vpop.xlane.xlu0 %802 }
 0x16c   : > { %v804_v29 = vrot.slane %v803_v27, 4  ;;  %v9175_v53 = vpop.permute.xlu1 %1636 }
 0x16d   : > { %7788 = vset.pattern.permute.xlu1 %v12463_v5 }
 0x16e   : > { %v805_v30 = vadd.f32 %v804_v29, %v803_v27  ;;  %1204 = vperm.xlu1 %7788, %v9060_v63  }
 0x16f   : > { %v843_v34 = vpop.xlane.xlu0 %842 }
 0x170   : > { %v806_v33 = vrot.slane %v805_v30, 2  ;;  %v844_v38 = vrot.slane %v843_v34, 4 }
 0x171   : > { %v9179_v55 = vpop.permute.xlu1 %1088 }
 0x172   : > { %7789 = vset.pattern.permute.xlu1 %v12459_v60  ;;  %v807_v37 = vadd.f32 %v806_v33, %v805_v30  ;;  %v845_v41 = vadd.f32 %v844_v38, %v843_v34 }
 0x173   : > { %1324 = vperm.xlu1 %7789, %v9052_v62  }
 0x174   : > { %v808_v39 = vrot.slane %v807_v37, 1  ;;  %v846_v45 = vrot.slane %v845_v41, 2 }
 0x176   : > { %v809_v44 = vadd.f32 %v808_v39, %v807_v37  ;;  %v847_v46 = vadd.f32 %v846_v45, %v845_v41  ;;  %v9183_v56 = vpop.permute.xlu1 %1356 }
 0x177   : > { %7790 = vset.pattern.permute.xlu1 %v12467_v57  ;;  %12617 = vst [vmem:[#allocation51_spill] sm:$0xff] %v9183_v56 }
 0x178   : > { %7561 = vpush %v809_v44  ;;  %1600 = vperm.xlu1 %7790, %v9077_v7   ;;  %v848_v47 = vrot.slane %v847_v46, 1 }
 0x17a   : > { %v849_v50 = vadd.f32 %v848_v47, %v847_v46 }
 0x17b   : > { %v9187_v6 = vpop.permute.xlu1 %1484 }
 0x17c   : > { %7791 = vset.pattern.permute.xlu1 %v12465_v1  ;;  %7563 = vpush %v849_v50 }
 0x17d   : > { %1043 = vperm.xlu1 %7791, %v9092_v8  }
 0x180   : > { %v9192_v7 = vpop.permute.xlu1 %1232 }
 0x181   : > { %7792 = vset.pattern.permute.xlu1 %v12459_v60  ;;  %12618 = vst [vmem:[#allocation52_spill] sm:$0xff] %v9192_v7 }
 0x182   : > { %1320 = vperm.xlu1 %7792, %v9085_v24  }
 0x186   : > { %7793 = vset.pattern.permute.xlu1 %v12461_v0 }
 0x187   : > { %1448 = vperm.xlu1 %7793, %v9085_v24  }
 0x18b   : > { %7794 = vset.pattern.permute.xlu1 %v12463_v5  ;;  %v768_v5 = vld [vmem:[#allocation2 + $0x68] sm:$0xff] }
 0x18c   : > { %1196 = vperm.xlu1 %7794, %v9106_v12  }
 0x190   : > { %7795 = vset.pattern.permute.xlu1 %v12459_v60 }
 0x191   : > { %1316 = vperm.xlu1 %7795, %v9060_v63  }
 0x195   : > { %7797 = vset.pattern.permute.xlu1 %v12467_v57 }
 0x196   : > { %1592 = vperm.xlu1 %7797, %v9085_v24   ;;  %v9196_v24 = vpop.permute.xlu1 %1352 }
 0x197   : > { %12619 = vst [vmem:[#allocation53_spill] sm:$0xff] %v9196_v24 }
 0x19a   : > { %7798 = vset.pattern.permute.xlu1 %v12465_v1  ;;  %v9200_v27 = vpop.permute.xlu1 %1628 }
 0x19b   : > { %1033 = vperm.xlu1 %7798, %v9099_v11   ;;  %12620 = vst [vmem:[#allocation54_spill] sm:$0xff] %v9200_v27  ;;  %v757_v27 = vld [vmem:[#allocation2 + $0x10] sm:$0xff] }
 0x19e   : > { %v9203_v29 = vpop.permute.xlu1 %1228 }
 0x19f   : > { %7799 = vset.pattern.permute.xlu1 %v12459_v60  ;;  %12621 = vst [vmem:[#allocation55_spill] sm:$0xff] %v9203_v29  ;;  %v770_v60 = vld [vmem:[#allocation2 + $0x78] sm:$0xff] }
 0x1a0   : > { %1312 = vperm.xlu1 %7799, %v9092_v8  }
 0x1a2   : > { %v9205_v33 = vpop.permute.xlu1 %1348 }
 0x1a3   : > { %12622 = vst [vmem:[#allocation56_spill] sm:$0xff] %v9205_v33 }
 0x1a4   : > { %7800 = vset.pattern.permute.xlu1 %v12461_v0 }
 0x1a5   : > { %1440 = vperm.xlu1 %7800, %v9092_v8  }
 0x1a6   : > { %v9207_v34 = vpop.permute.xlu1 %1624 }
 0x1a7   : > { %12623 = vst [vmem:[#allocation57_spill] sm:$0xff] %v9207_v34 }
 0x1a9   : > { %s7562_s26 = spop %7561  ;;  %1436 = vperm.xlu1 %7800, %v9106_v12  }
 0x1aa   : > { %s851_s3 = smul.f32 6.1035156e-05, %s7562_s26 }
 0x1ac   : > { %s853_s20 = smul.f32 %s851_s3, %s851_s3  ;;  %v9225_v50 = vstv %s851_s3 }
 0x1ad   : > { %7802 = vset.pattern.permute.xlu1 %v12467_v57  ;;  %s7564_s17 = spop %7563  ;;  %v861_v57 = vsub.f32 %v8910_v31, %v9225_v50  ;;  %v786_v31 = vld [vmem:[#allocation5 + $0x78] sm:$0xff] }
 0x1ae   : > { %1584 = vperm.xlu1 %7802, %v9092_v8   ;;  %s852_s23 = smul.f32 6.1035156e-05, %s7564_s17  ;;  %v9209_v8 = vpop.permute.xlu1 %1073 }
 0x1af   : > { %12624 = vst [vmem:[#allocation58_spill] sm:$0xff] %v9209_v8 }
 0x1b0   : > { %s854_s18 = ssub.f32 %s852_s23, %s853_s20 }
 0x1b2   : > { %7804 = vset.pattern.permute.xlu1 %v12461_v0  ;;  %s872_s30 = sadd.f32 1e-05, %s854_s18  ;;  %v9211_v38 = vpop.permute.xlu1 %1344  ;;  %v769_v0 = vld [vmem:[#allocation2 + $0x70] sm:$0xff] }
 0x1b3   : > { %12625 = vst [vmem:[#allocation59_spill] sm:$0xff] %v9211_v38  ;;  %v871_v38 = vsub.f32 %v9004_v40, %v9225_v50 }
 0x1b4   : > { %v873_v30 = vstv %s872_s30 }
 0x1b5   : > { %7860 = vrsqrt.f32 %v873_v30  ;;  %v760_v30 = vld [vmem:[#allocation2 + $0x28] sm:$0xff] }
 0x1b6   : > { %v9213_v39 = vpop.permute.xlu1 %1472 }
 0x1b7   : > { %12626 = vst [vmem:[#allocation60_spill] sm:$0xff] %v9213_v39 }
 0x1ba   : > { %v9215_v41 = vpop.permute.xlu1 %1220 }
 0x1bb   : > { %12627 = vst [vmem:[#allocation61_spill] sm:$0xff] %v9215_v41 }
 0x1be   : > { %v9217_v44 = vpop.permute.xlu1 %1340 }
 0x1bf   : > { %12628 = vst [vmem:[#allocation62_spill] sm:$0xff] %v9217_v44  ;;  %v857_v44 = vsub.f32 %v8876_v16, %v9225_v50  ;;  %v869_v16 = vsub.f32 %v8989_v28, %v9225_v50  ;;  %v785_v28 = vld [vmem:[#allocation5 + $0x70] sm:$0xff] }
 0x1c2   : > { %v7861_v37 = vpop.eup %7860  ;;  %v9219_v45 = vpop.permute.xlu1 %1616 }
 0x1c3   : > { %7565 = vpush %v7861_v37  ;;  %12629 = vst [vmem:[#allocation63_spill] sm:$0xff] %v9219_v45  ;;  %v756_v37 = vld [vmem:[#allocation2 + $0x8] sm:$0xff]  ;;  %v767_v45 = vld [vmem:[#allocation2 + $0x60] sm:$0xff] }
 0x1c6   : > { %v9221_v46 = vpop.permute.xlu1 %1063 }
 0x1c7   : > { %12630 = vst [vmem:[#allocation64_spill] sm:$0xff] %v9221_v46  ;;  %v870_v46 = vsub.f32 %v8998_v35, %v9225_v50 }
 0x1ca   : > { %v9223_v47 = vpop.permute.xlu1 %1336 }
 0x1cb   : > { %12631 = vst [vmem:[#allocation65_spill] sm:$0xff] %v9223_v47 }
 0x1ce   : > { %v9235_v47 = vpop.permute.xlu1 %1464 }
 0x1cf   : > { %12632 = vst [vmem:[#allocation66_spill] sm:$0xff] %v9235_v47  ;;  %v859_v47 = vsub.f32 %v8885_v20, %v9225_v50 }
 0x1d2   : > { %v9258_v7 = vpop.permute.xlu1 %1212 }
 0x1f4   : > { %s7566_s0 = spop %7565 }
 0x1f5   : > { %v9227_v1 = vstv %s7566_s0  ;;  %s8527_s0 = smov 64  }
 0x1f6   : > { %v882_v24 = vmul.f32 %v9227_v1, %v760_v30  ;;  %v878_v33 = vmul.f32 %v9227_v1, %v756_v37  ;;  %v892_v56 = vmul.f32 %v9227_v1, %v770_v60  ;;  %v891_v41 = vmul.f32 %v9227_v1, %v769_v0 }
 0x1f7   : > { %v890_v40 = vmul.f32 %v9227_v1, %v768_v5  ;;  %v880_v39 = vmul.f32 %v9227_v1, %v758_v51  ;;  %v889_v35 = vmul.f32 %v9227_v1, %v767_v45  ;;  %v784_v5 = vld [vmem:[#allocation5 + $0x68] sm:$0xff] }
 0x1f8   : > { %v9248_v30 = vmul.f32 %v882_v24, %v861_v57  ;;  %v9250_v37 = vmul.f32 %v878_v33, %v857_v44  ;;  %v908_v60 = vmul.f32 %v892_v56, %v871_v38  ;;  %v907_v0 = vmul.f32 %v891_v41, %v870_v46  ;;  %v783_v24 = vld [vmem:[#allocation5 + $0x60] sm:$0xff] }
 0x1f9   : > { %v906_v34 = vmul.f32 %v890_v40, %v869_v16  ;;  %v9256_v29 = vmul.f32 %v880_v39, %v859_v47  ;;  %v858_v16 = vsub.f32 %v8878_v17, %v9225_v50  ;;  %v879_v56 = vmul.f32 %v9227_v1, %v757_v27  ;;  %v755_v38 = vld [vmem:[#allocation2] sm:$0xff]  ;;  %v9279_v39 = vpop.permute.xlu1 %1332 }
 0x1fa   : > { %v9254_v8 = vadd.f32 %v908_v60, %v786_v31  ;;  %v868_v31 = vsub.f32 %v8978_v19, %v9225_v50  ;;  %v9268_v40 = vadd.f32 %v907_v0, %v785_v28  ;;  %12634 = vst [vmem:[#allocation68_spill] sm:$0xff] %v9279_v39  ;;  %v765_v28 = vld [vmem:[#allocation2 + $0x50] sm:$0xff]  ;;  %v877_v27 = vmul.f32 %v9227_v1, %v755_v38  ;;  %v766_v0 = vld [vmem:[#allocation2 + $0x58] sm:$0xff] }
 0x1fb   : > { %v9270_v57 = vadd.f32 %v906_v34, %v784_v5  ;;  %v9277_v33 = vmul.f32 %v879_v56, %v858_v16  ;;  %v887_v44 = vmul.f32 %v9227_v1, %v765_v28  ;;  %v866_v46 = vsub.f32 %v8959_v61, %v9225_v50  ;;  %v781_v60 = vld [vmem:[#allocation5 + $0x50] sm:$0xff]  ;;  %v782_v28 = vld [vmem:[#allocation5 + $0x58] sm:$0xff] }
 0x1fc   : > { %1189 = vrot.lane.b32.xlu0 %v9254_v8, %s8520_s21  ;;  %1029 = vrot.lane.b32.xlu1 %v9254_v8, %s8521_s22  ;;  %12633 = vst [vmem:[#allocation67_spill] sm:$0xff] %v9268_v40  ;;  %v905_v51 = vmul.f32 %v889_v35, %v868_v31  ;;  %v856_v35 = vsub.f32 %v8874_v15, %v9225_v50  ;;  %v777_v61 = vld [vmem:[#allocation5 + $0x30] sm:$0xff]  ;;  %v12650_v17 = vmov 4  }
 0x1fd   : > { %v9293_v45 = vpop.permute.xlu1 %1608  ;;  %v903_v47 = vmul.f32 %v887_v44, %v866_v46  ;;  %v888_v16 = vmul.f32 %v9227_v1, %v766_v0  ;;  %v867_v56 = vsub.f32 %v8969_v10, %v9225_v50  ;;  %v762_v10 = vld [vmem:[#allocation2 + $0x38] sm:$0xff] }
 0x1fe   : > { %v9281_v41 = vadd.f32 %v905_v51, %v783_v24  ;;  %v9290_v34 = vmul.f32 %v877_v27, %v856_v35  ;;  %v763_v51 = vld [vmem:[#allocation2 + $0x40] sm:$0xff]  ;;  %v864_v27 = vsub.f32 %v8940_v48, %v9225_v50 }
 0x1ff   : > { %v9307_v31 = vadd.f32 %v903_v47, %v781_v60  ;;  %v904_v24 = vmul.f32 %v888_v16, %v867_v56  ;;  %v885_v38 = vmul.f32 %v9227_v1, %v763_v51  ;;  %v779_v47 = vld [vmem:[#allocation5 + $0x40] sm:$0xff]  ;;  %v764_v60 = vld [vmem:[#allocation2 + $0x48] sm:$0xff]  ;;  %v761_v56 = vld [vmem:[#allocation2 + $0x30] sm:$0xff] }
 0x200   : > { %1027 = vrot.lane.b32.xlu1 %v9268_v40, %s8521_s22  ;;  %1185 = vrot.lane.b32.xlu0 %v9270_v57, %s8520_s21  ;;  %12635 = vst [vmem:[#allocation69_spill] sm:$0xff] %v9281_v41  ;;  %v886_v51 = vmul.f32 %v9227_v1, %v764_v60 }
 0x201   : > { %v9305_v5 = vpop.permute.xlu1 %1053  ;;  %12636 = vst [vmem:[#allocation70_spill] sm:$0xff] %v9307_v31  ;;  %v9325_v44 = vadd.f32 %v904_v24, %v782_v28  ;;  %v901_v46 = vmul.f32 %v885_v38, %v864_v27  ;;  %v865_v24 = vsub.f32 %v8949_v54, %v9225_v50  ;;  %v883_v28 = vmul.f32 %v9227_v1, %v761_v56  ;;  %v780_v27 = vld [vmem:[#allocation5 + $0x48] sm:$0xff]  ;;  %v759_v54 = vld [vmem:[#allocation2 + $0x20] sm:$0xff] }
 0x203   : > { %12638 = vst [vmem:[#allocation72_spill] sm:$0xff] %v9325_v44  ;;  %v9333_v16 = vadd.f32 %v901_v46, %v779_v47  ;;  %v902_v38 = vmul.f32 %v886_v51, %v865_v24  ;;  %v862_v46 = vsub.f32 %v8920_v36, %v9225_v50  ;;  %v884_v24 = vmul.f32 %v9227_v1, %v762_v10  ;;  %v775_v36 = vld [vmem:[#allocation5 + $0x20] sm:$0xff] }
 0x204   : > { %1187 = vrot.lane.b32.xlu1 %v9268_v40, %s8520_s21  ;;  %1183 = vrot.lane.b32.xlu0 %v9281_v41, %s8520_s21 }
 0x205   : > { %v9317_v35 = vpop.permute.xlu1 %1328  ;;  %12639 = vst [vmem:[#allocation73_spill] sm:$0xff] %v9333_v16  ;;  %v9351_v47 = vadd.f32 %v902_v38, %v780_v27  ;;  %v899_v60 = vmul.f32 %v883_v28, %v862_v46  ;;  %v863_v38 = vsub.f32 %v8929_v42, %v9225_v50  ;;  %v881_v28 = vmul.f32 %v9227_v1, %v759_v54  ;;  %v778_v46 = vld [vmem:[#allocation5 + $0x38] sm:$0xff]  ;;  %v9379_v42 = vpop.permute.xlu0 %1468 }
 0x206   : > { %12637 = vst [vmem:[#allocation71_spill] sm:$0xff] %v9317_v35 }
 0x207   : > { %12640 = vst [vmem:[#allocation74_spill] sm:$0xff] %v9351_v47  ;;  %v9359_v56 = vadd.f32 %v899_v60, %v777_v61  ;;  %v900_v27 = vmul.f32 %v884_v24, %v863_v38  ;;  %v860_v61 = vsub.f32 %v8898_v25, %v9225_v50  ;;  %v776_v24 = vld [vmem:[#allocation5 + $0x28] sm:$0xff] }
 0x208   : > { %1025 = vrot.lane.b32.xlu1 %v9270_v57, %s8521_s22  ;;  %1573 = vrot.lane.b32.xlu0 %v9254_v8, %s8522_s19 }
 0x209   : > { %v9331_v0 = vpop.permute.xlu1 %1456  ;;  %12641 = vst [vmem:[#allocation75_spill] sm:$0xff] %v9359_v56  ;;  %v897_v10 = vmul.f32 %v881_v28, %v860_v61  ;;  %v9377_v60 = vadd.f32 %v900_v27, %v778_v46  ;;  %v9393_v50 = vpop.permute.xlu0 %1460  ;;  %v773_v28 = vld [vmem:[#allocation5 + $0x10] sm:$0xff] }
 0x20a   : > { %v9413_v61 = vadd.f32 %v9277_v33, %v773_v28 }
 0x20b   : > { %12642 = vst [vmem:[#allocation76_spill] sm:$0xff] %v9377_v60  ;;  %v9387_v54 = vadd.f32 %v897_v10, %v775_v36  ;;  %v9402_v36 = vadd.f32 %v9248_v30, %v776_v24 }
 0x20c   : > { %1429 = vrot.lane.b32.xlu1 %v9254_v8, %s8523_s24  ;;  %1425 = vrot.lane.b32.xlu0 %v9270_v57, %s8523_s24  ;;  %12645 = vst [vmem:[#allocation79_spill] sm:$0xff] %v9413_v61 }
 0x20d   : > { %v9343_v19 = vpop.permute.xlu1 %1204  ;;  %v9404_v27 = vpop.permute.xlu0 %1452 }
 0x210   : > { %1023 = vrot.lane.b32.xlu1 %v9281_v41, %s8521_s22  ;;  %1179 = vrot.lane.b32.xlu0 %v9307_v31, %s8520_s21 }
 0x211   : > { %v9357_v51 = vpop.permute.xlu1 %1324  ;;  %v9419_v30 = vpop.permute.xlu0 %1444 }
 0x212   : > { %12646 = vst [vmem:[#allocation80_spill] sm:$0xff] %v9419_v30 }
 0x214   : > { %1427 = vrot.lane.b32.xlu1 %v9268_v40, %s8523_s24  ;;  %1569 = vrot.lane.b32.xlu0 %v9270_v57, %s8522_s19 }
 0x215   : > { %v9369_v48 = vpop.permute.xlu1 %1600  ;;  %v9427_v24 = vpop.permute.xlu0 %1236 }
 0x218   : > { %1021 = vrot.lane.b32.xlu1 %v9325_v44, %s8521_s22  ;;  %1421 = vrot.lane.b32.xlu0 %v9325_v44, %s8523_s24 }
 0x219   : > { %v9385_v1 = vpop.permute.xlu1 %1043  ;;  %v9434_v28 = vpop.permute.xlu0 %1224 }
 0x21c   : > { %1181 = vrot.lane.b32.xlu1 %v9325_v44, %s8520_s21  ;;  %1175 = vrot.lane.b32.xlu0 %v9333_v16, %s8520_s21 }
 0x21d   : > { %v9395_v38 = vpop.permute.xlu1 %1320  ;;  %v9445_v20 = vpop.permute.xlu0 %1216 }
 0x21e   : > { %12643 = vst [vmem:[#allocation77_spill] sm:$0xff] %v9395_v38 }
 0x220   : > { %1571 = vrot.lane.b32.xlu1 %v9268_v40, %s8522_s19  ;;  %1565 = vrot.lane.b32.xlu0 %v9325_v44, %s8522_s19 }
 0x221   : > { %v9406_v46 = vpop.permute.xlu1 %1448 }
 0x222   : > { %12644 = vst [vmem:[#allocation78_spill] sm:$0xff] %v9406_v46  ;;  %v925_v46 = vlaneseq }
 0x224   : > { %1019 = vrot.lane.b32.xlu1 %v9307_v31, %s8521_s22  ;;  %1417 = vrot.lane.b32.xlu0 %v9351_v47, %s8523_s24  ;;  %v926_v39 = vand.u32 127, %v925_v46  ;;  %v12659_v46 = vmov 0  }
 0x225   : > { %v9421_v10 = vpop.permute.xlu1 %1196 }
 0x226   : > { %12647 = vst [vmem:[#allocation81_spill] sm:$0xff] %v9421_v10  ;;  %v9452_v10 = vpop.permute.xlu0 %1208 }
 0x228   : > { %1423 = vrot.lane.b32.xlu1 %v9281_v41, %s8523_s24  ;;  %1171 = vrot.lane.b32.xlu0 %v9359_v56, %s8520_s21 }
 0x229   : > { %v9429_v33 = vpop.permute.xlu1 %1316 }
 0x22a   : > { %12648 = vst [vmem:[#allocation82_spill] sm:$0xff] %v9429_v33  ;;  %v774_v33 = vld [vmem:[#allocation5 + $0x18] sm:$0xff] }
 0x22c   : > { %1017 = vrot.lane.b32.xlu1 %v9351_v47, %s8521_s22  ;;  %1561 = vrot.lane.b32.xlu0 %v9351_v47, %s8522_s19 }
 0x22d   : > { %v9436_v25 = vpop.permute.xlu1 %1592 }
 0x22e   : > { %12649 = vst [vmem:[#allocation83_spill] sm:$0xff] %v9436_v25 }
 0x230   : > { %1177 = vrot.lane.b32.xlu1 %v9351_v47, %s8520_s21  ;;  %1413 = vrot.lane.b32.xlu0 %v9377_v60, %s8523_s24 }
 0x231   : > { %v9447_v15 = vpop.permute.xlu1 %1033 }
 0x232   : > { %12651 = vst [vmem:[#allocation84_spill] sm:$0xff] %v9447_v15  ;;  %v9464_v15 = vpop.permute.xlu0 %1200 }
 0x234   : > { %1567 = vrot.lane.b32.xlu1 %v9281_v41, %s8522_s19  ;;  %1167 = vrot.lane.b32.xlu0 %v9387_v54, %s8520_s21 }
 0x235   : > { %v9454_v30 = vpop.permute.xlu1 %1312 }
 0x236   : > { %12652 = vst [vmem:[#allocation85_spill] sm:$0xff] %v9454_v30  ;;  %v9471_v25 = vpop.permute.xlu0 %1192 }
 0x237   : > { %12655 = vst [vmem:[#allocation88_spill] sm:$0xff] %v9471_v25  ;;  %v927_v25 = vadd.s32 4294967294, %v926_v39 }
 0x238   : > { %1015 = vrot.lane.b32.xlu1 %v9333_v16, %s8521_s22  ;;  %1557 = vrot.lane.b32.xlu0 %v9377_v60, %s8522_s19 }
 0x239   : > { %vm928_vm0 = vcmp.ge.s32.totalorder %v927_v25, 0  ;;  %v939_v25 = vadd.s32 1, %v926_v39 }
 0x23b   : > { %vm941_vm2 = vcmp.lt.s32.totalorder %v939_v25, 128  ;;  %v771_v25 = vld [vmem:[#allocation5] sm:$0xff] }
 0x23c   : > { %1419 = vrot.lane.b32.xlu1 %v9307_v31, %s8523_s24  ;;  %1409 = vrot.lane.b32.xlu0 %v9402_v36, %s8523_s24 }
 0x240   : > { %1013 = vrot.lane.b32.xlu1 %v9377_v60, %s8521_s22  ;;  %1003 = vrot.lane.b32.xlu0 %v9413_v61, %s8521_s22 }
 0x244   : > { %1173 = vrot.lane.b32.xlu1 %v9377_v60, %s8520_s21  ;;  %1407 = vrot.lane.b32.xlu0 %v9387_v54, %s8523_s24  ;;  %v933_v60 = vadd.s32 4294967295, %v926_v39 }
 0x246   : > { %vm934_vm1 = vcmp.ge.s32.totalorder %v933_v60, 0 }
 0x248   : > { %1563 = vrot.lane.b32.xlu1 %v9307_v31, %s8522_s19  ;;  %1304 = vperm.xlu0 %7801, %v9099_v11  }
 0x24c   : > { %1011 = vrot.lane.b32.xlu1 %v9359_v56, %s8521_s22  ;;  %7803 = vset.pattern.permute.xlu0 %v12650_v17 }
 0x24d   : > { %1632 = vperm.xlu0 %7803, %v8859_v9  }
 0x250   : > { %1415 = vrot.lane.b32.xlu1 %v9333_v16, %s8523_s24 }
 0x251   : > { %1620 = vperm.xlu0 %7803, %v8843_v4   ;;  %v9461_v4 = vpop.permute.xlu1 %1440 }
 0x252   : > { %12653 = vst [vmem:[#allocation86_spill] sm:$0xff] %v9461_v4  ;;  %v9477_v4 = vadd.f32 %v9256_v29, %v774_v33 }
 0x254   : > { %1009 = vrot.lane.b32.xlu1 %v9402_v36, %s8521_s22  ;;  %12656 = vst [vmem:[#allocation89_spill] sm:$0xff] %v9477_v4 }
 0x255   : > { %1612 = vperm.xlu0 %7803, %v9033_v58   ;;  %v9469_v30 = vpop.permute.xlu1 %1436 }
 0x256   : > { %12654 = vst [vmem:[#allocation87_spill] sm:$0xff] %v9469_v30  ;;  %v9485_v30 = vpop.permute.xlu0 %1308 }
 0x257   : > { %12658 = vst [vmem:[#allocation91_spill] sm:$0xff] %v9485_v30 }
 0x258   : > { %1169 = vrot.lane.b32.xlu1 %v9402_v36, %s8520_s21 }
 0x259   : > { %1604 = vperm.xlu0 %7803, %v9040_v2   ;;  %v9481_v17 = vpop.permute.xlu1 %1584 }
 0x25a   : > { %12657 = vst [vmem:[#allocation90_spill] sm:$0xff] %v9481_v17  ;;  %v8524_v17 = vmov 0.0  }
 0x25b   : > { %v9493_v47 = vsel %vm928_vm0, 1.0, %v8524_v17  ;;  %v9495_v30 = vsel %vm934_vm1, 1.0, %v8524_v17  ;;  %v9518_v38 = vsel %vm941_vm2, 1.0, %v8524_v17 }
 0x25c   : > { %1559 = vrot.lane.b32.xlu1 %v9333_v16, %s8522_s19  ;;  %12660 = vst [vmem:[#allocation92_spill] sm:$0xff] %v9495_v30  ;;  %v1126_v60 = vmul.f32 %v9493_v47, %v9124_v3  ;;  %v1270_v35 = vmul.f32 %v9495_v30, %v9128_v13  ;;  %v772_v13 = vld [vmem:[#allocation5 + $0x8] sm:$0xff]  ;;  %12663 = vst [vmem:[#allocation95_spill] sm:$0xff] %v9518_v38 }
 0x25d   : > { %1596 = vperm.xlu0 %7803, %v9052_v62  }
 0x260   : > { %1007 = vrot.lane.b32.xlu1 %v9387_v54, %s8521_s22 }
 0x261   : > { %1588 = vperm.xlu0 %7803, %v9060_v63  }
 0x264   : > { %1411 = vrot.lane.b32.xlu1 %v9359_v56, %s8523_s24 }
 0x265   : > { %1580 = vperm.xlu0 %7803, %v9106_v12  }
 0x268   : > { %1005 = vrot.lane.b32.xlu1 %v9477_v4, %s8521_s22 }
 0x269   : > { %1405 = vrot.lane.b32.xlu0 %v9477_v4, %s8523_s24 }
 0x26c   : > { %1165 = vrot.lane.b32.xlu1 %v9477_v4, %s8520_s21 }
 0x26d   : > { %1576 = vperm.xlu0 %7803, %v9099_v11  }
 0x26e   : > { %v1030_v29 = vpop.permute.xlu1 %1029  ;;  %v1190_v33 = vpop.permute.xlu0 %1189 }
 0x26f   : > { %v1286_v41 = vmul.f32 %v1270_v35, %v1190_v33  ;;  %v1382_v35 = vmul.f32 %v9149_v26, %v9254_v8 }
 0x270   : > { %1555 = vrot.lane.b32.xlu1 %v9359_v56, %s8522_s19  ;;  %v945_v56 = vadd.s32 2, %v926_v39 }
 0x271   : > { %7805 = vset.pattern.permute.xlu0 %v12659_v46 }
 0x272   : > { %v9497_v31 = vpop.permute.xlu1 %1027  ;;  %1103 = vperm.xlu0 %7805, %v8859_v9   ;;  %v9500_v40 = vpop.permute.xlu0 %1185  ;;  %v1142_v9 = vmul.f32 %v1126_v60, %v1030_v29  ;;  %vm947_vm3 = vcmp.lt.s32.totalorder %v945_v56, 128  ;;  %v9528_v56 = vadd.f32 %v9250_v37, %v772_v13 }
 0x273   : > { %12661 = vst [vmem:[#allocation93_spill] sm:$0xff] %v9497_v31 }
 0x274   : > { %1163 = vrot.lane.b32.xlu1 %v9413_v61, %s8520_s21  ;;  %v1302_v39 = vadd.f32 %v1286_v41, %v1142_v9  ;;  %12664 = vst [vmem:[#allocation96_spill] sm:$0xff] %v9528_v56  ;;  %v9558_v9 = vadd.f32 %v9290_v34, %v771_v25 }
 0x276   : > { %v9508_v16 = vpop.permute.xlu1 %1187  ;;  %1083 = vperm.xlu0 %7805, %v9046_v59   ;;  %v9511_v31 = vpop.permute.xlu0 %1183  ;;  %v1510_v59 = vmul.f32 %v9518_v38, %v9153_v32  ;;  %v1398_v33 = vadd.f32 %v1382_v35, %v1302_v39  ;;  %12665 = vst [vmem:[#allocation97_spill] sm:$0xff] %v9558_v9 }
 0x277   : > { %12662 = vst [vmem:[#allocation94_spill] sm:$0xff] %v9508_v16  ;;  %v9520_v16 = vsel %vm947_vm3, 1.0, %v8524_v17 }
 0x278   : > { %1553 = vrot.lane.b32.xlu1 %v9402_v36, %s8522_s19  ;;  %v1654_v17 = vmul.f32 %v9520_v16, %v9175_v53 }
 0x27a   : > { %v9515_v44 = vpop.permute.xlu1 %1025  ;;  %1078 = vperm.xlu0 %7805, %v9033_v58   ;;  %v1574_v3 = vpop.permute.xlu0 %1573 }
 0x27c   : > { %1432 = vperm.xlu1 %7804, %v9099_v11   ;;  %v1670_v11 = vmul.f32 %v1654_v17, %v1574_v3  ;;  %v984_v17 = vld [vmem:[%s12438_s6 + $0x8] sm:$0xff] }
 0x27e   : > { %v1430_v29 = vpop.permute.xlu1 %1429  ;;  %1068 = vperm.xlu0 %7805, %v9040_v2   ;;  %v9531_v58 = vpop.permute.xlu0 %1425 }
 0x27f   : > { %v1526_v41 = vmul.f32 %v1510_v59, %v1430_v29  ;;  %v983_v29 = vld [vmem:[%s12438_s6] sm:$0xff] }
 0x280   : > { %1001 = vrot.lane.b32.xlu1 %v9528_v56, %s8521_s22 }
 0x281   : > { %v1542_v32 = vadd.f32 %v1526_v41, %v1398_v33  ;;  %7806 = vset.pattern.permute.xlu1 %v12659_v46  ;;  %v967_v41 = vld [vmem:[%s12437_s5] sm:$0xff] }
 0x282   : > { %v9538_v26 = vpop.permute.xlu1 %1023  ;;  %1058 = vperm.xlu0 %7805, %v9052_v62   ;;  %v9541_v8 = vpop.permute.xlu0 %1179  ;;  %6921 = vmatprep.mubr.f32.mxu1 %v967_v41  ;;  %v987_v41 = vld [vmem:[%s12438_s6 + $0x20] sm:$0xff] }
 0x283   : > { %v1686_v2 = vadd.f32 %v1670_v11, %v1542_v32  ;;  %v986_v32 = vld [vmem:[%s12438_s6 + $0x18] sm:$0xff] }
 0x284   : > { %1161 = vrot.lane.b32.xlu1 %v9528_v56, %s8520_s21 }
 0x285   : > { %6889 = vmatprep.subr.mxu1 %v1686_v2 }
 0x286   : > { %v9545_v53 = vpop.permute.xlu1 %1427  ;;  %1048 = vperm.xlu0 %7805, %v9060_v63   ;;  %6890 = vmatpush3.msra.mxu1 %v1686_v2  ;;  %v9548_v37 = vpop.permute.xlu0 %1569  ;;  %v985_v2 = vld [vmem:[%s12438_s6 + $0x10] sm:$0xff] }
 0x288   : > { %1551 = vrot.lane.b32.xlu1 %v9387_v54, %s8522_s19 }
 0x28a   : > { %v9552_v60 = vpop.permute.xlu1 %1021  ;;  %1038 = vperm.xlu0 %7805, %v9106_v12   ;;  %v9555_v62 = vpop.permute.xlu0 %1421 }
 0x28c   : > { %999 = vrot.lane.b32.xlu1 %v9558_v9, %s8521_s22 }
 0x28e   : > { %v9562_v63 = vpop.permute.xlu1 %1181  ;;  %1159 = vrot.lane.b32.xlu0 %v9558_v9, %s8520_s21  ;;  %v9566_v3 = vpop.permute.xlu0 %1175 }
 0x290   : > { %1403 = vrot.lane.b32.xlu1 %v9413_v61, %s8523_s24 }
 0x292   : > { %v9570_v13 = vpop.permute.xlu1 %1571  ;;  %1549 = vrot.lane.b32.xlu0 %v9477_v4, %s8522_s19  ;;  %v9574_v12 = vpop.permute.xlu0 %1565 }
 0x293   : > { %12666 = vst [vmem:[#allocation98_spill] sm:$0xff] %v9570_v13  ;;  %12667 = vst [vmem:[#allocation99_spill] sm:$0xff] %v9574_v12 }
 0x294   : > { %1401 = vrot.lane.b32.xlu1 %v9528_v56, %s8523_s24 }
 0x296   : > { %v9578_v34 = vpop.permute.xlu1 %1019  ;;  %1547 = vrot.lane.b32.xlu0 %v9413_v61, %s8522_s19  ;;  %v9582_v39 = vpop.permute.xlu0 %1417  ;;  %v989_v61 = vld [vmem:[%s12438_s6 + $0x30] sm:$0xff] }
 0x297   : > { %12668 = vst [vmem:[#allocation100_spill] sm:$0xff] %v9582_v39 }
 0x298   : > { %1399 = vrot.lane.b32.xlu1 %v9558_v9, %s8523_s24 }
 0x29a   : > { %v9586_v59 = vpop.permute.xlu1 %1423  ;;  %1545 = vrot.lane.b32.xlu0 %v9528_v56, %s8522_s19  ;;  %v9590_v35 = vpop.permute.xlu0 %1171 }
 0x29b   : > { %12669 = vst [vmem:[#allocation101_spill] sm:$0xff] %v9590_v35 }
 0x29c   : > { %1543 = vrot.lane.b32.xlu1 %v9558_v9, %s8522_s19 }
 0x29e   : > { %v9603_v33 = vpop.permute.xlu1 %1017  ;;  %1689 = vperm.xlu0 %7805, %v983_v29   ;;  %v9605_v11 = vpop.permute.xlu0 %1561  ;;  %v988_v29 = vld [vmem:[%s12438_s6 + $0x28] sm:$0xff] }
 0x29f   : > { %12670 = vst [vmem:[#allocation102_spill] sm:$0xff] %v9603_v33  ;;  %12671 = vst [vmem:[#allocation103_spill] sm:$0xff] %v9605_v11  ;;  %v991_v11 = vld [vmem:[%s12438_s6 + $0x40] sm:$0xff] }
 0x2a0   : > { %1694 = vperm.xlu1 %7806, %v984_v17  }
 0x2a2   : > { %v9613_v25 = vpop.permute.xlu1 %1177  ;;  %1704 = vperm.xlu0 %7805, %v986_v32   ;;  %v9615_v9 = vpop.permute.xlu0 %1413  ;;  %v990_v32 = vld [vmem:[%s12438_s6 + $0x38] sm:$0xff] }
 0x2a3   : > { %12672 = vst [vmem:[#allocation104_spill] sm:$0xff] %v9613_v25  ;;  %12673 = vst [vmem:[#allocation105_spill] sm:$0xff] %v9615_v9 }
 0x2a4   : > { %1699 = vperm.xlu1 %7806, %v985_v2   ;;  %v992_v2 = vld [vmem:[%s12438_s6 + $0x48] sm:$0xff] }
 0x2a6   : > { %v9623_v56 = vpop.permute.xlu1 %1567  ;;  %1714 = vperm.xlu0 %7805, %v988_v29   ;;  %v9625_v17 = vpop.permute.xlu0 %1167 }
 0x2a7   : > { %12674 = vst [vmem:[#allocation106_spill] sm:$0xff] %v9625_v17 }
 0x2a8   : > { %1709 = vperm.xlu1 %7806, %v987_v41   ;;  %v994_v41 = vld [vmem:[%s12438_s6 + $0x58] sm:$0xff] }
 0x2aa   : > { %v9633_v4 = vpop.permute.xlu1 %1015  ;;  %1724 = vperm.xlu0 %7805, %v990_v32   ;;  %v9638_v29 = vpop.permute.xlu0 %1557  ;;  %v993_v32 = vld [vmem:[%s12438_s6 + $0x50] sm:$0xff] }
 0x2ab   : > { %12675 = vst [vmem:[#allocation107_spill] sm:$0xff] %v9638_v29  ;;  %v996_v29 = vld [vmem:[%s12438_s6 + $0x68] sm:$0xff] }
 0x2ac   : > { %1719 = vperm.xlu1 %7806, %v989_v61  }
 0x2ae   : > { %v9643_v12 = vpop.permute.xlu1 %1419  ;;  %1734 = vperm.xlu0 %7805, %v992_v2   ;;  %v9653_v61 = vpop.permute.xlu0 %1409  ;;  %v995_v2 = vld [vmem:[%s12438_s6 + $0x60] sm:$0xff] }
 0x2af   : > { %12676 = vst [vmem:[#allocation108_spill] sm:$0xff] %v9643_v12  ;;  %12678 = vst [vmem:[#allocation110_spill] sm:$0xff] %v9653_v61  ;;  %v997_v61 = vld [vmem:[%s12438_s6 + $0x70] sm:$0xff] }
 0x2b0   : > { %1729 = vperm.xlu1 %7806, %v991_v11   ;;  %v998_v11 = vld [vmem:[%s12438_s6 + $0x78] sm:$0xff] }
 0x2b2   : > { %v9651_v17 = vpop.permute.xlu1 %1013  ;;  %1744 = vperm.xlu0 %7805, %v994_v41   ;;  %v9666_v41 = vpop.permute.xlu0 %1003 }
 0x2b3   : > { %12677 = vst [vmem:[#allocation109_spill] sm:$0xff] %v9651_v17  ;;  %12680 = vst [vmem:[#allocation112_spill] sm:$0xff] %v9666_v41  ;;  %v12683_v41 = vmov 1  }
 0x2b4   : > { %1739 = vperm.xlu1 %7806, %v993_v32  }
 0x2b6   : > { %v9661_v12 = vpop.permute.xlu1 %1173  ;;  %1754 = vperm.xlu0 %7805, %v996_v29   ;;  %v6401_v29 = vld [vmem:[%s12436_s4 + $0xf8] sm:$0xff] }
 0x2b7   : > { %12679 = vst [vmem:[#allocation111_spill] sm:$0xff] %v9661_v12  ;;  %v9684_v12 = vpop.permute.xlu0 %1407 }
 0x2b8   : > { %1749 = vperm.xlu1 %7806, %v995_v2   ;;  %v9681_v2 = vld [vmem:[%s12436_s4 + $0xf0] sm:$0xff]  ;;  %12684 = vst [vmem:[#allocation115_spill] sm:$0xff] %v9684_v12 }
 0x2b9   : > { %v9705_v12 = vld [vmem:[%s12436_s4 + $0xd0] sm:$0xff] }
 0x2ba   : > { %v9671_v17 = vpop.permute.xlu1 %1563  ;;  %1764 = vperm.xlu0 %7805, %v998_v11   ;;  %v9693_v11 = vld [vmem:[%s12436_s4 + $0xe0] sm:$0xff]  ;;  %12689 = vst [vmem:[#allocation120_spill] sm:$0xff] %v9705_v12 }
 0x2bb   : > { %12681 = vst [vmem:[#allocation113_spill] sm:$0xff] %v9671_v17  ;;  %12686 = vst [vmem:[#allocation117_spill] sm:$0xff] %v9693_v11 }
 0x2bc   : > { %1759 = vperm.xlu1 %7806, %v997_v61  }
 0x2be   : > { %v9673_v32 = vpop.permute.xlu1 %1011  ;;  %7809 = vset.pattern.permute.xlu0 %v12683_v41 }
 0x2bf   : > { %12682 = vst [vmem:[#allocation114_spill] sm:$0xff] %v9673_v32  ;;  %2414 = vperm.xlu0 %7809, %v9681_v2  }
 0x2c0   : > { %7807 = vset.pattern.permute.xlu1 %v12683_v41 }
 0x2c1   : > { %2418 = vperm.xlu1 %7807, %v6401_v29  }
 0x2c2   : > { %v9688_v61 = vpop.permute.xlu1 %1415 }
 0x2c3   : > { %12685 = vst [vmem:[#allocation116_spill] sm:$0xff] %v9688_v61  ;;  %v9695_v17 = vpop.permute.xlu0 %1304  ;;  %2406 = vperm.xlu0 %7809, %v9693_v11   ;;  %v9710_v61 = vld [vmem:[%s12436_s4 + $0xe8] sm:$0xff] }
 0x2c4   : > { %12687 = vst [vmem:[#allocation118_spill] sm:$0xff] %v9695_v17 }
 0x2c5   : > { %7808 = vset.pattern.permute.xlu1 %v12659_v46 }
 0x2c6   : > { %v9699_v32 = vpop.permute.xlu1 %1009  ;;  %2269 = vperm.xlu1 %7808, %v9681_v2  }
 0x2c7   : > { %12688 = vst [vmem:[#allocation119_spill] sm:$0xff] %v9699_v32  ;;  %2398 = vperm.xlu0 %7809, %v9705_v12   ;;  %v9721_v32 = vld [vmem:[%s12436_s4 + $0xc8] sm:$0xff]  ;;  %v9732_v12 = vld [vmem:[%s12436_s4 + $0xb8] sm:$0xff] }
 0x2c8   : > { %v9713_v17 = vpop.permute.xlu0 %1632  ;;  %12691 = vst [vmem:[#allocation122_spill] sm:$0xff] %v9721_v32  ;;  %12694 = vst [vmem:[#allocation125_spill] sm:$0xff] %v9732_v12 }
 0x2ca   : > { %v9715_v33 = vpop.permute.xlu1 %1169  ;;  %2264 = vperm.xlu1 %7808, %v9710_v61  }
 0x2cb   : > { %12690 = vst [vmem:[#allocation121_spill] sm:$0xff] %v9715_v33  ;;  %2394 = vperm.xlu0 %7809, %v9721_v32   ;;  %v9743_v32 = vld [vmem:[%s12436_s4 + $0xa8] sm:$0xff] }
 0x2cc   : > { %v9724_v9 = vpop.permute.xlu0 %1620  ;;  %12697 = vst [vmem:[#allocation128_spill] sm:$0xff] %v9743_v32 }
 0x2cd   : > { %12692 = vst [vmem:[#allocation123_spill] sm:$0xff] %v9724_v9 }
 0x2ce   : > { %v9726_v25 = vpop.permute.xlu1 %1559  ;;  %7810 = vset.pattern.permute.xlu1 %v12683_v41 }
 0x2cf   : > { %12693 = vst [vmem:[#allocation124_spill] sm:$0xff] %v9726_v25  ;;  %2410 = vperm.xlu1 %7810, %v9710_v61   ;;  %2386 = vperm.xlu0 %7809, %v9732_v12   ;;  %v12698_v25 = vmov 3  }
 0x2d0   : > { %v9736_v33 = vpop.permute.xlu0 %1612 }
 0x2d1   : > { %12695 = vst [vmem:[#allocation126_spill] sm:$0xff] %v9736_v33  ;;  %v12704_v33 = vmov 2  }
 0x2d2   : > { %v9738_v35 = vpop.permute.xlu1 %1007 }
 0x2d3   : > { %12696 = vst [vmem:[#allocation127_spill] sm:$0xff] %v9738_v35  ;;  %7811 = vset.pattern.permute.xlu1 %v12698_v25  ;;  %2378 = vperm.xlu0 %7809, %v9743_v32  }
 0x2d4   : > { %v9747_v39 = vpop.permute.xlu0 %1604  ;;  %2658 = vperm.xlu1 %7811, %v6401_v29   ;;  %v9767_v29 = vmul.f32 %v9518_v38, %v9139_v21  ;;  %v1123_v21 = vmul.f32 %v9493_v47, %v9157_v43 }
 0x2d5   : > { %12699 = vst [vmem:[#allocation129_spill] sm:$0xff] %v9747_v39 }
 0x2d6   : > { %v9749_v9 = vpop.permute.xlu1 %1411 }
 0x2d7   : > { %12700 = vst [vmem:[#allocation130_spill] sm:$0xff] %v9749_v9  ;;  %v12711_v9 = vld [vmem:[#allocation54_spill] sm:$0xff] }
 0x2d8   : > { %v9751_v13 = vpop.permute.xlu0 %1596  ;;  %7812 = vset.pattern.permute.xlu1 %v12659_v46 }
 0x2d9   : > { %12701 = vst [vmem:[#allocation131_spill] sm:$0xff] %v9751_v13  ;;  %2259 = vperm.xlu1 %7812, %v9693_v11   ;;  %v9771_v13 = vmul.f32 %v9518_v38, %v9145_v23  ;;  %v9793_v23 = vmul.f32 %v9518_v38, %v9170_v52  ;;  %v1652_v11 = vmul.f32 %v9520_v16, %v12711_v9 }
 0x2da   : > { %v9755_v12 = vpop.permute.xlu1 %1005 }
 0x2db   : > { %12702 = vst [vmem:[#allocation132_spill] sm:$0xff] %v9755_v12  ;;  %v9775_v12 = vmul.f32 %v9495_v30, %v9132_v14  ;;  %v9789_v14 = vmul.f32 %v9518_v38, %v9379_v42  ;;  %v9807_v42 = vmul.f32 %v9518_v38, %v9404_v27  ;;  %v9826_v27 = vmul.f32 %v9495_v30, %v9434_v28 }
 0x2dc   : > { %v9757_v35 = vpop.permute.xlu0 %1588 }
 0x2dd   : > { %12703 = vst [vmem:[#allocation133_spill] sm:$0xff] %v9757_v35  ;;  %7813 = vset.pattern.permute.xlu1 %v12704_v33  ;;  %v1124_v35 = vmul.f32 %v9493_v47, %v9135_v18  ;;  %v1122_v18 = vmul.f32 %v9493_v47, %v9179_v55  ;;  %12709 = vst [vmem:[#allocation138_spill] sm:$0xff] %v9807_v42  ;;  %v9816_v55 = vld [vmem:[%s12436_s4 + $0xd8] sm:$0xff] }
 0x2de   : > { %2526 = vperm.xlu1 %7813, %v9681_v2   ;;  %v9763_v39 = vpop.permute.xlu1 %1165  ;;  %v12715_v42 = vld [vmem:[#allocation57_spill] sm:$0xff] }
 0x2df   : > { %12706 = vst [vmem:[#allocation135_spill] sm:$0xff] %v9763_v39  ;;  %v1267_v39 = vmul.f32 %v9495_v30, %v9161_v49  ;;  %v9803_v49 = vmul.f32 %v9518_v38, %v9393_v50  ;;  %v1266_v50 = vmul.f32 %v9495_v30, %v9427_v24  ;;  %v9831_v9 = vmul.f32 %v9520_v16, %v12715_v42  ;;  %v12720_v42 = vld [vmem:[#allocation60_spill] sm:$0xff] }
 0x2e0   : > { %v9761_v32 = vpop.permute.xlu0 %1580  ;;  %v9843_v24 = vmul.f32 %v9495_v30, %v9464_v15 }
 0x2e1   : > { %12705 = vst [vmem:[#allocation134_spill] sm:$0xff] %v9761_v32  ;;  %v1268_v32 = vmul.f32 %v9495_v30, %v9142_v22  ;;  %v1508_v22 = vmul.f32 %v9518_v38, %v9187_v6  ;;  %12708 = vst [vmem:[#allocation137_spill] sm:$0xff] %v9803_v49  ;;  %v12713_v6 = vld [vmem:[#allocation55_spill] sm:$0xff]  ;;  %v9835_v49 = vmul.f32 %v9495_v30, %v9445_v20 }
 0x2e2   : > { %7814 = vset.pattern.permute.xlu1 %v12698_v25  ;;  %v12710_v25 = vld [vmem:[#allocation52_spill] sm:$0xff]  ;;  %12717 = vst [vmem:[#allocation57_spill] sm:$0xff] %v9843_v24  ;;  %v9845_v28 = vpop.permute.xlu1 %1555  ;;  %v9854_v20 = vmul.f32 %v9518_v38, %v12720_v42  ;;  %v12724_v24 = vld [vmem:[#allocation63_spill] sm:$0xff]  ;;  %v12726_v42 = vld [vmem:[#allocation66_spill] sm:$0xff] }
 0x2e3   : > { %2654 = vperm.xlu1 %7814, %v9681_v2   ;;  %v1265_v52 = vmul.f32 %v9495_v30, %v12710_v25  ;;  %12712 = vst [vmem:[#allocation52_spill] sm:$0xff] %v9816_v55  ;;  %v1140_v25 = vmul.f32 %v1124_v35, %v9515_v44  ;;  %12718 = vst [vmem:[#allocation139_spill] sm:$0xff] %v9845_v28  ;;  %v12719_v44 = vld [vmem:[#allocation58_spill] sm:$0xff] }
 0x2e4   : > { %v9799_v43 = vpop.permute.xlu0 %1405  ;;  %v9850_v35 = vmul.f32 %v9493_v47, %v12719_v44  ;;  %12721 = vst [vmem:[#allocation58_spill] sm:$0xff] %v9854_v20  ;;  %v12725_v44 = vld [vmem:[#allocation64_spill] sm:$0xff]  ;;  %v9874_v20 = vmul.f32 %v9518_v38, %v12726_v42 }
 0x2e5   : > { %12707 = vst [vmem:[#allocation136_spill] sm:$0xff] %v9799_v43  ;;  %v9820_v43 = vmul.f32 %v9495_v30, %v12713_v6  ;;  %v9839_v6 = vmul.f32 %v9495_v30, %v9452_v10  ;;  %v9870_v28 = vmul.f32 %v9493_v47, %v12725_v44 }
 0x2e7   : > { %12714 = vst [vmem:[#allocation54_spill] sm:$0xff] %v9820_v43  ;;  %12716 = vst [vmem:[#allocation55_spill] sm:$0xff] %v9839_v6  ;;  %7815 = vset.pattern.permute.xlu1 %v12683_v41  ;;  %v12722_v43 = vld [vmem:[#allocation61_spill] sm:$0xff]  ;;  %v1284_v6 = vmul.f32 %v1268_v32, %v9500_v40  ;;  %v9866_v41 = vmul.f32 %v9520_v16, %v12724_v24  ;;  %v9879_v40 = vmul.f32 %v9495_v30, %v9258_v7 }
 0x2e8   : > { %v9858_v10 = vmul.f32 %v9495_v30, %v12722_v43  ;;  %v9861_v15 = vpop.permute.xlu0 %1576  ;;  %2402 = vperm.xlu1 %7815, %v9816_v55   ;;  %v1282_v43 = vmul.f32 %v1266_v50, %v9562_v63  ;;  %v9883_v32 = vmul.f32 %v9520_v16, %v9293_v45  ;;  %v9887_v24 = vmul.f32 %v9493_v47, %v9305_v5  ;;  %v12735_v55 = vld [vmem:[#allocation53_spill] sm:$0xff] }
 0x2e9   : > { %12723 = vst [vmem:[#allocation60_spill] sm:$0xff] %v9861_v15  ;;  %v1300_v44 = vadd.f32 %v1284_v6, %v1140_v25  ;;  %v9891_v15 = vmul.f32 %v9518_v38, %v9331_v0  ;;  %v9895_v63 = vmul.f32 %v9495_v30, %v9343_v19  ;;  %v1139_v7 = vmul.f32 %v1123_v21, %v9538_v26  ;;  %v12728_v25 = vld [vmem:[#allocation51_spill] sm:$0xff]  ;;  %v12729_v26 = vld [vmem:[#allocation77_spill] sm:$0xff]  ;;  %v12731_v21 = vld [vmem:[#allocation72_spill] sm:$0xff]  ;;  %v9921_v6 = vpop.permute.xlu1 %1163 }
 0x2ea   : > { %v1138_v50 = vmul.f32 %v1122_v18, %v9552_v60  ;;  %v9901_v45 = vmul.f32 %v9357_v51, %v9402_v36  ;;  %v9905_v5 = vmul.f32 %v9520_v16, %v9369_v48  ;;  %v9909_v0 = vmul.f32 %v9493_v47, %v9385_v1  ;;  %v12732_v18 = vld [vmem:[#allocation56_spill] sm:$0xff]  ;;  %12733 = vst [vmem:[#allocation64_spill] sm:$0xff] %v9921_v6  ;;  %v12736_v30 = vld [vmem:[#allocation73_spill] sm:$0xff]  ;;  %v12741_v6 = vld [vmem:[#allocation50_spill] sm:$0xff] }
 0x2eb   : > { %v1380_v19 = vmul.f32 %v12728_v25, %v9270_v57  ;;  %v9916_v60 = vmul.f32 %v12729_v26, %v9387_v54  ;;  %v1283_v51 = vmul.f32 %v1267_v39, %v9511_v31  ;;  %v1378_v48 = vmul.f32 %v12732_v18, %v12731_v21  ;;  %v12734_v25 = vld [vmem:[#allocation69_spill] sm:$0xff]  ;;  %v12740_v18 = vld [vmem:[#allocation67_spill] sm:$0xff]  ;;  %v12748_v38 = vld [vmem:[#allocation76_spill] sm:$0xff] }
 0x2ec   : > { %12727 = vst [vmem:[#allocation61_spill] sm:$0xff] %v9909_v0  ;;  %7816 = vset.pattern.permute.xlu1 %v12704_v33  ;;  %v1298_v36 = vadd.f32 %v1282_v43, %v1138_v50  ;;  %v1524_v57 = vmul.f32 %v1508_v22, %v9531_v58  ;;  %v1379_v0 = vmul.f32 %v12735_v55, %v12734_v25  ;;  %v12737_v31 = vld [vmem:[#allocation65_spill] sm:$0xff]  ;;  %v12738_v43 = vld [vmem:[#allocation75_spill] sm:$0xff] }
 0x2ed   : > { %12730 = vst [vmem:[#allocation63_spill] sm:$0xff] %v9916_v60  ;;  %v1104_v42 = vpop.permute.xlu0 %1103  ;;  %2522 = vperm.xlu1 %7816, %v9710_v61   ;;  %v1396_v1 = vadd.f32 %v1380_v19, %v1300_v44  ;;  %v1299_v26 = vadd.f32 %v1283_v51, %v1139_v7  ;;  %v9930_v39 = vmul.f32 %v12737_v31, %v12736_v30  ;;  %v12739_v50 = vld [vmem:[#allocation71_spill] sm:$0xff]  ;;  %v12742_v44 = vld [vmem:[#allocation94_spill] sm:$0xff]  ;;  %v12743_v55 = vld [vmem:[#allocation93_spill] sm:$0xff] }
 0x2ee   : > { %v1125_v54 = vmul.f32 %v9493_v47, %v1104_v42  ;;  %v9934_v21 = vmul.f32 %v12739_v50, %v12738_v43  ;;  %v1381_v61 = vmul.f32 %v12741_v6, %v12740_v18  ;;  %v1285_v58 = vmul.f32 %v9775_v12, %v12742_v44  ;;  %v12744_v42 = vld [vmem:[#allocation70_spill] sm:$0xff]  ;;  %v12745_v7 = vld [vmem:[#allocation59_spill] sm:$0xff]  ;;  %v12749_v6 = vld [vmem:[#allocation68_spill] sm:$0xff] }
 0x2ef   : > { %v1668_v22 = vmul.f32 %v1652_v11, %v9548_v37  ;;  %v1377_v51 = vmul.f32 %v12745_v7, %v12744_v42  ;;  %v1394_v25 = vadd.f32 %v1378_v48, %v1298_v36  ;;  %v1653_v30 = vmul.f32 %v9520_v16, %v9713_v17  ;;  %v12746_v43 = vld [vmem:[#allocation74_spill] sm:$0xff]  ;;  %v12757_v42 = vld [vmem:[#allocation120_spill] sm:$0xff]  ;;  %v12758_v7 = vld [vmem:[#allocation105_spill] sm:$0xff] }
 0x2f0   : > { %v1141_v19 = vmul.f32 %v1125_v54, %v12743_v55  ;;  %v12747_v50 = vld [vmem:[#allocation62_spill] sm:$0xff]  ;;  %v9950_v18 = vmul.f32 %v12749_v6, %v12748_v38  ;;  %v12750_v12 = vmov 4   ;;  %v1540_v37 = vadd.f32 %v1524_v57, %v1396_v1  ;;  %v9962_v55 = vpop.permute.xlu1 %1553 }
 0x2f1   : > { %v1084_v31 = vpop.permute.xlu0 %1083  ;;  %v1376_v60 = vmul.f32 %v12747_v50, %v12746_v43  ;;  %7817 = vset.pattern.permute.xlu1 %v12750_v12  ;;  %v1281_v11 = vmul.f32 %v1265_v52, %v9541_v8  ;;  %v1525_v17 = vmul.f32 %v9793_v23, %v9545_v53  ;;  %v1522_v36 = vmul.f32 %v9771_v13, %v9555_v62  ;;  %v12751_v62 = vld [vmem:[#allocation98_spill] sm:$0xff] }
 0x2f2   : > { %v1301_v54 = vadd.f32 %v1285_v58, %v1141_v19  ;;  %v1121_v44 = vmul.f32 %v9493_v47, %v1084_v31  ;;  %2798 = vperm.xlu1 %7817, %v9681_v2   ;;  %v1395_v48 = vadd.f32 %v1379_v0, %v1299_v26  ;;  %v1523_v38 = vmul.f32 %v9767_v29, %v9586_v59  ;;  %v12752_v59 = vld [vmem:[#allocation123_spill] sm:$0xff]  ;;  %v12760_v43 = vld [vmem:[#allocation102_spill] sm:$0xff] }
 0x2f3   : > { %v1684_v1 = vadd.f32 %v1668_v22, %v1540_v37  ;;  %v1279_v8 = vmul.f32 %v9826_v27, %v9566_v3  ;;  %v1667_v2 = vmul.f32 %v9831_v9, %v9623_v56  ;;  %v1135_v53 = vmul.f32 %v9850_v35, %v9633_v4  ;;  %v12754_v9 = vld [vmem:[#allocation101_spill] sm:$0xff]  ;;  %v12755_v35 = vld [vmem:[#allocation104_spill] sm:$0xff] }
 0x2f4   : > { %v1397_v52 = vadd.f32 %v1381_v61, %v1301_v54  ;;  %v1137_v57 = vmul.f32 %v1121_v44, %v9578_v34  ;;  %v1669_v13 = vmul.f32 %v1653_v30, %v12751_v62  ;;  %v1538_v0 = vadd.f32 %v1522_v36, %v1394_v25  ;;  %v12753_v34 = vld [vmem:[#allocation100_spill] sm:$0xff]  ;;  %v12756_v61 = vld [vmem:[#allocation54_spill] sm:$0xff]  ;;  %v12759_v25 = vld [vmem:[#allocation137_spill] sm:$0xff] }
 0x2f5   : > { %v1079_v23 = vpop.permute.xlu0 %1078  ;;  %v1650_v29 = vmul.f32 %v9520_v16, %v12752_v59  ;;  %v1520_v27 = vmul.f32 %v9789_v14, %v12753_v34  ;;  %v1539_v56 = vadd.f32 %v1523_v38, %v1395_v48  ;;  %v1277_v4 = vmul.f32 %v9835_v49, %v12754_v9  ;;  %v12761_v14 = vld [vmem:[#allocation106_spill] sm:$0xff]  ;;  %v12764_v48 = vld [vmem:[#allocation108_spill] sm:$0xff]  ;;  %v12767_v59 = vld [vmem:[#allocation111_spill] sm:$0xff] }
 0x2f6   : > { %v1297_v26 = vadd.f32 %v1281_v11, %v1137_v57  ;;  %v1120_v58 = vmul.f32 %v9493_v47, %v1079_v23  ;;  %v1541_v3 = vadd.f32 %v1525_v17, %v1397_v52  ;;  %7818 = vset.pattern.permute.xlu1 %v12659_v46  ;;  %v1280_v22 = vmul.f32 %v12756_v61, %v12755_v35  ;;  %v12762_v11 = vld [vmem:[#allocation55_spill] sm:$0xff]  ;;  %v12763_v49 = vld [vmem:[#allocation114_spill] sm:$0xff]  ;;  %v12772_v9 = vld [vmem:[#allocation113_spill] sm:$0xff] }
 0x2f7   : > { %v9982_v19 = vpop.permute.xlu1 %1432  ;;  %2249 = vperm.xlu1 %7818, %v12757_v42   ;;  %v1518_v30 = vmul.f32 %v12759_v25, %v12758_v7  ;;  %v1683_v37 = vadd.f32 %v1667_v2, %v1539_v56  ;;  %v1275_v54 = vmul.f32 %v12762_v11, %v12761_v14  ;;  %v1295_v44 = vadd.f32 %v1279_v8, %v1135_v53  ;;  %v12765_v38 = vld [vmem:[#allocation58_spill] sm:$0xff]  ;;  %v12766_v57 = vld [vmem:[#allocation99_spill] sm:$0xff]  ;;  %v12771_v56 = vld [vmem:[#allocation117_spill] sm:$0xff] }
 0x2f8   : > { %v1393_v31 = vadd.f32 %v1377_v51, %v1297_v26  ;;  %v1136_v50 = vmul.f32 %v1120_v58, %v12760_v43  ;;  %v1685_v6 = vadd.f32 %v1669_v13, %v1541_v3  ;;  %v1133_v17 = vmul.f32 %v9870_v28, %v12763_v49  ;;  %v12768_v13 = vld [vmem:[#allocation116_spill] sm:$0xff]  ;;  %v12769_v8 = vld [vmem:[#allocation126_spill] sm:$0xff]  ;;  %v12773_v61 = vld [vmem:[#allocation127_spill] sm:$0xff] }
 0x2f9   : > { %v1069_v36 = vpop.permute.xlu0 %1068  ;;  %v1521_v52 = vmul.f32 %v12765_v38, %v12764_v48  ;;  %v1666_v62 = vmul.f32 %v1650_v29, %v12766_v57  ;;  %v1278_v2 = vmul.f32 %v9858_v10, %v12767_v59  ;;  %v1519_v26 = vmul.f32 %v9874_v20, %v12768_v13  ;;  %v12770_v29 = vld [vmem:[#allocation109_spill] sm:$0xff]  ;;  %v12775_v11 = vld [vmem:[#allocation124_spill] sm:$0xff]  ;;  %v12779_v48 = vld [vmem:[#allocation130_spill] sm:$0xff] }
 0x2fa   : > { %v1296_v23 = vadd.f32 %v1280_v22, %v1136_v50  ;;  %v1118_v51 = vmul.f32 %v9493_v47, %v1069_v36  ;;  %6891 = vmatprep.subr.mxu1 %v1685_v6  ;;  %v1648_v53 = vmul.f32 %v9520_v16, %v12769_v8  ;;  %v1665_v10 = vmul.f32 %v9866_v41, %v12772_v9 }
 0x2fb   : > { %v10002_v28 = vpop.permute.xlu1 %1001  ;;  %6892 = vmatpush3.msra.mxu1 %v1685_v6  ;;  %7819 = vset.pattern.permute.xlu1 %v12704_v33  ;;  %v1537_v34 = vadd.f32 %v1521_v52, %v1393_v31  ;;  %v1293_v35 = vadd.f32 %v1277_v4, %v1133_v17  ;;  %v1391_v20 = vadd.f32 %v9930_v39, %v1295_v44  ;;  %v12774_v6 = vld [vmem:[#allocation121_spill] sm:$0xff]  ;;  %v12776_v4 = vld [vmem:[#allocation103_spill] sm:$0xff]  ;;  %v12780_v52 = vmov 3  }
 0x2fc   : > { %v1392_v58 = vadd.f32 %v1376_v60, %v1296_v23  ;;  %v1134_v3 = vmul.f32 %v1118_v51, %v12770_v29  ;;  %6893 = vmatprep.subr.mxu1 %v1684_v1  ;;  %2518 = vperm.xlu1 %7819, %v12771_v56   ;;  %v1131_v22 = vmul.f32 %v9887_v24, %v12773_v61  ;;  %v12777_v24 = vld [vmem:[#allocation129_spill] sm:$0xff]  ;;  %v12778_v17 = vld [vmem:[#allocation119_spill] sm:$0xff]  ;;  %v12782_v23 = vld [vmem:[#allocation138_spill] sm:$0xff] }
 0x2fd   : > { %6894 = vmatpush3.msra.mxu1 %v1684_v1  ;;  %v1059_v7 = vpop.permute.xlu0 %1058  ;;  %v1682_v43 = vadd.f32 %v1666_v62, %v1538_v0  ;;  %v1535_v31 = vadd.f32 %v1519_v26, %v1391_v20  ;;  %v1276_v14 = vmul.f32 %v9879_v40, %v12774_v6  ;;  %v1663_v41 = vmul.f32 %v9883_v32, %v12775_v11  ;;  %v12784_v26 = vld [vmem:[#allocation107_spill] sm:$0xff]  ;;  %v12786_v29 = vld [vmem:[#allocation132_spill] sm:$0xff] }
 0x2fe   : > { %v1294_v25 = vadd.f32 %v1278_v2, %v1134_v3  ;;  %v1116_v60 = vmul.f32 %v9493_v47, %v1059_v7  ;;  %6895 = vmatprep.subr.mxu1 %v1683_v37  ;;  %v1536_v50 = vadd.f32 %v1520_v27, %v1392_v58  ;;  %v1664_v39 = vmul.f32 %v1648_v53, %v12776_v4  ;;  %v12783_v2 = vld [vmem:[#allocation139_spill] sm:$0xff]  ;;  %v12796_v4 = vld [vmem:[#allocation57_spill] sm:$0xff] }
 0x2ff   : > { %v10018_v44 = vpop.permute.xlu1 %1161  ;;  %6896 = vmatpush3.msra.mxu1 %v1683_v37  ;;  %v1646_v1 = vmul.f32 %v9520_v16, %v12777_v24  ;;  %v1681_v27 = vadd.f32 %v1665_v10, %v1537_v34  ;;  %v1291_v36 = vadd.f32 %v1275_v54, %v1131_v22  ;;  %v1517_v40 = vmul.f32 %v9891_v15, %v12779_v48  ;;  %v12785_v53 = vld [vmem:[#allocation135_spill] sm:$0xff]  ;;  %v12787_v34 = vld [vmem:[#allocation78_spill] sm:$0xff] }
 0x300   : > { %v1390_v49 = vadd.f32 %v9950_v18, %v1294_v25  ;;  %v1132_v0 = vmul.f32 %v1116_v60, %v12778_v17  ;;  %6897 = vmatprep.subr.mxu1 %v1682_v43  ;;  %v1680_v38 = vadd.f32 %v1664_v39, %v1536_v50  ;;  %7820 = vset.pattern.permute.xlu1 %v12780_v52  ;;  %v12781_v18 = vld [vmem:[#allocation110_spill] sm:$0xff]  ;;  %v12789_v10 = vld [vmem:[#allocation83_spill] sm:$0xff]  ;;  %v12792_v60 = vld [vmem:[#allocation89_spill] sm:$0xff] }
 0x301   : > { %6898 = vmatpush3.msra.mxu1 %v1682_v43  ;;  %v1049_v32 = vpop.permute.xlu0 %1048  ;;  %2646 = vperm.xlu1 %7820, %v12771_v56   ;;  %v1516_v51 = vmul.f32 %v12782_v23, %v12781_v18  ;;  %v1679_v59 = vadd.f32 %v1663_v41, %v1535_v31  ;;  %v1389_v54 = vadd.f32 %v9934_v21, %v1293_v35  ;;  %v12788_v56 = vld [vmem:[#allocation95_spill] sm:$0xff]  ;;  %v12793_v43 = vld [vmem:[#allocation82_spill] sm:$0xff]  ;;  %v12795_v41 = vld [vmem:[#allocation64_spill] sm:$0xff] }
 0x302   : > { %v1292_v57 = vadd.f32 %v1276_v14, %v1132_v0  ;;  %v1114_v37 = vmul.f32 %v9493_v47, %v1049_v32  ;;  %6899 = vmatprep.subr.mxu1 %v1681_v27  ;;  %v1534_v62 = vadd.f32 %v1518_v30, %v1390_v49  ;;  %v1661_v15 = vmul.f32 %v9905_v5, %v12783_v2  ;;  %v12790_v35 = vld [vmem:[#allocation63_spill] sm:$0xff]  ;;  %v12797_v17 = vld [vmem:[#allocation80_spill] sm:$0xff]  ;;  %v12800_v32 = vld [vmem:[#allocation122_spill] sm:$0xff] }
 0x303   : > { %v1552_v13 = vpop.permute.xlu1 %1551  ;;  %6900 = vmatpush3.msra.mxu1 %v1681_v27  ;;  %v1662_v8 = vmul.f32 %v1646_v1, %v12784_v26  ;;  %v1274_v58 = vmul.f32 %v9895_v63, %v12785_v53  ;;  %v1499_v9 = vmul.f32 %v12788_v56, %v12787_v34  ;;  %v1643_v21 = vmul.f32 %v9520_v16, %v12789_v10  ;;  %v12791_v22 = vld [vmem:[#allocation131_spill] sm:$0xff]  ;;  %v12798_v27 = vld [vmem:[#allocation88_spill] sm:$0xff]  ;;  %v12803_v23 = vld [vmem:[#allocation81_spill] sm:$0xff] }
 0x304   : > { %v1388_v30 = vadd.f32 %v9901_v45, %v1292_v57  ;;  %v1130_v3 = vmul.f32 %v1114_v37, %v12786_v29  ;;  %6901 = vmatprep.subr.mxu1 %v1680_v38  ;;  %v1387_v5 = vadd.f32 %v12790_v35, %v1291_v36  ;;  %v1533_v20 = vadd.f32 %v1517_v40, %v1389_v54  ;;  %v12794_v31 = vld [vmem:[#allocation115_spill] sm:$0xff]  ;;  %v12799_v36 = vld [vmem:[#allocation92_spill] sm:$0xff]  ;;  %v12802_v57 = vld [vmem:[#allocation61_spill] sm:$0xff] }
 0x305   : > { %6902 = vmatpush3.msra.mxu1 %v1680_v38  ;;  %v1039_v61 = vpop.permute.xlu0 %1038  ;;  %v1644_v7 = vmul.f32 %v9520_v16, %v12791_v22  ;;  %v1678_v45 = vadd.f32 %v1662_v8, %v1534_v62  ;;  %v1370_v50 = vmul.f32 %v12793_v43, %v12792_v60  ;;  %v1515_v6 = vmul.f32 %v1499_v9, %v12794_v31  ;;  %v12801_v38 = vld [vmem:[#allocation112_spill] sm:$0xff]  ;;  %v12805_v2 = vld [vmem:[#allocation86_spill] sm:$0xff]  ;;  %v12808_v34 = vld [vmem:[#allocation79_spill] sm:$0xff] }
 0x306   : > { %v1290_v63 = vadd.f32 %v1274_v58, %v1130_v3  ;;  %6903 = vmatprep.subr.mxu1 %v1679_v59  ;;  %v1532_v25 = vadd.f32 %v1516_v51, %v1388_v30  ;;  %v1677_v14 = vadd.f32 %v1661_v15, %v1533_v20  ;;  %7821 = vset.pattern.permute.xlu1 %v12659_v46  ;;  %v12807_v53 = vld [vmem:[#allocation136_spill] sm:$0xff]  ;;  %v12809_v9 = vld [vmem:[#allocation85_spill] sm:$0xff]  ;;  %v12812_v60 = vld [vmem:[#allocation90_spill] sm:$0xff] }
 0x307   : > { %v1000_v11 = vpop.permute.xlu1 %999  ;;  %6904 = vmatpush3.msra.mxu1 %v1679_v59  ;;  %v1273_v39 = vmul.f32 %v12796_v4, %v12795_v41  ;;  %v1660_v24 = vmul.f32 %v1644_v7, %v9962_v55  ;;  %v1659_v1 = vmul.f32 %v1643_v21, %v1552_v13  ;;  %v1112_v49 = vmul.f32 %v9493_v47, %v1039_v61  ;;  %v12804_v59 = vld [vmem:[#allocation84_spill] sm:$0xff]  ;;  %v12806_v13 = vld [vmem:[#allocation133_spill] sm:$0xff] }
 0x308   : > { %6905 = vmatprep.subr.mxu1 %v1678_v45  ;;  %v1498_v0 = vmul.f32 %v12788_v56, %v12797_v17  ;;  %v1255_v48 = vmul.f32 %v12799_v36, %v12798_v27  ;;  %2244 = vperm.xlu1 %7821, %v12800_v32   ;;  %v1129_v37 = vmul.f32 %v12802_v57, %v12801_v38  ;;  %v12810_v7 = vld [vmem:[#allocation52_spill] sm:$0xff] }
 0x309   : > { %6906 = vmatpush3.msra.mxu1 %v1678_v45  ;;  %v1160_v40 = vpop.permute.xlu0 %1159  ;;  %v1531_v62 = vadd.f32 %v1515_v6, %v1387_v5  ;;  %v1676_v55 = vadd.f32 %v1660_v24, %v1532_v25  ;;  %v1386_v18 = vadd.f32 %v1370_v50, %v1290_v63  ;;  %v1256_v51 = vmul.f32 %v12799_v36, %v12803_v23  ;;  %v12811_v63 = vld [vmem:[#allocation87_spill] sm:$0xff]  ;;  %v12813_v6 = vld [vmem:[#allocation96_spill] sm:$0xff] }
 0x30a   : > { %6907 = vmatprep.subr.mxu1 %v1677_v14  ;;  %v1111_v54 = vmul.f32 %v9493_v47, %v12804_v59  ;;  %v1497_v15 = vmul.f32 %v12788_v56, %v12805_v2  ;;  %v1642_v26 = vmul.f32 %v9520_v16, %v12806_v13  ;;  %v1514_v58 = vmul.f32 %v1498_v0, %v12807_v53  ;;  %v12816_v0 = vld [vmem:[#allocation118_spill] sm:$0xff] }
 0x30b   : > { %v1404_v8 = vpop.permute.xlu1 %1403  ;;  %6908 = vmatpush3.msra.mxu1 %v1677_v14  ;;  %v1289_v30 = vadd.f32 %v1273_v39, %v1129_v37  ;;  %v1675_v29 = vadd.f32 %v1659_v1, %v1531_v62  ;;  %v1128_v3 = vmul.f32 %v1112_v49, %v10002_v28  ;;  %v1369_v10 = vmul.f32 %v12809_v9, %v12808_v34  ;;  %v12814_v14 = vld [vmem:[#allocation91_spill] sm:$0xff]  ;;  %v973_v34 = vld [vmem:[%s12437_s5 + $0x30] sm:$0xff]  ;;  %v974_v9 = vld [vmem:[%s12437_s5 + $0x38] sm:$0xff] }
 0x30c   : > { %6909 = vmatprep.subr.mxu1 %v1676_v55  ;;  %v1272_v21 = vmul.f32 %v1256_v51, %v10018_v44  ;;  %v1271_v35 = vmul.f32 %v1255_v48, %v1160_v40  ;;  %7822 = vset.pattern.permute.xlu1 %v12704_v33  ;;  %v1513_v20 = vmul.f32 %v1497_v15, %v1404_v8  ;;  %v12817_v40 = vld [vmem:[#allocation134_spill] sm:$0xff]  ;;  %v12819_v15 = vmov 1  }
 0x30d   : > { %6910 = vmatpush3.msra.mxu1 %v1676_v55  ;;  %v1550_v5 = vpop.permute.xlu0 %1549  ;;  %v1530_v61 = vadd.f32 %v1514_v58, %v1386_v18  ;;  %2514 = vperm.xlu1 %7822, %v12810_v7   ;;  %v1496_v28 = vmul.f32 %v12788_v56, %v12811_v63  ;;  %v1127_v45 = vmul.f32 %v1111_v54, %v1000_v11  ;;  %v12815_v11 = vld [vmem:[#allocation97_spill] sm:$0xff]  ;;  %v10093_v55 = vld [vmem:[%s12436_s4 + $0xc0] sm:$0xff]  ;;  %v12818_v18 = vld [vmem:[#allocation60_spill] sm:$0xff] }
 0x30e   : > { %v1658_v22 = vmul.f32 %v1642_v26, %v1550_v5  ;;  %6911 = vmatprep.subr.mxu1 %v1675_v29  ;;  %v1641_v44 = vmul.f32 %v9520_v16, %v12812_v60  ;;  %v1288_v43 = vadd.f32 %v1272_v21, %v1128_v3  ;;  %v1385_v50 = vadd.f32 %v1369_v10, %v1289_v30  ;;  %v968_v58 = vld [vmem:[%s12437_s5 + $0x8] sm:$0xff]  ;;  %v969_v30 = vld [vmem:[%s12437_s5 + $0x10] sm:$0xff]  ;;  %v971_v3 = vld [vmem:[%s12437_s5 + $0x20] sm:$0xff] }
 0x30f   : > { %v1402_v25 = vpop.permute.xlu1 %1401  ;;  %6912 = vmatpush3.msra.mxu1 %v1675_v29  ;;  %v1368_v41 = vmul.f32 %v12814_v14, %v12813_v6  ;;  %v1495_v4 = vmul.f32 %v12788_v56, %v9982_v19  ;;  %v1287_v39 = vadd.f32 %v1271_v35, %v1127_v45  ;;  %v1367_v27 = vmul.f32 %v12816_v0, %v12815_v11  ;;  %v970_v29 = vld [vmem:[%s12437_s5 + $0x18] sm:$0xff]  ;;  %v975_v21 = vld [vmem:[%s12437_s5 + $0x40] sm:$0xff]  ;;  %v976_v35 = vld [vmem:[%s12437_s5 + $0x48] sm:$0xff] }
 0x310   : > { %v1674_v31 = vadd.f32 %v1658_v22, %v1530_v61  ;;  %v1529_v1 = vadd.f32 %v1513_v20, %v1385_v50  ;;  %v1512_v49 = vmul.f32 %v1496_v28, %v1402_v25  ;;  %v1640_v38 = vmul.f32 %v9520_v16, %v12817_v40  ;;  %v12820_v10 = vld [vmem:[#allocation125_spill] sm:$0xff]  ;;  %v977_v5 = vld [vmem:[%s12437_s5 + $0x50] sm:$0xff]  ;;  %v979_v61 = vld [vmem:[%s12437_s5 + $0x60] sm:$0xff] }
 0x311   : > { %v1548_v24 = vpop.permute.xlu0 %1547  ;;  %7823 = vset.pattern.permute.xlu1 %v12780_v52  ;;  %v1384_v57 = vadd.f32 %v1368_v41, %v1288_v43  ;;  %v1639_v23 = vmul.f32 %v9520_v16, %v12818_v18  ;;  %v1383_v59 = vadd.f32 %v1367_v27, %v1287_v39  ;;  %v978_v20 = vld [vmem:[%s12437_s5 + $0x58] sm:$0xff]  ;;  %v980_v22 = vld [vmem:[%s12437_s5 + $0x68] sm:$0xff]  ;;  %v981_v63 = vld [vmem:[%s12437_s5 + $0x70] sm:$0xff] }
 0x312   : > { %v1657_v17 = vmul.f32 %v1641_v44, %v1548_v24  ;;  %6913 = vmatprep.subr.mxu1 %v1674_v31  ;;  %2642 = vperm.xlu1 %7823, %v12810_v7   ;;  %v982_v28 = vld [vmem:[%s12437_s5 + $0x78] sm:$0xff]  ;;  %v12821_v45 = vld [vmem:[#allocation128_spill] sm:$0xff]  ;;  %v10174_v25 = vld [vmem:[%s12436_s4 + $0xa0] sm:$0xff] }
 0x313   : > { %v1400_v48 = vpop.permute.xlu1 %1399  ;;  %6914 = vmatpush3.msra.mxu1 %v1674_v31  ;;  %v1528_v51 = vadd.f32 %v1512_v49, %v1384_v57  ;;  %v12822_v18 = vld [vmem:[#allocation35_spill] sm:$0xff] }
 0x314   : > { %v1673_v19 = vadd.f32 %v1657_v17, %v1529_v1  ;;  %v1511_v37 = vmul.f32 %v1495_v4, %v1400_v48 }
 0x315   : > { %v1546_v62 = vpop.permute.xlu0 %1545 }
 0x316   : > { %v1656_v54 = vmul.f32 %v1640_v38, %v1546_v62  ;;  %6915 = vmatprep.subr.mxu1 %v1673_v19  ;;  %7824 = vset.pattern.permute.xlu1 %v12819_v15  ;;  %v1527_v13 = vadd.f32 %v1511_v37, %v1383_v59 }
 0x317   : > { %v1544_v2 = vpop.permute.xlu1 %1543  ;;  %6916 = vmatpush3.msra.mxu1 %v1673_v19  ;;  %2390 = vperm.xlu1 %7824, %v10093_v55  }
 0x318   : > { %v1672_v26 = vadd.f32 %v1656_v54, %v1528_v51  ;;  %v1655_v8 = vmul.f32 %v1639_v23, %v1544_v2  ;;  %v12824_v54 = vld [vmem:[#allocation34_spill] sm:$0xff] }
 0x319   : > { %v1690_v39 = vpop.permute.xlu0 %1689 }
 0x31a   : > { %v1671_v53 = vadd.f32 %v1655_v8, %v1527_v13  ;;  %6917 = vmatprep.subr.mxu1 %v1672_v26 }
 0x31b   : > { %6918 = vmatpush3.msra.mxu1 %v1672_v26  ;;  %7825 = vset.pattern.permute.xlu1 %v12704_v33  ;;  %v1695_v60 = vpop.permute.xlu1 %1694 }
 0x31c   : > { %6919 = vmatprep.subr.mxu1 %v1671_v53  ;;  %2510 = vperm.xlu1 %7825, %v12757_v42   ;;  %v972_v42 = vld [vmem:[%s12437_s5 + $0x28] sm:$0xff] }
 0x31d   : > { %6920 = vmatpush3.msra.mxu1 %v1671_v53  ;;  %v1705_v1 = vpop.permute.xlu0 %1704 }
 0x31e   : > { %6922 = vmatmul.mubr.f32.vlgmr.msra.gmra.mxu1 %v968_v58 }
 0x31f   : > { %6924 = vmatprep.mubr.f32.mxu1 %v969_v30  ;;  %v1700_v44 = vpop.permute.xlu1 %1699 }
 0x320   : > { %7826 = vset.pattern.permute.xlu1 %v12750_v12 }
 0x321   : > { %2786 = vperm.xlu1 %7826, %v12810_v7   ;;  %v10151_v7 = vld [vmem:[%s12436_s4 + $0xb0] sm:$0xff]  ;;  %v1715_v17 = vpop.permute.xlu0 %1714 }
 0x322   : > { %6925 = vmatmul.mubr.f32.gmra.mxu1 %v970_v29 }
 0x323   : > { %6927 = vmatprep.mubr.f32.mxu1 %v971_v3  ;;  %v1710_v43 = vpop.permute.xlu1 %1709  ;;  %v12826_v3 = vld [vmem:[#allocation37_spill] sm:$0xff] }
 0x325   : > { %7827 = vset.pattern.permute.xlu1 %v12659_v46  ;;  %v1725_v57 = vpop.permute.xlu0 %1724 }
 0x326   : > { %6928 = vmatmul.mubr.f32.gmra.mxu1 %v972_v42  ;;  %2234 = vperm.xlu1 %7827, %v12820_v10  }
 0x327   : > { %6930 = vmatprep.mubr.f32.mxu1 %v973_v34  ;;  %v1720_v50 = vpop.permute.xlu1 %1719 }
 0x329   : > { %v1735_v30 = vpop.permute.xlu0 %1734 }
 0x32a   : > { %6931 = vmatmul.mubr.f32.gmra.mxu1 %v974_v9  ;;  %7828 = vset.pattern.permute.xlu1 %v12704_v33 }
 0x32b   : > { %6933 = vmatprep.mubr.f32.mxu1 %v975_v21  ;;  %2506 = vperm.xlu1 %7828, %v12800_v32   ;;  %v10190_v31 = vpop.permute.xlu1 %1729  ;;  %v12828_v21 = vld [vmem:[#allocation36_spill] sm:$0xff] }
 0x32e   : > { %6934 = vmatmul.mubr.f32.gmra.mxu1 %v976_v35 }
 0x32f   : > { %6936 = vmatprep.mubr.f32.mxu1 %v977_v5  ;;  %7829 = vset.pattern.permute.xlu1 %v12780_v52  ;;  %v10192_v6 = vpop.permute.xlu1 %1739 }
 0x330   : > { %2634 = vperm.xlu1 %7829, %v12800_v32  }
 0x332   : > { %6937 = vmatmul.mubr.f32.gmra.mxu1 %v978_v20 }
 0x333   : > { %6939 = vmatprep.mubr.f32.mxu1 %v979_v61  ;;  %v10194_v14 = vpop.permute.xlu1 %1749 }
 0x334   : > { %7830 = vset.pattern.permute.xlu1 %v12819_v15 }
 0x335   : > { %2382 = vperm.xlu1 %7830, %v10151_v7  }
 0x336   : > { %6940 = vmatmul.mubr.f32.gmra.mxu1 %v980_v22 }
 0x337   : > { %6942 = vmatprep.mubr.f32.mxu1 %v981_v63  ;;  %v10196_v41 = vpop.permute.xlu1 %1759 }
 0x339   : > { %7831 = vset.pattern.permute.xlu1 %v12704_v33 }
 0x33a   : > { %6943 = vmatmul.mubr.f32.gmra.mxu1 %v982_v28  ;;  %2502 = vperm.xlu1 %7831, %v10093_v55  }
 0x33c   : > { %v10198_v4 = vpop.permute.xlu1 %2418 }
 0x33e   : > { %7832 = vset.pattern.permute.xlu1 %v12750_v12 }
 0x33f   : > { %2778 = vperm.xlu1 %7832, %v12800_v32   ;;  %v10186_v32 = vld [vmem:[%s12436_s4 + $0x98] sm:$0xff] }
 0x341   : > { %v10200_v24 = vpop.permute.xlu1 %2269 }
 0x343   : > { %7833 = vset.pattern.permute.xlu1 %v12659_v46 }
 0x344   : > { %2224 = vperm.xlu1 %7833, %v12821_v45  }
 0x345   : > { %v10202_v49 = vpop.permute.xlu1 %2264 }
 0x348   : > { %7834 = vset.pattern.permute.xlu1 %v12704_v33 }
 0x349   : > { %2498 = vperm.xlu1 %7834, %v12820_v10  }
 0x34a   : > { %v10204_v0 = vpop.permute.xlu1 %2410 }
 0x34d   : > { %7835 = vset.pattern.permute.xlu1 %v12780_v52 }
 0x34e   : > { %2626 = vperm.xlu1 %7835, %v12820_v10  }
 0x34f   : > { %v10209_v59 = vpop.permute.xlu1 %2658 }
 0x352   : > { %7836 = vset.pattern.permute.xlu1 %v12819_v15 }
 0x353   : > { %2374 = vperm.xlu1 %7836, %v10174_v25  }
 0x354   : > { %v10226_v63 = vpop.permute.xlu1 %2259 }
 0x357   : > { %7837 = vset.pattern.permute.xlu1 %v12704_v33 }
 0x358   : > { %2494 = vperm.xlu1 %7837, %v10151_v7  }
 0x35c   : > { %7838 = vset.pattern.permute.xlu1 %v12750_v12 }
 0x35d   : > { %2770 = vperm.xlu1 %7838, %v12820_v10  }
 0x361   : > { %7839 = vset.pattern.permute.xlu1 %v12659_v46 }
 0x362   : > { %2214 = vperm.xlu1 %7839, %v10186_v32  }
 0x366   : > { %7840 = vset.pattern.permute.xlu1 %v12704_v33 }
 0x3de   : > { %v6923_v11 = vpop.f32.mrf.mxu1 }
 0x3df   : > { %v1839_v27 = vadd.f32 %v6923_v11, %v1695_v60 }
 0x3e0   : > { %v1833_v48 = vpop.f32.mrf.mxu1 }
 0x3e1   : > { %v1913_v40 = vmax.f32 %v1839_v27, 0.0  ;;  %v1834_v38 = vadd.f32 %v1833_v48, %v1690_v39  ;;  %v12830_v27 = vld [vmem:[#allocation39_spill] sm:$0xff] }
 0x3e2   : > { %v6926_v19 = vpop.f32.mrf.mxu1 }
 0x3e3   : > { %v1912_v37 = vmax.f32 %v1834_v38, 0.0  ;;  %v1849_v62 = vadd.f32 %v6926_v19, %v1705_v1  ;;  %v10207_v23 = vadd.f32 %v1913_v40, %v12822_v18  ;;  %v1745_v19 = vpop.permute.xlu0 %1744 }
 0x3e4   : > { %v1843_v51 = vpop.f32.mrf.mxu1 }
 0x3e5   : > { %12823 = vst [vmem:[#allocation66_spill] sm:$0xff] %v10207_v23  ;;  %v10212_v2 = vadd.f32 %v1912_v37, %v12824_v54  ;;  %v1915_v13 = vmax.f32 %v1849_v62, 0.0  ;;  %v1844_v26 = vadd.f32 %v1843_v51, %v1700_v44  ;;  %v2001_v29 = vmul.f32 %v10207_v23, %v10207_v23 }
 0x3e6   : > { %v6929_v8 = vpop.f32.mrf.mxu1 }
 0x3e7   : > { %12825 = vst [vmem:[#allocation51_spill] sm:$0xff] %v10212_v2  ;;  %v2000_v53 = vmul.f32 %v10212_v2, %v10212_v2  ;;  %v1914_v58 = vmax.f32 %v1844_v26, 0.0  ;;  %v10219_v42 = vadd.f32 %v1915_v13, %v12826_v3  ;;  %v1859_v34 = vadd.f32 %v6929_v8, %v1715_v17 }
 0x3e8   : > { %v1853_v9 = vpop.f32.mrf.mxu1  ;;  %v1976_v10 = vadd.f32 %v10207_v23, %v10212_v2 }
 0x3e9   : > { %12827 = vst [vmem:[#allocation77_spill] sm:$0xff] %v10219_v42  ;;  %v10224_v35 = vadd.f32 %v1914_v58, %v12828_v21  ;;  %v1854_v5 = vadd.f32 %v1853_v9, %v1710_v43  ;;  %v2016_v20 = vadd.f32 %v2001_v29, %v2000_v53  ;;  %v1917_v61 = vmax.f32 %v1859_v34, 0.0  ;;  %v12832_v43 = vld [vmem:[#allocation38_spill] sm:$0xff]  ;;  %v10243_v53 = vpop.permute.xlu1 %2526  ;;  %v12834_v34 = vld [vmem:[#allocation41_spill] sm:$0xff] }
 0x3ea   : > { %v6932_v22 = vpop.f32.mrf.mxu1  ;;  %v2003_v1 = vmul.f32 %v10219_v42, %v10219_v42 }
 0x3eb   : > { %12829 = vst [vmem:[#allocation72_spill] sm:$0xff] %v10224_v35  ;;  %v1977_v28 = vadd.f32 %v1976_v10, %v10224_v35  ;;  %v2002_v60 = vmul.f32 %v10224_v35, %v10224_v35  ;;  %v1916_v44 = vmax.f32 %v1854_v5, 0.0  ;;  %v1869_v39 = vadd.f32 %v6932_v22, %v1725_v57  ;;  %v12836_v10 = vld [vmem:[#allocation40_spill] sm:$0xff] }
 0x3ec   : > { %v1863_v17 = vpop.f32.mrf.mxu1  ;;  %v10234_v48 = vadd.f32 %v1917_v61, %v12830_v27 }
 0x3ed   : > { %v2017_v11 = vadd.f32 %v2016_v20, %v2002_v60  ;;  %v10237_v40 = vadd.f32 %v1916_v44, %v12832_v43  ;;  %v1978_v38 = vadd.f32 %v1977_v28, %v10219_v42  ;;  %v1919_v37 = vmax.f32 %v1869_v39, 0.0  ;;  %v1755_v28 = vpop.permute.xlu0 %1754 }
 0x3ee   : > { %12831 = vst [vmem:[#allocation56_spill] sm:$0xff] %v10234_v48  ;;  %v1864_v62 = vadd.f32 %v1863_v17, %v1720_v50  ;;  %v6935_v18 = vpop.f32.mrf.mxu1  ;;  %v2005_v58 = vmul.f32 %v10234_v48, %v10234_v48 }
 0x3ef   : > { %12833 = vst [vmem:[#allocation69_spill] sm:$0xff] %v10237_v40  ;;  %v1979_v51 = vadd.f32 %v1978_v38, %v10237_v40  ;;  %v2004_v57 = vmul.f32 %v10237_v40, %v10237_v40  ;;  %v2018_v54 = vadd.f32 %v2017_v11, %v2003_v1  ;;  %v1879_v26 = vadd.f32 %v6935_v18, %v1735_v30  ;;  %v12838_v1 = vld [vmem:[#allocation42_spill] sm:$0xff]  ;;  %v12840_v38 = vld [vmem:[#allocation43_spill] sm:$0xff]  ;;  %v10268_v18 = vpop.permute.xlu1 %2654 }
 0x3f0   : > { %v1918_v13 = vmax.f32 %v1864_v62, 0.0  ;;  %v1873_v8 = vpop.f32.mrf.mxu1  ;;  %v10250_v9 = vadd.f32 %v1919_v37, %v12834_v34 }
 0x3f1   : > { %v2019_v29 = vadd.f32 %v2018_v54, %v2004_v57  ;;  %v1980_v3 = vadd.f32 %v1979_v51, %v10234_v48  ;;  %v1874_v50 = vadd.f32 %v1873_v8, %v10190_v31  ;;  %v1921_v5 = vmax.f32 %v1879_v26, 0.0  ;;  %v12842_v8 = vld [vmem:[#allocation45_spill] sm:$0xff]  ;;  %v1765_v34 = vpop.permute.xlu0 %1764 }
 0x3f2   : > { %12835 = vst [vmem:[#allocation53_spill] sm:$0xff] %v10250_v9  ;;  %v10253_v21 = vadd.f32 %v1918_v13, %v12836_v10  ;;  %v6938_v20 = vpop.f32.mrf.mxu1  ;;  %v2007_v27 = vmul.f32 %v10250_v9, %v10250_v9 }
 0x3f3   : > { %v2020_v30 = vadd.f32 %v2019_v29, %v2005_v58  ;;  %v1920_v61 = vmax.f32 %v1874_v50, 0.0  ;;  %v1889_v22 = vadd.f32 %v6938_v20, %v1745_v19  ;;  %v10265_v37 = vadd.f32 %v1921_v5, %v12840_v38  ;;  %v12844_v29 = vld [vmem:[#allocation44_spill] sm:$0xff] }
 0x3f4   : > { %12837 = vst [vmem:[#allocation73_spill] sm:$0xff] %v10253_v21  ;;  %v1981_v60 = vadd.f32 %v1980_v3, %v10253_v21  ;;  %v2006_v44 = vmul.f32 %v10253_v21, %v10253_v21  ;;  %v1883_v39 = vpop.f32.mrf.mxu1 }
 0x3f5   : > { %v10259_v31 = vadd.f32 %v1920_v61, %v12838_v1  ;;  %v1923_v17 = vmax.f32 %v1889_v22, 0.0  ;;  %v1884_v11 = vadd.f32 %v1883_v39, %v10192_v6  ;;  %12841 = vst [vmem:[#allocation75_spill] sm:$0xff] %v10265_v37  ;;  %v2009_v10 = vmul.f32 %v10265_v37, %v10265_v37 }
 0x3f6   : > { %v2021_v43 = vadd.f32 %v2020_v30, %v2006_v44  ;;  %v1982_v19 = vadd.f32 %v1981_v60, %v10250_v9  ;;  %v6941_v62 = vpop.f32.mrf.mxu1 }
 0x3f7   : > { %12839 = vst [vmem:[#allocation65_spill] sm:$0xff] %v10259_v31  ;;  %v2008_v51 = vmul.f32 %v10259_v31, %v10259_v31  ;;  %v1922_v57 = vmax.f32 %v1884_v11, 0.0  ;;  %v1899_v54 = vadd.f32 %v6941_v62, %v1755_v28  ;;  %v10274_v58 = vadd.f32 %v1923_v17, %v12842_v8  ;;  %v10286_v17 = vpop.permute.xlu1 %2402  ;;  %v12846_v11 = vld [vmem:[#allocation46_spill] sm:$0xff]  ;;  %v12850_v8 = vld [vmem:[#allocation48_spill] sm:$0xff] }
 0x3f8   : > { %v1983_v13 = vadd.f32 %v1982_v19, %v10259_v31  ;;  %v2022_v6 = vadd.f32 %v2021_v43, %v2007_v27  ;;  %v1893_v26 = vpop.f32.mrf.mxu1  ;;  %v12848_v19 = vld [vmem:[#allocation47_spill] sm:$0xff] }
 0x3f9   : > { %12843 = vst [vmem:[#allocation71_spill] sm:$0xff] %v10274_v58  ;;  %v10277_v3 = vadd.f32 %v1922_v57, %v12844_v29  ;;  %v1894_v50 = vadd.f32 %v1893_v26, %v10194_v14  ;;  %v1925_v30 = vmax.f32 %v1899_v54, 0.0  ;;  %v2011_v14 = vmul.f32 %v10274_v58, %v10274_v58 }
 0x3fa   : > { %v2023_v5 = vadd.f32 %v2022_v6, %v2008_v51  ;;  %v1984_v20 = vadd.f32 %v1983_v13, %v10265_v37  ;;  %v6944_v61 = vpop.f32.mrf.mxu1 }
 0x3fb   : > { %12845 = vst [vmem:[#allocation67_spill] sm:$0xff] %v10277_v3  ;;  %v2010_v22 = vmul.f32 %v10277_v3, %v10277_v3  ;;  %v1924_v28 = vmax.f32 %v1894_v50, 0.0  ;;  %v1909_v60 = vadd.f32 %v6944_v61, %v1765_v34  ;;  %v10295_v62 = vadd.f32 %v1925_v30, %v12848_v19  ;;  %v12852_v50 = vld [vmem:[#allocation49_spill] sm:$0xff] }
 0x3fc   : > { %v1985_v44 = vadd.f32 %v1984_v20, %v10277_v3  ;;  %v2024_v39 = vadd.f32 %v2023_v5, %v2009_v10  ;;  %v1903_v1 = vpop.f32.mrf.mxu1  ;;  %v10310_v20 = vpop.permute.xlu1 %2522 }
 0x3fd   : > { %v10291_v27 = vadd.f32 %v1924_v28, %v12846_v11  ;;  %v1904_v43 = vadd.f32 %v1903_v1, %v10196_v41  ;;  %12849 = vst [vmem:[#allocation94_spill] sm:$0xff] %v10295_v62  ;;  %v1927_v51 = vmax.f32 %v1909_v60, 0.0  ;;  %v2013_v10 = vmul.f32 %v10295_v62, %v10295_v62 }
 0x3fe   : > { %v2025_v38 = vadd.f32 %v2024_v39, %v2010_v22  ;;  %v1986_v57 = vadd.f32 %v1985_v44, %v10274_v58 }
 0x3ff   : > { %12847 = vst [vmem:[#allocation50_spill] sm:$0xff] %v10291_v27  ;;  %v2012_v54 = vmul.f32 %v10291_v27, %v10291_v27  ;;  %v1926_v13 = vmax.f32 %v1904_v43, 0.0  ;;  %v10305_v34 = vadd.f32 %v1927_v51, %v12852_v50  ;;  %v6387_v51 = vld [vmem:[%s12436_s4 + $0x88] sm:$0xff]  ;;  %v6386_v50 = vld [vmem:[%s12436_s4 + $0x80] sm:$0xff] }
 0x400   : > { %v1987_v6 = vadd.f32 %v1986_v57, %v10291_v27  ;;  %v2026_v26 = vadd.f32 %v2025_v38, %v2011_v14  ;;  %v10318_v1 = vpop.permute.xlu1 %2798  ;;  %v10333_v38 = vld [vmem:[%s12436_s4 + $0x90] sm:$0xff] }
 0x401   : > { %v10302_v29 = vadd.f32 %v1926_v13, %v12850_v8  ;;  %12853 = vst [vmem:[#allocation70_spill] sm:$0xff] %v10305_v34  ;;  %v2015_v60 = vmul.f32 %v10305_v34, %v10305_v34  ;;  %v8125_v13 = vld [vmem:[%s12436_s4 + $0xa8] sm:$0xff] }
 0x402   : > { %v1988_v41 = vadd.f32 %v1987_v6, %v10295_v62  ;;  %v2027_v5 = vadd.f32 %v2026_v26, %v2012_v54  ;;  %v8126_v6 = vld [vmem:[%s12436_s4 + $0xd0] sm:$0xff] }
 0x403   : > { %12851 = vst [vmem:[#allocation93_spill] sm:$0xff] %v10302_v29  ;;  %v2014_v30 = vmul.f32 %v10302_v29, %v10302_v29 }
 0x404   : > { %v1989_v61 = vadd.f32 %v1988_v41, %v10302_v29  ;;  %v2028_v22 = vadd.f32 %v2027_v5, %v2013_v10  ;;  %v10320_v14 = vpop.permute.xlu1 %2249  ;;  %v8127_v5 = vld [vmem:[%s12436_s4 + $0xf8] sm:$0xff] }
 0x406   : > { %v1990_v28 = vadd.f32 %v1989_v61, %v10305_v34  ;;  %v2029_v44 = vadd.f32 %v2028_v22, %v2014_v30  ;;  %v8128_v22 = vld [vmem:[%s12436_s4 + $0xe0] sm:$0xff] }
 0x408   : > { %1991 = vadd.xlane.f32.xlu1 %v1990_v28  ;;  %v2030_v39 = vadd.f32 %v2029_v44, %v2015_v60  ;;  %v10322_v11 = vpop.permute.xlu1 %2518  ;;  %v8129_v60 = vld [vmem:[%s12436_s4 + $0xd8] sm:$0xff] }
 0x40a   : > { %2031 = vadd.xlane.f32.xlu0 %v2030_v39 }
 0x40c   : > { %v10325_v43 = vpop.permute.xlu1 %2646 }
 0x410   : > { %v10335_v19 = vpop.permute.xlu1 %2244 }
 0x411   : > { %12854 = vst [vmem:[#allocation59_spill] sm:$0xff] %v10335_v19 }
 0x414   : > { %v10342_v57 = vpop.permute.xlu1 %2514 }
 0x418   : > { %v10351_v54 = vpop.permute.xlu1 %2642 }
 0x419   : > { %2490 = vperm.xlu1 %7840, %v12821_v45  }
 0x41c   : > { %v10361_v26 = vpop.permute.xlu1 %2390 }
 0x41d   : > { %7841 = vset.pattern.permute.xlu1 %v12780_v52 }
 0x41e   : > { %2618 = vperm.xlu1 %7841, %v12821_v45   ;;  %v8124_v45 = vld [vmem:[%s12436_s4 + $0xe8] sm:$0xff] }
 0x420   : > { %2370 = vperm.xlu0 %7809, %v10186_v32   ;;  %v10366_v8 = vpop.permute.xlu1 %2510 }
 0x422   : > { %7842 = vset.pattern.permute.xlu1 %v12819_v15 }
 0x423   : > { %2366 = vperm.xlu1 %7842, %v10333_v38  }
 0x424   : > { %2362 = vperm.xlu0 %7809, %v6387_v51   ;;  %v10375_v41 = vpop.permute.xlu1 %2786 }
 0x425   : > { %12855 = vst [vmem:[#allocation74_spill] sm:$0xff] %v10375_v41 }
 0x427   : > { %7843 = vset.pattern.permute.xlu1 %v12704_v33 }
 0x428   : > { %2486 = vperm.xlu1 %7843, %v10174_v25   ;;  %7846 = vset.pattern.permute.xlu0 %v12780_v52  ;;  %v10378_v10 = vpop.permute.xlu1 %2234 }
 0x429   : > { %2650 = vperm.xlu0 %7846, %v8124_v45   ;;  %12856 = vst [vmem:[#allocation62_spill] sm:$0xff] %v10378_v10 }
 0x42c   : > { %7844 = vset.pattern.permute.xlu1 %v12750_v12  ;;  %v10387_v30 = vpop.permute.xlu1 %2506 }
 0x42d   : > { %2762 = vperm.xlu1 %7844, %v8125_v13   ;;  %2638 = vperm.xlu0 %7846, %v8126_v6   ;;  %12857 = vst [vmem:[#allocation76_spill] sm:$0xff] %v10387_v30 }
 0x431   : > { %7845 = vset.pattern.permute.xlu1 %v12659_v46  ;;  %2630 = vperm.xlu0 %7846, %v10093_v55  }
 0x432   : > { %2204 = vperm.xlu1 %7845, %v6387_v51  }
 0x435   : > { %2622 = vperm.xlu0 %7846, %v10151_v7  }
 0x436   : > { %7847 = vset.pattern.permute.xlu1 %v12704_v33 }
 0x437   : > { %2482 = vperm.xlu1 %7847, %v10186_v32  }
 0x439   : > { %2614 = vperm.xlu0 %7846, %v10174_v25  }
 0x43b   : > { %7848 = vset.pattern.permute.xlu1 %v12780_v52 }
 0x43c   : > { %2610 = vperm.xlu1 %7848, %v10186_v32  }
 0x43d   : > { %2606 = vperm.xlu0 %7846, %v10333_v38  }
 0x440   : > { %7849 = vset.pattern.permute.xlu1 %v12819_v15  ;;  %v10392_v15 = vpop.permute.xlu1 %2634 }
 0x441   : > { %2358 = vperm.xlu1 %7849, %v6386_v50   ;;  %2602 = vperm.xlu0 %7846, %v6387_v51   ;;  %12858 = vst [vmem:[#allocation68_spill] sm:$0xff] %v10392_v15 }
 0x444   : > { %v10396_v61 = vpop.permute.xlu1 %2382 }
 0x445   : > { %7850 = vset.pattern.permute.xlu1 %v12704_v33  ;;  %7853 = vset.pattern.permute.xlu0 %v12704_v33  ;;  %12859 = vst [vmem:[#allocation98_spill] sm:$0xff] %v10396_v61  ;;  %v1974_v61 = vld [vmem:[#allocation8 + $0x70] sm:$0xff] }
 0x446   : > { %2478 = vperm.xlu1 %7850, %v10333_v38   ;;  %2530 = vperm.xlu0 %7853, %v8127_v5  }
 0x44a   : > { %7851 = vset.pattern.permute.xlu1 %v12750_v12  ;;  %2470 = vperm.xlu0 %7853, %v6386_v50  }
 0x44b   : > { %2754 = vperm.xlu1 %7851, %v10186_v32  }
 0x44e   : > { %7855 = vset.pattern.permute.xlu0 %v12750_v12 }
 0x44f   : > { %7852 = vset.pattern.permute.xlu1 %v12704_v33  ;;  %2802 = vperm.xlu0 %7855, %v8127_v5   ;;  %v10402_v33 = vpop.permute.xlu1 %2502 }
 0x450   : > { %2474 = vperm.xlu1 %7852, %v6387_v51   ;;  %12860 = vst [vmem:[#allocation123_spill] sm:$0xff] %v10402_v33 }
 0x453   : > { %2794 = vperm.xlu0 %7855, %v8124_v45   ;;  %v10406_v32 = vpop.permute.xlu1 %2778 }
 0x454   : > { %7854 = vset.pattern.permute.xlu1 %v12750_v12  ;;  %12861 = vst [vmem:[#allocation100_spill] sm:$0xff] %v10406_v32 }
 0x455   : > { %2750 = vperm.xlu1 %7854, %v10333_v38  }
 0x457   : > { %2790 = vperm.xlu0 %7855, %v8128_v22   ;;  %v10411_v28 = vpop.permute.xlu1 %2224 }
 0x458   : > { %12862 = vst [vmem:[#allocation101_spill] sm:$0xff] %v10411_v28 }
 0x459   : > { %7856 = vset.pattern.permute.xlu1 %v12780_v52 }
 0x45a   : > { %2598 = vperm.xlu1 %7856, %v6386_v50  }
 0x45b   : > { %2782 = vperm.xlu0 %7855, %v8126_v6   ;;  %v10413_v52 = vpop.permute.xlu1 %2498 }
 0x45c   : > { %12863 = vst [vmem:[#allocation104_spill] sm:$0xff] %v10413_v52 }
 0x45e   : > { %7857 = vset.pattern.permute.xlu1 %v12750_v12  ;;  %v10416_v12 = vpop.permute.xlu0 %2414 }
 0x45f   : > { %2774 = vperm.xlu0 %7855, %v10093_v55   ;;  %2746 = vperm.xlu1 %7857, %v6387_v51   ;;  %v10421_v44 = vpop.permute.xlu1 %2626 }
 0x460   : > { %12864 = vst [vmem:[#allocation54_spill] sm:$0xff] %v10421_v44 }
 0x462   : > { %v10423_v39 = vpop.permute.xlu0 %2406 }
 0x463   : > { %2766 = vperm.xlu0 %7855, %v10151_v7   ;;  %7859 = vset.pattern.permute.xlu1 %v12659_v46  ;;  %v10426_v51 = vpop.permute.xlu1 %2374 }
 0x464   : > { %12865 = vst [vmem:[#allocation120_spill] sm:$0xff] %v10426_v51 }
 0x466   : > { %v10429_v45 = vpop.permute.xlu0 %2398 }
 0x467   : > { %2758 = vperm.xlu0 %7855, %v10174_v25  }
 0x46a   : > { %v10434_v13 = vpop.permute.xlu0 %2394 }
 0x46b   : > { %2742 = vperm.xlu0 %7855, %v6386_v50   ;;  %12867 = vst [vmem:[#allocation137_spill] sm:$0xff] %v10434_v13 }
 0x46f   : > { %7858 = vset.pattern.permute.xlu0 %v12659_v46  ;;  %v10432_v46 = vpop.permute.xlu1 %2494 }
 0x470   : > { %2274 = vperm.xlu0 %7858, %v8127_v5   ;;  %12866 = vst [vmem:[#allocation105_spill] sm:$0xff] %v10432_v46  ;;  %v10439_v5 = vpop.permute.xlu0 %2386 }
 0x471   : > { %12869 = vst [vmem:[#allocation106_spill] sm:$0xff] %v10439_v5 }
 0x473   : > { %v10437_v6 = vpop.permute.xlu1 %2770 }
 0x474   : > { %2254 = vperm.xlu0 %7858, %v8129_v60   ;;  %12868 = vst [vmem:[#allocation102_spill] sm:$0xff] %v10437_v6  ;;  %v10443_v22 = vpop.permute.xlu0 %2378 }
 0x475   : > { %12871 = vst [vmem:[#allocation114_spill] sm:$0xff] %v10443_v22 }
 0x478   : > { %2239 = vperm.xlu0 %7858, %v10093_v55   ;;  %v10441_v55 = vpop.permute.xlu1 %2214 }
 0x479   : > { %12870 = vst [vmem:[#allocation55_spill] sm:$0xff] %v10441_v55 }
 0x47c   : > { %2229 = vperm.xlu0 %7858, %v10151_v7  }
 0x480   : > { %2219 = vperm.xlu0 %7858, %v10174_v25  }
 0x484   : > { %2209 = vperm.xlu0 %7858, %v10333_v38  }
 0x488   : > { %2199 = vperm.xlu0 %7858, %v6386_v50  }
 0x491   : > { %v1992_v7 = vpop.xlane.xlu1 %1991 }
 0x492   : > { %v1993_v60 = vrot.slane %v1992_v7, 4 }
 0x493   : > { %v2032_v51 = vpop.xlane.xlu0 %2031 }
 0x494   : > { %v1994_v28 = vadd.f32 %v1993_v60, %v1992_v7  ;;  %v2033_v25 = vrot.slane %v2032_v51, 4  ;;  %v1945_v60 = vld [vmem:[#allocation7 + $0x8] sm:$0xff] }
 0x496   : > { %v2034_v52 = vadd.f32 %v2033_v25, %v2032_v51  ;;  %v1995_v44 = vrot.slane %v1994_v28, 2  ;;  %v1944_v25 = vld [vmem:[#allocation7] sm:$0xff] }
 0x498   : > { %v1996_v10 = vadd.f32 %v1995_v44, %v1994_v28  ;;  %v2035_v46 = vrot.slane %v2034_v52, 2 }
 0x49a   : > { %v1997_v32 = vrot.slane %v1996_v10, 1  ;;  %v2036_v38 = vadd.f32 %v2035_v46, %v2034_v52 }
 0x49b   : > { %v10445_v28 = vpop.permute.xlu0 %2370 }
 0x49c   : > { %v1998_v30 = vadd.f32 %v1997_v32, %v1996_v10  ;;  %v2037_v6 = vrot.slane %v2036_v38, 1  ;;  %12872 = vst [vmem:[#allocation108_spill] sm:$0xff] %v10445_v28 }
 0x49e   : > { %7567 = vpush %v1998_v30  ;;  %v2038_v50 = vadd.f32 %v2037_v6, %v2036_v38  ;;  %v1959_v6 = vld [vmem:[#allocation7 + $0x78] sm:$0xff]  ;;  %v1958_v38 = vld [vmem:[#allocation7 + $0x70] sm:$0xff] }
 0x49f   : > { %v10447_v44 = vpop.permute.xlu0 %2362 }
 0x4a0   : > { %7569 = vpush %v2038_v50  ;;  %12873 = vst [vmem:[#allocation58_spill] sm:$0xff] %v10447_v44 }
 0x4a4   : > { %v10449_v10 = vpop.permute.xlu0 %2650 }
 0x4a8   : > { %v10451_v30 = vpop.permute.xlu0 %2638 }
 0x4ac   : > { %v10453_v32 = vpop.permute.xlu0 %2630 }
 0x4ad   : > { %12874 = vst [vmem:[#allocation99_spill] sm:$0xff] %v10453_v32  ;;  %v1946_v32 = vld [vmem:[#allocation7 + $0x10] sm:$0xff] }
 0x4b0   : > { %v10457_v46 = vpop.permute.xlu0 %2622 }
 0x4b1   : > { %12875 = vst [vmem:[#allocation111_spill] sm:$0xff] %v10457_v46 }
 0x4b4   : > { %v10473_v15 = vpop.permute.xlu0 %2614 }
 0x4b5   : > { %12876 = vst [vmem:[#allocation116_spill] sm:$0xff] %v10473_v15 }
 0x4cf   : > { %s7568_s27 = spop %7567 }
 0x4d0   : > { %s2040_s26 = smul.f32 6.1035156e-05, %s7568_s27 }
 0x4d1   : > { %s7570_s3 = spop %7569 }
 0x4d2   : > { %s2042_s20 = smul.f32 %s2040_s26, %s2040_s26  ;;  %v10455_v52 = vstv %s2040_s26  ;;  %s699_s26 = sand.u32 1, %s8492_s25  }
 0x4d3   : > { %s2041_s17 = smul.f32 6.1035156e-05, %s7570_s3  ;;  %v2060_v50 = vsub.f32 %v10305_v34, %v10455_v52  ;;  %v2045_v44 = vsub.f32 %v10212_v2, %v10455_v52  ;;  %v2059_v28 = vsub.f32 %v10302_v29, %v10455_v52  ;;  %v1975_v34 = vld [vmem:[#allocation8 + $0x78] sm:$0xff] }
 0x4d5   : > { %s2043_s23 = ssub.f32 %s2041_s17, %s2042_s20 }
 0x4d7   : > { %s2061_s18 = sadd.f32 1e-05, %s2043_s23 }
 0x4d9   : > { %v2062_v7 = vstv %s2061_s18  ;;  %s8525_s18 = smov 96  }
 0x4da   : > { %7862 = vrsqrt.f32 %v2062_v7 }
 0x4e7   : > { %v7863_v51 = vpop.eup %7862 }
 0x4e8   : > { %7571 = vpush %v7863_v51  ;;  %v2046_v51 = vsub.f32 %v10207_v23, %v10455_v52 }
 0x519   : > { %s7572_s30 = spop %7571 }
 0x51a   : > { %v10461_v7 = vstv %s7572_s30  ;;  %s8526_s30 = smov 32  }
 0x51b   : > { %v2081_v55 = vmul.f32 %v10461_v7, %v1959_v6  ;;  %v2067_v22 = vmul.f32 %v10461_v7, %v1945_v60  ;;  %v2066_v5 = vmul.f32 %v10461_v7, %v1944_v25  ;;  %v2080_v46 = vmul.f32 %v10461_v7, %v1958_v38  ;;  %v1957_v6 = vld [vmem:[#allocation7 + $0x68] sm:$0xff]  ;;  %v1955_v60 = vld [vmem:[#allocation7 + $0x58] sm:$0xff]  ;;  %v1948_v25 = vld [vmem:[#allocation7 + $0x20] sm:$0xff] }
 0x51d   : > { %v2097_v13 = vmul.f32 %v2081_v55, %v2060_v50  ;;  %v10475_v23 = vmul.f32 %v2067_v22, %v2046_v51  ;;  %v10477_v19 = vmul.f32 %v2066_v5, %v2045_v44  ;;  %v2096_v2 = vmul.f32 %v2080_v46, %v2059_v28  ;;  %v10489_v5 = vpop.permute.xlu0 %2606  ;;  %v1973_v51 = vld [vmem:[#allocation8 + $0x68] sm:$0xff] }
 0x51e   : > { %v2047_v55 = vsub.f32 %v10224_v35, %v10455_v52  ;;  %12877 = vst [vmem:[#allocation126_spill] sm:$0xff] %v10489_v5  ;;  %v2058_v22 = vsub.f32 %v10295_v62, %v10455_v52  ;;  %v2056_v28 = vsub.f32 %v10274_v58, %v10455_v52  ;;  %v2049_v46 = vsub.f32 %v10237_v40, %v10455_v52  ;;  %v1954_v62 = vld [vmem:[#allocation7 + $0x50] sm:$0xff]  ;;  %v1967_v40 = vld [vmem:[#allocation8 + $0x38] sm:$0xff]  ;;  %v1952_v35 = vld [vmem:[#allocation7 + $0x40] sm:$0xff] }
 0x51f   : > { %v10479_v33 = vadd.f32 %v2097_v13, %v1975_v34  ;;  %v10481_v29 = vadd.f32 %v2096_v2, %v1974_v61  ;;  %v2079_v34 = vmul.f32 %v10461_v7, %v1957_v6  ;;  %v2077_v2 = vmul.f32 %v10461_v7, %v1955_v60  ;;  %v1971_v6 = vld [vmem:[#allocation8 + $0x58] sm:$0xff]  ;;  %v1956_v60 = vld [vmem:[#allocation7 + $0x60] sm:$0xff]  ;;  %v1965_v5 = vld [vmem:[#allocation8 + $0x28] sm:$0xff] }
 0x520   : > { %v2068_v61 = vmul.f32 %v10461_v7, %v1946_v32  ;;  %v2070_v13 = vmul.f32 %v10461_v7, %v1948_v25 }
 0x521   : > { %2195 = vrot.lane.b32.xlu1 %v10479_v33, %s8521_s22  ;;  %2353 = vrot.lane.b32.xlu0 %v10481_v29, %s8520_s21  ;;  %v2095_v32 = vmul.f32 %v2079_v34, %v2058_v22  ;;  %v2093_v38 = vmul.f32 %v2077_v2, %v2056_v28  ;;  %v10509_v25 = vpop.permute.xlu0 %2602  ;;  %v2078_v34 = vmul.f32 %v10461_v7, %v1956_v60  ;;  %v1953_v2 = vld [vmem:[#allocation7 + $0x48] sm:$0xff] }
 0x522   : > { %v10503_v44 = vmul.f32 %v2068_v61, %v2047_v55  ;;  %v10507_v50 = vmul.f32 %v2070_v13, %v2049_v46  ;;  %12878 = vst [vmem:[#allocation109_spill] sm:$0xff] %v10509_v25  ;;  %v2057_v13 = vsub.f32 %v10291_v27, %v10455_v52  ;;  %v2075_v46 = vmul.f32 %v10461_v7, %v1953_v2  ;;  %v1969_v60 = vld [vmem:[#allocation8 + $0x48] sm:$0xff] }
 0x523   : > { %v10515_v55 = vadd.f32 %v2095_v32, %v1973_v51  ;;  %v10517_v61 = vadd.f32 %v2093_v38, %v1971_v6  ;;  %v1972_v32 = vld [vmem:[#allocation8 + $0x60] sm:$0xff]  ;;  %v2054_v38 = vsub.f32 %v10265_v37, %v10455_v52  ;;  %v2076_v2 = vmul.f32 %v10461_v7, %v1954_v62 }
 0x524   : > { %v2094_v28 = vmul.f32 %v2078_v34, %v2057_v13  ;;  %v1951_v13 = vld [vmem:[#allocation7 + $0x38] sm:$0xff]  ;;  %v2052_v62 = vsub.f32 %v10250_v9, %v10455_v52  ;;  %v1949_v9 = vld [vmem:[#allocation7 + $0x28] sm:$0xff] }
 0x525   : > { %2355 = vrot.lane.b32.xlu1 %v10479_v33, %s8520_s21  ;;  %2595 = vrot.lane.b32.xlu0 %v10479_v33, %s8523_s24  ;;  %v10526_v22 = vpop.permute.xlu0 %2530  ;;  %v2091_v6 = vmul.f32 %v2075_v46, %v2054_v38 }
 0x526   : > { %v10535_v51 = vadd.f32 %v2094_v28, %v1972_v32  ;;  %v2055_v28 = vsub.f32 %v10277_v3, %v10455_v52  ;;  %v10554_v32 = vpop.permute.xlu1 %2490 }
 0x527   : > { %v10543_v34 = vadd.f32 %v2091_v6, %v1969_v60  ;;  %12881 = vst [vmem:[#allocation127_spill] sm:$0xff] %v10554_v32  ;;  %v2073_v6 = vmul.f32 %v10461_v7, %v1951_v13  ;;  %v1970_v60 = vld [vmem:[#allocation8 + $0x50] sm:$0xff]  ;;  %v1963_v32 = vld [vmem:[#allocation8 + $0x18] sm:$0xff] }
 0x528   : > { %v2092_v38 = vmul.f32 %v2076_v2, %v2055_v28  ;;  %v2074_v28 = vmul.f32 %v10461_v7, %v1952_v35  ;;  %v2050_v35 = vsub.f32 %v10234_v48, %v10455_v52  ;;  %v1947_v48 = vld [vmem:[#allocation7 + $0x18] sm:$0xff] }
 0x529   : > { %2593 = vrot.lane.b32.xlu0 %v10481_v29, %s8523_s24  ;;  %2193 = vrot.lane.b32.xlu1 %v10481_v29, %s8521_s22  ;;  %v10537_v27 = vpop.permute.xlu0 %2470  ;;  %12880 = vst [vmem:[#allocation113_spill] sm:$0xff] %v10543_v34  ;;  %v2089_v3 = vmul.f32 %v2073_v6, %v2052_v62 }
 0x52a   : > { %12879 = vst [vmem:[#allocation117_spill] sm:$0xff] %v10537_v27  ;;  %v10563_v58 = vadd.f32 %v2092_v38, %v1970_v60  ;;  %v10567_v2 = vpop.permute.xlu1 %2618  ;;  %v2053_v38 = vsub.f32 %v10259_v31, %v10455_v52 }
 0x52b   : > { %12882 = vst [vmem:[#allocation121_spill] sm:$0xff] %v10567_v2  ;;  %v10573_v13 = vadd.f32 %v2089_v3, %v1967_v40  ;;  %v2071_v40 = vmul.f32 %v10461_v7, %v1949_v9  ;;  %v1968_v3 = vld [vmem:[#allocation8 + $0x40] sm:$0xff] }
 0x52c   : > { %v2090_v62 = vmul.f32 %v2074_v28, %v2053_v38 }
 0x52d   : > { %2191 = vrot.lane.b32.xlu1 %v10515_v55, %s8521_s22  ;;  %2347 = vrot.lane.b32.xlu0 %v10517_v61, %s8520_s21  ;;  %v10552_v46 = vpop.permute.xlu0 %2802  ;;  %12883 = vst [vmem:[#allocation124_spill] sm:$0xff] %v10573_v13  ;;  %v2087_v31 = vmul.f32 %v2071_v40, %v2050_v35 }
 0x52e   : > { %v10584_v60 = vpop.permute.xlu1 %2366  ;;  %v10593_v25 = vadd.f32 %v2090_v62, %v1968_v3  ;;  %v2051_v62 = vsub.f32 %v10253_v21, %v10455_v52 }
 0x52f   : > { %12884 = vst [vmem:[#allocation103_spill] sm:$0xff] %v10584_v60  ;;  %v1950_v60 = vld [vmem:[#allocation7 + $0x30] sm:$0xff]  ;;  %v10603_v9 = vadd.f32 %v2087_v31, %v1965_v5  ;;  %v2069_v31 = vmul.f32 %v10461_v7, %v1947_v48 }
 0x530   : > { %12885 = vst [vmem:[#allocation129_spill] sm:$0xff] %v10593_v25  ;;  %v2072_v38 = vmul.f32 %v10461_v7, %v1950_v60  ;;  %v1966_v5 = vld [vmem:[#allocation8 + $0x30] sm:$0xff]  ;;  %v2048_v60 = vsub.f32 %v10219_v42, %v10455_v52  ;;  %v1960_v42 = vld [vmem:[#allocation8] sm:$0xff] }
 0x531   : > { %2351 = vrot.lane.b32.xlu1 %v10515_v55, %s8520_s21  ;;  %2737 = vrot.lane.b32.xlu0 %v10481_v29, %s8522_s19  ;;  %v10565_v37 = vpop.permute.xlu0 %2794  ;;  %12887 = vst [vmem:[#allocation130_spill] sm:$0xff] %v10603_v9 }
 0x532   : > { %v10597_v28 = vpop.permute.xlu1 %2486  ;;  %v2088_v35 = vmul.f32 %v2072_v38, %v2051_v62  ;;  %v2085_v21 = vmul.f32 %v2069_v31, %v2048_v60  ;;  %v1962_v38 = vld [vmem:[#allocation8 + $0x10] sm:$0xff]  ;;  %v1964_v62 = vld [vmem:[#allocation8 + $0x20] sm:$0xff] }
 0x533   : > { %12886 = vst [vmem:[#allocation119_spill] sm:$0xff] %v10597_v28  ;;  %v10659_v31 = vadd.f32 %v10507_v50, %v1964_v62 }
 0x534   : > { %v10623_v15 = vadd.f32 %v2088_v35, %v1966_v5  ;;  %v10633_v48 = vadd.f32 %v2085_v21, %v1963_v32  ;;  %v10648_v21 = vadd.f32 %v10503_v44, %v1962_v38  ;;  %v1961_v5 = vld [vmem:[#allocation8 + $0x8] sm:$0xff] }
 0x535   : > { %2189 = vrot.lane.b32.xlu1 %v10535_v51, %s8521_s22  ;;  %2589 = vrot.lane.b32.xlu0 %v10535_v51, %s8523_s24  ;;  %v10582_v6 = vpop.permute.xlu0 %2790  ;;  %v10668_v38 = vadd.f32 %v10475_v23, %v1961_v5 }
 0x536   : > { %v10614_v3 = vpop.permute.xlu1 %2762  ;;  %12890 = vst [vmem:[#allocation139_spill] sm:$0xff] %v10623_v15 }
 0x537   : > { %12889 = vst [vmem:[#allocation138_spill] sm:$0xff] %v10614_v3 }
 0x539   : > { %2349 = vrot.lane.b32.xlu1 %v10535_v51, %s8520_s21  ;;  %2343 = vrot.lane.b32.xlu0 %v10543_v34, %s8520_s21  ;;  %v10595_v27 = vpop.permute.xlu0 %2782 }
 0x53a   : > { %v10627_v3 = vpop.permute.xlu1 %2204 }
 0x53b   : > { %12892 = vst [vmem:[#allocation135_spill] sm:$0xff] %v10627_v3 }
 0x53d   : > { %2739 = vrot.lane.b32.xlu1 %v10479_v33, %s8522_s19  ;;  %2733 = vrot.lane.b32.xlu0 %v10535_v51, %s8522_s19  ;;  %v10612_v40 = vpop.permute.xlu0 %2774 }
 0x53e   : > { %12888 = vst [vmem:[#allocation110_spill] sm:$0xff] %v10612_v40  ;;  %v10641_v7 = vpop.permute.xlu1 %2482  ;;  %v2291_v40 = vmul.f32 %v9493_v47, %v10200_v24  ;;  %v2289_v24 = vmul.f32 %v9493_v47, %v10226_v63  ;;  %v2819_v63 = vmul.f32 %v9520_v16, %v10318_v1 }
 0x53f   : > { %12894 = vst [vmem:[#allocation78_spill] sm:$0xff] %v10641_v7 }
 0x541   : > { %2187 = vrot.lane.b32.xlu1 %v10517_v61, %s8521_s22  ;;  %2585 = vrot.lane.b32.xlu0 %v10563_v58, %s8523_s24  ;;  %v10625_v28 = vpop.permute.xlu0 %2766 }
 0x542   : > { %12891 = vst [vmem:[#allocation107_spill] sm:$0xff] %v10625_v28  ;;  %v10652_v35 = vpop.permute.xlu1 %2610  ;;  %v2436_v28 = vmul.f32 %v12799_v36, %v10198_v4 }
 0x543   : > { %12896 = vst [vmem:[#allocation83_spill] sm:$0xff] %v10652_v35 }
 0x545   : > { %2591 = vrot.lane.b32.xlu1 %v10515_v55, %s8523_s24  ;;  %2339 = vrot.lane.b32.xlu0 %v10573_v13, %s8520_s21  ;;  %v10639_v52 = vpop.permute.xlu0 %2758 }
 0x546   : > { %12893 = vst [vmem:[#allocation132_spill] sm:$0xff] %v10639_v52  ;;  %v10665_v60 = vpop.permute.xlu1 %2358 }
 0x547   : > { %12897 = vst [vmem:[#allocation63_spill] sm:$0xff] %v10665_v60 }
 0x549   : > { %2185 = vrot.lane.b32.xlu1 %v10563_v58, %s8521_s22  ;;  %2729 = vrot.lane.b32.xlu0 %v10563_v58, %s8522_s19  ;;  %v10650_v32 = vpop.permute.xlu0 %2742 }
 0x54a   : > { %12895 = vst [vmem:[#allocation95_spill] sm:$0xff] %v10650_v32  ;;  %v10676_v62 = vpop.permute.xlu1 %2478  ;;  %v10695_v32 = vadd.f32 %v10477_v19, %v1960_v42  ;;  %v6419_v19 = vld [vmem:[%s12438_s6 + $0x88] sm:$0xff] }
 0x54b   : > { %12898 = vst [vmem:[#allocation131_spill] sm:$0xff] %v10676_v62 }
 0x54d   : > { %2345 = vrot.lane.b32.xlu1 %v10563_v58, %s8520_s21  ;;  %2581 = vrot.lane.b32.xlu0 %v10593_v25, %s8523_s24  ;;  %v2275_v44 = vpop.permute.xlu0 %2274 }
 0x54e   : > { %v10688_v5 = vpop.permute.xlu1 %2754 }
 0x54f   : > { %12900 = vst [vmem:[#allocation82_spill] sm:$0xff] %v10688_v5 }
 0x551   : > { %2735 = vrot.lane.b32.xlu1 %v10515_v55, %s8522_s19  ;;  %2335 = vrot.lane.b32.xlu0 %v10603_v9, %s8520_s21  ;;  %v10674_v50 = vpop.permute.xlu0 %2254 }
 0x552   : > { %v10699_v35 = vpop.permute.xlu1 %2474  ;;  %v2288_v1 = vmul.f32 %v9493_v47, %v10674_v50 }
 0x553   : > { %12902 = vst [vmem:[#allocation64_spill] sm:$0xff] %v10699_v35  ;;  %v6422_v35 = vld [vmem:[%s12438_s6 + $0xa0] sm:$0xff] }
 0x555   : > { %2183 = vrot.lane.b32.xlu1 %v10543_v34, %s8521_s22  ;;  %2725 = vrot.lane.b32.xlu0 %v10593_v25, %s8522_s19  ;;  %v10686_v23 = vpop.permute.xlu0 %2239 }
 0x556   : > { %12899 = vst [vmem:[#allocation89_spill] sm:$0xff] %v10686_v23  ;;  %v10709_v5 = vpop.permute.xlu1 %2750 }
 0x557   : > { %12903 = vst [vmem:[#allocation57_spill] sm:$0xff] %v10709_v5  ;;  %v6424_v5 = vld [vmem:[%s12438_s6 + $0xb0] sm:$0xff] }
 0x559   : > { %2587 = vrot.lane.b32.xlu1 %v10517_v61, %s8523_s24  ;;  %2577 = vrot.lane.b32.xlu0 %v10623_v15, %s8523_s24  ;;  %v10697_v62 = vpop.permute.xlu0 %2229 }
 0x55a   : > { %12901 = vst [vmem:[#allocation115_spill] sm:$0xff] %v10697_v62  ;;  %v10721_v3 = vpop.permute.xlu1 %2598 }
 0x55b   : > { %12905 = vst [vmem:[#allocation88_spill] sm:$0xff] %v10721_v3  ;;  %v6426_v3 = vld [vmem:[%s12438_s6 + $0xc0] sm:$0xff] }
 0x55d   : > { %2181 = vrot.lane.b32.xlu1 %v10593_v25, %s8521_s22  ;;  %2331 = vrot.lane.b32.xlu0 %v10633_v48, %s8520_s21  ;;  %v10711_v42 = vpop.permute.xlu0 %2219 }
 0x55e   : > { %12904 = vst [vmem:[#allocation80_spill] sm:$0xff] %v10711_v42 }
 0x561   : > { %2341 = vrot.lane.b32.xlu1 %v10593_v25, %s8520_s21  ;;  %2721 = vrot.lane.b32.xlu0 %v10623_v15, %s8522_s19  ;;  %v10723_v60 = vpop.permute.xlu0 %2209 }
 0x562   : > { %12906 = vst [vmem:[#allocation92_spill] sm:$0xff] %v10723_v60 }
 0x565   : > { %2731 = vrot.lane.b32.xlu1 %v10517_v61, %s8522_s19  ;;  %2169 = vrot.lane.b32.xlu0 %v10648_v21, %s8521_s22  ;;  %v10734_v7 = vpop.permute.xlu0 %2199 }
 0x566   : > { %12908 = vst [vmem:[#allocation112_spill] sm:$0xff] %v10734_v7 }
 0x569   : > { %2179 = vrot.lane.b32.xlu1 %v10573_v13, %s8521_s22  ;;  %2573 = vrot.lane.b32.xlu0 %v10659_v31, %s8523_s24 }
 0x56d   : > { %2583 = vrot.lane.b32.xlu1 %v10543_v34, %s8523_s24  ;;  %2167 = vrot.lane.b32.xlu0 %v10668_v38, %s8521_s22 }
 0x571   : > { %2177 = vrot.lane.b32.xlu1 %v10623_v15, %s8521_s22  ;;  %2571 = vrot.lane.b32.xlu0 %v10633_v48, %s8523_s24 }
 0x575   : > { %2337 = vrot.lane.b32.xlu1 %v10623_v15, %s8520_s21  ;;  %2569 = vrot.lane.b32.xlu0 %v10648_v21, %s8523_s24  ;;  %v2292_v15 = vmul.f32 %v9493_v47, %v2275_v44 }
 0x579   : > { %2727 = vrot.lane.b32.xlu1 %v10543_v34, %s8522_s19  ;;  %2567 = vrot.lane.b32.xlu0 %v10668_v38, %s8523_s24 }
 0x57d   : > { %2175 = vrot.lane.b32.xlu1 %v10603_v9, %s8521_s22  ;;  %2565 = vrot.lane.b32.xlu0 %v10695_v32, %s8523_s24 }
 0x581   : > { %2579 = vrot.lane.b32.xlu1 %v10573_v13, %s8523_s24  ;;  %2709 = vrot.lane.b32.xlu0 %v10695_v32, %s8522_s19 }
 0x585   : > { %2173 = vrot.lane.b32.xlu1 %v10659_v31, %s8521_s22  ;;  %2860 = vperm.xlu0 %7858, %v6419_v19   ;;  %v10732_v19 = vpop.permute.xlu1 %2746 }
 0x586   : > { %12907 = vst [vmem:[#allocation122_spill] sm:$0xff] %v10732_v19 }
 0x589   : > { %2333 = vrot.lane.b32.xlu1 %v10659_v31, %s8520_s21  ;;  %2875 = vperm.xlu0 %7858, %v6422_v35   ;;  %v6428_v35 = vld [vmem:[%s12438_s6 + $0xd0] sm:$0xff] }
 0x58d   : > { %2723 = vrot.lane.b32.xlu1 %v10573_v13, %s8522_s19  ;;  %2885 = vperm.xlu0 %7858, %v6424_v5   ;;  %v6430_v5 = vld [vmem:[%s12438_s6 + $0xe0] sm:$0xff] }
 0x591   : > { %2171 = vrot.lane.b32.xlu1 %v10633_v48, %s8521_s22  ;;  %2895 = vperm.xlu0 %7858, %v6426_v3   ;;  %v6432_v3 = vld [vmem:[%s12438_s6 + $0xf0] sm:$0xff] }
 0x593   : > { %v2196_v60 = vpop.permute.xlu1 %2195  ;;  %v2354_v52 = vpop.permute.xlu0 %2353 }
 0x595   : > { %2575 = vrot.lane.b32.xlu1 %v10603_v9, %s8523_s24  ;;  %2905 = vperm.xlu0 %7858, %v6428_v35  }
 0x597   : > { %v2356_v19 = vpop.permute.xlu1 %2355  ;;  %v2596_v7 = vpop.permute.xlu0 %2595 }
 0x599   : > { %2329 = vrot.lane.b32.xlu1 %v10648_v21, %s8520_s21  ;;  %2915 = vperm.xlu0 %7858, %v6430_v5   ;;  %v2452_v5 = vmul.f32 %v2436_v28, %v2356_v19  ;;  %v2548_v28 = vmul.f32 %v10526_v22, %v10479_v33  ;;  %v2547_v33 = vmul.f32 %v10243_v53, %v10481_v29 }
 0x59a   : > { %v2675_v19 = vmul.f32 %v12788_v56, %v10268_v18  ;;  %v2545_v29 = vmul.f32 %v10322_v11, %v10535_v51  ;;  %v2817_v18 = vmul.f32 %v9520_v16, %v10582_v6 }
 0x59b   : > { %v2194_v42 = vpop.permute.xlu1 %2193  ;;  %v2594_v2 = vpop.permute.xlu0 %2593 }
 0x59c   : > { %v2307_v4 = vmul.f32 %v2291_v40, %v2194_v42 }
 0x59d   : > { %2719 = vrot.lane.b32.xlu1 %v10603_v9, %s8522_s19  ;;  %2925 = vperm.xlu0 %7858, %v6432_v3   ;;  %v2308_v9 = vmul.f32 %v2292_v15, %v2196_v60  ;;  %v2435_v3 = vmul.f32 %v12799_v36, %v10416_v12  ;;  %v2433_v15 = vmul.f32 %v12799_v36, %v10423_v39 }
 0x59e   : > { %v2676_v12 = vmul.f32 %v12788_v56, %v10209_v59  ;;  %v2673_v39 = vmul.f32 %v12788_v56, %v10325_v43  ;;  %v2820_v59 = vmul.f32 %v9520_v16, %v10552_v46  ;;  %v2691_v43 = vmul.f32 %v2675_v19, %v2594_v2  ;;  %v6402_v2 = vld [vmem:[%s12437_s5 + $0x80] sm:$0xff] }
 0x59f   : > { %v10756_v35 = vpop.permute.xlu1 %2191  ;;  %v2348_v13 = vpop.permute.xlu0 %2347  ;;  %v2468_v25 = vadd.f32 %v2452_v5, %v2308_v9  ;;  %v2451_v23 = vmul.f32 %v2435_v3, %v2354_v52  ;;  %v2432_v46 = vmul.f32 %v12799_v36, %v10286_v17  ;;  %6977 = vmatprep.mubr.f32.mxu1 %v6402_v2 }
 0x5a1   : > { %2327 = vrot.lane.b32.xlu1 %v10668_v38, %s8520_s21  ;;  %v2467_v60 = vadd.f32 %v2451_v23, %v2307_v4  ;;  %v2564_v9 = vadd.f32 %v2548_v28, %v2468_v25  ;;  %v2692_v23 = vmul.f32 %v2676_v12, %v2596_v7 }
 0x5a3   : > { %v10763_v34 = vpop.permute.xlu1 %2351  ;;  %v2738_v62 = vpop.permute.xlu0 %2737  ;;  %v2563_v25 = vadd.f32 %v2547_v33, %v2467_v60  ;;  %v2708_v5 = vadd.f32 %v2692_v23, %v2564_v9  ;;  %v2448_v60 = vmul.f32 %v2432_v46, %v2348_v13  ;;  %v2544_v9 = vmul.f32 %v10342_v57, %v10517_v61 }
 0x5a4   : > { %v2835_v4 = vmul.f32 %v2819_v63, %v2738_v62  ;;  %v2434_v33 = vmul.f32 %v12799_v36, %v10204_v0  ;;  %v2287_v57 = vmul.f32 %v9493_v47, %v10320_v14  ;;  %v2431_v0 = vmul.f32 %v12799_v36, %v10429_v45 }
 0x5a5   : > { %2717 = vrot.lane.b32.xlu1 %v10659_v31, %s8522_s19  ;;  %v2707_v11 = vadd.f32 %v2691_v43, %v2563_v25  ;;  %v2674_v61 = vmul.f32 %v12788_v56, %v10449_v10  ;;  %v2818_v14 = vmul.f32 %v9520_v16, %v10565_v37  ;;  %v2543_v45 = vmul.f32 %v10366_v8, %v10563_v58 }
 0x5a6   : > { %v2450_v19 = vmul.f32 %v2434_v33, %v10763_v34  ;;  %v2815_v10 = vmul.f32 %v9520_v16, %v10595_v27  ;;  %v6418_v27 = vld [vmem:[%s12438_s6 + $0x80] sm:$0xff] }
 0x5a7   : > { %v2190_v44 = vpop.permute.xlu1 %2189  ;;  %v2590_v41 = vpop.permute.xlu0 %2589  ;;  %v2851_v62 = vadd.f32 %v2835_v4, %v2707_v11  ;;  %v2672_v11 = vmul.f32 %v12788_v56, %v10351_v54 }
 0x5a8   : > { %v2305_v22 = vmul.f32 %v2289_v24, %v2190_v44  ;;  %v2689_v44 = vmul.f32 %v2673_v39, %v2590_v41 }
 0x5a9   : > { %2165 = vrot.lane.b32.xlu1 %v10695_v32, %s8521_s22 }
 0x5ab   : > { %v2350_v40 = vpop.permute.xlu1 %2349  ;;  %v10781_v42 = vpop.permute.xlu0 %2343 }
 0x5ac   : > { %v2449_v52 = vmul.f32 %v2433_v15, %v2350_v40 }
 0x5ad   : > { %2325 = vrot.lane.b32.xlu1 %v10695_v32, %s8520_s21 }
 0x5ae   : > { %v2465_v53 = vadd.f32 %v2449_v52, %v2305_v22  ;;  %v2290_v52 = vmul.f32 %v9493_v47, %v10202_v49  ;;  %v2546_v49 = vmul.f32 %v10310_v20, %v10515_v55 }
 0x5af   : > { %v2740_v7 = vpop.permute.xlu1 %2739  ;;  %v2734_v3 = vpop.permute.xlu0 %2733 }
 0x5b0   : > { %v2561_v28 = vadd.f32 %v2545_v29, %v2465_v53  ;;  %v2836_v24 = vmul.f32 %v2820_v59, %v2740_v7  ;;  %v2833_v15 = vmul.f32 %v2817_v18, %v2734_v3  ;;  %v2306_v39 = vmul.f32 %v2290_v52, %v10756_v35  ;;  %v6421_v52 = vld [vmem:[%s12438_s6 + $0x98] sm:$0xff] }
 0x5b1   : > { %2715 = vrot.lane.b32.xlu1 %v10633_v48, %s8522_s19  ;;  %v2671_v35 = vmul.f32 %v12788_v56, %v10451_v30 }
 0x5b2   : > { %v2852_v51 = vadd.f32 %v2836_v24, %v2708_v5  ;;  %v2705_v6 = vadd.f32 %v2689_v44, %v2561_v28  ;;  %v2466_v59 = vadd.f32 %v2450_v19, %v2306_v39  ;;  %v12914_v19 = vld [vmem:[#allocation110_spill] sm:$0xff] }
 0x5b3   : > { %v2188_v50 = vpop.permute.xlu1 %2187  ;;  %v2586_v13 = vpop.permute.xlu0 %2585 }
 0x5b4   : > { %v2849_v41 = vadd.f32 %v2833_v15, %v2705_v6  ;;  %v2304_v12 = vmul.f32 %v2288_v1, %v2188_v50  ;;  %6945 = vmatprep.subr.mxu1 %v2852_v51  ;;  %v2562_v18 = vadd.f32 %v2546_v49, %v2466_v59  ;;  %v2687_v20 = vmul.f32 %v2671_v35, %v2586_v13  ;;  %v12909_v6 = vld [vmem:[#allocation89_spill] sm:$0xff] }
 0x5b5   : > { %2713 = vrot.lane.b32.xlu1 %v10648_v21, %s8522_s19  ;;  %6946 = vmatpush3.msra.mxu1 %v2852_v51  ;;  %v2429_v51 = vmul.f32 %v12799_v36, %v10361_v26  ;;  %v2285_v15 = vmul.f32 %v9493_v47, %v12909_v6  ;;  %v12912_v26 = vld [vmem:[#allocation129_spill] sm:$0xff] }
 0x5b6   : > { %v2464_v17 = vadd.f32 %v2448_v60, %v2304_v12  ;;  %6947 = vmatprep.subr.mxu1 %v2851_v62  ;;  %v6420_v60 = vld [vmem:[%s12438_s6 + $0x90] sm:$0xff]  ;;  %v12910_v12 = vld [vmem:[#allocation74_spill] sm:$0xff] }
 0x5b7   : > { %v2592_v40 = vpop.permute.xlu1 %2591  ;;  %6948 = vmatpush3.msra.mxu1 %v2851_v62  ;;  %v10820_v23 = vpop.permute.xlu0 %2339 }
 0x5b8   : > { %v2560_v22 = vadd.f32 %v2544_v9, %v2464_v17  ;;  %v2690_v34 = vmul.f32 %v2674_v61, %v2592_v40  ;;  %v2816_v17 = vmul.f32 %v9520_v16, %v12910_v12  ;;  %v12911_v9 = vld [vmem:[#allocation99_spill] sm:$0xff] }
 0x5b9   : > { %2711 = vrot.lane.b32.xlu1 %v10668_v38, %s8522_s19  ;;  %v2669_v54 = vmul.f32 %v12788_v56, %v12911_v9  ;;  %v12913_v40 = vld [vmem:[#allocation123_spill] sm:$0xff] }
 0x5ba   : > { %v2706_v55 = vadd.f32 %v2690_v34, %v2562_v18  ;;  %v2541_v33 = vmul.f32 %v12913_v40, %v12912_v26  ;;  %v6431_v40 = vld [vmem:[%s12438_s6 + $0xe8] sm:$0xff] }
 0x5bb   : > { %v2186_v63 = vpop.permute.xlu1 %2185  ;;  %v2730_v5 = vpop.permute.xlu0 %2729 }
 0x5bc   : > { %v2303_v53 = vmul.f32 %v2287_v57, %v2186_v63  ;;  %v2831_v4 = vmul.f32 %v2815_v10, %v2730_v5  ;;  %v2813_v63 = vmul.f32 %v9520_v16, %v12914_v19  ;;  %v12916_v5 = vld [vmem:[#allocation137_spill] sm:$0xff] }
 0x5bd   : > { %2855 = vperm.xlu1 %7859, %v6418_v27   ;;  %v6429_v27 = vld [vmem:[%s12438_s6 + $0xd8] sm:$0xff] }
 0x5bf   : > { %v2346_v25 = vpop.permute.xlu1 %2345  ;;  %v2582_v24 = vpop.permute.xlu0 %2581 }
 0x5c0   : > { %v2447_v29 = vmul.f32 %v2431_v0, %v2346_v25  ;;  %v2685_v0 = vmul.f32 %v2669_v54, %v2582_v24  ;;  %v12924_v54 = vld [vmem:[#allocation139_spill] sm:$0xff] }
 0x5c1   : > { %2865 = vperm.xlu1 %7859, %v6420_v60  }
 0x5c2   : > { %v2463_v1 = vadd.f32 %v2447_v29, %v2303_v53  ;;  %v6423_v29 = vld [vmem:[%s12438_s6 + $0xa8] sm:$0xff] }
 0x5c3   : > { %v2736_v43 = vpop.permute.xlu1 %2735  ;;  %v10841_v8 = vpop.permute.xlu0 %2335 }
 0x5c4   : > { %v2559_v7 = vadd.f32 %v2543_v45, %v2463_v1  ;;  %v2834_v3 = vmul.f32 %v2818_v14, %v2736_v43  ;;  %v12915_v45 = vld [vmem:[#allocation59_spill] sm:$0xff]  ;;  %v2430_v43 = vmul.f32 %v12799_v36, %v12916_v5 }
 0x5c5   : > { %2870 = vperm.xlu1 %7859, %v6421_v52   ;;  %v2286_v10 = vmul.f32 %v9493_v47, %v12915_v45  ;;  %v12928_v45 = vld [vmem:[#allocation106_spill] sm:$0xff] }
 0x5c6   : > { %v2850_v44 = vadd.f32 %v2834_v3, %v2706_v55  ;;  %v2703_v30 = vadd.f32 %v2687_v20, %v2559_v7  ;;  %v6427_v55 = vld [vmem:[%s12438_s6 + $0xc8] sm:$0xff]  ;;  %v2446_v3 = vmul.f32 %v2430_v43, %v10781_v42  ;;  %v12921_v42 = vld [vmem:[#allocation76_spill] sm:$0xff] }
 0x5c7   : > { %v2184_v28 = vpop.permute.xlu1 %2183  ;;  %v2726_v39 = vpop.permute.xlu0 %2725 }
 0x5c8   : > { %6949 = vmatprep.subr.mxu1 %v2850_v44  ;;  %v2847_v37 = vadd.f32 %v2831_v4, %v2703_v30  ;;  %v2829_v49 = vmul.f32 %v2813_v63, %v2726_v39  ;;  %v2302_v20 = vmul.f32 %v2286_v10, %v2184_v28  ;;  %v2428_v10 = vmul.f32 %v12799_v36, %v12928_v45 }
 0x5c9   : > { %6950 = vmatpush3.msra.mxu1 %v2850_v44  ;;  %2880 = vperm.xlu1 %7859, %v6423_v29   ;;  %v12917_v44 = vld [vmem:[#allocation68_spill] sm:$0xff] }
 0x5ca   : > { %6951 = vmatprep.subr.mxu1 %v2849_v41  ;;  %v2670_v30 = vmul.f32 %v12788_v56, %v12917_v44  ;;  %v2462_v28 = vadd.f32 %v2446_v3, %v2302_v20  ;;  %v2444_v20 = vmul.f32 %v2428_v10, %v10820_v23  ;;  %v12933_v23 = vld [vmem:[#allocation101_spill] sm:$0xff] }
 0x5cb   : > { %v2588_v46 = vpop.permute.xlu1 %2587  ;;  %6952 = vmatpush3.msra.mxu1 %v2849_v41  ;;  %v2578_v18 = vpop.permute.xlu0 %2577 }
 0x5cc   : > { %v2688_v2 = vmul.f32 %v2672_v11, %v2588_v46  ;;  %v12919_v46 = vld [vmem:[#allocation115_spill] sm:$0xff] }
 0x5ce   : > { %v2704_v61 = vadd.f32 %v2688_v2, %v2560_v22  ;;  %v6425_v22 = vld [vmem:[%s12438_s6 + $0xb8] sm:$0xff]  ;;  %v12922_v2 = vld [vmem:[#allocation100_spill] sm:$0xff] }
 0x5cf   : > { %v2182_v58 = vpop.permute.xlu1 %2181  ;;  %2890 = vperm.xlu1 %7859, %v6425_v22   ;;  %v10877_v4 = vpop.permute.xlu0 %2331 }
 0x5d0   : > { %v2301_v62 = vmul.f32 %v2285_v15, %v2182_v58  ;;  %v2283_v58 = vmul.f32 %v9493_v47, %v12919_v46 }
 0x5d3   : > { %v2342_v50 = vpop.permute.xlu1 %2341  ;;  %2900 = vperm.xlu1 %7859, %v6427_v55   ;;  %v2722_v19 = vpop.permute.xlu0 %2721  ;;  %v12929_v55 = vld [vmem:[#allocation54_spill] sm:$0xff] }
 0x5d4   : > { %v2445_v41 = vmul.f32 %v2429_v51, %v2342_v50  ;;  %v12920_v51 = vld [vmem:[#allocation113_spill] sm:$0xff] }
 0x5d5   : > { %v2542_v6 = vmul.f32 %v12921_v42, %v12920_v51 }
 0x5d6   : > { %v2461_v13 = vadd.f32 %v2445_v41, %v2301_v62  ;;  %v2814_v62 = vmul.f32 %v9520_v16, %v12922_v2  ;;  %v12923_v41 = vld [vmem:[#allocation111_spill] sm:$0xff] }
 0x5d7   : > { %v2732_v57 = vpop.permute.xlu1 %2731  ;;  %2910 = vperm.xlu1 %7859, %v6429_v27   ;;  %v2667_v12 = vmul.f32 %v12788_v56, %v12923_v41 }
 0x5d8   : > { %v2557_v59 = vadd.f32 %v2541_v33, %v2461_v13  ;;  %v2832_v25 = vmul.f32 %v2816_v17, %v2732_v57  ;;  %v2558_v17 = vadd.f32 %v2542_v6, %v2462_v28  ;;  %v12925_v13 = vld [vmem:[#allocation105_spill] sm:$0xff]  ;;  %v12926_v33 = vld [vmem:[#allocation107_spill] sm:$0xff] }
 0x5d9   : > { %v2539_v26 = vmul.f32 %v12925_v13, %v12924_v54  ;;  %v2811_v52 = vmul.f32 %v9520_v16, %v12926_v33  ;;  %v2683_v39 = vmul.f32 %v2667_v12, %v2578_v18  ;;  %v12927_v18 = vld [vmem:[#allocation62_spill] sm:$0xff]  ;;  %v12936_v54 = vld [vmem:[#allocation121_spill] sm:$0xff]  ;;  %v12937_v33 = vld [vmem:[#allocation80_spill] sm:$0xff] }
 0x5da   : > { %v2848_v34 = vadd.f32 %v2832_v25, %v2704_v61  ;;  %v2701_v53 = vadd.f32 %v2685_v0, %v2557_v59  ;;  %v2666_v13 = vmul.f32 %v12788_v56, %v12936_v54 }
 0x5db   : > { %v2180_v35 = vpop.permute.xlu1 %2179  ;;  %2920 = vperm.xlu1 %7859, %v6431_v40   ;;  %v2827_v59 = vmul.f32 %v2811_v52, %v2722_v19  ;;  %v2281_v52 = vmul.f32 %v9493_v47, %v12937_v33  ;;  %v12952_v33 = vld [vmem:[#allocation83_spill] sm:$0xff] }
 0x5dc   : > { %6953 = vmatprep.subr.mxu1 %v2848_v34  ;;  %v2845_v14 = vadd.f32 %v2829_v49, %v2701_v53 }
 0x5dd   : > { %6954 = vmatpush3.msra.mxu1 %v2848_v34  ;;  %v6433_v34 = vld [vmem:[%s12438_s6 + $0xf8] sm:$0xff] }
 0x5de   : > { %6955 = vmatprep.subr.mxu1 %v2847_v37 }
 0x5df   : > { %v2584_v1 = vpop.permute.xlu1 %2583  ;;  %6956 = vmatpush3.msra.mxu1 %v2847_v37  ;;  %v12918_v37 = vld [vmem:[#allocation98_spill] sm:$0xff]  ;;  %2930 = vperm.xlu1 %7859, %v6433_v34  }
 0x5e0   : > { %v2427_v24 = vmul.f32 %v12799_v36, %v12918_v37  ;;  %v2686_v15 = vmul.f32 %v2670_v30, %v2584_v1  ;;  %v2284_v1 = vmul.f32 %v9493_v47, %v12927_v18  ;;  %v12930_v30 = vld [vmem:[#allocation124_spill] sm:$0xff]  ;;  %v12941_v18 = vld [vmem:[#allocation119_spill] sm:$0xff] }
 0x5e1   : > { %v12931_v37 = vld [vmem:[#allocation104_spill] sm:$0xff] }
 0x5e2   : > { %v2702_v57 = vadd.f32 %v2686_v15, %v2558_v17  ;;  %v2300_v5 = vmul.f32 %v2284_v1, %v2180_v35  ;;  %v2170_v35 = vpop.permute.xlu0 %2169  ;;  %v2282_v15 = vmul.f32 %v9493_v47, %v12933_v23  ;;  %v12935_v17 = vld [vmem:[#allocation120_spill] sm:$0xff]  ;;  %v2537_v1 = vmul.f32 %v12941_v18, %v10659_v31 }
 0x5e3   : > { %v2178_v7 = vpop.permute.xlu1 %2177 }
 0x5e4   : > { %v2299_v60 = vmul.f32 %v2283_v58, %v2178_v7  ;;  %v2668_v7 = vmul.f32 %v12788_v56, %v12929_v55  ;;  %v2460_v3 = vadd.f32 %v2444_v20, %v2300_v5  ;;  %v12942_v20 = vld [vmem:[#allocation116_spill] sm:$0xff] }
 0x5e5   : > { %v2665_v55 = vmul.f32 %v12788_v56, %v12942_v20 }
 0x5e7   : > { %v2338_v11 = vpop.permute.xlu1 %2337 }
 0x5e8   : > { %v2443_v50 = vmul.f32 %v2427_v24, %v2338_v11  ;;  %v2540_v24 = vmul.f32 %v12931_v37, %v12930_v30 }
 0x5ea   : > { %v2459_v9 = vadd.f32 %v2443_v50, %v2299_v60  ;;  %v2556_v28 = vadd.f32 %v2540_v24, %v2460_v3  ;;  %v12934_v60 = vld [vmem:[#allocation114_spill] sm:$0xff]  ;;  %v12943_v3 = vld [vmem:[#allocation55_spill] sm:$0xff]  ;;  %v12945_v24 = vld [vmem:[#allocation108_spill] sm:$0xff] }
 0x5eb   : > { %v2728_v63 = vpop.permute.xlu1 %2727  ;;  %v2426_v50 = vmul.f32 %v12799_v36, %v12934_v60 }
 0x5ec   : > { %v2555_v0 = vadd.f32 %v2539_v26, %v2459_v9  ;;  %v2830_v61 = vmul.f32 %v2814_v62, %v2728_v63  ;;  %v2574_v62 = vpop.permute.xlu0 %2573  ;;  %v2425_v9 = vmul.f32 %v12799_v36, %v12935_v17  ;;  %v12938_v63 = vld [vmem:[#allocation130_spill] sm:$0xff] }
 0x5ed   : > { %v2442_v12 = vmul.f32 %v2426_v50, %v10841_v8  ;;  %v2681_v37 = vmul.f32 %v2665_v55, %v2574_v62  ;;  %v12947_v50 = vld [vmem:[#allocation92_spill] sm:$0xff] }
 0x5ee   : > { %v2846_v25 = vadd.f32 %v2830_v61, %v2702_v57  ;;  %v2699_v49 = vadd.f32 %v2683_v39, %v2555_v0  ;;  %v12939_v39 = vld [vmem:[#allocation127_spill] sm:$0xff] }
 0x5ef   : > { %v2176_v53 = vpop.permute.xlu1 %2175  ;;  %v2538_v57 = vmul.f32 %v12939_v39, %v12938_v63  ;;  %v12953_v39 = vld [vmem:[#allocation112_spill] sm:$0xff] }
 0x5f0   : > { %6957 = vmatprep.subr.mxu1 %v2846_v25  ;;  %v2843_v29 = vadd.f32 %v2827_v59, %v2699_v49  ;;  %v2298_v2 = vmul.f32 %v2282_v15, %v2176_v53  ;;  %v2168_v61 = vpop.permute.xlu0 %2167  ;;  %v12940_v59 = vld [vmem:[#allocation138_spill] sm:$0xff] }
 0x5f1   : > { %6958 = vmatpush3.msra.mxu1 %v2846_v25  ;;  %v2810_v8 = vmul.f32 %v9520_v16, %v12940_v59 }
 0x5f2   : > { %6959 = vmatprep.subr.mxu1 %v2845_v14  ;;  %v2458_v26 = vadd.f32 %v2442_v12, %v2298_v2  ;;  %v2279_v2 = vmul.f32 %v9493_v47, %v12947_v50  ;;  %v12949_v12 = vld [vmem:[#allocation58_spill] sm:$0xff]  ;;  %v12963_v50 = vld [vmem:[#allocation95_spill] sm:$0xff] }
 0x5f3   : > { %v2580_v22 = vpop.permute.xlu1 %2579  ;;  %6960 = vmatpush3.msra.mxu1 %v2845_v14  ;;  %v12932_v14 = vld [vmem:[#allocation102_spill] sm:$0xff]  ;;  %v2422_v17 = vmul.f32 %v12799_v36, %v12949_v12 }
 0x5f4   : > { %v2684_v46 = vmul.f32 %v2668_v7, %v2580_v22  ;;  %v2812_v58 = vmul.f32 %v9520_v16, %v12932_v14  ;;  %v2554_v49 = vadd.f32 %v2538_v57, %v2458_v26  ;;  %v2572_v10 = vpop.permute.xlu0 %2571  ;;  %v2295_v54 = vmul.f32 %v2279_v2, %v2170_v35 }
 0x5f5   : > { %v2805_v2 = vmul.f32 %v9520_v16, %v12963_v50 }
 0x5f6   : > { %v2700_v11 = vadd.f32 %v2684_v46, %v2556_v28  ;;  %v2424_v46 = vmul.f32 %v12799_v36, %v12945_v24 }
 0x5f7   : > { %v2174_v43 = vpop.permute.xlu1 %2173 }
 0x5f8   : > { %v2297_v25 = vmul.f32 %v2281_v52, %v2174_v43  ;;  %v12944_v43 = vld [vmem:[#allocation132_spill] sm:$0xff]  ;;  %v2664_v52 = vmul.f32 %v12788_v56, %v12952_v33  ;;  %v6409_v33 = vld [vmem:[%s12437_s5 + $0xb8] sm:$0xff] }
 0x5f9   : > { %v2809_v30 = vmul.f32 %v9520_v16, %v12944_v43 }
 0x5fb   : > { %v2334_v44 = vpop.permute.xlu1 %2333 }
 0x5fc   : > { %v2441_v19 = vmul.f32 %v2425_v9, %v2334_v44  ;;  %v2280_v44 = vmul.f32 %v9493_v47, %v12943_v3  ;;  %v12958_v3 = vld [vmem:[#allocation64_spill] sm:$0xff] }
 0x5fe   : > { %v2457_v53 = vadd.f32 %v2441_v19, %v2297_v25  ;;  %v12954_v25 = vld [vmem:[#allocation82_spill] sm:$0xff] }
 0x5ff   : > { %v2724_v27 = vpop.permute.xlu1 %2723 }
 0x600   : > { %v2828_v51 = vmul.f32 %v2812_v58, %v2724_v27  ;;  %v2553_v7 = vadd.f32 %v2537_v1, %v2457_v53  ;;  %v2440_v27 = vmul.f32 %v2424_v46, %v10877_v4  ;;  %v12950_v4 = vld [vmem:[#allocation63_spill] sm:$0xff]  ;;  %v12961_v46 = vld [vmem:[#allocation88_spill] sm:$0xff] }
 0x601   : > { %v2421_v9 = vmul.f32 %v12799_v36, %v12950_v4  ;;  %v6403_v4 = vld [vmem:[%s12437_s5 + $0x88] sm:$0xff] }
 0x602   : > { %v2844_v42 = vadd.f32 %v2828_v51, %v2700_v11  ;;  %v2697_v58 = vadd.f32 %v2681_v37, %v2553_v7  ;;  %v2570_v11 = vpop.permute.xlu0 %2569  ;;  %v12946_v51 = vld [vmem:[#allocation103_spill] sm:$0xff]  ;;  %v12960_v37 = vld [vmem:[#allocation109_spill] sm:$0xff] }
 0x603   : > { %v2172_v6 = vpop.permute.xlu1 %2171  ;;  %v2662_v24 = vmul.f32 %v12788_v56, %v12960_v37 }
 0x604   : > { %6961 = vmatprep.subr.mxu1 %v2844_v42  ;;  %v2296_v31 = vmul.f32 %v2280_v44, %v2172_v6  ;;  %v12959_v44 = vld [vmem:[#allocation117_spill] sm:$0xff] }
 0x605   : > { %6962 = vmatpush3.msra.mxu1 %v2844_v42  ;;  %v2423_v42 = vmul.f32 %v12799_v36, %v12946_v51  ;;  %v2808_v36 = vmul.f32 %v9520_v16, %v12954_v25 }
 0x606   : > { %6963 = vmatprep.subr.mxu1 %v2843_v29  ;;  %v2456_v15 = vadd.f32 %v2440_v27, %v2296_v31  ;;  %v2568_v19 = vpop.permute.xlu0 %2567  ;;  %v2661_v31 = vmul.f32 %v12788_v56, %v12961_v46 }
 0x607   : > { %v2576_v41 = vpop.permute.xlu1 %2575  ;;  %6964 = vmatpush3.msra.mxu1 %v2843_v29 }
 0x608   : > { %v2682_v0 = vmul.f32 %v2666_v13, %v2576_v41  ;;  %v12948_v41 = vld [vmem:[#allocation78_spill] sm:$0xff]  ;;  %v12951_v13 = vld [vmem:[#allocation135_spill] sm:$0xff] }
 0x609   : > { %v2536_v6 = vmul.f32 %v12948_v41, %v10633_v48  ;;  %v2278_v26 = vmul.f32 %v9493_v47, %v12951_v13  ;;  %v2277_v48 = vmul.f32 %v9493_v47, %v12953_v39  ;;  %v6407_v13 = vld [vmem:[%s12437_s5 + $0xa8] sm:$0xff]  ;;  %v6414_v39 = vld [vmem:[%s12437_s5 + $0xe0] sm:$0xff] }
 0x60a   : > { %v2698_v29 = vadd.f32 %v2682_v0, %v2554_v49  ;;  %v12955_v49 = vld [vmem:[#allocation131_spill] sm:$0xff]  ;;  %v2566_v7 = vpop.permute.xlu0 %2565 }
 0x60b   : > { %v2330_v40 = vpop.permute.xlu1 %2329  ;;  %v2294_v35 = vmul.f32 %v2278_v26, %v2168_v61  ;;  %v2534_v61 = vmul.f32 %v12958_v3, %v10668_v38  ;;  %v6408_v26 = vld [vmem:[%s12437_s5 + $0xb0] sm:$0xff]  ;;  %v12966_v3 = vld [vmem:[#allocation51_spill] sm:$0xff] }
 0x60c   : > { %v2439_v62 = vmul.f32 %v2423_v42, %v2330_v40  ;;  %v2552_v40 = vadd.f32 %v2536_v6, %v2456_v15  ;;  %v12962_v42 = vld [vmem:[#allocation122_spill] sm:$0xff] }
 0x60d   : > { %v2806_v38 = vmul.f32 %v9520_v16, %v12962_v42 }
 0x60e   : > { %v2455_v57 = vadd.f32 %v2439_v62, %v2295_v54  ;;  %v2710_v15 = vpop.permute.xlu0 %2709  ;;  %v6406_v54 = vld [vmem:[%s12437_s5 + $0xa0] sm:$0xff] }
 0x60f   : > { %v2720_v34 = vpop.permute.xlu1 %2719  ;;  %v2821_v6 = vmul.f32 %v2805_v2, %v2710_v15 }
 0x610   : > { %v2826_v22 = vmul.f32 %v2810_v8, %v2720_v34  ;;  %v2680_v8 = vmul.f32 %v2664_v52, %v2572_v10  ;;  %v2535_v34 = vmul.f32 %v12955_v49, %v10648_v21  ;;  %v2533_v21 = vmul.f32 %v12959_v44, %v10695_v32  ;;  %v6410_v52 = vld [vmem:[%s12437_s5 + $0xc0] sm:$0xff] }
 0x611   : > { %v2677_v32 = vmul.f32 %v2661_v31, %v2566_v7  ;;  %v12968_v31 = vld [vmem:[#allocation77_spill] sm:$0xff] }
 0x612   : > { %v2842_v45 = vadd.f32 %v2826_v22, %v2698_v29  ;;  %v12956_v29 = vld [vmem:[#allocation126_spill] sm:$0xff]  ;;  %v2696_v1 = vadd.f32 %v2680_v8, %v2552_v40  ;;  %v6412_v40 = vld [vmem:[%s12437_s5 + $0xd0] sm:$0xff] }
 0x613   : > { %v2328_v5 = vpop.permute.xlu1 %2327  ;;  %v2663_v22 = vmul.f32 %v12788_v56, %v12956_v29 }
 0x614   : > { %6965 = vmatprep.subr.mxu1 %v2842_v45  ;;  %v2438_v0 = vmul.f32 %v2422_v17, %v2328_v5  ;;  %v12957_v5 = vld [vmem:[#allocation57_spill] sm:$0xff] }
 0x615   : > { %6966 = vmatpush3.msra.mxu1 %v2842_v45  ;;  %v2551_v45 = vadd.f32 %v2535_v34, %v2455_v57  ;;  %v2807_v10 = vmul.f32 %v9520_v16, %v12957_v5  ;;  %v2679_v43 = vmul.f32 %v2663_v22, %v2570_v11  ;;  %v6405_v16 = vld [vmem:[%s12437_s5 + $0x98] sm:$0xff]  ;;  %v6416_v57 = vld [vmem:[%s12437_s5 + $0xf0] sm:$0xff]  ;;  %v12964_v5 = vld [vmem:[#allocation66_spill] sm:$0xff] }
 0x616   : > { %v2454_v20 = vadd.f32 %v2438_v0, %v2294_v35  ;;  %v6417_v0 = vld [vmem:[%s12437_s5 + $0xf8] sm:$0xff] }
 0x617   : > { %v2718_v14 = vpop.permute.xlu1 %2717  ;;  %v2695_v27 = vadd.f32 %v2679_v43, %v2551_v45 }
 0x618   : > { %v2825_v28 = vmul.f32 %v2809_v30, %v2718_v14 }
 0x61a   : > { %v2841_v23 = vadd.f32 %v2825_v28, %v2697_v58  ;;  %v2550_v58 = vadd.f32 %v2534_v61, %v2454_v20 }
 0x61b   : > { %v2166_v60 = vpop.permute.xlu1 %2165 }
 0x61c   : > { %6967 = vmatprep.subr.mxu1 %v2841_v23  ;;  %v2293_v53 = vmul.f32 %v2277_v48, %v2166_v60  ;;  %v6415_v48 = vld [vmem:[%s12437_s5 + $0xe8] sm:$0xff] }
 0x61d   : > { %6968 = vmatpush3.msra.mxu1 %v2841_v23  ;;  %v2678_v23 = vmul.f32 %v2662_v24, %v2568_v19  ;;  %v6411_v19 = vld [vmem:[%s12437_s5 + $0xc8] sm:$0xff] }
 0x61f   : > { %v2326_v63 = vpop.permute.xlu1 %2325  ;;  %v2694_v62 = vadd.f32 %v2678_v23, %v2550_v58 }
 0x620   : > { %v2437_v59 = vmul.f32 %v2421_v9, %v2326_v63  ;;  %v6404_v9 = vld [vmem:[%s12437_s5 + $0x90] sm:$0xff]  ;;  %v6413_v63 = vld [vmem:[%s12437_s5 + $0xd8] sm:$0xff] }
 0x622   : > { %v2453_v47 = vadd.f32 %v2437_v59, %v2293_v53 }
 0x623   : > { %v2716_v18 = vpop.permute.xlu1 %2715 }
 0x624   : > { %v2824_v55 = vmul.f32 %v2808_v36, %v2716_v18  ;;  %v2549_v28 = vadd.f32 %v2533_v21, %v2453_v47  ;;  %v2861_v36 = vpop.permute.xlu0 %2860 }
 0x626   : > { %v2840_v30 = vadd.f32 %v2824_v55, %v2696_v1  ;;  %v2693_v41 = vadd.f32 %v2677_v32, %v2549_v28 }
 0x627   : > { %v2714_v14 = vpop.permute.xlu1 %2713 }
 0x628   : > { %v2823_v51 = vmul.f32 %v2807_v10, %v2714_v14  ;;  %6969 = vmatprep.subr.mxu1 %v2840_v30  ;;  %v2837_v17 = vadd.f32 %v2821_v6, %v2693_v41  ;;  %v2876_v49 = vpop.permute.xlu0 %2875 }
 0x629   : > { %6970 = vmatpush3.msra.mxu1 %v2840_v30 }
 0x62a   : > { %v2839_v11 = vadd.f32 %v2823_v51, %v2695_v27  ;;  %v12970_v51 = vld [vmem:[#allocation72_spill] sm:$0xff] }
 0x62b   : > { %v2712_v60 = vpop.permute.xlu1 %2711 }
 0x62c   : > { %v2822_v56 = vmul.f32 %v2806_v38, %v2712_v60  ;;  %6971 = vmatprep.subr.mxu1 %v2839_v11  ;;  %v2886_v55 = vpop.permute.xlu0 %2885 }
 0x62d   : > { %6972 = vmatpush3.msra.mxu1 %v2839_v11 }
 0x62e   : > { %v2838_v12 = vadd.f32 %v2822_v56, %v2694_v62 }
 0x630   : > { %6973 = vmatprep.subr.mxu1 %v2838_v12  ;;  %v2896_v23 = vpop.permute.xlu0 %2895 }
 0x631   : > { %6974 = vmatpush3.msra.mxu1 %v2838_v12  ;;  %v12972_v12 = vld [vmem:[#allocation56_spill] sm:$0xff] }
 0x632   : > { %6975 = vmatprep.subr.mxu1 %v2837_v17 }
 0x633   : > { %6976 = vmatpush3.msra.mxu1 %v2837_v17 }
 0x634   : > { %6978 = vmatmul.mubr.f32.vlgmr.msra.gmra.mxu1 %v6403_v4  ;;  %v12974_v4 = vld [vmem:[#allocation69_spill] sm:$0xff] }
 0x635   : > { %6980 = vmatprep.mubr.f32.mxu1 %v6404_v9 }
 0x638   : > { %6981 = vmatmul.mubr.f32.gmra.mxu1 %v6405_v16  ;;  %v2856_v59 = vpop.permute.xlu1 %2855 }
 0x639   : > { %6983 = vmatprep.mubr.f32.mxu1 %v6406_v54 }
 0x63c   : > { %6984 = vmatmul.mubr.f32.gmra.mxu1 %v6407_v13  ;;  %v2866_v8 = vpop.permute.xlu1 %2865 }
 0x63d   : > { %6986 = vmatprep.mubr.f32.mxu1 %v6408_v26 }
 0x640   : > { %6987 = vmatmul.mubr.f32.gmra.mxu1 %v6409_v33  ;;  %v2871_v25 = vpop.permute.xlu1 %2870 }
 0x641   : > { %6989 = vmatprep.mubr.f32.mxu1 %v6410_v52 }
 0x644   : > { %6990 = vmatmul.mubr.f32.gmra.mxu1 %v6411_v19  ;;  %v2881_v35 = vpop.permute.xlu1 %2880 }
 0x645   : > { %6992 = vmatprep.mubr.f32.mxu1 %v6412_v40 }
 0x648   : > { %6993 = vmatmul.mubr.f32.gmra.mxu1 %v6413_v63  ;;  %v2906_v63 = vpop.permute.xlu0 %2905 }
 0x649   : > { %6995 = vmatprep.mubr.f32.mxu1 %v6414_v39 }
 0x64a   : > { %v2891_v1 = vpop.permute.xlu1 %2890 }
 0x64c   : > { %6996 = vmatmul.mubr.f32.gmra.mxu1 %v6415_v48 }
 0x64d   : > { %6998 = vmatprep.mubr.f32.mxu1 %v6416_v57 }
 0x64e   : > { %v2901_v24 = vpop.permute.xlu1 %2900 }
 0x650   : > { %6999 = vmatmul.mubr.f32.gmra.mxu1 %v6417_v0 }
 0x652   : > { %v2911_v54 = vpop.permute.xlu1 %2910 }
 0x6f4   : > { %v6979_v34 = vpop.f32.mrf.mxu1 }
 0x6f5   : > { %v3005_v53 = vadd.f32 %v6979_v34, %v2861_v36  ;;  %v12976_v36 = vld [vmem:[#allocation53_spill] sm:$0xff] }
 0x6f6   : > { %v2999_v29 = vpop.f32.mrf.mxu1 }
 0x6f7   : > { %v3079_v22 = vmax.f32 %v3005_v53, 0.0  ;;  %v3000_v18 = vadd.f32 %v2999_v29, %v2856_v59 }
 0x6f8   : > { %v6982_v45 = vpop.f32.mrf.mxu1 }
 0x6f9   : > { %v3078_v20 = vmax.f32 %v3000_v18, 0.0  ;;  %v3015_v47 = vadd.f32 %v6982_v45, %v2871_v25  ;;  %v11023_v10 = vadd.f32 %v3079_v22, %v12964_v5  ;;  %v2921_v45 = vpop.permute.xlu1 %2920  ;;  %v12980_v5 = vld [vmem:[#allocation65_spill] sm:$0xff] }
 0x6fa   : > { %v3009_v7 = vpop.f32.mrf.mxu1 }
 0x6fb   : > { %12965 = vst [vmem:[#allocation61_spill] sm:$0xff] %v11023_v10  ;;  %v11026_v61 = vadd.f32 %v3078_v20, %v12966_v3  ;;  %v3081_v44 = vmax.f32 %v3015_v47, 0.0  ;;  %v3010_v21 = vadd.f32 %v3009_v7, %v2866_v8  ;;  %v3169_v46 = vmul.f32 %v11023_v10, %v11023_v10 }
 0x6fc   : > { %v6985_v43 = vpop.f32.mrf.mxu1 }
 0x6fd   : > { %12967 = vst [vmem:[#allocation81_spill] sm:$0xff] %v11026_v61  ;;  %v3168_v30 = vmul.f32 %v11026_v61, %v11026_v61  ;;  %v3080_v37 = vmax.f32 %v3010_v21, 0.0  ;;  %v11033_v14 = vadd.f32 %v3081_v44, %v12968_v31  ;;  %v3025_v58 = vadd.f32 %v6985_v43, %v2881_v35  ;;  %v2916_v21 = vpop.permute.xlu0 %2915 }
 0x6fe   : > { %v3019_v28 = vpop.f32.mrf.mxu1  ;;  %v3144_v27 = vadd.f32 %v11023_v10, %v11026_v61 }
 0x6ff   : > { %12969 = vst [vmem:[#allocation84_spill] sm:$0xff] %v11033_v14  ;;  %v11038_v42 = vadd.f32 %v3080_v37, %v12970_v51  ;;  %v3020_v38 = vadd.f32 %v3019_v28, %v2876_v49  ;;  %v3184_v32 = vadd.f32 %v3169_v46, %v3168_v30  ;;  %v3083_v11 = vmax.f32 %v3025_v58, 0.0  ;;  %v12978_v49 = vld [vmem:[#allocation73_spill] sm:$0xff]  ;;  %v12982_v37 = vld [vmem:[#allocation75_spill] sm:$0xff] }
 0x700   : > { %v6988_v15 = vpop.f32.mrf.mxu1  ;;  %v3171_v56 = vmul.f32 %v11033_v14, %v11033_v14 }
 0x701   : > { %12971 = vst [vmem:[#allocation86_spill] sm:$0xff] %v11038_v42  ;;  %v3145_v60 = vadd.f32 %v3144_v27, %v11038_v42  ;;  %v3170_v50 = vmul.f32 %v11038_v42, %v11038_v42  ;;  %v3082_v2 = vmax.f32 %v3020_v38, 0.0  ;;  %v3035_v62 = vadd.f32 %v6988_v15, %v2891_v1  ;;  %v12986_v15 = vld [vmem:[#allocation67_spill] sm:$0xff] }
 0x702   : > { %v3029_v41 = vpop.f32.mrf.mxu1  ;;  %v11046_v17 = vadd.f32 %v3083_v11, %v12972_v12 }
 0x703   : > { %v3185_v6 = vadd.f32 %v3184_v32, %v3170_v50  ;;  %v11049_v9 = vadd.f32 %v3082_v2, %v12974_v4  ;;  %v3146_v16 = vadd.f32 %v3145_v60, %v11033_v14  ;;  %v3085_v13 = vmax.f32 %v3035_v62, 0.0  ;;  %v12984_v32 = vld [vmem:[#allocation71_spill] sm:$0xff]  ;;  %v2931_v2 = vpop.permute.xlu1 %2930 }
 0x704   : > { %12973 = vst [vmem:[#allocation133_spill] sm:$0xff] %v11046_v17  ;;  %v3030_v26 = vadd.f32 %v3029_v41, %v2886_v55  ;;  %v6991_v33 = vpop.f32.mrf.mxu1  ;;  %v3173_v0 = vmul.f32 %v11046_v17, %v11046_v17 }
 0x705   : > { %12975 = vst [vmem:[#allocation136_spill] sm:$0xff] %v11049_v9  ;;  %v3147_v52 = vadd.f32 %v3146_v16, %v11049_v9  ;;  %v3172_v19 = vmul.f32 %v11049_v9, %v11049_v9  ;;  %v3186_v40 = vadd.f32 %v3185_v6, %v3171_v56  ;;  %v3045_v48 = vadd.f32 %v6991_v33, %v2901_v24 }
 0x706   : > { %v3084_v39 = vmax.f32 %v3030_v26, 0.0  ;;  %v3039_v57 = vpop.f32.mrf.mxu1  ;;  %v11059_v35 = vadd.f32 %v3085_v13, %v12976_v36  ;;  %v2926_v13 = vpop.permute.xlu0 %2925 }
 0x707   : > { %v3187_v59 = vadd.f32 %v3186_v40, %v3172_v19  ;;  %v3148_v8 = vadd.f32 %v3147_v52, %v11046_v17  ;;  %v3040_v25 = vadd.f32 %v3039_v57, %v2896_v23  ;;  %v3087_v53 = vmax.f32 %v3045_v48, 0.0  ;;  %v12988_v40 = vld [vmem:[#allocation50_spill] sm:$0xff] }
 0x708   : > { %12977 = vst [vmem:[#allocation79_spill] sm:$0xff] %v11059_v35  ;;  %v11062_v34 = vadd.f32 %v3084_v39, %v12978_v49  ;;  %v6994_v29 = vpop.f32.mrf.mxu1  ;;  %v3175_v43 = vmul.f32 %v11059_v35, %v11059_v35  ;;  %v12990_v57 = vld [vmem:[#allocation94_spill] sm:$0xff] }
 0x709   : > { %v3188_v22 = vadd.f32 %v3187_v59, %v3173_v0  ;;  %v3086_v18 = vmax.f32 %v3040_v25, 0.0  ;;  %v3055_v1 = vadd.f32 %v6994_v29, %v2911_v54  ;;  %v11073_v24 = vadd.f32 %v3087_v53, %v12982_v37  ;;  %v12992_v29 = vld [vmem:[#allocation93_spill] sm:$0xff] }
 0x70a   : > { %12979 = vst [vmem:[#allocation85_spill] sm:$0xff] %v11062_v34  ;;  %v3149_v20 = vadd.f32 %v3148_v8, %v11062_v34  ;;  %v3174_v47 = vmul.f32 %v11062_v34, %v11062_v34  ;;  %v3049_v55 = vpop.f32.mrf.mxu1 }
 0x70b   : > { %v11068_v7 = vadd.f32 %v3086_v18, %v12980_v5  ;;  %v3089_v3 = vmax.f32 %v3055_v1, 0.0  ;;  %v3050_v44 = vadd.f32 %v3049_v55, %v2906_v63  ;;  %12983 = vst [vmem:[#allocation87_spill] sm:$0xff] %v11073_v24  ;;  %v3177_v62 = vmul.f32 %v11073_v24, %v11073_v24  ;;  %v12994_v18 = vld [vmem:[#allocation70_spill] sm:$0xff] }
 0x70c   : > { %v3189_v30 = vadd.f32 %v3188_v22, %v3174_v47  ;;  %v3150_v46 = vadd.f32 %v3149_v20, %v11059_v35  ;;  %v6997_v31 = vpop.f32.mrf.mxu1 }
 0x70d   : > { %12981 = vst [vmem:[#allocation52_spill] sm:$0xff] %v11068_v7  ;;  %v3176_v58 = vmul.f32 %v11068_v7, %v11068_v7  ;;  %v3088_v28 = vmax.f32 %v3050_v44, 0.0  ;;  %v3065_v27 = vadd.f32 %v6997_v31, %v2921_v45  ;;  %v11080_v11 = vadd.f32 %v3089_v3, %v12984_v32 }
 0x70e   : > { %v3151_v51 = vadd.f32 %v3150_v46, %v11068_v7  ;;  %v3190_v38 = vadd.f32 %v3189_v30, %v3175_v43  ;;  %v3059_v23 = vpop.f32.mrf.mxu1 }
 0x70f   : > { %12985 = vst [vmem:[#allocation90_spill] sm:$0xff] %v11080_v11  ;;  %v11083_v60 = vadd.f32 %v3088_v28, %v12986_v15  ;;  %v3060_v50 = vadd.f32 %v3059_v23, %v2916_v21  ;;  %v3091_v6 = vmax.f32 %v3065_v27, 0.0  ;;  %v3179_v19 = vmul.f32 %v11080_v11, %v11080_v11 }
 0x710   : > { %v3191_v56 = vadd.f32 %v3190_v38, %v3176_v58  ;;  %v3152_v41 = vadd.f32 %v3151_v51, %v11073_v24  ;;  %v7000_v12 = vpop.f32.mrf.mxu1 }
 0x711   : > { %12987 = vst [vmem:[#allocation96_spill] sm:$0xff] %v11083_v60  ;;  %v3178_v4 = vmul.f32 %v11083_v60, %v11083_v60  ;;  %v3090_v16 = vmax.f32 %v3060_v50, 0.0  ;;  %v3075_v54 = vadd.f32 %v7000_v12, %v2931_v2  ;;  %v11097_v0 = vadd.f32 %v3091_v6, %v12990_v57  ;;  %v3443_v6 = vld [vmem:[#allocation11] sm:$0xff]  ;;  %v3143_v57 = vld [vmem:[#allocation8 + $0xf8] sm:$0xff] }
 0x712   : > { %v3153_v26 = vadd.f32 %v3152_v41, %v11083_v60  ;;  %v3192_v33 = vadd.f32 %v3191_v56, %v3177_v62  ;;  %v3069_v52 = vpop.f32.mrf.mxu1  ;;  %v3282_v56 = vld [vmem:[#allocation10] sm:$0xff]  ;;  %7089 = vmatprep.mubr.f32.mxu1 %v3443_v6 }
 0x713   : > { %v11094_v63 = vadd.f32 %v3090_v16, %v12988_v40  ;;  %v3070_v39 = vadd.f32 %v3069_v52, %v2926_v13  ;;  %12991 = vst [vmem:[#allocation97_spill] sm:$0xff] %v11097_v0  ;;  %v3093_v59 = vmax.f32 %v3075_v54, 0.0  ;;  %v3181_v20 = vmul.f32 %v11097_v0, %v11097_v0  ;;  %7033 = vmatprep.mubr.f32.mxu0 %v3282_v56  ;;  %v3126_v16 = vld [vmem:[#allocation7 + $0xf8] sm:$0xff]  ;;  %v3125_v54 = vld [vmem:[#allocation7 + $0xf0] sm:$0xff]  ;;  %v3124_v13 = vld [vmem:[#allocation7 + $0xe8] sm:$0xff] }
 0x714   : > { %v3193_v48 = vadd.f32 %v3192_v33, %v3178_v4  ;;  %v3154_v8 = vadd.f32 %v3153_v26, %v11080_v11  ;;  %v3123_v52 = vld [vmem:[#allocation7 + $0xe0] sm:$0xff] }
 0x715   : > { %12989 = vst [vmem:[#allocation91_spill] sm:$0xff] %v11094_v63  ;;  %v3180_v25 = vmul.f32 %v11094_v63, %v11094_v63  ;;  %v3092_v36 = vmax.f32 %v3070_v39, 0.0  ;;  %v11107_v1 = vadd.f32 %v3093_v59, %v12994_v18  ;;  %v3122_v59 = vld [vmem:[#allocation7 + $0xd8] sm:$0xff] }
 0x716   : > { %v3155_v49 = vadd.f32 %v3154_v8, %v11094_v63  ;;  %v3194_v53 = vadd.f32 %v3193_v48, %v3179_v19 }
 0x717   : > { %v11104_v22 = vadd.f32 %v3092_v36, %v12992_v29  ;;  %12995 = vst [vmem:[#allocation134_spill] sm:$0xff] %v11107_v1  ;;  %v3183_v21 = vmul.f32 %v11107_v1, %v11107_v1  ;;  %v3121_v29 = vld [vmem:[#allocation7 + $0xd0] sm:$0xff] }
 0x718   : > { %v3156_v45 = vadd.f32 %v3155_v49, %v11097_v0  ;;  %v3195_v47 = vadd.f32 %v3194_v53, %v3180_v25  ;;  %v3142_v53 = vld [vmem:[#allocation8 + $0xf0] sm:$0xff] }
 0x719   : > { %12993 = vst [vmem:[#allocation118_spill] sm:$0xff] %v11104_v22  ;;  %v3182_v55 = vmul.f32 %v11104_v22, %v11104_v22 }
 0x71a   : > { %v3157_v5 = vadd.f32 %v3156_v45, %v11104_v22  ;;  %v3196_v3 = vadd.f32 %v3195_v47, %v3181_v20 }
 0x71c   : > { %v3158_v44 = vadd.f32 %v3157_v5, %v11107_v1  ;;  %v3197_v43 = vadd.f32 %v3196_v3, %v3182_v55  ;;  %v3141_v55 = vld [vmem:[#allocation8 + $0xe8] sm:$0xff] }
 0x71d   : > { %v3120_v3 = vld [vmem:[#allocation7 + $0xc8] sm:$0xff] }
 0x71e   : > { %3159 = vadd.xlane.f32.xlu0 %v3158_v44  ;;  %v3198_v30 = vadd.f32 %v3197_v43, %v3183_v21 }
 0x720   : > { %3199 = vadd.xlane.f32.xlu1 %v3198_v30  ;;  %v3140_v30 = vld [vmem:[#allocation8 + $0xe0] sm:$0xff] }
 0x7a7   : > { %v3160_v37 = vpop.xlane.xlu0 %3159 }
 0x7a8   : > { %v3161_v46 = vrot.slane %v3160_v37, 4 }
 0x7a9   : > { %v3200_v31 = vpop.xlane.xlu1 %3199 }
 0x7aa   : > { %v3162_v58 = vadd.f32 %v3161_v46, %v3160_v37  ;;  %v3201_v28 = vrot.slane %v3200_v31, 4  ;;  %v3119_v46 = vld [vmem:[#allocation7 + $0xc0] sm:$0xff] }
 0x7ac   : > { %v3202_v27 = vadd.f32 %v3201_v28, %v3200_v31  ;;  %v3163_v51 = vrot.slane %v3162_v58, 2 }
 0x7ae   : > { %v3164_v38 = vadd.f32 %v3163_v51, %v3162_v58  ;;  %v3203_v23 = vrot.slane %v3202_v27, 2 }
 0x7b0   : > { %v3165_v32 = vrot.slane %v3164_v38, 1  ;;  %v3204_v15 = vadd.f32 %v3203_v23, %v3202_v27  ;;  %v3139_v27 = vld [vmem:[#allocation8 + $0xd8] sm:$0xff] }
 0x7b2   : > { %v3166_v50 = vadd.f32 %v3165_v32, %v3164_v38  ;;  %v3205_v2 = vrot.slane %v3204_v15, 1  ;;  %v3118_v38 = vld [vmem:[#allocation7 + $0xb8] sm:$0xff] }
 0x7b4   : > { %7573 = vpush %v3166_v50  ;;  %v3206_v62 = vadd.f32 %v3205_v2, %v3204_v15  ;;  %v3138_v50 = vld [vmem:[#allocation8 + $0xd0] sm:$0xff] }
 0x7b6   : > { %7575 = vpush %v3206_v62  ;;  %v3117_v62 = vld [vmem:[#allocation7 + $0xb0] sm:$0xff] }
 0x7e5   : > { %s7574_s3 = spop %7573 }
 0x7e6   : > { %s3208_s20 = smul.f32 6.1035156e-05, %s7574_s3  ;;  %s6379_s3 = sshll.u32 %s699_s26, 7 }
 0x7e7   : > { %s7576_s21 = spop %7575 }
 0x7e8   : > { %s3210_s22 = smul.f32 %s3208_s20, %s3208_s20  ;;  %v11118_v4 = vstv %s3208_s20  ;;  %s12348_s20 = scalar_lea.vmem [#allocation20], %s6379_s3 }
 0x7e9   : > { %s3209_s19 = smul.f32 6.1035156e-05, %s7576_s21  ;;  %v3228_v33 = vsub.f32 %v11107_v1, %v11118_v4  ;;  %v3227_v40 = vsub.f32 %v11104_v22, %v11118_v4  ;;  %v3226_v36 = vsub.f32 %v11097_v0, %v11118_v4  ;;  %v3225_v20 = vsub.f32 %v11094_v63, %v11118_v4  ;;  %s6504_s21 = sshll.u32 %s8642_s28, 11 }
 0x7ea   : > { %v3224_v5 = vsub.f32 %v11080_v11, %v11118_v4  ;;  %v3223_v37 = vsub.f32 %v11083_v60, %v11118_v4  ;;  %v3222_v51 = vsub.f32 %v11073_v24, %v11118_v4  ;;  %v3221_v2 = vsub.f32 %v11068_v7, %v11118_v4  ;;  %s12392_s28 = scalar_lea.sflag [#allocation4], %s699_s26 }
 0x7eb   : > { %s3211_s24 = ssub.f32 %s3209_s19, %s3210_s22  ;;  %s6184_s22 = sshll.u32 %s12348_s20, 4  ;;  %s12385_s22 = int_to_ptr.vmem [resolvable:$true] %s6184_s22 }
 0x7ed   : > { %s3229_s17 = sadd.f32 1e-05, %s3211_s24 }
 0x7ef   : > { %v3230_v41 = vstv %s3229_s17 }
 0x7f0   : > { %7864 = vrsqrt.f32 %v3230_v41 }
 0x7fd   : > { %v7865_v12 = vpop.eup %7864 }
 0x7fe   : > { %7577 = vpush %v7865_v12  ;;  %v3137_v12 = vld [vmem:[#allocation8 + $0xc8] sm:$0xff] }
 0x82f   : > { %s7578_s23 = spop %7577 }
 0x830   : > { %v11120_v26 = vstv %s7578_s23 }
 0x831   : > { %v3249_v19 = vmul.f32 %v11120_v26, %v3126_v16  ;;  %v3248_v39 = vmul.f32 %v11120_v26, %v3125_v54  ;;  %v3247_v48 = vmul.f32 %v11120_v26, %v3124_v13  ;;  %v3246_v49 = vmul.f32 %v11120_v26, %v3123_v52  ;;  %v3116_v54 = vld [vmem:[#allocation7 + $0xa8] sm:$0xff] }
 0x832   : > { %v3245_v47 = vmul.f32 %v11120_v26, %v3122_v59  ;;  %v3244_v43 = vmul.f32 %v11120_v26, %v3121_v29  ;;  %v3243_v28 = vmul.f32 %v11120_v26, %v3120_v3  ;;  %v3242_v15 = vmul.f32 %v11120_v26, %v3119_v46 }
 0x833   : > { %v3265_v8 = vmul.f32 %v3249_v19, %v3228_v33  ;;  %v3264_v25 = vmul.f32 %v3248_v39, %v3227_v40  ;;  %v3263_v45 = vmul.f32 %v3247_v48, %v3226_v36  ;;  %v3262_v21 = vmul.f32 %v3246_v49, %v3225_v20  ;;  %v3136_v19 = vld [vmem:[#allocation8 + $0xc0] sm:$0xff]  ;;  %v3114_v36 = vld [vmem:[#allocation7 + $0x98] sm:$0xff] }
 0x834   : > { %v3261_v58 = vmul.f32 %v3245_v47, %v3224_v5  ;;  %v3260_v32 = vmul.f32 %v3244_v43, %v3223_v37  ;;  %v3259_v41 = vmul.f32 %v3243_v28, %v3222_v51  ;;  %v3241_v6 = vmul.f32 %v11120_v26, %v3118_v38  ;;  %v3115_v39 = vld [vmem:[#allocation7 + $0xa0] sm:$0xff]  ;;  %v3113_v47 = vld [vmem:[#allocation7 + $0x90] sm:$0xff] }
 0x835   : > { %v11132_v18 = vadd.f32 %v3265_v8, %v3143_v57  ;;  %v11141_v44 = vadd.f32 %v3264_v25, %v3142_v53  ;;  %v11150_v31 = vadd.f32 %v3263_v45, %v3141_v55  ;;  %v11159_v23 = vadd.f32 %v3262_v21, %v3140_v30  ;;  %v3135_v8 = vld [vmem:[#allocation8 + $0xb8] sm:$0xff]  ;;  %v3134_v45 = vld [vmem:[#allocation8 + $0xb0] sm:$0xff]  ;;  %v3133_v21 = vld [vmem:[#allocation8 + $0xa8] sm:$0xff] }
 0x836   : > { %v11168_v56 = vadd.f32 %v3261_v58, %v3139_v27  ;;  %v3220_v16 = vsub.f32 %v11059_v35, %v11118_v4  ;;  %v11177_v13 = vadd.f32 %v3260_v32, %v3138_v50  ;;  %v3258_v33 = vmul.f32 %v3242_v15, %v3221_v2  ;;  %v3112_v30 = vld [vmem:[#allocation7 + $0x88] sm:$0xff]  ;;  %v3132_v28 = vld [vmem:[#allocation8 + $0xa0] sm:$0xff]  ;;  %v3131_v50 = vld [vmem:[#allocation8 + $0x98] sm:$0xff] }
 0x837   : > { %7001 = vmatprep.subr.mxu0 %v11132_v18  ;;  %7057 = vmatprep.subr.mxu1 %v11132_v18  ;;  %v3240_v52 = vmul.f32 %v11120_v26, %v3117_v62  ;;  %v3219_v40 = vsub.f32 %v11062_v34, %v11118_v4  ;;  %v11186_v48 = vadd.f32 %v3259_v41, %v3137_v12  ;;  %v3111_v51 = vld [vmem:[#allocation7 + $0x80] sm:$0xff]  ;;  %v3130_v12 = vld [vmem:[#allocation8 + $0x90] sm:$0xff]  ;;  %v3605_v35 = vld [vmem:[#allocation13 + $0x8] sm:$0xff] }
 0x838   : > { %7002 = vmatpush3.msra.mxu0 %v11132_v18  ;;  %7058 = vmatpush3.msra.mxu1 %v11132_v18  ;;  %v3257_v57 = vmul.f32 %v3241_v6, %v3220_v16  ;;  %v3239_v59 = vmul.f32 %v11120_v26, %v3116_v54  ;;  %v3218_v25 = vsub.f32 %v11046_v17, %v11118_v4  ;;  %v3604_v34 = vld [vmem:[#allocation13] sm:$0xff]  ;;  %v3607_v17 = vld [vmem:[#allocation13 + $0x18] sm:$0xff] }
 0x839   : > { %7003 = vmatprep.subr.mxu0 %v11141_v44  ;;  %7059 = vmatprep.subr.mxu1 %v11141_v44  ;;  %v11195_v49 = vadd.f32 %v3258_v33, %v3136_v19  ;;  %v3256_v53 = vmul.f32 %v3240_v52, %v3219_v40  ;;  %v3238_v29 = vmul.f32 %v11120_v26, %v3115_v39  ;;  %v3128_v40 = vld [vmem:[#allocation8 + $0x80] sm:$0xff] }
 0x83a   : > { %7004 = vmatpush3.msra.mxu0 %v11141_v44  ;;  %7060 = vmatpush3.msra.mxu1 %v11141_v44  ;;  %v3217_v20 = vsub.f32 %v11049_v9, %v11118_v4  ;;  %v11204_v55 = vadd.f32 %v3257_v57, %v3135_v8  ;;  %v3255_v5 = vmul.f32 %v3239_v59, %v3218_v25  ;;  %v3283_v57 = vld [vmem:[#allocation10 + $0x8] sm:$0xff]  ;;  %v3284_v59 = vld [vmem:[#allocation10 + $0x10] sm:$0xff] }
 0x83b   : > { %7005 = vmatprep.subr.mxu0 %v11150_v31  ;;  %7061 = vmatprep.subr.mxu1 %v11150_v31  ;;  %v3237_v3 = vmul.f32 %v11120_v26, %v3114_v36  ;;  %v3216_v43 = vsub.f32 %v11033_v14, %v11118_v4  ;;  %v11213_v37 = vadd.f32 %v3256_v53, %v3134_v45  ;;  %v3444_v8 = vld [vmem:[#allocation11 + $0x8] sm:$0xff]  ;;  %v3445_v25 = vld [vmem:[#allocation11 + $0x10] sm:$0xff]  ;;  %v3285_v36 = vld [vmem:[#allocation10 + $0x18] sm:$0xff] }
 0x83c   : > { %7006 = vmatpush3.msra.mxu0 %v11150_v31  ;;  %7062 = vmatpush3.msra.mxu1 %v11150_v31  ;;  %v3254_v46 = vmul.f32 %v3238_v29, %v3217_v20  ;;  %v3236_v58 = vmul.f32 %v11120_v26, %v3113_v47  ;;  %v3215_v27 = vsub.f32 %v11038_v42, %v11118_v4  ;;  %v3286_v53 = vld [vmem:[#allocation10 + $0x20] sm:$0xff]  ;;  %v3446_v29 = vld [vmem:[#allocation11 + $0x18] sm:$0xff]  ;;  %v3287_v45 = vld [vmem:[#allocation10 + $0x28] sm:$0xff] }
 0x83d   : > { %7007 = vmatprep.subr.mxu0 %v11159_v23  ;;  %7063 = vmatprep.subr.mxu1 %v11159_v23  ;;  %v11222_v38 = vadd.f32 %v3255_v5, %v3133_v21  ;;  %v3253_v32 = vmul.f32 %v3237_v3, %v3216_v43  ;;  %v3235_v15 = vmul.f32 %v11120_v26, %v3112_v30  ;;  %v3290_v20 = vld [vmem:[#allocation10 + $0x40] sm:$0xff]  ;;  %v3297_v47 = vld [vmem:[#allocation10 + $0x78] sm:$0xff]  ;;  %v3448_v5 = vld [vmem:[#allocation11 + $0x28] sm:$0xff] }
 0x83e   : > { %7008 = vmatpush3.msra.mxu0 %v11159_v23  ;;  %7064 = vmatpush3.msra.mxu1 %v11159_v23  ;;  %v3214_v2 = vsub.f32 %v11023_v10, %v11118_v4  ;;  %v11231_v62 = vadd.f32 %v3254_v46, %v3132_v28  ;;  %v3252_v41 = vmul.f32 %v3236_v58, %v3215_v27  ;;  %v3449_v3 = vld [vmem:[#allocation11 + $0x30] sm:$0xff]  ;;  %v3450_v21 = vld [vmem:[#allocation11 + $0x38] sm:$0xff]  ;;  %v3451_v43 = vld [vmem:[#allocation11 + $0x40] sm:$0xff] }
 0x83f   : > { %7009 = vmatprep.subr.mxu0 %v11168_v56  ;;  %7065 = vmatprep.subr.mxu1 %v11168_v56  ;;  %v3234_v6 = vmul.f32 %v11120_v26, %v3111_v51  ;;  %v11238_v16 = vadd.f32 %v3253_v32, %v3131_v50  ;;  %v3213_v33 = vsub.f32 %v11026_v61, %v11118_v4  ;;  %v3129_v26 = vld [vmem:[#allocation8 + $0x88] sm:$0xff]  ;;  %v3454_v46 = vld [vmem:[#allocation11 + $0x58] sm:$0xff]  ;;  %v3455_v58 = vld [vmem:[#allocation11 + $0x60] sm:$0xff] }
 0x840   : > { %7010 = vmatpush3.msra.mxu0 %v11168_v56  ;;  %7066 = vmatpush3.msra.mxu1 %v11168_v56  ;;  %v3251_v54 = vmul.f32 %v3235_v15, %v3214_v2  ;;  %v11246_v52 = vadd.f32 %v3252_v41, %v3130_v12  ;;  %v3452_v30 = vld [vmem:[#allocation11 + $0x48] sm:$0xff]  ;;  %v3457_v27 = vld [vmem:[#allocation11 + $0x70] sm:$0xff]  ;;  %v3458_v51 = vld [vmem:[#allocation11 + $0x78] sm:$0xff] }
 0x841   : > { %7011 = vmatprep.subr.mxu0 %v11177_v13  ;;  %7067 = vmatprep.subr.mxu1 %v11177_v13  ;;  %v3250_v19 = vmul.f32 %v3234_v6, %v3213_v33  ;;  %v3456_v28 = vld [vmem:[#allocation11 + $0x68] sm:$0xff]  ;;  %v3606_v9 = vld [vmem:[#allocation13 + $0x10] sm:$0xff]  ;;  %v3608_v42 = vld [vmem:[#allocation13 + $0x20] sm:$0xff] }
 0x842   : > { %7012 = vmatpush3.msra.mxu0 %v11177_v13  ;;  %7068 = vmatpush3.msra.mxu1 %v11177_v13  ;;  %v11252_v4 = vadd.f32 %v3251_v54, %v3129_v26  ;;  %v3609_v14 = vld [vmem:[#allocation13 + $0x28] sm:$0xff]  ;;  %v3610_v61 = vld [vmem:[#allocation13 + $0x30] sm:$0xff]  ;;  %v3611_v10 = vld [vmem:[#allocation13 + $0x38] sm:$0xff] }
 0x843   : > { %7013 = vmatprep.subr.mxu0 %v11186_v48  ;;  %7069 = vmatprep.subr.mxu1 %v11186_v48  ;;  %v11258_v39 = vadd.f32 %v3250_v19, %v3128_v40 }
 0x844   : > { %7014 = vmatpush3.msra.mxu0 %v11186_v48  ;;  %7070 = vmatpush3.msra.mxu1 %v11186_v48 }
 0x845   : > { %7015 = vmatprep.subr.mxu0 %v11195_v49  ;;  %7071 = vmatprep.subr.mxu1 %v11195_v49 }
 0x846   : > { %7016 = vmatpush3.msra.mxu0 %v11195_v49  ;;  %7072 = vmatpush3.msra.mxu1 %v11195_v49 }
 0x847   : > { %7017 = vmatprep.subr.mxu0 %v11204_v55  ;;  %7073 = vmatprep.subr.mxu1 %v11204_v55 }
 0x848   : > { %7018 = vmatpush3.msra.mxu0 %v11204_v55  ;;  %7074 = vmatpush3.msra.mxu1 %v11204_v55 }
 0x849   : > { %7019 = vmatprep.subr.mxu0 %v11213_v37  ;;  %7075 = vmatprep.subr.mxu1 %v11213_v37 }
 0x84a   : > { %7020 = vmatpush3.msra.mxu0 %v11213_v37  ;;  %7076 = vmatpush3.msra.mxu1 %v11213_v37 }
 0x84b   : > { %7021 = vmatprep.subr.mxu0 %v11222_v38  ;;  %7077 = vmatprep.subr.mxu1 %v11222_v38 }
 0x84c   : > { %7022 = vmatpush3.msra.mxu0 %v11222_v38  ;;  %7078 = vmatpush3.msra.mxu1 %v11222_v38 }
 0x84d   : > { %7023 = vmatprep.subr.mxu0 %v11231_v62  ;;  %7079 = vmatprep.subr.mxu1 %v11231_v62 }
 0x84e   : > { %7024 = vmatpush3.msra.mxu0 %v11231_v62  ;;  %7080 = vmatpush3.msra.mxu1 %v11231_v62 }
 0x84f   : > { %7025 = vmatprep.subr.mxu0 %v11238_v16  ;;  %7081 = vmatprep.subr.mxu1 %v11238_v16 }
 0x850   : > { %7026 = vmatpush3.msra.mxu0 %v11238_v16  ;;  %7082 = vmatpush3.msra.mxu1 %v11238_v16 }
 0x851   : > { %7027 = vmatprep.subr.mxu0 %v11246_v52  ;;  %7083 = vmatprep.subr.mxu1 %v11246_v52 }
 0x852   : > { %7028 = vmatpush3.msra.mxu0 %v11246_v52  ;;  %7084 = vmatpush3.msra.mxu1 %v11246_v52 }
 0x853   : > { %7029 = vmatprep.subr.mxu0 %v11252_v4  ;;  %7085 = vmatprep.subr.mxu1 %v11252_v4 }
 0x854   : > { %7030 = vmatpush3.msra.mxu0 %v11252_v4  ;;  %7086 = vmatpush3.msra.mxu1 %v11252_v4 }
 0x855   : > { %7031 = vmatprep.subr.mxu0 %v11258_v39  ;;  %7087 = vmatprep.subr.mxu1 %v11258_v39 }
 0x856   : > { %7032 = vmatpush3.msra.mxu0 %v11258_v39  ;;  %7088 = vmatpush3.msra.mxu1 %v11258_v39 }
 0x857   : > { %7034 = vmatmul.mubr.f32.vlgmr.msra.gmra.mxu0 %v3283_v57  ;;  %7113 = vmatprep.subr.mxu0 %v11132_v18 }
 0x858   : > { %7114 = vmatpush3.msra.mxu0 %v11132_v18  ;;  %7036 = vmatprep.mubr.f32.mxu0 %v3284_v59  ;;  %v3288_v18 = vld [vmem:[#allocation10 + $0x30] sm:$0xff] }
 0x859   : > { %7115 = vmatprep.subr.mxu0 %v11141_v44  ;;  %7090 = vmatmul.mubr.f32.vlgmr.msra.gmra.mxu1 %v3444_v8 }
 0x85a   : > { %7116 = vmatpush3.msra.mxu0 %v11141_v44  ;;  %7092 = vmatprep.mubr.f32.mxu1 %v3445_v25  ;;  %v3289_v44 = vld [vmem:[#allocation10 + $0x38] sm:$0xff] }
 0x85b   : > { %7117 = vmatprep.subr.mxu0 %v11150_v31  ;;  %7037 = vmatmul.mubr.f32.gmra.mxu0 %v3285_v36 }
 0x85c   : > { %7118 = vmatpush3.msra.mxu0 %v11150_v31  ;;  %7039 = vmatprep.mubr.f32.mxu0 %v3286_v53  ;;  %v3291_v31 = vld [vmem:[#allocation10 + $0x48] sm:$0xff] }
 0x85d   : > { %7119 = vmatprep.subr.mxu0 %v11159_v23  ;;  %7093 = vmatmul.mubr.f32.gmra.mxu1 %v3446_v29 }
 0x85e   : > { %7120 = vmatpush3.msra.mxu0 %v11159_v23  ;;  %v3292_v23 = vld [vmem:[#allocation10 + $0x50] sm:$0xff] }
 0x85f   : > { %7121 = vmatprep.subr.mxu0 %v11168_v56  ;;  %7040 = vmatmul.mubr.f32.gmra.mxu0 %v3287_v45 }
 0x860   : > { %7122 = vmatpush3.msra.mxu0 %v11168_v56  ;;  %7042 = vmatprep.mubr.f32.mxu0 %v3288_v18  ;;  %v3293_v56 = vld [vmem:[#allocation10 + $0x58] sm:$0xff] }
 0x861   : > { %7123 = vmatprep.subr.mxu0 %v11177_v13 }
 0x862   : > { %7124 = vmatpush3.msra.mxu0 %v11177_v13  ;;  %v3294_v13 = vld [vmem:[#allocation10 + $0x60] sm:$0xff] }
 0x863   : > { %7125 = vmatprep.subr.mxu0 %v11186_v48  ;;  %7043 = vmatmul.mubr.f32.gmra.mxu0 %v3289_v44 }
 0x864   : > { %7126 = vmatpush3.msra.mxu0 %v11186_v48  ;;  %7045 = vmatprep.mubr.f32.mxu0 %v3290_v20  ;;  %v3295_v48 = vld [vmem:[#allocation10 + $0x68] sm:$0xff] }
 0x865   : > { %7127 = vmatprep.subr.mxu0 %v11195_v49 }
 0x866   : > { %7128 = vmatpush3.msra.mxu0 %v11195_v49  ;;  %v3296_v49 = vld [vmem:[#allocation10 + $0x70] sm:$0xff] }
 0x867   : > { %7129 = vmatprep.subr.mxu0 %v11204_v55  ;;  %7046 = vmatmul.mubr.f32.gmra.mxu0 %v3291_v31 }
 0x868   : > { %7130 = vmatpush3.msra.mxu0 %v11204_v55  ;;  %7048 = vmatprep.mubr.f32.mxu0 %v3292_v23  ;;  %v3447_v55 = vld [vmem:[#allocation11 + $0x20] sm:$0xff] }
 0x869   : > { %7131 = vmatprep.subr.mxu0 %v11213_v37  ;;  %7095 = vmatprep.mubr.f32.mxu1 %v3447_v55 }
 0x86a   : > { %7132 = vmatpush3.msra.mxu0 %v11213_v37  ;;  %7096 = vmatmul.mubr.f32.gmra.mxu1 %v3448_v5  ;;  %v3453_v37 = vld [vmem:[#allocation11 + $0x50] sm:$0xff] }
 0x86b   : > { %7133 = vmatprep.subr.mxu0 %v11222_v38  ;;  %7049 = vmatmul.mubr.f32.gmra.mxu0 %v3293_v56 }
 0x86c   : > { %7134 = vmatpush3.msra.mxu0 %v11222_v38  ;;  %7051 = vmatprep.mubr.f32.mxu0 %v3294_v13 }
 0x86d   : > { %7135 = vmatprep.subr.mxu0 %v11231_v62  ;;  %7098 = vmatprep.mubr.f32.mxu1 %v3449_v3 }
 0x86e   : > { %7136 = vmatpush3.msra.mxu0 %v11231_v62  ;;  %7099 = vmatmul.mubr.f32.gmra.mxu1 %v3450_v21 }
 0x86f   : > { %7137 = vmatprep.subr.mxu0 %v11238_v16  ;;  %7052 = vmatmul.mubr.f32.gmra.mxu0 %v3295_v48 }
 0x870   : > { %7138 = vmatpush3.msra.mxu0 %v11238_v16  ;;  %7054 = vmatprep.mubr.f32.mxu0 %v3296_v49 }
 0x871   : > { %7139 = vmatprep.subr.mxu0 %v11246_v52  ;;  %7101 = vmatprep.mubr.f32.mxu1 %v3451_v43 }
 0x872   : > { %7140 = vmatpush3.msra.mxu0 %v11246_v52  ;;  %7102 = vmatmul.mubr.f32.gmra.mxu1 %v3452_v30 }
 0x873   : > { %7141 = vmatprep.subr.mxu0 %v11252_v4  ;;  %7055 = vmatmul.mubr.f32.gmra.mxu0 %v3297_v47 }
 0x874   : > { %7142 = vmatpush3.msra.mxu0 %v11252_v4  ;;  %7104 = vmatprep.mubr.f32.mxu1 %v3453_v37 }
 0x875   : > { %7143 = vmatprep.subr.mxu0 %v11258_v39  ;;  %7145 = vmatprep.mubr.f32.mxu0 %v3604_v34 }
 0x876   : > { %7144 = vmatpush3.msra.mxu0 %v11258_v39  ;;  %7105 = vmatmul.mubr.f32.gmra.mxu1 %v3454_v46 }
 0x877   : > { %7107 = vmatprep.mubr.f32.mxu1 %v3455_v58  ;;  %7146 = vmatmul.mubr.f32.vlgmr.msra.gmra.mxu0 %v3605_v35 }
 0x878   : > { %7148 = vmatprep.mubr.f32.mxu0 %v3606_v9 }
 0x87a   : > { %7108 = vmatmul.mubr.f32.gmra.mxu1 %v3456_v28 }
 0x87b   : > { %7110 = vmatprep.mubr.f32.mxu1 %v3457_v27  ;;  %7149 = vmatmul.mubr.f32.gmra.mxu0 %v3607_v17 }
 0x87c   : > { %7151 = vmatprep.mubr.f32.mxu0 %v3608_v42 }
 0x87e   : > { %7111 = vmatmul.mubr.f32.gmra.mxu1 %v3458_v51 }
 0x87f   : > { %7152 = vmatmul.mubr.f32.gmra.mxu0 %v3609_v14 }
 0x880   : > { %7154 = vmatprep.mubr.f32.mxu0 %v3610_v61 }
 0x883   : > { %7155 = vmatmul.mubr.f32.gmra.mxu0 %v3611_v10 }
 0x917   : > { %v7035_v38 = vpop.f32.mrf.mxu0 }
 0x919   : > { %v3364_v32 = vpop.f32.mrf.mxu0  ;;  %v7091_v15 = vpop.f32.mrf.mxu1 }
 0x91a   : > { %3765 = vxpose.xlu0.b32.start [1/16] %v3364_v32, 128 }
 0x91b   : > { %v3525_v50 = vpop.f32.mrf.mxu1  ;;  %v7038_v2 = vpop.f32.mrf.mxu0 }
 0x91d   : > { %v7094_v62 = vpop.f32.mrf.mxu1  ;;  %v3374_v6 = vpop.f32.mrf.mxu0 }
 0x91e   : > { %3766 = vxpose.xlu0.b32.cont [2/16] %v7035_v38, 128  ;;  %7169 = vmatprep.subr.mxu1 %v7094_v62 }
 0x91f   : > { %v3535_v41 = vpop.f32.mrf.mxu1  ;;  %7170 = vmatpush3.msra.mxu1 %v7094_v62  ;;  %v7041_v12 = vpop.f32.mrf.mxu0 }
 0x920   : > { %7171 = vmatprep.subr.mxu1 %v3535_v41 }
 0x921   : > { %7172 = vmatpush3.msra.mxu1 %v3535_v41  ;;  %v3384_v16 = vpop.f32.mrf.mxu0 }
 0x922   : > { %3767 = vxpose.xlu0.b32.cont [3/16] %v3374_v6, 128  ;;  %7173 = vmatprep.subr.mxu1 %v7091_v15 }
 0x923   : > { %7174 = vmatpush3.msra.mxu1 %v7091_v15  ;;  %v7044_v54 = vpop.f32.mrf.mxu0 }
 0x924   : > { %7175 = vmatprep.subr.mxu1 %v3525_v50 }
 0x925   : > { %7176 = vmatpush3.msra.mxu1 %v3525_v50  ;;  %v3394_v33 = vpop.f32.mrf.mxu0 }
 0x926   : > { %3768 = vxpose.xlu0.b32.cont [4/16] %v7038_v2, 128 }
 0x927   : > { %v7047_v26 = vpop.f32.mrf.mxu0 }
 0x929   : > { %v3404_v52 = vpop.f32.mrf.mxu0 }
 0x92a   : > { %3769 = vxpose.xlu0.b32.cont [5/16] %v3384_v16, 128  ;;  %v7097_v8 = vpop.f32.mrf.mxu1 }
 0x92b   : > { %v7050_v19 = vpop.f32.mrf.mxu0 }
 0x92c   : > { %v3545_v25 = vpop.f32.mrf.mxu1 }
 0x92d   : > { %v3414_v40 = vpop.f32.mrf.mxu0 }
 0x92e   : > { %3770 = vxpose.xlu0.b32.cont [6/16] %v7041_v12, 128  ;;  %v7100_v36 = vpop.f32.mrf.mxu1 }
 0x92f   : > { %v7053_v4 = vpop.f32.mrf.mxu0  ;;  %7239 = vmatprep.subr.mxu1 %v7100_v36 }
 0x930   : > { %v3555_v45 = vpop.f32.mrf.mxu1 }
 0x931   : > { %v3424_v39 = vpop.f32.mrf.mxu0 }
 0x932   : > { %3771 = vxpose.xlu0.b32.cont [7/16] %v3394_v33, 128  ;;  %v11410_v12 = vpop.f32.mrf.mxu1 }
 0x933   : > { %v7056_v57 = vpop.f32.mrf.mxu0  ;;  %13001 = vst [vmem:[#allocation37_spill] sm:$0xff] %v11410_v12 }
 0x934   : > { %v11412_v16 = vpop.f32.mrf.mxu1 }
 0x935   : > { %v3434_v59 = vpop.f32.mrf.mxu0  ;;  %13002 = vst [vmem:[#allocation36_spill] sm:$0xff] %v11412_v16 }
 0x936   : > { %3772 = vxpose.xlu0.b32.cont [8/16] %v7044_v54, 128  ;;  %v11414_v54 = vpop.f32.mrf.mxu1 }
 0x937   : > { %13003 = vst [vmem:[#allocation39_spill] sm:$0xff] %v11414_v54 }
 0x938   : > { %v11416_v33 = vpop.f32.mrf.mxu1 }
 0x939   : > { %13004 = vst [vmem:[#allocation38_spill] sm:$0xff] %v11416_v33 }
 0x93a   : > { %3773 = vxpose.xlu0.b32.cont [9/16] %v3404_v52, 128 }
 0x93e   : > { %3774 = vxpose.xlu0.b32.cont [10/16] %v7047_v26, 128  ;;  %v11418_v26 = vpop.f32.mrf.mxu1 }
 0x93f   : > { %13005 = vst [vmem:[#allocation41_spill] sm:$0xff] %v11418_v26 }
 0x940   : > { %v11420_v52 = vpop.f32.mrf.mxu1 }
 0x941   : > { %13006 = vst [vmem:[#allocation40_spill] sm:$0xff] %v11420_v52 }
 0x942   : > { %3775 = vxpose.xlu0.b32.cont [11/16] %v3414_v40, 128 }
 0x946   : > { %3776 = vxpose.xlu0.b32.cont [12/16] %v7050_v19, 128  ;;  %v11422_v19 = vpop.f32.mrf.mxu1 }
 0x947   : > { %13007 = vst [vmem:[#allocation42_spill] sm:$0xff] %v11422_v19 }
 0x948   : > { %v11424_v40 = vpop.f32.mrf.mxu1 }
 0x949   : > { %13008 = vst [vmem:[#allocation43_spill] sm:$0xff] %v11424_v40 }
 0x94a   : > { %3777 = vxpose.xlu0.b32.cont [13/16] %v3424_v39, 128 }
 0x94e   : > { %3778 = vxpose.xlu0.b32.cont [14/16] %v7053_v4, 128 }
 0x952   : > { %3779 = vxpose.xlu0.b32.cont [15/16] %v3434_v59, 128 }
 0x956   : > { %3780 = vxpose.xlu0.b32.end [16/16] %v7056_v57, 128 }
 0x996   : > { %v11298_v53 = vpop.trf.xlu0 }
 0x997   : > { %7177 = vmatprep.mubr.msk.f32.mxu1 %vm3797_vm4, %v11298_v53  ;;  %4220 = vrot.lane.b32.xlu1 %v11298_v53, %s8525_s18 }
 0x99a   : > { %v11304_v29 = vpop.trf.xlu0 }
 0x99b   : > { %7178 = vmatmul.mubr.msk.f32.vlgmr.msra.gmra.mxu1 %vm3797_vm4, %v11304_v29  ;;  %4222 = vrot.lane.b32.xlu1 %v11304_v29, %s8525_s18 }
 0x99c   : > { %7240 = vmatpush3.msra.mxu1 %v7100_v36 }
 0x99d   : > { %7241 = vmatprep.subr.mxu1 %v3555_v45 }
 0x99e   : > { %v11310_v18 = vpop.trf.xlu0  ;;  %7242 = vmatpush3.msra.mxu1 %v3555_v45 }
 0x99f   : > { %7180 = vmatprep.mubr.msk.f32.mxu1 %vm3797_vm4, %v11310_v18  ;;  %4224 = vrot.lane.b32.xlu1 %v11310_v18, %s8525_s18 }
 0x9a0   : > { %7243 = vmatprep.subr.mxu1 %v7097_v8 }
 0x9a1   : > { %7244 = vmatpush3.msra.mxu1 %v7097_v8 }
 0x9a2   : > { %v11316_v44 = vpop.trf.xlu0  ;;  %7245 = vmatprep.subr.mxu1 %v3545_v25 }
 0x9a3   : > { %7181 = vmatmul.mubr.msk.f32.gmra.mxu1 %vm3797_vm4, %v11316_v44  ;;  %4226 = vrot.lane.b32.xlu1 %v11316_v44, %s8525_s18 }
 0x9a4   : > { %7246 = vmatpush3.msra.mxu1 %v3545_v25 }
 0x9a6   : > { %v11322_v20 = vpop.trf.xlu0 }
 0x9a7   : > { %7183 = vmatprep.mubr.msk.f32.mxu1 %vm3797_vm4, %v11322_v20  ;;  %4228 = vrot.lane.b32.xlu1 %v11322_v20, %s8525_s18 }
 0x9aa   : > { %v11328_v31 = vpop.trf.xlu0 }
 0x9ab   : > { %7184 = vmatmul.mubr.msk.f32.gmra.mxu1 %vm3797_vm4, %v11328_v31  ;;  %4230 = vrot.lane.b32.xlu1 %v11328_v31, %s8525_s18 }
 0x9ae   : > { %v11334_v23 = vpop.trf.xlu0 }
 0x9af   : > { %7186 = vmatprep.mubr.msk.f32.mxu1 %vm3797_vm4, %v11334_v23  ;;  %4232 = vrot.lane.b32.xlu1 %v11334_v23, %s8525_s18 }
 0x9b2   : > { %v11340_v56 = vpop.trf.xlu0 }
 0x9b3   : > { %7187 = vmatmul.mubr.msk.f32.gmra.mxu1 %vm3797_vm4, %v11340_v56  ;;  %4234 = vrot.lane.b32.xlu1 %v11340_v56, %s8525_s18 }
 0x9b6   : > { %v11346_v13 = vpop.trf.xlu0 }
 0x9b7   : > { %7189 = vmatprep.mubr.msk.f32.mxu1 %vm3797_vm4, %v11346_v13  ;;  %4236 = vrot.lane.b32.xlu1 %v11346_v13, %s8525_s18 }
 0x9ba   : > { %v11352_v48 = vpop.trf.xlu0 }
 0x9bb   : > { %7190 = vmatmul.mubr.msk.f32.gmra.mxu1 %vm3797_vm4, %v11352_v48  ;;  %4238 = vrot.lane.b32.xlu1 %v11352_v48, %s8525_s18 }
 0x9be   : > { %v11358_v49 = vpop.trf.xlu0 }
 0x9bf   : > { %7192 = vmatprep.mubr.msk.f32.mxu1 %vm3797_vm4, %v11358_v49  ;;  %4240 = vrot.lane.b32.xlu1 %v11358_v49, %s8525_s18 }
 0x9c2   : > { %v11364_v47 = vpop.trf.xlu0 }
 0x9c3   : > { %12996 = vst [vmem:[#allocation60_spill] sm:$0xff] %v11364_v47  ;;  %7193 = vmatmul.mubr.msk.f32.gmra.mxu1 %vm3797_vm4, %v11364_v47  ;;  %4242 = vrot.lane.b32.xlu1 %v11364_v47, %s8525_s18 }
 0x9c6   : > { %v11370_v55 = vpop.trf.xlu0 }
 0x9c7   : > { %12997 = vst [vmem:[#allocation125_spill] sm:$0xff] %v11370_v55  ;;  %7195 = vmatprep.mubr.msk.f32.mxu1 %vm3797_vm4, %v11370_v55  ;;  %4244 = vrot.lane.b32.xlu1 %v11370_v55, %s8525_s18 }
 0x9ca   : > { %v11376_v5 = vpop.trf.xlu0 }
 0x9cb   : > { %12998 = vst [vmem:[#allocation128_spill] sm:$0xff] %v11376_v5  ;;  %7196 = vmatmul.mubr.msk.f32.gmra.mxu1 %vm3797_vm4, %v11376_v5  ;;  %4246 = vrot.lane.b32.xlu1 %v11376_v5, %s8525_s18 }
 0x9ce   : > { %v11382_v3 = vpop.trf.xlu0 }
 0x9cf   : > { %12999 = vst [vmem:[#allocation35_spill] sm:$0xff] %v11382_v3  ;;  %7198 = vmatprep.mubr.msk.f32.mxu1 %vm3797_vm4, %v11382_v3  ;;  %4248 = vrot.lane.b32.xlu1 %v11382_v3, %s8525_s18 }
 0x9d2   : > { %v11388_v21 = vpop.trf.xlu0 }
 0x9d3   : > { %13000 = vst [vmem:[#allocation34_spill] sm:$0xff] %v11388_v21  ;;  %7199 = vmatmul.mubr.msk.f32.gmra.mxu1 %vm3797_vm4, %v11388_v21  ;;  %4250 = vrot.lane.b32.xlu1 %v11388_v21, %s8525_s18 }
 0xa09   : > { %v4221_v43 = vpop.permute.xlu1 %4220 }
 0xa0a   : > { %7247 = vmatprep.mubr.msk.f32.mxu1 %vm3797_vm4, %v4221_v43 }
 0xa0d   : > { %v4223_v30 = vpop.permute.xlu1 %4222 }
 0xa0e   : > { %7248 = vmatmul.mubr.msk.f32.vlgmr.msra.gmra.mxu1 %vm3797_vm4, %v4223_v30 }
 0xa11   : > { %v4225_v37 = vpop.permute.xlu1 %4224 }
 0xa12   : > { %7250 = vmatprep.mubr.msk.f32.mxu1 %vm3797_vm4, %v4225_v37 }
 0xa15   : > { %v4227_v46 = vpop.permute.xlu1 %4226 }
 0xa16   : > { %7251 = vmatmul.mubr.msk.f32.gmra.mxu1 %vm3797_vm4, %v4227_v46 }
 0xa19   : > { %v4229_v58 = vpop.permute.xlu1 %4228 }
 0xa1a   : > { %7253 = vmatprep.mubr.msk.f32.mxu1 %vm3797_vm4, %v4229_v58 }
 0xa1d   : > { %v4231_v28 = vpop.permute.xlu1 %4230 }
 0xa1e   : > { %7254 = vmatmul.mubr.msk.f32.gmra.mxu1 %vm3797_vm4, %v4231_v28 }
 0xa21   : > { %v4233_v27 = vpop.permute.xlu1 %4232 }
 0xa22   : > { %7256 = vmatprep.mubr.msk.f32.mxu1 %vm3797_vm4, %v4233_v27 }
 0xa25   : > { %v4235_v51 = vpop.permute.xlu1 %4234 }
 0xa26   : > { %7257 = vmatmul.mubr.msk.f32.gmra.mxu1 %vm3797_vm4, %v4235_v51 }
 0xa29   : > { %v4237_v38 = vpop.permute.xlu1 %4236 }
 0xa2a   : > { %7259 = vmatprep.mubr.msk.f32.mxu1 %vm3797_vm4, %v4237_v38 }
 0xa2d   : > { %v4239_v32 = vpop.permute.xlu1 %4238 }
 0xa2e   : > { %7260 = vmatmul.mubr.msk.f32.gmra.mxu1 %vm3797_vm4, %v4239_v32 }
 0xa31   : > { %v4241_v15 = vpop.permute.xlu1 %4240 }
 0xa32   : > { %7262 = vmatprep.mubr.msk.f32.mxu1 %vm3797_vm4, %v4241_v15 }
 0xa35   : > { %v4243_v50 = vpop.permute.xlu1 %4242 }
 0xa36   : > { %7263 = vmatmul.mubr.msk.f32.gmra.mxu1 %vm3797_vm4, %v4243_v50 }
 0xa39   : > { %v4245_v2 = vpop.permute.xlu1 %4244 }
 0xa3a   : > { %7265 = vmatprep.mubr.msk.f32.mxu1 %vm3797_vm4, %v4245_v2 }
 0xa3d   : > { %v4247_v62 = vpop.permute.xlu1 %4246 }
 0xa3e   : > { %7266 = vmatmul.mubr.msk.f32.gmra.mxu1 %vm3797_vm4, %v4247_v62 }
 0xa41   : > { %v4249_v41 = vpop.permute.xlu1 %4248 }
 0xa42   : > { %7268 = vmatprep.mubr.msk.f32.mxu1 %vm3797_vm4, %v4249_v41 }
 0xa45   : > { %v4251_v6 = vpop.permute.xlu1 %4250 }
 0xa46   : > { %7269 = vmatmul.mubr.msk.f32.gmra.mxu1 %vm3797_vm4, %v4251_v6 }
 0xa5b   : > { %v11426_v4 = vpop.f32.mrf.mxu1 }
 0xa5d   : > { %v11428_v39 = vpop.f32.mrf.mxu1 }
 0xa63   : > { %v11430_v57 = vpop.f32.mrf.mxu1 }
 0xa65   : > { %v11432_v59 = vpop.f32.mrf.mxu1 }
 0xa6b   : > { %v11434_v8 = vpop.f32.mrf.mxu1 }
 0xa6d   : > { %v11436_v25 = vpop.f32.mrf.mxu1 }
 0xa73   : > { %v11438_v36 = vpop.f32.mrf.mxu1 }
 0xa75   : > { %v11440_v45 = vpop.f32.mrf.mxu1 }
 0xa7b   : > { %v11442_v43 = vpop.f32.mrf.mxu1 }
 0xa7d   : > { %v11444_v30 = vpop.f32.mrf.mxu1 }
 0xa83   : > { %v11446_v37 = vpop.f32.mrf.mxu1 }
 0xa85   : > { %v11448_v46 = vpop.f32.mrf.mxu1 }
 0xa8b   : > { %v11450_v58 = vpop.f32.mrf.mxu1 }
 0xa8d   : > { %v11452_v28 = vpop.f32.mrf.mxu1 }
 0xa93   : > { %v11454_v27 = vpop.f32.mrf.mxu1 }
 0xa95   : > { %v11456_v51 = vpop.f32.mrf.mxu1 }
 0xace   : > { %v11458_v38 = vpop.f32.mrf.mxu1 }
 0xad0   : > { %v11460_v32 = vpop.f32.mrf.mxu1 }
 0xad6   : > { %v11462_v15 = vpop.f32.mrf.mxu1 }
 0xad8   : > { %v11464_v50 = vpop.f32.mrf.mxu1 }
 0xade   : > { %v11466_v2 = vpop.f32.mrf.mxu1 }
 0xae0   : > { %v11468_v62 = vpop.f32.mrf.mxu1 }
 0xae6   : > { %v11470_v41 = vpop.f32.mrf.mxu1 }
 0xae8   : > { %v11472_v6 = vpop.f32.mrf.mxu1 }
 0xaee   : > { %v11474_v22 = vpop.f32.mrf.mxu1 }
 0xaf0   : > { %v11476_v1 = vpop.f32.mrf.mxu1 }
 0xaf6   : > { %v11478_v63 = vpop.f32.mrf.mxu1 }
 0xaf8   : > { %v11480_v0 = vpop.f32.mrf.mxu1 }
 0xafe   : > { %v11482_v60 = vpop.f32.mrf.mxu1 }
 0xb00   : > { %v11484_v11 = vpop.f32.mrf.mxu1 }
 0xb06   : > { %v11486_v7 = vpop.f32.mrf.mxu1 }
 0xb07   : > { %4459 = vmax.xlane.f32.xlu1 %v11486_v7 }
 0xb08   : > { %v11489_v24 = vpop.f32.mrf.mxu1 }
 0xb09   : > { %4457 = vmax.xlane.f32.xlu0 %v11489_v24 }
 0xb0b   : > { %4021 = vmax.xlane.f32.xlu1 %v11454_v27 }
 0xb0d   : > { %4013 = vmax.xlane.f32.xlu0 %v11446_v37 }
 0xb0f   : > { %4455 = vmax.xlane.f32.xlu1 %v11482_v60 }
 0xb11   : > { %4011 = vmax.xlane.f32.xlu0 %v11448_v46 }
 0xb13   : > { %4019 = vmax.xlane.f32.xlu1 %v11456_v51 }
 0xb15   : > { %4009 = vmax.xlane.f32.xlu0 %v11442_v43 }
 0xb17   : > { %4453 = vmax.xlane.f32.xlu1 %v11484_v11 }
 0xb19   : > { %4007 = vmax.xlane.f32.xlu0 %v11444_v30 }
 0xb1b   : > { %4017 = vmax.xlane.f32.xlu1 %v11450_v58 }
 0xb1d   : > { %4005 = vmax.xlane.f32.xlu0 %v11438_v36 }
 0xb1f   : > { %4451 = vmax.xlane.f32.xlu1 %v11478_v63 }
 0xb21   : > { %4003 = vmax.xlane.f32.xlu0 %v11440_v45 }
 0xb23   : > { %4015 = vmax.xlane.f32.xlu1 %v11452_v28 }
 0xb25   : > { %4001 = vmax.xlane.f32.xlu0 %v11434_v8 }
 0xb27   : > { %4449 = vmax.xlane.f32.xlu1 %v11480_v0 }
 0xb29   : > { %3999 = vmax.xlane.f32.xlu0 %v11436_v25 }
 0xb2b   : > { %4447 = vmax.xlane.f32.xlu1 %v11474_v22 }
 0xb2d   : > { %3997 = vmax.xlane.f32.xlu0 %v11430_v57 }
 0xb2f   : > { %4445 = vmax.xlane.f32.xlu1 %v11476_v1 }
 0xb31   : > { %3995 = vmax.xlane.f32.xlu0 %v11432_v59 }
 0xb33   : > { %4443 = vmax.xlane.f32.xlu1 %v11470_v41 }
 0xb35   : > { %3993 = vmax.xlane.f32.xlu0 %v11426_v4 }
 0xb37   : > { %4441 = vmax.xlane.f32.xlu1 %v11472_v6 }
 0xb3b   : > { %4439 = vmax.xlane.f32.xlu1 %v11466_v2 }
 0xb3f   : > { %4437 = vmax.xlane.f32.xlu1 %v11468_v62 }
 0xb43   : > { %4435 = vmax.xlane.f32.xlu1 %v11462_v15 }
 0xb47   : > { %4433 = vmax.xlane.f32.xlu1 %v11464_v50 }
 0xb4b   : > { %4431 = vmax.xlane.f32.xlu1 %v11458_v38 }
 0xb4f   : > { %4429 = vmax.xlane.f32.xlu1 %v11460_v32 }
 0xb53   : > { %3991 = vmax.xlane.f32.xlu1 %v11428_v39 }
 0xb90   : > { %v4460_v52 = vpop.xlane.xlu1 %4459 }
 0xb91   : > { %v4476_v55 = vsub.f32 %v11486_v7, %v4460_v52 }
 0xb92   : > { %v11522_v40 = vpop.xlane.xlu0 %4457 }
 0xb94   : > { %v4022_v26 = vpop.xlane.xlu1 %4021 }
 0xb95   : > { %v4038_v9 = vsub.f32 %v11454_v27, %v4022_v26 }
 0xb96   : > { %v4014_v16 = vpop.xlane.xlu0 %4013 }
 0xb97   : > { %v4069_v14 = vmul.f32 1.442695, %v4038_v9  ;;  %v4507_v9 = vmul.f32 1.442695, %v4476_v55  ;;  %v4034_v7 = vsub.f32 %v11446_v37, %v4014_v16 }
 0xb98   : > { %v4456_v34 = vpop.xlane.xlu1 %4455 }
 0xb99   : > { %v4474_v54 = vsub.f32 %v11482_v60, %v4456_v34 }
 0xb9a   : > { %v4012_v35 = vpop.xlane.xlu0 %4011 }
 0xb9b   : > { %v4503_v47 = vmul.f32 1.442695, %v4474_v54  ;;  %v4033_v55 = vsub.f32 %v11448_v46, %v4012_v35 }
 0xb9c   : > { %v4020_v19 = vpop.xlane.xlu1 %4019 }
 0xb9d   : > { %v4037_v10 = vsub.f32 %v11456_v51, %v4020_v19 }
 0xb9e   : > { %v4010_v21 = vpop.xlane.xlu0 %4009 }
 0xb9f   : > { %v4067_v27 = vmul.f32 1.442695, %v4037_v10 }
 0xba0   : > { %v4454_v12 = vpop.xlane.xlu1 %4453 }
 0xba4   : > { %v4018_v17 = vpop.xlane.xlu1 %4017 }
 0xba5   : > { %v4036_v33 = vsub.f32 %v11450_v58, %v4018_v17  ;;  %v4473_v58 = vsub.f32 %v11484_v11, %v4454_v12 }
 0xba7   : > { %v4065_v42 = vmul.f32 1.442695, %v4036_v33  ;;  %v4008_v33 = vpop.xlane.xlu0 %4007  ;;  %v4501_v51 = vmul.f32 1.442695, %v4473_v58 }
 0xba8   : > { %v4452_v61 = vpop.xlane.xlu1 %4451 }
 0xba9   : > { %7866 = vpow2.f32 %v4065_v42  ;;  %v4472_v3 = vsub.f32 %v11478_v63, %v4452_v61  ;;  %v4032_v42 = vsub.f32 %v11442_v43, %v4010_v21  ;;  %v4031_v43 = vsub.f32 %v11444_v30, %v4008_v33 }
 0xbaa   : > { %7868 = vpow2.f32 %v4069_v14 }
 0xbab   : > { %v4499_v5 = vmul.f32 1.442695, %v4472_v3  ;;  %v4006_v52 = vpop.xlane.xlu0 %4005 }
 0xbac   : > { %v4016_v26 = vpop.xlane.xlu1 %4015 }
 0xbad   : > { %7870 = vpow2.f32 %v4499_v5  ;;  %v4035_v60 = vsub.f32 %v11452_v28, %v4016_v26  ;;  %v4057_v26 = vmul.f32 1.442695, %v4032_v42 }
 0xbae   : > { %7872 = vpow2.f32 %v4503_v47  ;;  %v4061_v47 = vmul.f32 1.442695, %v4034_v7 }
 0xbaf   : > { %7874 = vpow2.f32 %v4067_v27  ;;  %v4063_v3 = vmul.f32 1.442695, %v4035_v60  ;;  %v4004_v17 = vpop.xlane.xlu0 %4003 }
 0xbb0   : > { %v4450_v19 = vpop.xlane.xlu1 %4449  ;;  %7876 = vpow2.f32 %v4507_v9 }
 0xbb1   : > { %v4471_v63 = vsub.f32 %v11480_v0, %v4450_v19  ;;  %7878 = vpow2.f32 %v4501_v51  ;;  %v4055_v51 = vmul.f32 1.442695, %v4031_v43 }
 0xbb2   : > { %7880 = vpow2.f32 %v4063_v3  ;;  %v4029_v3 = vsub.f32 %v11440_v45, %v4004_v17 }
 0xbb3   : > { %v4497_v34 = vmul.f32 1.442695, %v4471_v63  ;;  %v4002_v58 = vpop.xlane.xlu0 %4001 }
 0xbb4   : > { %v4448_v54 = vpop.xlane.xlu1 %4447 }
 0xbb5   : > { %v4470_v11 = vsub.f32 %v11474_v22, %v4448_v54  ;;  %7882 = vpow2.f32 %v4497_v34  ;;  %v4059_v22 = vmul.f32 1.442695, %v4033_v55 }
 0xbb6   : > { %v11535_v5 = vpop.eup %7866  ;;  %7884 = vpow2.f32 %v4061_v47  ;;  %v4028_v47 = vsub.f32 %v11434_v8, %v4002_v58 }
 0xbb7   : > { %4097 = vadd.xlane.f32.xlu0 %v11535_v5  ;;  %v11539_v0 = vpop.eup %7868  ;;  %v4495_v16 = vmul.f32 1.442695, %v4470_v11  ;;  %v4000_v63 = vpop.xlane.xlu0 %3999 }
 0xbb8   : > { %v4446_v12 = vpop.xlane.xlu1 %4445 }
 0xbb9   : > { %v4469_v37 = vsub.f32 %v11476_v1, %v4446_v12  ;;  %7886 = vpow2.f32 %v4495_v16  ;;  %v4475_v1 = vsub.f32 %v11489_v24, %v11522_v40  ;;  %v4030_v24 = vsub.f32 %v11438_v36, %v4006_v52 }
 0xbba   : > { %v11542_v28 = vpop.eup %7870  ;;  %7888 = vpow2.f32 %v4059_v22  ;;  %v4027_v22 = vsub.f32 %v11436_v25, %v4000_v63 }
 0xbbb   : > { %4531 = vadd.xlane.f32.xlu1 %v11542_v28  ;;  %4101 = vadd.xlane.f32.xlu0 %v11539_v0  ;;  %v11547_v35 = vpop.eup %7872  ;;  %v4493_v14 = vmul.f32 1.442695, %v4469_v37  ;;  %v4505_v60 = vmul.f32 1.442695, %v4475_v1  ;;  %v4053_v7 = vmul.f32 1.442695, %v4030_v24  ;;  %v3998_v45 = vpop.xlane.xlu0 %3997 }
 0xbbc   : > { %v4444_v46 = vpop.xlane.xlu1 %4443  ;;  %v11550_v10 = vpop.eup %7874  ;;  %v4047_v1 = vmul.f32 1.442695, %v4027_v22 }
 0xbbd   : > { %v4468_v61 = vsub.f32 %v11470_v41, %v4444_v46  ;;  %v11556_v21 = vpop.eup %7876  ;;  %7890 = vpow2.f32 %v4493_v14 }
 0xbbe   : > { %v11559_v41 = vpop.eup %7878  ;;  %7892 = vpow2.f32 %v4057_v26  ;;  %v4026_v26 = vsub.f32 %v11430_v57, %v3998_v45 }
 0xbbf   : > { %4535 = vadd.xlane.f32.xlu1 %v11547_v35  ;;  %4099 = vadd.xlane.f32.xlu0 %v11550_v10  ;;  %v4491_v9 = vmul.f32 1.442695, %v4468_v61  ;;  %v11564_v19 = vpop.eup %7880 }
 0xbc0   : > { %v4442_v27 = vpop.xlane.xlu1 %4441 }
 0xbc1   : > { %7894 = vpow2.f32 %v4491_v9  ;;  %v4467_v30 = vsub.f32 %v11472_v6, %v4442_v27  ;;  %v4051_v6 = vmul.f32 1.442695, %v4029_v3 }
 0xbc2   : > { %v11567_v33 = vpop.eup %7882  ;;  %7896 = vpow2.f32 %v4505_v60 }
 0xbc3   : > { %4533 = vadd.xlane.f32.xlu1 %v11559_v41  ;;  %4539 = vadd.xlane.f32.xlu0 %v11556_v21  ;;  %v11572_v36 = vpop.eup %7884  ;;  %7898 = vpow2.f32 %v4055_v51  ;;  %v4489_v52 = vmul.f32 1.442695, %v4467_v30 }
 0xbc4   : > { %v4440_v40 = vpop.xlane.xlu1 %4439  ;;  %7900 = vpow2.f32 %v4053_v7 }
 0xbc5   : > { %v4466_v34 = vsub.f32 %v11466_v2, %v4440_v40  ;;  %7902 = vpow2.f32 %v4489_v52  ;;  %v4049_v2 = vmul.f32 1.442695, %v4028_v47 }
 0xbc6   : > { %v11575_v11 = vpop.eup %7886  ;;  %7904 = vpow2.f32 %v4051_v6 }
 0xbc7   : > { %4529 = vadd.xlane.f32.xlu1 %v11567_v33  ;;  %4095 = vadd.xlane.f32.xlu0 %v11564_v19  ;;  %v11580_v12 = vpop.eup %7888  ;;  %v4487_v16 = vmul.f32 1.442695, %v4466_v34 }
 0xbc8   : > { %v4438_v54 = vpop.xlane.xlu1 %4437 }
 0xbc9   : > { %v4465_v37 = vsub.f32 %v11468_v62, %v4438_v54  ;;  %7906 = vpow2.f32 %v4487_v16  ;;  %v3996_v62 = vpop.xlane.xlu0 %3995 }
 0xbca   : > { %v11583_v17 = vpop.eup %7890  ;;  %7908 = vpow2.f32 %v4049_v2  ;;  %v4025_v60 = vsub.f32 %v11432_v59, %v3996_v62  ;;  %v3612_v62 = vld [vmem:[#allocation13 + $0x40] sm:$0xff] }
 0xbcb   : > { %4527 = vadd.xlane.f32.xlu1 %v11575_v11  ;;  %4093 = vadd.xlane.f32.xlu0 %v11572_v36  ;;  %v11588_v8 = vpop.eup %7892  ;;  %v4485_v46 = vmul.f32 1.442695, %v4465_v37 }
 0xbcc   : > { %v4436_v55 = vpop.xlane.xlu1 %4435  ;;  %7157 = vmatprep.mubr.f32.mxu0 %v3612_v62 }
 0xbcd   : > { %v4464_v14 = vsub.f32 %v11462_v15, %v4436_v55  ;;  %7910 = vpow2.f32 %v4485_v46  ;;  %v4045_v15 = vmul.f32 1.442695, %v4026_v26  ;;  %v3994_v57 = vpop.xlane.xlu0 %3993  ;;  %v3614_v26 = vld [vmem:[#allocation13 + $0x50] sm:$0xff] }
 0xbce   : > { %v11591_v61 = vpop.eup %7894  ;;  %7912 = vpow2.f32 %v4047_v1  ;;  %v4024_v7 = vsub.f32 %v11426_v4, %v3994_v57  ;;  %v3613_v1 = vld [vmem:[#allocation13 + $0x48] sm:$0xff] }
 0xbcf   : > { %4525 = vadd.xlane.f32.xlu1 %v11583_v17  ;;  %4091 = vadd.xlane.f32.xlu0 %v11580_v12  ;;  %v11596_v25 = vpop.eup %7896  ;;  %v4483_v43 = vmul.f32 1.442695, %v4464_v14 }
 0xbd0   : > { %v4434_v42 = vpop.xlane.xlu1 %4433  ;;  %v11599_v9 = vpop.eup %7898  ;;  %7158 = vmatmul.mubr.f32.gmra.mxu0 %v3613_v1 }
 0xbd1   : > { %v4463_v58 = vsub.f32 %v11464_v50, %v4434_v42  ;;  %v11604_v40 = vpop.eup %7900  ;;  %7914 = vpow2.f32 %v4483_v43  ;;  %v4043_v50 = vmul.f32 1.442695, %v4025_v60  ;;  %7160 = vmatprep.mubr.f32.mxu0 %v3614_v26  ;;  %v3616_v43 = vld [vmem:[#allocation13 + $0x60] sm:$0xff]  ;;  %v3619_v60 = vld [vmem:[#allocation13 + $0x78] sm:$0xff] }
 0xbd2   : > { %v11607_v63 = vpop.eup %7902  ;;  %7916 = vpow2.f32 %v4045_v15  ;;  %v3618_v15 = vld [vmem:[#allocation13 + $0x70] sm:$0xff] }
 0xbd3   : > { %4523 = vadd.xlane.f32.xlu1 %v11591_v61  ;;  %4089 = vadd.xlane.f32.xlu0 %v11588_v8  ;;  %v4481_v51 = vmul.f32 1.442695, %v4463_v58  ;;  %v11612_v3 = vpop.eup %7904  ;;  %v3617_v58 = vld [vmem:[#allocation13 + $0x68] sm:$0xff] }
 0xbd4   : > { %v4432_v27 = vpop.xlane.xlu1 %4431 }
 0xbd5   : > { %v4462_v30 = vsub.f32 %v11458_v38, %v4432_v27  ;;  %7918 = vpow2.f32 %v4481_v51  ;;  %v4041_v38 = vmul.f32 1.442695, %v4024_v7  ;;  %v3615_v27 = vld [vmem:[#allocation13 + $0x58] sm:$0xff] }
 0xbd6   : > { %v11615_v52 = vpop.eup %7906  ;;  %7920 = vpow2.f32 %v4043_v50  ;;  %7161 = vmatmul.mubr.f32.gmra.mxu0 %v3615_v27 }
 0xbd7   : > { %4537 = vadd.xlane.f32.xlu1 %v11596_v25  ;;  %4087 = vadd.xlane.f32.xlu0 %v11599_v9  ;;  %v4479_v59 = vmul.f32 1.442695, %v4462_v30  ;;  %v11619_v6 = vpop.eup %7908 }
 0xbd8   : > { %v4430_v24 = vpop.xlane.xlu1 %4429  ;;  %7163 = vmatprep.mubr.f32.mxu0 %v3616_v43 }
 0xbd9   : > { %v4461_v54 = vsub.f32 %v11460_v32, %v4430_v24  ;;  %7922 = vpow2.f32 %v4479_v59  ;;  %v11669_v24 = vpop.f32.mrf.mxu0 }
 0xbda   : > { %v11622_v55 = vpop.eup %7910  ;;  %7924 = vpow2.f32 %v4041_v38  ;;  %7164 = vmatmul.mubr.f32.gmra.mxu0 %v3617_v58 }
 0xbdb   : > { %4521 = vadd.xlane.f32.xlu1 %v11607_v63  ;;  %4085 = vadd.xlane.f32.xlu0 %v11604_v40  ;;  %v4477_v47 = vmul.f32 1.442695, %v4461_v54  ;;  %v11626_v32 = vpop.eup %7912 }
 0xbdc   : > { %v3992_v34 = vpop.xlane.xlu1 %3991  ;;  %7166 = vmatprep.mubr.f32.mxu0 %v3618_v15 }
 0xbdd   : > { %v4023_v4 = vsub.f32 %v11428_v39, %v3992_v34  ;;  %7926 = vpow2.f32 %v4477_v47 }
 0xbde   : > { %v11628_v16 = vpop.eup %7914  ;;  %7167 = vmatmul.mubr.f32.gmra.mxu0 %v3619_v60 }
 0xbdf   : > { %4519 = vadd.xlane.f32.xlu1 %v11615_v52  ;;  %4083 = vadd.xlane.f32.xlu0 %v11612_v3  ;;  %v4039_v45 = vmul.f32 1.442695, %v4023_v4  ;;  %v11632_v37 = vpop.eup %7916 }
 0xbe1   : > { %7928 = vpow2.f32 %v4039_v45 }
 0xbe2   : > { %v11634_v39 = vpop.eup %7918 }
 0xbe3   : > { %4517 = vadd.xlane.f32.xlu1 %v11622_v55  ;;  %4081 = vadd.xlane.f32.xlu0 %v11619_v6  ;;  %v11638_v2 = vpop.eup %7920 }
 0xbe6   : > { %v11640_v22 = vpop.eup %7922 }
 0xbe7   : > { %4515 = vadd.xlane.f32.xlu1 %v11628_v16  ;;  %4079 = vadd.xlane.f32.xlu0 %v11626_v32  ;;  %v11644_v42 = vpop.eup %7924 }
 0xbea   : > { %v11646_v46 = vpop.eup %7926 }
 0xbeb   : > { %4513 = vadd.xlane.f32.xlu1 %v11634_v39  ;;  %4077 = vadd.xlane.f32.xlu0 %v11632_v37 }
 0xbee   : > { %v11650_v14 = vpop.eup %7928 }
 0xbef   : > { %4511 = vadd.xlane.f32.xlu1 %v11640_v22  ;;  %4075 = vadd.xlane.f32.xlu0 %v11638_v2 }
 0xbf3   : > { %4509 = vadd.xlane.f32.xlu1 %v11646_v46  ;;  %4073 = vadd.xlane.f32.xlu0 %v11644_v42 }
 0xbf7   : > { %4071 = vadd.xlane.f32.xlu1 %v11650_v14 }
 0xc08   : > { %5098 = vrot.lane.b32.xlu1 %v11304_v29, %s8526_s30 }
 0xc09   : > { %5096 = vrot.lane.b32.xlu0 %v11298_v53, %s8526_s30 }
 0xc0c   : > { %5100 = vrot.lane.b32.xlu1 %v11310_v18, %s8526_s30 }
 0xc0d   : > { %4658 = vrot.lane.b32.xlu0 %v11298_v53, %s8527_s0  ;;  %v3686_v53 = vpop.f32.mrf.mxu0 }
 0xc0e   : > { %7233 = vmatprep.mubr.f32.mxu0 %v3686_v53 }
 0xc10   : > { %5102 = vrot.lane.b32.xlu1 %v11316_v44, %s8526_s30 }
 0xc11   : > { %4660 = vrot.lane.b32.xlu0 %v11304_v29, %s8527_s0  ;;  %v11683_v29 = vpop.f32.mrf.mxu0 }
 0xc14   : > { %5104 = vrot.lane.b32.xlu1 %v11322_v20, %s8526_s30 }
 0xc15   : > { %4662 = vrot.lane.b32.xlu0 %v11310_v18, %s8527_s0  ;;  %v11689_v18 = vpop.f32.mrf.mxu0 }
 0xc18   : > { %5106 = vrot.lane.b32.xlu1 %v11328_v31, %s8526_s30 }
 0xc19   : > { %4664 = vrot.lane.b32.xlu0 %v11316_v44, %s8527_s0  ;;  %v11693_v44 = vpop.f32.mrf.mxu0 }
 0xc1c   : > { %5108 = vrot.lane.b32.xlu1 %v11334_v23, %s8526_s30 }
 0xc1d   : > { %4666 = vrot.lane.b32.xlu0 %v11322_v20, %s8527_s0  ;;  %v3706_v20 = vpop.f32.mrf.mxu0 }
 0xc1e   : > { %7303 = vmatprep.mubr.f32.mxu1 %v3706_v20 }
 0xc20   : > { %5110 = vrot.lane.b32.xlu1 %v11340_v56, %s8526_s30 }
 0xc21   : > { %4668 = vrot.lane.b32.xlu0 %v11328_v31, %s8527_s0  ;;  %v13009_v31 = vld [vmem:[#allocation60_spill] sm:$0xff] }
 0xc24   : > { %5112 = vrot.lane.b32.xlu1 %v11346_v13, %s8526_s30 }
 0xc25   : > { %4670 = vrot.lane.b32.xlu0 %v11334_v23, %s8527_s0  ;;  %v13010_v23 = vld [vmem:[#allocation125_spill] sm:$0xff] }
 0xc28   : > { %5114 = vrot.lane.b32.xlu1 %v11352_v48, %s8526_s30 }
 0xc29   : > { %4672 = vrot.lane.b32.xlu0 %v11340_v56, %s8527_s0  ;;  %v13011_v56 = vld [vmem:[#allocation128_spill] sm:$0xff] }
 0xc2c   : > { %5116 = vrot.lane.b32.xlu1 %v11358_v49, %s8526_s30 }
 0xc2d   : > { %4674 = vrot.lane.b32.xlu0 %v11346_v13, %s8527_s0  ;;  %v13012_v13 = vld [vmem:[#allocation35_spill] sm:$0xff] }
 0xc30   : > { %5118 = vrot.lane.b32.xlu1 %v13009_v31, %s8526_s30 }
 0xc31   : > { %4676 = vrot.lane.b32.xlu0 %v11352_v48, %s8527_s0  ;;  %v13013_v48 = vld [vmem:[#allocation34_spill] sm:$0xff] }
 0xc34   : > { %5120 = vrot.lane.b32.xlu1 %v13010_v23, %s8526_s30 }
 0xc35   : > { %4678 = vrot.lane.b32.xlu0 %v11358_v49, %s8527_s0 }
 0xc38   : > { %5122 = vrot.lane.b32.xlu1 %v13011_v56, %s8526_s30 }
 0xc39   : > { %4680 = vrot.lane.b32.xlu0 %v13009_v31, %s8527_s0 }
 0xc3c   : > { %5124 = vrot.lane.b32.xlu1 %v13012_v13, %s8526_s30 }
 0xc3d   : > { %4682 = vrot.lane.b32.xlu0 %v13010_v23, %s8527_s0 }
 0xc40   : > { %5126 = vrot.lane.b32.xlu1 %v13013_v48, %s8526_s30  ;;  %v4098_v57 = vpop.xlane.xlu0 %4097 }
 0xc41   : > { %4686 = vrot.lane.b32.xlu0 %v13012_v13, %s8527_s0 }
 0xc44   : > { %v4532_v49 = vpop.xlane.xlu1 %4531  ;;  %4684 = vrot.lane.b32.xlu1 %v13011_v56, %s8527_s0  ;;  %v4102_v51 = vpop.xlane.xlu0 %4101 }
 0xc45   : > { %7930 = vrcp.f32 %v4102_v51 }
 0xc46   : > { %7932 = vrcp.f32 %v4098_v57 }
 0xc48   : > { %v4536_v30 = vpop.xlane.xlu1 %4535  ;;  %4688 = vrot.lane.b32.xlu1 %v13013_v48, %s8527_s0  ;;  %v4100_v50 = vpop.xlane.xlu0 %4099 }
 0xc49   : > { %7934 = vrcp.f32 %v4100_v50 }
 0xc4c   : > { %v4534_v7 = vpop.xlane.xlu1 %4533  ;;  %v4540_v59 = vpop.xlane.xlu0 %4539 }
 0xc4d   : > { %7936 = vrcp.f32 %v4540_v59 }
 0xc50   : > { %v4530_v54 = vpop.xlane.xlu1 %4529  ;;  %v4096_v34 = vpop.xlane.xlu0 %4095 }
 0xc51   : > { %7938 = vrcp.f32 %v4096_v34 }
 0xc52   : > { %v7931_v38 = vpop.eup %7930 }
 0xc53   : > { %v4134_v45 = vmul.f32 %v7931_v38, %v11539_v0  ;;  %v7933_v62 = vpop.eup %7932 }
 0xc54   : > { %v11725_v47 = vpop.xlane.xlu1 %4527  ;;  %v4094_v4 = vpop.xlane.xlu0 %4093  ;;  %v4130_v58 = vmul.f32 %v7933_v62, %v11535_v5 }
 0xc55   : > { %7940 = vrcp.f32 %v4094_v4  ;;  %7201 = vmatprep.subr.mxu0 %v4134_v45 }
 0xc56   : > { %v7935_v1 = vpop.eup %7934  ;;  %7202 = vmatpush3.xpose.msra.mxu0 %v4134_v45 }
 0xc57   : > { %v4132_v43 = vmul.f32 %v7935_v1, %v11550_v10 }
 0xc58   : > { %v11728_v26 = vpop.xlane.xlu1 %4525  ;;  %v4092_v27 = vpop.xlane.xlu0 %4091 }
 0xc59   : > { %7942 = vrcp.f32 %v4092_v27  ;;  %7203 = vmatprep.subr.mxu0 %v4132_v43 }
 0xc5a   : > { %v7937_v15 = vpop.eup %7936  ;;  %7204 = vmatpush3.xpose.msra.mxu0 %v4132_v43 }
 0xc5b   : > { %7205 = vmatprep.subr.mxu0 %v4130_v58  ;;  %v4572_v53 = vmul.f32 %v7937_v15, %v11556_v21 }
 0xc5c   : > { %v11732_v60 = vpop.xlane.xlu1 %4523  ;;  %v4090_v0 = vpop.xlane.xlu0 %4089 }
 0xc5d   : > { %7944 = vrcp.f32 %v4090_v0  ;;  %7271 = vmatprep.subr.mxu1 %v4572_v53 }
 0xc5e   : > { %v7939_v20 = vpop.eup %7938  ;;  %7206 = vmatpush3.xpose.msra.mxu0 %v4130_v58  ;;  %7272 = vmatpush3.xpose.msra.mxu1 %v4572_v53  ;;  %7946 = vrcp.f32 %v4536_v30 }
 0xc5f   : > { %v4128_v23 = vmul.f32 %v7939_v20, %v11564_v19 }
 0xc60   : > { %v4538_v31 = vpop.xlane.xlu1 %4537  ;;  %v4088_v10 = vpop.xlane.xlu0 %4087 }
 0xc61   : > { %7948 = vrcp.f32 %v4538_v31  ;;  %7207 = vmatprep.subr.mxu0 %v4128_v23 }
 0xc62   : > { %7950 = vrcp.f32 %v4088_v10  ;;  %v7941_v5 = vpop.eup %7940  ;;  %7208 = vmatpush3.xpose.msra.mxu0 %v4128_v23 }
 0xc63   : > { %v4126_v21 = vmul.f32 %v7941_v5, %v11572_v36  ;;  %7952 = vrcp.f32 %v4534_v7 }
 0xc64   : > { %v11736_v56 = vpop.xlane.xlu1 %4521  ;;  %v4086_v13 = vpop.xlane.xlu0 %4085 }
 0xc65   : > { %7954 = vrcp.f32 %v4086_v13  ;;  %7209 = vmatprep.subr.mxu0 %v4126_v21 }
 0xc66   : > { %v7943_v48 = vpop.eup %7942  ;;  %7210 = vmatpush3.xpose.msra.mxu0 %v4126_v21  ;;  %7956 = vrcp.f32 %v4532_v49 }
 0xc67   : > { %v4124_v19 = vmul.f32 %v7943_v48, %v11580_v12 }
 0xc68   : > { %v11739_v57 = vpop.xlane.xlu1 %4519  ;;  %v4084_v51 = vpop.xlane.xlu0 %4083 }
 0xc69   : > { %7958 = vrcp.f32 %v4084_v51  ;;  %7211 = vmatprep.subr.mxu0 %v4124_v19 }
 0xc6a   : > { %v7945_v30 = vpop.eup %7944  ;;  %7212 = vmatpush3.xpose.msra.mxu0 %v4124_v19  ;;  %7960 = vrcp.f32 %v4530_v54 }
 0xc6b   : > { %v4122_v36 = vmul.f32 %v7945_v30, %v11588_v8  ;;  %v7947_v7 = vpop.eup %7946 }
 0xc6c   : > { %v11742_v50 = vpop.xlane.xlu1 %4517  ;;  %v4082_v59 = vpop.xlane.xlu0 %4081  ;;  %v4568_v62 = vmul.f32 %v7947_v7, %v11547_v35 }
 0xc6d   : > { %7962 = vrcp.f32 %v4082_v59  ;;  %7213 = vmatprep.subr.mxu0 %v4122_v36 }
 0xc6e   : > { %v7949_v34 = vpop.eup %7948  ;;  %7214 = vmatpush3.xpose.msra.mxu0 %v4122_v36  ;;  %7964 = vrcp.f32 %v11725_v47 }
 0xc6f   : > { %v7951_v38 = vpop.eup %7950  ;;  %v4570_v4 = vmul.f32 %v7949_v34, %v11596_v25 }
 0xc70   : > { %v11746_v12 = vpop.xlane.xlu1 %4515  ;;  %v4080_v49 = vpop.xlane.xlu0 %4079  ;;  %v4120_v45 = vmul.f32 %v7951_v38, %v11599_v9 }
 0xc71   : > { %7273 = vmatprep.subr.mxu1 %v4570_v4  ;;  %v7953_v8 = vpop.eup %7952  ;;  %7966 = vrcp.f32 %v4080_v49 }
 0xc72   : > { %7215 = vmatprep.subr.mxu0 %v4120_v45  ;;  %7274 = vmatpush3.xpose.msra.mxu1 %v4570_v4  ;;  %v7955_v54 = vpop.eup %7954  ;;  %7968 = vrcp.f32 %v11728_v26  ;;  %v4566_v9 = vmul.f32 %v7953_v8, %v11559_v41 }
 0xc73   : > { %7216 = vmatpush3.xpose.msra.mxu0 %v4120_v45  ;;  %7275 = vmatprep.subr.mxu1 %v4568_v62  ;;  %v4118_v27 = vmul.f32 %v7955_v54, %v11604_v40  ;;  %v7957_v47 = vpop.eup %7956 }
 0xc74   : > { %v11751_v1 = vpop.xlane.xlu1 %4513  ;;  %v4078_v25 = vpop.xlane.xlu0 %4077  ;;  %v4564_v40 = vmul.f32 %v7957_v47, %v11542_v28 }
 0xc75   : > { %7970 = vrcp.f32 %v4078_v25  ;;  %7217 = vmatprep.subr.mxu0 %v4118_v27 }
 0xc76   : > { %7276 = vmatpush3.xpose.msra.mxu1 %v4568_v62  ;;  %v7959_v35 = vpop.eup %7958  ;;  %7972 = vrcp.f32 %v11732_v60 }
 0xc77   : > { %7218 = vmatpush3.xpose.msra.mxu0 %v4118_v27  ;;  %7277 = vmatprep.subr.mxu1 %v4566_v9  ;;  %v4116_v15 = vmul.f32 %v7959_v35, %v11612_v3  ;;  %v7961_v0 = vpop.eup %7960 }
 0xc78   : > { %v11756_v43 = vpop.xlane.xlu1 %4511  ;;  %v4076_v58 = vpop.xlane.xlu0 %4075  ;;  %v4562_v3 = vmul.f32 %v7961_v0, %v11567_v33 }
 0xc79   : > { %7974 = vrcp.f32 %v4076_v58  ;;  %7219 = vmatprep.subr.mxu0 %v4116_v15 }
 0xc7a   : > { %7278 = vmatpush3.xpose.msra.mxu1 %v4566_v9  ;;  %v7963_v41 = vpop.eup %7962  ;;  %7976 = vrcp.f32 %v11736_v56 }
 0xc7b   : > { %7220 = vmatpush3.xpose.msra.mxu0 %v4116_v15  ;;  %7279 = vmatprep.subr.mxu1 %v4564_v40  ;;  %v4114_v20 = vmul.f32 %v7963_v41, %v11619_v6  ;;  %v7965_v31 = vpop.eup %7964 }
 0xc7c   : > { %v11761_v26 = vpop.xlane.xlu1 %4509  ;;  %v4074_v53 = vpop.xlane.xlu0 %4073  ;;  %v4560_v6 = vmul.f32 %v7965_v31, %v11575_v11  ;;  %v13019_v31 = vld [vmem:[#allocation43_spill] sm:$0xff] }
 0xc7d   : > { %7978 = vrcp.f32 %v4074_v53  ;;  %7221 = vmatprep.subr.mxu0 %v4114_v20 }
 0xc7e   : > { %7280 = vmatpush3.xpose.msra.mxu1 %v4564_v40  ;;  %v7967_v28 = vpop.eup %7966  ;;  %7980 = vrcp.f32 %v11739_v57  ;;  %v7156_v40 = vpop.f32.mrf.mxu0 }
 0xc7f   : > { %7222 = vmatpush3.xpose.msra.mxu0 %v4114_v20  ;;  %7281 = vmatprep.subr.mxu1 %v4562_v3  ;;  %v4112_v23 = vmul.f32 %v7967_v28, %v11626_v32  ;;  %v7969_v5 = vpop.eup %7968  ;;  %v13020_v28 = vld [vmem:[#allocation41_spill] sm:$0xff] }
 0xc80   : > { %v4072_v60 = vpop.xlane.xlu1 %4071  ;;  %v11767_v10 = vpop.permute.xlu0 %5096  ;;  %v4558_v48 = vmul.f32 %v7969_v5, %v11583_v17 }
 0xc81   : > { %7982 = vrcp.f32 %v4072_v60  ;;  %7223 = vmatprep.subr.mxu0 %v4112_v23  ;;  %v3716_v41 = vpop.f32.mrf.mxu0 }
 0xc82   : > { %7282 = vmatpush3.xpose.msra.mxu1 %v4562_v3  ;;  %v7971_v33 = vpop.eup %7970  ;;  %7984 = vrcp.f32 %v11742_v50 }
 0xc83   : > { %7224 = vmatpush3.xpose.msra.mxu0 %v4112_v23  ;;  %7283 = vmatprep.subr.mxu1 %v4560_v6  ;;  %v4110_v21 = vmul.f32 %v7971_v33, %v11632_v37  ;;  %v7973_v32 = vpop.eup %7972  ;;  %7986 = vrcp.f32 %v11746_v12  ;;  %v13021_v23 = vld [vmem:[#allocation40_spill] sm:$0xff] }
 0xc84   : > { %v11771_v56 = vpop.permute.xlu1 %5098  ;;  %v11773_v13 = vpop.permute.xlu0 %4658  ;;  %v4556_v30 = vmul.f32 %v7973_v32, %v11591_v61  ;;  %7988 = vrcp.f32 %v11751_v1 }
 0xc85   : > { %7225 = vmatprep.subr.mxu0 %v4110_v21  ;;  %7990 = vrcp.f32 %v11756_v43 }
 0xc86   : > { %7284 = vmatpush3.xpose.msra.mxu1 %v4560_v6  ;;  %v7975_v11 = vpop.eup %7974  ;;  %7992 = vrcp.f32 %v11761_v26  ;;  %v13018_v26 = vld [vmem:[#allocation42_spill] sm:$0xff] }
 0xc87   : > { %7226 = vmatpush3.xpose.msra.mxu0 %v4110_v21  ;;  %7285 = vmatprep.subr.mxu1 %v4558_v48  ;;  %v4108_v19 = vmul.f32 %v7975_v11, %v11638_v2  ;;  %v7977_v59 = vpop.eup %7976 }
 0xc88   : > { %v11778_v57 = vpop.permute.xlu1 %5100  ;;  %v4661_v51 = vpop.permute.xlu0 %4660  ;;  %v4554_v34 = vmul.f32 %v7977_v59, %v11607_v63  ;;  %v13014_v63 = vld [vmem:[#allocation39_spill] sm:$0xff] }
 0xc89   : > { %7227 = vmatprep.subr.mxu0 %v4108_v19 }
 0xc8a   : > { %7286 = vmatpush3.xpose.msra.mxu1 %v4558_v48  ;;  %v7979_v37 = vpop.eup %7978 }
 0xc8b   : > { %7228 = vmatpush3.xpose.msra.mxu0 %v4108_v19  ;;  %7287 = vmatprep.subr.mxu1 %v4556_v30  ;;  %v4106_v36 = vmul.f32 %v7979_v37, %v11644_v42  ;;  %v7981_v7 = vpop.eup %7980 }
 0xc8c   : > { %v11783_v17 = vpop.permute.xlu1 %5102  ;;  %v4663_v50 = vpop.permute.xlu0 %4662  ;;  %v4552_v12 = vmul.f32 %v7981_v7, %v11615_v52  ;;  %v13015_v52 = vld [vmem:[#allocation38_spill] sm:$0xff] }
 0xc8d   : > { %7229 = vmatprep.subr.mxu0 %v4106_v36 }
 0xc8e   : > { %v7983_v38 = vpop.eup %7982  ;;  %7288 = vmatpush3.xpose.msra.mxu1 %v4556_v30 }
 0xc8f   : > { %7230 = vmatpush3.xpose.msra.mxu0 %v4106_v36  ;;  %7289 = vmatprep.subr.mxu1 %v4554_v34  ;;  %v4104_v61 = vmul.f32 %v7983_v38, %v11650_v14  ;;  %v7985_v49 = vpop.eup %7984 }
 0xc90   : > { %v11789_v2 = vpop.permute.xlu1 %5104  ;;  %v4665_v4 = vpop.permute.xlu0 %4664  ;;  %v4550_v62 = vmul.f32 %v7985_v49, %v11622_v55  ;;  %v13016_v55 = vld [vmem:[#allocation37_spill] sm:$0xff] }
 0xc91   : > { %7231 = vmatprep.subr.mxu0 %v4104_v61  ;;  %v7987_v14 = vpop.eup %7986 }
 0xc92   : > { %7290 = vmatpush3.xpose.msra.mxu1 %v4554_v34  ;;  %v7989_v1 = vpop.eup %7988 }
 0xc93   : > { %7232 = vmatpush3.xpose.msra.mxu0 %v4104_v61  ;;  %7291 = vmatprep.subr.mxu1 %v4552_v12  ;;  %v7991_v9 = vpop.eup %7990 }
 0xc94   : > { %7309 = vmatprep.subr.mxu0 %v13014_v63  ;;  %v11794_v42 = vpop.permute.xlu1 %5106  ;;  %v4667_v45 = vpop.permute.xlu0 %4666  ;;  %v4544_v35 = vmul.f32 %v7991_v9, %v11640_v22 }
 0xc95   : > { %v7993_v43 = vpop.eup %7992 }
 0xc96   : > { %7234 = vmatmul.mubr.f32.vlgmr.msra.gmra.mxu0 %v11669_v24  ;;  %7292 = vmatpush3.xpose.msra.mxu1 %v4552_v12  ;;  %v4548_v24 = vmul.f32 %v7987_v14, %v11628_v16  ;;  %v4542_v15 = vmul.f32 %v7993_v43, %v11646_v46 }
 0xc97   : > { %7310 = vmatpush3.msra.mxu0 %v13014_v63  ;;  %7293 = vmatprep.subr.mxu1 %v4550_v62 }
 0xc98   : > { %7311 = vmatprep.subr.mxu0 %v13015_v52  ;;  %v11801_v8 = vpop.permute.xlu1 %5108  ;;  %v4669_v54 = vpop.permute.xlu0 %4668  ;;  %7236 = vmatprep.mubr.f32.mxu0 %v11689_v18  ;;  %v13017_v18 = vld [vmem:[#allocation36_spill] sm:$0xff] }
 0xc99   : > { %7312 = vmatpush3.msra.mxu0 %v13015_v52 }
 0xc9a   : > { %7237 = vmatmul.mubr.f32.gmra.mxu0 %v11683_v29  ;;  %7313 = vmatprep.subr.mxu0 %v13016_v55  ;;  %v4546_v29 = vmul.f32 %v7989_v1, %v11634_v39 }
 0xc9b   : > { %7294 = vmatpush3.xpose.msra.mxu1 %v4550_v62  ;;  %7314 = vmatpush3.msra.mxu0 %v13016_v55 }
 0xc9c   : > { %7317 = vmatprep.mubr.msk.f32.mxu0 %vm3797_vm4, %v11773_v13  ;;  %7295 = vmatprep.subr.mxu1 %v4548_v24  ;;  %v11811_v25 = vpop.permute.xlu1 %5110  ;;  %v4671_v27 = vpop.permute.xlu0 %4670 }
 0xc9d   : > { %7315 = vmatprep.subr.mxu0 %v13017_v18  ;;  %v11859_v13 = vpop.f32.mrf.mxu0 }
 0xc9e   : > { %7316 = vmatpush3.msra.mxu0 %v13017_v18 }
 0xc9f   : > { %7318 = vmatmul.mubr.msk.f32.vlgmr.msra.gmra.mxu0 %vm3797_vm4, %v4661_v51  ;;  %7296 = vmatpush3.xpose.msra.mxu1 %v4548_v24  ;;  %v3726_v21 = vpop.f32.mrf.mxu0 }
 0xca0   : > { %7320 = vmatprep.mubr.msk.f32.mxu0 %vm3797_vm4, %v4663_v50  ;;  %7297 = vmatprep.subr.mxu1 %v4546_v29  ;;  %v5113_v16 = vpop.permute.xlu1 %5112  ;;  %v4673_v47 = vpop.permute.xlu0 %4672 }
 0xca1   : > { %v11863_v48 = vpop.f32.mrf.mxu0 }
 0xca3   : > { %7321 = vmatmul.mubr.msk.f32.gmra.mxu0 %vm3797_vm4, %v4665_v4  ;;  %7298 = vmatpush3.xpose.msra.mxu1 %v4546_v29  ;;  %v11866_v32 = vpop.f32.mrf.mxu0 }
 0xca4   : > { %7323 = vmatprep.mubr.msk.f32.mxu0 %vm3797_vm4, %v4667_v45  ;;  %7299 = vmatprep.subr.mxu1 %v4544_v35  ;;  %v5115_v58 = vpop.permute.xlu1 %5114  ;;  %v4675_v39 = vpop.permute.xlu0 %4674 }
 0xca5   : > { %v11870_v11 = vpop.f32.mrf.mxu0 }
 0xca7   : > { %7324 = vmatmul.mubr.msk.f32.gmra.mxu0 %vm3797_vm4, %v4669_v54  ;;  %7300 = vmatpush3.xpose.msra.mxu1 %v4544_v35 }
 0xca8   : > { %7326 = vmatprep.mubr.msk.f32.mxu0 %vm3797_vm4, %v4671_v27  ;;  %7301 = vmatprep.subr.mxu1 %v4542_v15  ;;  %v5117_v0 = vpop.permute.xlu1 %5116  ;;  %v4677_v22 = vpop.permute.xlu0 %4676 }
 0xcab   : > { %7327 = vmatmul.mubr.msk.f32.gmra.mxu0 %vm3797_vm4, %v4673_v47  ;;  %7302 = vmatpush3.xpose.msra.mxu1 %v4542_v15 }
 0xcac   : > { %7329 = vmatprep.mubr.msk.f32.mxu0 %vm3797_vm4, %v4675_v39  ;;  %7379 = vmatprep.subr.mxu1 %v13018_v26  ;;  %v5119_v53 = vpop.permute.xlu1 %5118  ;;  %v4679_v20 = vpop.permute.xlu0 %4678 }
 0xcae   : > { %7304 = vmatmul.mubr.f32.vlgmr.msra.gmra.mxu1 %v11693_v44 }
 0xcaf   : > { %7330 = vmatmul.mubr.msk.f32.gmra.mxu0 %vm3797_vm4, %v4677_v22  ;;  %7306 = vmatprep.mubr.f32.mxu1 %v3716_v41 }
 0xcb0   : > { %7332 = vmatprep.mubr.msk.f32.mxu0 %vm3797_vm4, %v4679_v20  ;;  %7380 = vmatpush3.msra.mxu1 %v13018_v26  ;;  %v5121_v46 = vpop.permute.xlu1 %5120  ;;  %v4681_v3 = vpop.permute.xlu0 %4680 }
 0xcb1   : > { %7381 = vmatprep.subr.mxu1 %v13019_v31 }
 0xcb2   : > { %7382 = vmatpush3.msra.mxu1 %v13019_v31 }
 0xcb3   : > { %7307 = vmatmul.mubr.f32.gmra.mxu1 %v7156_v40  ;;  %7333 = vmatmul.mubr.msk.f32.gmra.mxu0 %vm3797_vm4, %v4681_v3 }
 0xcb4   : > { %7383 = vmatprep.subr.mxu1 %v13020_v28  ;;  %7387 = vmatprep.mubr.msk.f32.mxu1 %vm3797_vm4, %v11767_v10  ;;  %v5123_v44 = vpop.permute.xlu1 %5122  ;;  %v4683_v60 = vpop.permute.xlu0 %4682 }
 0xcb5   : > { %7384 = vmatpush3.msra.mxu1 %v13020_v28  ;;  %7335 = vmatprep.mubr.msk.f32.mxu0 %vm3797_vm4, %v4683_v60 }
 0xcb6   : > { %7385 = vmatprep.subr.mxu1 %v13021_v23 }
 0xcb7   : > { %7386 = vmatpush3.msra.mxu1 %v13021_v23 }
 0xcb8   : > { %7388 = vmatmul.mubr.msk.f32.vlgmr.msra.gmra.mxu1 %vm3797_vm4, %v11771_v56  ;;  %v5125_v6 = vpop.permute.xlu1 %5124  ;;  %v4687_v33 = vpop.permute.xlu0 %4686 }
 0xcb9   : > { %7390 = vmatprep.mubr.msk.f32.mxu1 %vm3797_vm4, %v11778_v57  ;;  %v3746_v57 = vpop.f32.mrf.mxu0 }
 0xcbb   : > { %v11874_v51 = vpop.f32.mrf.mxu0 }
 0xcbc   : > { %7391 = vmatmul.mubr.msk.f32.gmra.mxu1 %vm3797_vm4, %v11783_v17  ;;  %v5127_v10 = vpop.permute.xlu1 %5126 }
 0xcbd   : > { %7393 = vmatprep.mubr.msk.f32.mxu1 %vm3797_vm4, %v11789_v2  ;;  %v11876_v19 = vpop.f32.mrf.mxu0 }
 0xcc0   : > { %7394 = vmatmul.mubr.msk.f32.gmra.mxu1 %vm3797_vm4, %v11794_v42  ;;  %v4685_v5 = vpop.permute.xlu1 %4684 }
 0xcc1   : > { %7396 = vmatprep.mubr.msk.f32.mxu1 %vm3797_vm4, %v11801_v8  ;;  %7336 = vmatmul.mubr.msk.f32.gmra.mxu0 %vm3797_vm4, %v4685_v5 }
 0xcc2   : > { %7338 = vmatprep.mubr.msk.f32.mxu0 %vm3797_vm4, %v4687_v33 }
 0xcc4   : > { %7397 = vmatmul.mubr.msk.f32.gmra.mxu1 %vm3797_vm4, %v11811_v25  ;;  %v4689_v56 = vpop.permute.xlu1 %4688 }
 0xcc5   : > { %7399 = vmatprep.mubr.msk.f32.mxu1 %vm3797_vm4, %v5113_v16  ;;  %7339 = vmatmul.mubr.msk.f32.gmra.mxu0 %vm3797_vm4, %v4689_v56 }
 0xcc6   : > { %7373 = vmatprep.mubr.f32.mxu0 %v3726_v21 }
 0xcc8   : > { %7400 = vmatmul.mubr.msk.f32.gmra.mxu1 %vm3797_vm4, %v5115_v58 }
 0xcc9   : > { %7402 = vmatprep.mubr.msk.f32.mxu1 %vm3797_vm4, %v5117_v0 }
 0xccc   : > { %7403 = vmatmul.mubr.msk.f32.gmra.mxu1 %vm3797_vm4, %v5119_v53 }
 0xccd   : > { %7405 = vmatprep.mubr.msk.f32.mxu1 %vm3797_vm4, %v5121_v46 }
 0xcd0   : > { %7406 = vmatmul.mubr.msk.f32.gmra.mxu1 %vm3797_vm4, %v5123_v44 }
 0xcd1   : > { %7408 = vmatprep.mubr.msk.f32.mxu1 %vm3797_vm4, %v5125_v6 }
 0xcd4   : > { %7409 = vmatmul.mubr.msk.f32.gmra.mxu1 %vm3797_vm4, %v5127_v10 }
 0xcd5   : > { %7443 = vmatprep.mubr.f32.mxu1 %v3746_v57 }
 0xd56   : > { %v11878_v30 = vpop.f32.mrf.mxu0 }
 0xd58   : > { %v11880_v59 = vpop.f32.mrf.mxu0 }
 0xd5a   : > { %v11882_v37 = vpop.f32.mrf.mxu0 }
 0xd5c   : > { %v11884_v17 = vpop.f32.mrf.mxu0 }
 0xd5f   : > { %v11886_v50 = vpop.f32.mrf.mxu0 }
 0xd61   : > { %v11888_v36 = vpop.f32.mrf.mxu0 }
 0xd63   : > { %v11890_v7 = vpop.f32.mrf.mxu0 }
 0xd65   : > { %v11892_v34 = vpop.f32.mrf.mxu0 }
 0xd67   : > { %v11898_v2 = vpop.f32.mrf.mxu0 }
 0xd69   : > { %v11904_v49 = vpop.f32.mrf.mxu0 }
 0xd6b   : > { %v11908_v42 = vpop.f32.mrf.mxu0 }
 0xd6d   : > { %v11914_v14 = vpop.f32.mrf.mxu0 }
 0xd6e   : > { %v11894_v38 = vpop.f32.mrf.mxu1 }
 0xd6f   : > { %v11920_v54 = vpop.f32.mrf.mxu0 }
 0xd70   : > { %v11896_v61 = vpop.f32.mrf.mxu1 }
 0xd71   : > { %v11926_v1 = vpop.f32.mrf.mxu0 }
 0xd73   : > { %v11900_v4 = vpop.f32.mrf.mxu1  ;;  %v11932_v18 = vpop.f32.mrf.mxu0 }
 0xd75   : > { %v11902_v12 = vpop.f32.mrf.mxu1  ;;  %v11938_v16 = vpop.f32.mrf.mxu0 }
 0xd78   : > { %v11906_v63 = vpop.f32.mrf.mxu1 }
 0xd7a   : > { %v11910_v45 = vpop.f32.mrf.mxu1 }
 0xd7c   : > { %v11912_v62 = vpop.f32.mrf.mxu1 }
 0xd7e   : > { %v11916_v52 = vpop.f32.mrf.mxu1 }
 0xd80   : > { %v11918_v8 = vpop.f32.mrf.mxu1 }
 0xd81   : > { %v11942_v35 = vpop.f32.mrf.mxu0 }
 0xd82   : > { %v11922_v55 = vpop.f32.mrf.mxu1 }
 0xd83   : > { %v11944_v39 = vpop.f32.mrf.mxu0 }
 0xd84   : > { %v11924_v24 = vpop.f32.mrf.mxu1 }
 0xd85   : > { %v7340_v0 = vpop.f32.mrf.mxu0 }
 0xd86   : > { %v11928_v25 = vpop.f32.mrf.mxu1 }
 0xd87   : > { %v4858_v22 = vpop.f32.mrf.mxu0 }
 0xd88   : > { %v11930_v27 = vpop.f32.mrf.mxu1 }
 0xd8a   : > { %v11934_v29 = vpop.f32.mrf.mxu1 }
 0xd8c   : > { %v11936_v9 = vpop.f32.mrf.mxu1 }
 0xd8e   : > { %v11940_v47 = vpop.f32.mrf.mxu1 }
 0xd90   : > { %v7407_v43 = vpop.f32.mrf.mxu1 }
 0xd92   : > { %v5286_v58 = vpop.f32.mrf.mxu1 }
 0xd94   : > { %v7410_v15 = vpop.f32.mrf.mxu1 }
 0xd95   : > { %5335 = vmax.xlane.f32.xlu0 %v7410_v15 }
 0xd96   : > { %v5296_v40 = vpop.f32.mrf.mxu1 }
 0xd97   : > { %5333 = vmax.xlane.f32.xlu1 %v5296_v40 }
 0xd99   : > { %4897 = vmax.xlane.f32.xlu0 %v7340_v0 }
 0xd9b   : > { %5329 = vmax.xlane.f32.xlu1 %v5286_v58 }
 0xd9d   : > { %5331 = vmax.xlane.f32.xlu0 %v7407_v43 }
 0xd9f   : > { %5327 = vmax.xlane.f32.xlu1 %v11936_v9 }
 0xda1   : > { %4895 = vmax.xlane.f32.xlu0 %v4858_v22 }
 0xda3   : > { %5325 = vmax.xlane.f32.xlu1 %v11940_v47 }
 0xda5   : > { %4893 = vmax.xlane.f32.xlu0 %v11942_v35 }
 0xda7   : > { %5323 = vmax.xlane.f32.xlu1 %v11930_v27 }
 0xda9   : > { %4891 = vmax.xlane.f32.xlu0 %v11944_v39 }
 0xdab   : > { %5321 = vmax.xlane.f32.xlu1 %v11934_v29 }
 0xdad   : > { %4889 = vmax.xlane.f32.xlu0 %v11932_v18 }
 0xdaf   : > { %5319 = vmax.xlane.f32.xlu1 %v11924_v24 }
 0xdb1   : > { %4887 = vmax.xlane.f32.xlu0 %v11938_v16 }
 0xdb3   : > { %5317 = vmax.xlane.f32.xlu1 %v11928_v25 }
 0xdb5   : > { %4885 = vmax.xlane.f32.xlu0 %v11920_v54 }
 0xdb7   : > { %5315 = vmax.xlane.f32.xlu1 %v11918_v8 }
 0xdb9   : > { %4883 = vmax.xlane.f32.xlu0 %v11926_v1 }
 0xdbb   : > { %5313 = vmax.xlane.f32.xlu1 %v11922_v55 }
 0xdbd   : > { %4881 = vmax.xlane.f32.xlu0 %v11908_v42 }
 0xdbf   : > { %5311 = vmax.xlane.f32.xlu1 %v11912_v62 }
 0xdc1   : > { %4879 = vmax.xlane.f32.xlu0 %v11914_v14 }
 0xdc3   : > { %5309 = vmax.xlane.f32.xlu1 %v11916_v52 }
 0xdc5   : > { %4877 = vmax.xlane.f32.xlu0 %v11898_v2 }
 0xdc7   : > { %5307 = vmax.xlane.f32.xlu1 %v11906_v63 }
 0xdc9   : > { %4875 = vmax.xlane.f32.xlu0 %v11904_v49 }
 0xdcb   : > { %5305 = vmax.xlane.f32.xlu1 %v11910_v45 }
 0xdcd   : > { %4873 = vmax.xlane.f32.xlu0 %v11890_v7 }
 0xdcf   : > { %4867 = vmax.xlane.f32.xlu1 %v11888_v36 }
 0xdd1   : > { %4871 = vmax.xlane.f32.xlu0 %v11892_v34 }
 0xdd5   : > { %4869 = vmax.xlane.f32.xlu0 %v11886_v50 }
 0xe1e   : > { %v5336_v41 = vpop.xlane.xlu0 %5335 }
 0xe1f   : > { %v5352_v26 = vsub.f32 %v7410_v15, %v5336_v41 }
 0xe20   : > { %v5334_v53 = vpop.xlane.xlu1 %5333 }
 0xe21   : > { %v5383_v20 = vmul.f32 1.442695, %v5352_v26  ;;  %v5351_v46 = vsub.f32 %v5296_v40, %v5334_v53 }
 0xe22   : > { %v4898_v3 = vpop.xlane.xlu0 %4897 }
 0xe23   : > { %7994 = vpow2.f32 %v5383_v20  ;;  %v5381_v31 = vmul.f32 1.442695, %v5351_v46  ;;  %v4914_v28 = vsub.f32 %v7340_v0, %v4898_v3 }
 0xe24   : > { %v5330_v44 = vpop.xlane.xlu1 %5329 }
 0xe25   : > { %7996 = vpow2.f32 %v5381_v31  ;;  %v4945_v60 = vmul.f32 1.442695, %v4914_v28  ;;  %v5349_v23 = vsub.f32 %v5286_v58, %v5330_v44 }
 0xe26   : > { %v5332_v6 = vpop.xlane.xlu0 %5331 }
 0xe27   : > { %7998 = vpow2.f32 %v4945_v60  ;;  %v5350_v10 = vsub.f32 %v7407_v43, %v5332_v6  ;;  %v5377_v56 = vmul.f32 1.442695, %v5349_v23 }
 0xe28   : > { %v5328_v5 = vpop.xlane.xlu1 %5327 }
 0xe29   : > { %v5379_v33 = vmul.f32 1.442695, %v5350_v10  ;;  %v5348_v21 = vsub.f32 %v11936_v9, %v5328_v5 }
 0xe2a   : > { %v4896_v57 = vpop.xlane.xlu0 %4895 }
 0xe2b   : > { %8000 = vpow2.f32 %v5379_v33  ;;  %v4913_v15 = vsub.f32 %v4858_v22, %v4896_v57  ;;  %v5375_v26 = vmul.f32 1.442695, %v5348_v21 }
 0xe2c   : > { %v5326_v40 = vpop.xlane.xlu1 %5325  ;;  %8002 = vpow2.f32 %v5377_v56 }
 0xe2d   : > { %v4943_v41 = vmul.f32 1.442695, %v4913_v15  ;;  %v5347_v0 = vsub.f32 %v11940_v47, %v5326_v40 }
 0xe2e   : > { %v4894_v53 = vpop.xlane.xlu0 %4893 }
 0xe2f   : > { %8004 = vpow2.f32 %v4943_v41  ;;  %v4912_v58 = vsub.f32 %v11942_v35, %v4894_v53  ;;  %v5373_v22 = vmul.f32 1.442695, %v5347_v0 }
 0xe30   : > { %v11975_v20 = vpop.eup %7994  ;;  %v5324_v43 = vpop.xlane.xlu1 %5323  ;;  %8006 = vpow2.f32 %v5375_v26 }
 0xe31   : > { %v4941_v46 = vmul.f32 1.442695, %v4912_v58  ;;  %5415 = vadd.xlane.f32.xlu0 %v11975_v20  ;;  %v5346_v3 = vsub.f32 %v11930_v27, %v5324_v43 }
 0xe32   : > { %v11978_v9 = vpop.eup %7996  ;;  %v4892_v31 = vpop.xlane.xlu0 %4891 }
 0xe33   : > { %8008 = vpow2.f32 %v4941_v46  ;;  %v4911_v47 = vsub.f32 %v11944_v39, %v4892_v31  ;;  %5413 = vadd.xlane.f32.xlu1 %v11978_v9  ;;  %v5371_v60 = vmul.f32 1.442695, %v5346_v3 }
 0xe34   : > { %v11983_v28 = vpop.eup %7998  ;;  %v5322_v35 = vpop.xlane.xlu1 %5321  ;;  %8010 = vpow2.f32 %v5373_v22 }
 0xe35   : > { %v4939_v44 = vmul.f32 1.442695, %v4911_v47  ;;  %4977 = vadd.xlane.f32.xlu0 %v11983_v28  ;;  %v5345_v23 = vsub.f32 %v11934_v29, %v5322_v35 }
 0xe36   : > { %v4890_v6 = vpop.xlane.xlu0 %4889 }
 0xe37   : > { %8012 = vpow2.f32 %v4939_v44  ;;  %v4910_v27 = vsub.f32 %v11932_v18, %v4890_v6  ;;  %v5369_v33 = vmul.f32 1.442695, %v5345_v23 }
 0xe38   : > { %v11988_v10 = vpop.eup %8000  ;;  %v5320_v5 = vpop.xlane.xlu1 %5319  ;;  %8014 = vpow2.f32 %v5371_v60 }
 0xe39   : > { %v4937_v39 = vmul.f32 1.442695, %v4910_v27  ;;  %5411 = vadd.xlane.f32.xlu1 %v11988_v10  ;;  %v5344_v56 = vsub.f32 %v11924_v24, %v5320_v5  ;;  %v11992_v57 = vpop.eup %8002 }
 0xe3a   : > { %v4888_v21 = vpop.xlane.xlu0 %4887 }
 0xe3b   : > { %8016 = vpow2.f32 %v4937_v39  ;;  %v4909_v29 = vsub.f32 %v11938_v16, %v4888_v21  ;;  %v5367_v41 = vmul.f32 1.442695, %v5344_v56 }
 0xe3c   : > { %v11995_v15 = vpop.eup %8004  ;;  %v5318_v40 = vpop.xlane.xlu1 %5317  ;;  %8018 = vpow2.f32 %v5369_v33 }
 0xe3d   : > { %v4935_v18 = vmul.f32 1.442695, %v4909_v29  ;;  %5409 = vadd.xlane.f32.xlu1 %v11992_v57  ;;  %4975 = vadd.xlane.f32.xlu0 %v11995_v15  ;;  %v5343_v26 = vsub.f32 %v11928_v25, %v5318_v40  ;;  %v12000_v24 = vpop.eup %8006 }
 0xe3e   : > { %v4886_v0 = vpop.xlane.xlu0 %4885 }
 0xe3f   : > { %8020 = vpow2.f32 %v4935_v18  ;;  %v4908_v53 = vsub.f32 %v11920_v54, %v4886_v0  ;;  %v5365_v46 = vmul.f32 1.442695, %v5343_v26 }
 0xe40   : > { %v12003_v58 = vpop.eup %8008  ;;  %v5316_v16 = vpop.xlane.xlu1 %5315  ;;  %8022 = vpow2.f32 %v5367_v41 }
 0xe41   : > { %v4933_v43 = vmul.f32 1.442695, %v4908_v53  ;;  %5407 = vadd.xlane.f32.xlu1 %v12000_v24  ;;  %4973 = vadd.xlane.f32.xlu0 %v12003_v58  ;;  %v5342_v22 = vsub.f32 %v11918_v8, %v5316_v16  ;;  %v12008_v25 = vpop.eup %8010 }
 0xe42   : > { %v4884_v3 = vpop.xlane.xlu0 %4883 }
 0xe43   : > { %8024 = vpow2.f32 %v4933_v43  ;;  %v4907_v31 = vsub.f32 %v11926_v1, %v4884_v3  ;;  %v5363_v44 = vmul.f32 1.442695, %v5342_v22 }
 0xe44   : > { %v12011_v47 = vpop.eup %8012  ;;  %v5314_v54 = vpop.xlane.xlu1 %5313  ;;  %8026 = vpow2.f32 %v5365_v46 }
 0xe45   : > { %v4931_v35 = vmul.f32 1.442695, %v4907_v31  ;;  %5405 = vadd.xlane.f32.xlu1 %v12008_v25  ;;  %4971 = vadd.xlane.f32.xlu0 %v12011_v47  ;;  %v5341_v60 = vsub.f32 %v11922_v55, %v5314_v54  ;;  %v12016_v8 = vpop.eup %8014 }
 0xe46   : > { %v4882_v23 = vpop.xlane.xlu0 %4881 }
 0xe47   : > { %8028 = vpow2.f32 %v4931_v35  ;;  %v4906_v6 = vsub.f32 %v11908_v42, %v4882_v23  ;;  %v5361_v39 = vmul.f32 1.442695, %v5341_v60 }
 0xe48   : > { %v12019_v27 = vpop.eup %8016  ;;  %v5312_v1 = vpop.xlane.xlu1 %5311  ;;  %8030 = vpow2.f32 %v5363_v44 }
 0xe49   : > { %v4929_v5 = vmul.f32 1.442695, %v4906_v6  ;;  %5403 = vadd.xlane.f32.xlu1 %v12016_v8  ;;  %4969 = vadd.xlane.f32.xlu0 %v12019_v27  ;;  %v5340_v33 = vsub.f32 %v11912_v62, %v5312_v1  ;;  %v12024_v55 = vpop.eup %8018 }
 0xe4a   : > { %v4880_v56 = vpop.xlane.xlu0 %4879 }
 0xe4b   : > { %8032 = vpow2.f32 %v4929_v5  ;;  %v4905_v21 = vsub.f32 %v11914_v14, %v4880_v56  ;;  %v5359_v18 = vmul.f32 1.442695, %v5340_v33 }
 0xe4c   : > { %v12027_v29 = vpop.eup %8020  ;;  %v5310_v42 = vpop.xlane.xlu1 %5309  ;;  %8034 = vpow2.f32 %v5361_v39 }
 0xe4d   : > { %v4927_v40 = vmul.f32 1.442695, %v4905_v21  ;;  %5401 = vadd.xlane.f32.xlu1 %v12024_v55  ;;  %4967 = vadd.xlane.f32.xlu0 %v12027_v29  ;;  %v5339_v41 = vsub.f32 %v11916_v52, %v5310_v42  ;;  %v12032_v62 = vpop.eup %8022 }
 0xe4e   : > { %v4878_v26 = vpop.xlane.xlu0 %4877 }
 0xe4f   : > { %8036 = vpow2.f32 %v4927_v40  ;;  %v4904_v0 = vsub.f32 %v11898_v2, %v4878_v26  ;;  %v5357_v43 = vmul.f32 1.442695, %v5339_v41 }
 0xe50   : > { %v12035_v53 = vpop.eup %8024  ;;  %v5308_v14 = vpop.xlane.xlu1 %5307  ;;  %8038 = vpow2.f32 %v5359_v18 }
 0xe51   : > { %v4925_v16 = vmul.f32 1.442695, %v4904_v0  ;;  %5399 = vadd.xlane.f32.xlu1 %v12032_v62  ;;  %4965 = vadd.xlane.f32.xlu0 %v12035_v53  ;;  %v5338_v46 = vsub.f32 %v11906_v63, %v5308_v14  ;;  %v12040_v52 = vpop.eup %8026 }
 0xe52   : > { %v4876_v22 = vpop.xlane.xlu0 %4875 }
 0xe53   : > { %8040 = vpow2.f32 %v4925_v16  ;;  %v4903_v3 = vsub.f32 %v11904_v49, %v4876_v22  ;;  %v5355_v35 = vmul.f32 1.442695, %v5338_v46 }
 0xe54   : > { %v12043_v31 = vpop.eup %8028  ;;  %v5306_v2 = vpop.xlane.xlu1 %5305  ;;  %8042 = vpow2.f32 %v5357_v43 }
 0xe55   : > { %v4923_v54 = vmul.f32 1.442695, %v4903_v3  ;;  %5397 = vadd.xlane.f32.xlu1 %v12040_v52  ;;  %4963 = vadd.xlane.f32.xlu0 %v12043_v31  ;;  %v5337_v44 = vsub.f32 %v11910_v45, %v5306_v2  ;;  %v12048_v63 = vpop.eup %8030 }
 0xe56   : > { %v4874_v60 = vpop.xlane.xlu0 %4873 }
 0xe57   : > { %8044 = vpow2.f32 %v4923_v54  ;;  %v4902_v23 = vsub.f32 %v11890_v7, %v4874_v60  ;;  %v5353_v5 = vmul.f32 1.442695, %v5337_v44 }
 0xe58   : > { %v12051_v6 = vpop.eup %8032  ;;  %v4868_v49 = vpop.xlane.xlu1 %4867  ;;  %8046 = vpow2.f32 %v5355_v35 }
 0xe59   : > { %v4921_v1 = vmul.f32 1.442695, %v4902_v23  ;;  %5395 = vadd.xlane.f32.xlu1 %v12048_v63  ;;  %4961 = vadd.xlane.f32.xlu0 %v12051_v6  ;;  %v4899_v39 = vsub.f32 %v11888_v36, %v4868_v49  ;;  %v12056_v45 = vpop.eup %8034 }
 0xe5a   : > { %v4872_v33 = vpop.xlane.xlu0 %4871 }
 0xe5b   : > { %8048 = vpow2.f32 %v4921_v1  ;;  %v4901_v56 = vsub.f32 %v11892_v34, %v4872_v33  ;;  %v4915_v42 = vmul.f32 1.442695, %v4899_v39 }
 0xe5c   : > { %v12059_v21 = vpop.eup %8036  ;;  %8050 = vpow2.f32 %v5353_v5 }
 0xe5d   : > { %v4919_v7 = vmul.f32 1.442695, %v4901_v56  ;;  %5393 = vadd.xlane.f32.xlu1 %v12056_v45  ;;  %4959 = vadd.xlane.f32.xlu0 %v12059_v21  ;;  %v12063_v18 = vpop.eup %8038 }
 0xe5e   : > { %v4870_v40 = vpop.xlane.xlu0 %4869 }
 0xe5f   : > { %8052 = vpow2.f32 %v4919_v7  ;;  %v4900_v36 = vsub.f32 %v11886_v50, %v4870_v40 }
 0xe60   : > { %v12066_v41 = vpop.eup %8040  ;;  %8054 = vpow2.f32 %v4915_v42 }
 0xe61   : > { %v4917_v26 = vmul.f32 1.442695, %v4900_v36  ;;  %5391 = vadd.xlane.f32.xlu1 %v12063_v18  ;;  %4957 = vadd.xlane.f32.xlu0 %v12066_v41  ;;  %v12070_v34 = vpop.eup %8042 }
 0xe63   : > { %8056 = vpow2.f32 %v4917_v26 }
 0xe64   : > { %v12072_v0 = vpop.eup %8044 }
 0xe65   : > { %5389 = vadd.xlane.f32.xlu1 %v12070_v34  ;;  %4955 = vadd.xlane.f32.xlu0 %v12072_v0  ;;  %v12076_v14 = vpop.eup %8046 }
 0xe68   : > { %v12078_v50 = vpop.eup %8048 }
 0xe69   : > { %5387 = vadd.xlane.f32.xlu1 %v12076_v14  ;;  %4953 = vadd.xlane.f32.xlu0 %v12078_v50  ;;  %v12082_v16 = vpop.eup %8050 }
 0xe6c   : > { %v12084_v43 = vpop.eup %8052 }
 0xe6d   : > { %5385 = vadd.xlane.f32.xlu1 %v12082_v16  ;;  %4951 = vadd.xlane.f32.xlu0 %v12084_v43  ;;  %v12088_v46 = vpop.eup %8054 }
 0xe70   : > { %v12090_v22 = vpop.eup %8056 }
 0xe71   : > { %4947 = vadd.xlane.f32.xlu1 %v12088_v46  ;;  %4949 = vadd.xlane.f32.xlu0 %v12090_v22 }
 0xeba   : > { %v5416_v3 = vpop.xlane.xlu0 %5415 }
 0xebb   : > { %8058 = vrcp.f32 %v5416_v3 }
 0xebc   : > { %v5414_v2 = vpop.xlane.xlu1 %5413 }
 0xebd   : > { %8060 = vrcp.f32 %v5414_v2 }
 0xebe   : > { %v4978_v54 = vpop.xlane.xlu0 %4977 }
 0xebf   : > { %8062 = vrcp.f32 %v4978_v54 }
 0xec2   : > { %v5412_v35 = vpop.xlane.xlu1 %5411 }
 0xec3   : > { %8064 = vrcp.f32 %v5412_v35 }
 0xec6   : > { %v5410_v44 = vpop.xlane.xlu1 %5409  ;;  %v4976_v60 = vpop.xlane.xlu0 %4975 }
 0xec7   : > { %8066 = vrcp.f32 %v5410_v44 }
 0xec8   : > { %v8059_v23 = vpop.eup %8058  ;;  %8068 = vrcp.f32 %v4976_v60 }
 0xec9   : > { %v5448_v49 = vmul.f32 %v8059_v23, %v11975_v20 }
 0xeca   : > { %v8061_v1 = vpop.eup %8060  ;;  %v5408_v5 = vpop.xlane.xlu1 %5407 }
 0xecb   : > { %v4974_v39 = vpop.xlane.xlu0 %4973  ;;  %8070 = vrcp.f32 %v5408_v5  ;;  %7411 = vmatprep.subr.mxu1 %v5448_v49  ;;  %v5446_v33 = vmul.f32 %v8061_v1, %v11978_v9 }
 0xecc   : > { %v8063_v56 = vpop.eup %8062  ;;  %8072 = vrcp.f32 %v4974_v39  ;;  %7412 = vmatpush3.xpose.msra.mxu1 %v5448_v49 }
 0xecd   : > { %7413 = vmatprep.subr.mxu1 %v5446_v33  ;;  %v5010_v7 = vmul.f32 %v8063_v56, %v11983_v28 }
 0xece   : > { %v5406_v42 = vpop.xlane.xlu1 %5405 }
 0xecf   : > { %v4972_v40 = vpop.xlane.xlu0 %4971  ;;  %8074 = vrcp.f32 %v5406_v42  ;;  %7341 = vmatprep.subr.mxu0 %v5010_v7 }
 0xed0   : > { %v8065_v36 = vpop.eup %8064  ;;  %8076 = vrcp.f32 %v4972_v40  ;;  %7342 = vmatpush3.xpose.msra.mxu0 %v5010_v7  ;;  %7414 = vmatpush3.xpose.msra.mxu1 %v5446_v33 }
 0xed1   : > { %v5444_v20 = vmul.f32 %v8065_v36, %v11988_v10 }
 0xed2   : > { %v5404_v26 = vpop.xlane.xlu1 %5403 }
 0xed3   : > { %v4970_v3 = vpop.xlane.xlu0 %4969  ;;  %8078 = vrcp.f32 %v5404_v26  ;;  %7415 = vmatprep.subr.mxu1 %v5444_v20 }
 0xed4   : > { %v8067_v9 = vpop.eup %8066  ;;  %8080 = vrcp.f32 %v4970_v3  ;;  %7416 = vmatpush3.xpose.msra.mxu1 %v5444_v20 }
 0xed5   : > { %v8069_v2 = vpop.eup %8068  ;;  %v5442_v28 = vmul.f32 %v8067_v9, %v11992_v57 }
 0xed6   : > { %v5402_v54 = vpop.xlane.xlu1 %5401  ;;  %v5008_v44 = vmul.f32 %v8069_v2, %v11995_v15 }
 0xed7   : > { %v4968_v35 = vpop.xlane.xlu0 %4967  ;;  %8082 = vrcp.f32 %v5402_v54  ;;  %7417 = vmatprep.subr.mxu1 %v5442_v28 }
 0xed8   : > { %v8071_v60 = vpop.eup %8070  ;;  %8084 = vrcp.f32 %v4968_v35  ;;  %7343 = vmatprep.subr.mxu0 %v5008_v44  ;;  %7418 = vmatpush3.xpose.msra.mxu1 %v5442_v28 }
 0xed9   : > { %v8073_v10 = vpop.eup %8072  ;;  %7344 = vmatpush3.xpose.msra.mxu0 %v5008_v44  ;;  %v5440_v23 = vmul.f32 %v8071_v60, %v12000_v24 }
 0xeda   : > { %v5400_v49 = vpop.xlane.xlu1 %5399  ;;  %v5006_v5 = vmul.f32 %v8073_v10, %v12003_v58 }
 0xedb   : > { %v4966_v1 = vpop.xlane.xlu0 %4965  ;;  %8086 = vrcp.f32 %v5400_v49  ;;  %7419 = vmatprep.subr.mxu1 %v5440_v23 }
 0xedc   : > { %v8075_v57 = vpop.eup %8074  ;;  %8088 = vrcp.f32 %v4966_v1  ;;  %7345 = vmatprep.subr.mxu0 %v5006_v5  ;;  %7420 = vmatpush3.xpose.msra.mxu1 %v5440_v23 }
 0xedd   : > { %v8077_v15 = vpop.eup %8076  ;;  %7346 = vmatpush3.xpose.msra.mxu0 %v5006_v5  ;;  %v5438_v39 = vmul.f32 %v8075_v57, %v12008_v25 }
 0xede   : > { %v5398_v33 = vpop.xlane.xlu1 %5397  ;;  %v5004_v7 = vmul.f32 %v8077_v15, %v12011_v47 }
 0xedf   : > { %v4964_v56 = vpop.xlane.xlu0 %4963  ;;  %8090 = vrcp.f32 %v5398_v33  ;;  %7421 = vmatprep.subr.mxu1 %v5438_v39 }
 0xee0   : > { %v8079_v24 = vpop.eup %8078  ;;  %8092 = vrcp.f32 %v4964_v56  ;;  %7347 = vmatprep.subr.mxu0 %v5004_v7  ;;  %7422 = vmatpush3.xpose.msra.mxu1 %v5438_v39 }
 0xee1   : > { %v8081_v58 = vpop.eup %8080  ;;  %7348 = vmatpush3.xpose.msra.mxu0 %v5004_v7  ;;  %v5436_v42 = vmul.f32 %v8079_v24, %v12016_v8 }
 0xee2   : > { %v5396_v40 = vpop.xlane.xlu1 %5395  ;;  %v5002_v20 = vmul.f32 %v8081_v58, %v12019_v27 }
 0xee3   : > { %v4962_v36 = vpop.xlane.xlu0 %4961  ;;  %8094 = vrcp.f32 %v5396_v40  ;;  %7423 = vmatprep.subr.mxu1 %v5436_v42 }
 0xee4   : > { %v8083_v25 = vpop.eup %8082  ;;  %8096 = vrcp.f32 %v4962_v36  ;;  %7349 = vmatprep.subr.mxu0 %v5002_v20  ;;  %7424 = vmatpush3.xpose.msra.mxu1 %v5436_v42 }
 0xee5   : > { %v8085_v47 = vpop.eup %8084  ;;  %7350 = vmatpush3.xpose.msra.mxu0 %v5002_v20  ;;  %v5434_v26 = vmul.f32 %v8083_v25, %v12024_v55 }
 0xee6   : > { %v5394_v3 = vpop.xlane.xlu1 %5393  ;;  %v5000_v2 = vmul.f32 %v8085_v47, %v12027_v29 }
 0xee7   : > { %v4960_v9 = vpop.xlane.xlu0 %4959  ;;  %8098 = vrcp.f32 %v5394_v3  ;;  %7425 = vmatprep.subr.mxu1 %v5434_v26 }
 0xee8   : > { %v8087_v8 = vpop.eup %8086  ;;  %8100 = vrcp.f32 %v4960_v9  ;;  %7351 = vmatprep.subr.mxu0 %v5000_v2  ;;  %7426 = vmatpush3.xpose.msra.mxu1 %v5434_v26 }
 0xee9   : > { %v8089_v27 = vpop.eup %8088  ;;  %7352 = vmatpush3.xpose.msra.mxu0 %v5000_v2  ;;  %v5432_v28 = vmul.f32 %v8087_v8, %v12032_v62  ;;  %v5542_v8 = vld [vmem:[#allocation14 + $0x40] sm:$0xff] }
 0xeea   : > { %v5392_v54 = vpop.xlane.xlu1 %5391  ;;  %v4998_v44 = vmul.f32 %v8089_v27, %v12035_v53  ;;  %v5544_v27 = vld [vmem:[#allocation14 + $0x50] sm:$0xff] }
 0xeeb   : > { %v4958_v35 = vpop.xlane.xlu0 %4957  ;;  %8102 = vrcp.f32 %v5392_v54  ;;  %7427 = vmatprep.subr.mxu1 %v5432_v28  ;;  %v5547_v54 = vld [vmem:[#allocation14 + $0x68] sm:$0xff] }
 0xeec   : > { %v8091_v55 = vpop.eup %8090  ;;  %8104 = vrcp.f32 %v4958_v35  ;;  %7353 = vmatprep.subr.mxu0 %v4998_v44  ;;  %7428 = vmatpush3.xpose.msra.mxu1 %v5432_v28  ;;  %v5545_v28 = vld [vmem:[#allocation14 + $0x58] sm:$0xff]  ;;  %v5548_v35 = vld [vmem:[#allocation14 + $0x70] sm:$0xff] }
 0xeed   : > { %v8093_v29 = vpop.eup %8092  ;;  %7354 = vmatpush3.xpose.msra.mxu0 %v4998_v44  ;;  %v5430_v60 = vmul.f32 %v8091_v55, %v12040_v52  ;;  %v5549_v44 = vld [vmem:[#allocation14 + $0x78] sm:$0xff] }
 0xeee   : > { %v5390_v10 = vpop.xlane.xlu1 %5389  ;;  %v4996_v49 = vmul.f32 %v8093_v29, %v12043_v31 }
 0xeef   : > { %v4956_v23 = vpop.xlane.xlu0 %4955  ;;  %8106 = vrcp.f32 %v5390_v10  ;;  %7429 = vmatprep.subr.mxu1 %v5430_v60 }
 0xef0   : > { %v8095_v62 = vpop.eup %8094  ;;  %8108 = vrcp.f32 %v4956_v23  ;;  %7355 = vmatprep.subr.mxu0 %v4996_v49  ;;  %7430 = vmatpush3.xpose.msra.mxu1 %v5430_v60  ;;  %v13022_v60 = vld [vmem:[#allocation61_spill] sm:$0xff] }
 0xef1   : > { %v8097_v53 = vpop.eup %8096  ;;  %7356 = vmatpush3.xpose.msra.mxu0 %v4996_v49  ;;  %v5428_v1 = vmul.f32 %v8095_v62, %v12048_v63  ;;  %v13023_v23 = vld [vmem:[#allocation81_spill] sm:$0xff] }
 0xef2   : > { %v5388_v5 = vpop.xlane.xlu1 %5387  ;;  %v4994_v15 = vmul.f32 %v8097_v53, %v12051_v6 }
 0xef3   : > { %v4954_v57 = vpop.xlane.xlu0 %4953  ;;  %8110 = vrcp.f32 %v5388_v5  ;;  %7431 = vmatprep.subr.mxu1 %v5428_v1 }
 0xef4   : > { %v8099_v52 = vpop.eup %8098  ;;  %8112 = vrcp.f32 %v4954_v57  ;;  %7357 = vmatprep.subr.mxu0 %v4994_v15  ;;  %7432 = vmatpush3.xpose.msra.mxu1 %v5428_v1 }
 0xef5   : > { %v8101_v31 = vpop.eup %8100  ;;  %7358 = vmatpush3.xpose.msra.mxu0 %v4994_v15  ;;  %v5426_v39 = vmul.f32 %v8099_v52, %v12056_v45  ;;  %v13024_v15 = vld [vmem:[#allocation84_spill] sm:$0xff] }
 0xef6   : > { %v5386_v33 = vpop.xlane.xlu1 %5385  ;;  %v4992_v7 = vmul.f32 %v8101_v31, %v12059_v21  ;;  %v13025_v31 = vld [vmem:[#allocation86_spill] sm:$0xff] }
 0xef7   : > { %v4952_v56 = vpop.xlane.xlu0 %4951  ;;  %8114 = vrcp.f32 %v5386_v33  ;;  %7433 = vmatprep.subr.mxu1 %v5426_v39 }
 0xef8   : > { %v8103_v63 = vpop.eup %8102  ;;  %8116 = vrcp.f32 %v4952_v56  ;;  %7359 = vmatprep.subr.mxu0 %v4992_v7  ;;  %7434 = vmatpush3.xpose.msra.mxu1 %v5426_v39 }
 0xef9   : > { %v8105_v6 = vpop.eup %8104  ;;  %7360 = vmatpush3.xpose.msra.mxu0 %v4992_v7  ;;  %v5424_v24 = vmul.f32 %v8103_v63, %v12063_v18 }
 0xefa   : > { %v4948_v58 = vpop.xlane.xlu1 %4947  ;;  %v4990_v40 = vmul.f32 %v8105_v6, %v12066_v41  ;;  %v13026_v6 = vld [vmem:[#allocation133_spill] sm:$0xff] }
 0xefb   : > { %v4950_v42 = vpop.xlane.xlu0 %4949  ;;  %8118 = vrcp.f32 %v4948_v58  ;;  %7435 = vmatprep.subr.mxu1 %v5424_v24 }
 0xefc   : > { %v8107_v45 = vpop.eup %8106  ;;  %8120 = vrcp.f32 %v4950_v42  ;;  %7361 = vmatprep.subr.mxu0 %v4990_v40  ;;  %7436 = vmatpush3.xpose.msra.mxu1 %v5424_v24 }
 0xefd   : > { %v8109_v21 = vpop.eup %8108  ;;  %7362 = vmatpush3.xpose.msra.mxu0 %v4990_v40  ;;  %v5422_v36 = vmul.f32 %v8107_v45, %v12070_v34  ;;  %v13027_v45 = vld [vmem:[#allocation136_spill] sm:$0xff] }
 0xefe   : > { %v4988_v20 = vmul.f32 %v8109_v21, %v12072_v0 }
 0xeff   : > { %7437 = vmatprep.subr.mxu1 %v5422_v36 }
 0xf00   : > { %v8111_v25 = vpop.eup %8110  ;;  %7363 = vmatprep.subr.mxu0 %v4988_v20  ;;  %7438 = vmatpush3.xpose.msra.mxu1 %v5422_v36 }
 0xf01   : > { %v8113_v18 = vpop.eup %8112  ;;  %7364 = vmatpush3.xpose.msra.mxu0 %v4988_v20  ;;  %v5420_v41 = vmul.f32 %v8111_v25, %v12076_v14 }
 0xf02   : > { %v4986_v47 = vmul.f32 %v8113_v18, %v12078_v50 }
 0xf03   : > { %7439 = vmatprep.subr.mxu1 %v5420_v41 }
 0xf04   : > { %v8115_v26 = vpop.eup %8114  ;;  %7365 = vmatprep.subr.mxu0 %v4986_v47  ;;  %7440 = vmatpush3.xpose.msra.mxu1 %v5420_v41 }
 0xf05   : > { %v8117_v3 = vpop.eup %8116  ;;  %7366 = vmatpush3.xpose.msra.mxu0 %v4986_v47  ;;  %v5418_v34 = vmul.f32 %v8115_v26, %v12082_v16  ;;  %v5534_v16 = vld [vmem:[#allocation14] sm:$0xff] }
 0xf06   : > { %v4984_v0 = vmul.f32 %v8117_v3, %v12084_v43 }
 0xf07   : > { %7441 = vmatprep.subr.mxu1 %v5418_v34 }
 0xf08   : > { %v8119_v9 = vpop.eup %8118  ;;  %7367 = vmatprep.subr.mxu0 %v4984_v0  ;;  %7442 = vmatpush3.xpose.msra.mxu1 %v5418_v34  ;;  %v13028_v34 = vld [vmem:[#allocation79_spill] sm:$0xff] }
 0xf09   : > { %v8121_v2 = vpop.eup %8120  ;;  %7368 = vmatpush3.xpose.msra.mxu0 %v4984_v0  ;;  %v4980_v50 = vmul.f32 %v8119_v9, %v12088_v46  ;;  %v13029_v9 = vld [vmem:[#allocation85_spill] sm:$0xff] }
 0xf0a   : > { %v4982_v14 = vmul.f32 %v8121_v2, %v12090_v22 }
 0xf0b   : > { %7444 = vmatmul.mubr.f32.vlgmr.msra.gmra.mxu1 %v11870_v11 }
 0xf0c   : > { %7369 = vmatprep.subr.mxu0 %v4982_v14  ;;  %7446 = vmatprep.mubr.f32.mxu1 %v11876_v19 }
 0xf0d   : > { %7370 = vmatpush3.xpose.msra.mxu0 %v4982_v14 }
 0xf0e   : > { %7371 = vmatprep.subr.mxu0 %v4980_v50 }
 0xf0f   : > { %7447 = vmatmul.mubr.f32.gmra.mxu1 %v11874_v51 }
 0xf11   : > { %7372 = vmatpush3.xpose.msra.mxu0 %v4980_v50 }
 0xf14   : > { %7374 = vmatmul.mubr.f32.vlgmr.msra.gmra.mxu0 %v11859_v13 }
 0xf15   : > { %7376 = vmatprep.mubr.f32.mxu0 %v11866_v32 }
 0xf18   : > { %7377 = vmatmul.mubr.f32.gmra.mxu0 %v11863_v48  ;;  %v5535_v48 = vld [vmem:[#allocation14 + $0x8] sm:$0xff] }
 0xf19   : > { %7481 = vmatprep.mubr.f32.mxu0 %v5534_v16 }
 0xfcb   : > { %v7445_v43 = vpop.f32.mrf.mxu1 }
 0xfcd   : > { %v5515_v11 = vpop.f32.mrf.mxu1 }
 0xfcf   : > { %v7448_v22 = vpop.f32.mrf.mxu1 }
 0xfd0   : > { %7449 = vmatprep.subr.mxu0 %v7448_v22 }
 0xfd1   : > { %v5525_v19 = vpop.f32.mrf.mxu1  ;;  %7450 = vmatpush3.msra.mxu0 %v7448_v22  ;;  %v13030_v22 = vld [vmem:[#allocation87_spill] sm:$0xff] }
 0xfd2   : > { %7451 = vmatprep.subr.mxu0 %v5525_v19 }
 0xfd3   : > { %7452 = vmatpush3.msra.mxu0 %v5525_v19 }
 0xfd4   : > { %v7375_v46 = vpop.f32.mrf.mxu0  ;;  %7453 = vmatprep.subr.mxu0 %v7445_v43 }
 0xfd5   : > { %7454 = vmatpush3.msra.mxu0 %v7445_v43 }
 0xfd6   : > { %v5077_v51 = vpop.f32.mrf.mxu0  ;;  %7455 = vmatprep.subr.mxu0 %v5515_v11 }
 0xfd7   : > { %7456 = vmatpush3.msra.mxu0 %v5515_v11 }
 0xfd8   : > { %v7378_v13 = vpop.f32.mrf.mxu0 }
 0xfd9   : > { %7457 = vmatprep.subr.mxu0 %v7378_v13 }
 0xfda   : > { %v5087_v32 = vpop.f32.mrf.mxu0  ;;  %7458 = vmatpush3.msra.mxu0 %v7378_v13 }
 0xfdb   : > { %7459 = vmatprep.subr.mxu0 %v5087_v32 }
 0xfdc   : > { %7460 = vmatpush3.msra.mxu0 %v5087_v32  ;;  %v13031_v32 = vld [vmem:[#allocation52_spill] sm:$0xff] }
 0xfdd   : > { %7461 = vmatprep.subr.mxu0 %v7375_v46 }
 0xfde   : > { %7462 = vmatpush3.msra.mxu0 %v7375_v46 }
 0xfdf   : > { %7463 = vmatprep.subr.mxu0 %v5077_v51 }
 0xfe0   : > { %7464 = vmatpush3.msra.mxu0 %v5077_v51 }
 0xfe1   : > { %7465 = vmatprep.subr.mxu0 %v11900_v4 }
 0xfe2   : > { %7466 = vmatpush3.msra.mxu0 %v11900_v4  ;;  %v5538_v4 = vld [vmem:[#allocation14 + $0x20] sm:$0xff] }
 0xfe3   : > { %7467 = vmatprep.subr.mxu0 %v11902_v12 }
 0xfe4   : > { %7468 = vmatpush3.msra.mxu0 %v11902_v12  ;;  %v5540_v12 = vld [vmem:[#allocation14 + $0x30] sm:$0xff] }
 0xfe5   : > { %7469 = vmatprep.subr.mxu0 %v11894_v38 }
 0xfe6   : > { %7470 = vmatpush3.msra.mxu0 %v11894_v38  ;;  %v5536_v38 = vld [vmem:[#allocation14 + $0x10] sm:$0xff] }
 0xfe7   : > { %7471 = vmatprep.subr.mxu0 %v11896_v61 }
 0xfe8   : > { %7472 = vmatpush3.msra.mxu0 %v11896_v61  ;;  %v5537_v61 = vld [vmem:[#allocation14 + $0x18] sm:$0xff] }
 0xfe9   : > { %7473 = vmatprep.subr.mxu0 %v11882_v37 }
 0xfea   : > { %7474 = vmatpush3.msra.mxu0 %v11882_v37  ;;  %v5539_v37 = vld [vmem:[#allocation14 + $0x28] sm:$0xff] }
 0xfeb   : > { %7475 = vmatprep.subr.mxu0 %v11884_v17 }
 0xfec   : > { %7476 = vmatpush3.msra.mxu0 %v11884_v17  ;;  %v5541_v17 = vld [vmem:[#allocation14 + $0x38] sm:$0xff] }
 0xfed   : > { %7477 = vmatprep.subr.mxu0 %v11878_v30 }
 0xfee   : > { %7478 = vmatpush3.msra.mxu0 %v11878_v30  ;;  %v5543_v30 = vld [vmem:[#allocation14 + $0x48] sm:$0xff] }
 0xfef   : > { %7479 = vmatprep.subr.mxu0 %v11880_v59 }
 0xff0   : > { %7480 = vmatpush3.msra.mxu0 %v11880_v59  ;;  %v5546_v59 = vld [vmem:[#allocation14 + $0x60] sm:$0xff] }
 0xff1   : > { %7482 = vmatmul.mubr.f32.vlgmr.msra.gmra.mxu0 %v5535_v48 }
 0xff2   : > { %7484 = vmatprep.mubr.f32.mxu0 %v5536_v38 }
 0xff5   : > { %7485 = vmatmul.mubr.f32.gmra.mxu0 %v5537_v61 }
 0xff6   : > { %7487 = vmatprep.mubr.f32.mxu0 %v5538_v4 }
 0xff9   : > { %7488 = vmatmul.mubr.f32.gmra.mxu0 %v5539_v37 }
 0xffa   : > { %7490 = vmatprep.mubr.f32.mxu0 %v5540_v12 }
 0xffd   : > { %7491 = vmatmul.mubr.f32.gmra.mxu0 %v5541_v17 }
 0xffe   : > { %7493 = vmatprep.mubr.f32.mxu0 %v5542_v8 }
0x1001   : > { %7494 = vmatmul.mubr.f32.gmra.mxu0 %v5543_v30 }
0x1002   : > { %7496 = vmatprep.mubr.f32.mxu0 %v5544_v27  ;;  %v13032_v27 = vld [vmem:[#allocation90_spill] sm:$0xff] }
0x1005   : > { %7497 = vmatmul.mubr.f32.gmra.mxu0 %v5545_v28 }
0x1006   : > { %7499 = vmatprep.mubr.f32.mxu0 %v5546_v59  ;;  %v13033_v59 = vld [vmem:[#allocation96_spill] sm:$0xff] }
0x1009   : > { %7500 = vmatmul.mubr.f32.gmra.mxu0 %v5547_v54 }
0x100a   : > { %7502 = vmatprep.mubr.f32.mxu0 %v5548_v35 }
0x100d   : > { %7503 = vmatmul.mubr.f32.gmra.mxu0 %v5549_v44 }
0x10b1   : > { %v7483_v55 = vpop.f32.mrf.mxu0 }
0x10b2   : > { %v12149_v10 = vadd.f32 %v7483_v55, %v13022_v60 }
0x10b3   : > { %v5616_v29 = vpop.f32.mrf.mxu0 }
0x10b4   : > { %v12152_v49 = vadd.f32 %v5616_v29, %v13023_v23  ;;  %v5752_v5 = vmul.f32 %v12149_v10, %v12149_v10  ;;  %v13034_v23 = vld [vmem:[#allocation97_spill] sm:$0xff] }
0x10b5   : > { %v7486_v62 = vpop.f32.mrf.mxu0 }
0x10b6   : > { %v5751_v53 = vmul.f32 %v12152_v49, %v12152_v49  ;;  %v5727_v57 = vadd.f32 %v12149_v10, %v12152_v49  ;;  %v12161_v52 = vadd.f32 %v7486_v62, %v13024_v15 }
0x10b7   : > { %v5626_v1 = vpop.f32.mrf.mxu0 }
0x10b8   : > { %v12164_v39 = vadd.f32 %v5626_v1, %v13025_v31  ;;  %v5767_v56 = vadd.f32 %v5752_v5, %v5751_v53  ;;  %v5754_v42 = vmul.f32 %v12161_v52, %v12161_v52 }
0x10b9   : > { %v7489_v33 = vpop.f32.mrf.mxu0 }
0x10ba   : > { %v5728_v7 = vadd.f32 %v5727_v57, %v12164_v39  ;;  %v5753_v63 = vmul.f32 %v12164_v39, %v12164_v39  ;;  %v12170_v24 = vadd.f32 %v7489_v33, %v13026_v6  ;;  %v13035_v57 = vld [vmem:[#allocation91_spill] sm:$0xff] }
0x10bb   : > { %v5636_v58 = vpop.f32.mrf.mxu0 }
0x10bc   : > { %v5768_v40 = vadd.f32 %v5767_v56, %v5753_v63  ;;  %v12175_v21 = vadd.f32 %v5636_v58, %v13027_v45  ;;  %v5729_v36 = vadd.f32 %v5728_v7, %v12161_v52  ;;  %v5756_v47 = vmul.f32 %v12170_v24, %v12170_v24  ;;  %v13037_v45 = vld [vmem:[#allocation118_spill] sm:$0xff] }
0x10bd   : > { %v7492_v20 = vpop.f32.mrf.mxu0 }
0x10be   : > { %v5730_v25 = vadd.f32 %v5729_v36, %v12175_v21  ;;  %v5755_v18 = vmul.f32 %v12175_v21, %v12175_v21  ;;  %v5769_v41 = vadd.f32 %v5768_v40, %v5754_v42  ;;  %v12184_v0 = vadd.f32 %v7492_v20, %v13028_v34  ;;  %v13036_v42 = vld [vmem:[#allocation134_spill] sm:$0xff] }
0x10bf   : > { %v5646_v26 = vpop.f32.mrf.mxu0 }
0x10c0   : > { %v5770_v3 = vadd.f32 %v5769_v41, %v5755_v18  ;;  %v12187_v2 = vadd.f32 %v5646_v26, %v13029_v9  ;;  %v5731_v14 = vadd.f32 %v5730_v25, %v12170_v24  ;;  %v5758_v51 = vmul.f32 %v12184_v0, %v12184_v0 }
0x10c1   : > { %v7495_v50 = vpop.f32.mrf.mxu0 }
0x10c2   : > { %v5732_v16 = vadd.f32 %v5731_v14, %v12187_v2  ;;  %v5757_v43 = vmul.f32 %v12187_v2, %v12187_v2  ;;  %v5771_v11 = vadd.f32 %v5770_v3, %v5756_v47  ;;  %v12194_v19 = vadd.f32 %v7495_v50, %v13030_v22  ;;  %v5882_v14 = vld [vmem:[%s12448_s16 + $0x8] sm:$0xff]  ;;  %v5881_v50 = vld [vmem:[%s12448_s16] sm:$0xff]  ;;  %v5887_v22 = vld [vmem:[%s12448_s16 + $0x30] sm:$0xff] }
0x10c3   : > { %v5656_v46 = vpop.f32.mrf.mxu0 }
0x10c4   : > { %v5772_v13 = vadd.f32 %v5771_v11, %v5757_v43  ;;  %v12199_v48 = vadd.f32 %v5656_v46, %v13031_v32  ;;  %v5733_v38 = vadd.f32 %v5732_v16, %v12184_v0  ;;  %v5760_v17 = vmul.f32 %v12194_v19, %v12194_v19  ;;  %v5883_v16 = vld [vmem:[%s12448_s16 + $0x10] sm:$0xff]  ;;  %v5885_v43 = vld [vmem:[%s12448_s16 + $0x20] sm:$0xff]  ;;  %v5884_v11 = vld [vmem:[%s12448_s16 + $0x18] sm:$0xff] }
0x10c5   : > { %v7498_v61 = vpop.f32.mrf.mxu0  ;;  %v5886_v46 = vld [vmem:[%s12448_s16 + $0x28] sm:$0xff]  ;;  %v5891_v32 = vld [vmem:[%s12448_s16 + $0x50] sm:$0xff] }
0x10c6   : > { %v5734_v4 = vadd.f32 %v5733_v38, %v12199_v48  ;;  %v5759_v37 = vmul.f32 %v12199_v48, %v12199_v48  ;;  %v5773_v12 = vadd.f32 %v5772_v13, %v5758_v51  ;;  %v12208_v28 = vadd.f32 %v7498_v61, %v13032_v27  ;;  %v5889_v51 = vld [vmem:[%s12448_s16 + $0x40] sm:$0xff]  ;;  %v5888_v13 = vld [vmem:[%s12448_s16 + $0x38] sm:$0xff]  ;;  %v5890_v38 = vld [vmem:[%s12448_s16 + $0x48] sm:$0xff] }
0x10c7   : > { %v5666_v8 = vpop.f32.mrf.mxu0  ;;  %v5893_v61 = vld [vmem:[%s12448_s16 + $0x60] sm:$0xff] }
0x10c8   : > { %v5774_v30 = vadd.f32 %v5773_v12, %v5759_v37  ;;  %v12211_v54 = vadd.f32 %v5666_v8, %v13033_v59  ;;  %v5735_v35 = vadd.f32 %v5734_v4, %v12194_v19  ;;  %v5762_v1 = vmul.f32 %v12208_v28, %v12208_v28  ;;  %v5892_v4 = vld [vmem:[%s12448_s16 + $0x58] sm:$0xff]  ;;  %v5895_v37 = vld [vmem:[%s12448_s16 + $0x70] sm:$0xff]  ;;  %v5894_v12 = vld [vmem:[%s12448_s16 + $0x68] sm:$0xff] }
0x10c9   : > { %v7501_v44 = vpop.f32.mrf.mxu0 }
0x10ca   : > { %v5736_v55 = vadd.f32 %v5735_v35, %v12211_v54  ;;  %v5761_v29 = vmul.f32 %v12211_v54, %v12211_v54  ;;  %v5775_v60 = vadd.f32 %v5774_v30, %v5760_v17  ;;  %v12218_v62 = vadd.f32 %v7501_v44, %v13034_v23  ;;  %v5896_v17 = vld [vmem:[%s12448_s16 + $0x78] sm:$0xff] }
0x10cb   : > { %v5676_v53 = vpop.f32.mrf.mxu0 }
0x10cc   : > { %v5776_v5 = vadd.f32 %v5775_v60, %v5761_v29  ;;  %v12223_v15 = vadd.f32 %v5676_v53, %v13035_v57  ;;  %v5737_v31 = vadd.f32 %v5736_v55, %v12208_v28  ;;  %v5764_v6 = vmul.f32 %v12218_v62, %v12218_v62 }
0x10cd   : > { %v7504_v33 = vpop.f32.mrf.mxu0 }
0x10ce   : > { %v5738_v56 = vadd.f32 %v5737_v31, %v12223_v15  ;;  %v5763_v7 = vmul.f32 %v12223_v15, %v12223_v15  ;;  %v5777_v63 = vadd.f32 %v5776_v5, %v5762_v1  ;;  %v12232_v40 = vadd.f32 %v7504_v33, %v13036_v42  ;;  %v5865_v31 = vld [vmem:[#allocation19] sm:$0xff] }
0x10cf   : > { %v5686_v58 = vpop.f32.mrf.mxu0  ;;  %7537 = vmatprep.mubr.f32.mxu0 %v5865_v31 }
0x10d0   : > { %v12235_v36 = vadd.f32 %v5686_v58, %v13037_v45  ;;  %v5739_v20 = vadd.f32 %v5738_v56, %v12218_v62  ;;  %v5778_v25 = vadd.f32 %v5777_v63, %v5763_v7  ;;  %v5766_v3 = vmul.f32 %v12232_v40, %v12232_v40  ;;  %v5710_v63 = vld [vmem:[#allocation16 + $0x78] sm:$0xff]  ;;  %v5708_v58 = vld [vmem:[#allocation16 + $0x68] sm:$0xff] }
0x10d2   : > { %v5740_v18 = vadd.f32 %v5739_v20, %v12235_v36  ;;  %v5765_v41 = vmul.f32 %v12235_v36, %v12235_v36  ;;  %v5779_v47 = vadd.f32 %v5778_v25, %v5764_v6  ;;  %v5709_v6 = vld [vmem:[#allocation16 + $0x70] sm:$0xff]  ;;  %v5707_v20 = vld [vmem:[#allocation16 + $0x60] sm:$0xff] }
0x10d4   : > { %v5741_v26 = vadd.f32 %v5740_v18, %v12232_v40  ;;  %v5780_v34 = vadd.f32 %v5779_v47, %v5765_v41 }
0x10d6   : > { %5742 = vadd.xlane.f32.xlu0 %v5741_v26  ;;  %v5781_v9 = vadd.f32 %v5780_v34, %v5766_v3  ;;  %v5726_v26 = vld [vmem:[#allocation17 + $0x78] sm:$0xff] }
0x10d7   : > { %v5706_v3 = vld [vmem:[#allocation16 + $0x58] sm:$0xff] }
0x10d8   : > { %5782 = vadd.xlane.f32.xlu1 %v5781_v9 }
0x10e9   : > { %5904 = vperm.xlu1 %7859, %v5882_v14  }
0x10ec   : > { %5899 = vperm.xlu0 %7858, %v5881_v50  }
0x10ed   : > { %5909 = vperm.xlu1 %7859, %v5883_v16   ;;  %v5725_v16 = vld [vmem:[#allocation17 + $0x70] sm:$0xff] }
0x10f0   : > { %5919 = vperm.xlu0 %7858, %v5885_v43   ;;  %v5705_v43 = vld [vmem:[#allocation16 + $0x50] sm:$0xff] }
0x10f1   : > { %5914 = vperm.xlu1 %7859, %v5884_v11  }
0x10f4   : > { %5929 = vperm.xlu0 %7858, %v5887_v22  }
0x10f5   : > { %5924 = vperm.xlu1 %7859, %v5886_v46  }
0x10f8   : > { %5939 = vperm.xlu0 %7858, %v5889_v51  }
0x10f9   : > { %5934 = vperm.xlu1 %7859, %v5888_v13   ;;  %v5724_v13 = vld [vmem:[#allocation17 + $0x68] sm:$0xff] }
0x10fc   : > { %5949 = vperm.xlu0 %7858, %v5891_v32   ;;  %v5704_v32 = vld [vmem:[#allocation16 + $0x48] sm:$0xff] }
0x10fd   : > { %5944 = vperm.xlu1 %7859, %v5890_v38  }
0x1100   : > { %5959 = vperm.xlu0 %7858, %v5893_v61  }
0x1101   : > { %5954 = vperm.xlu1 %7859, %v5892_v4  }
0x1104   : > { %5969 = vperm.xlu0 %7858, %v5895_v37  }
0x1105   : > { %5964 = vperm.xlu1 %7859, %v5894_v12   ;;  %v5723_v12 = vld [vmem:[#allocation17 + $0x60] sm:$0xff] }
0x1109   : > { %5974 = vperm.xlu1 %7859, %v5896_v17   ;;  %v5703_v17 = vld [vmem:[#allocation16 + $0x40] sm:$0xff] }
0x115f   : > { %v5743_v8 = vpop.xlane.xlu0 %5742 }
0x1160   : > { %v5744_v30 = vrot.slane %v5743_v8, 4 }
0x1161   : > { %v5783_v27 = vpop.xlane.xlu1 %5782 }
0x1162   : > { %v5745_v59 = vadd.f32 %v5744_v30, %v5743_v8  ;;  %v5784_v35 = vrot.slane %v5783_v27, 4 }
0x1164   : > { %v5746_v44 = vrot.slane %v5745_v59, 2  ;;  %v5785_v55 = vadd.f32 %v5784_v35, %v5783_v27  ;;  %v5722_v35 = vld [vmem:[#allocation17 + $0x58] sm:$0xff] }
0x1166   : > { %v5786_v29 = vrot.slane %v5785_v55, 2  ;;  %v5747_v60 = vadd.f32 %v5746_v44, %v5745_v59  ;;  %v5702_v44 = vld [vmem:[#allocation16 + $0x38] sm:$0xff] }
0x1168   : > { %v5748_v23 = vrot.slane %v5747_v60, 1  ;;  %v5787_v53 = vadd.f32 %v5786_v29, %v5785_v55 }
0x116a   : > { %v5749_v1 = vadd.f32 %v5748_v23, %v5747_v60  ;;  %v5788_v5 = vrot.slane %v5787_v53, 1 }
0x116c   : > { %7579 = vpush %v5749_v1  ;;  %v5789_v57 = vadd.f32 %v5788_v5, %v5787_v53  ;;  %v5721_v53 = vld [vmem:[#allocation17 + $0x50] sm:$0xff] }
0x116d   : > { %v5701_v1 = vld [vmem:[#allocation16 + $0x30] sm:$0xff] }
0x116e   : > { %7581 = vpush %v5789_v57 }
0x119d   : > { %s7580_s19 = spop %7579 }
0x119e   : > { %s5791_s24 = smul.f32 6.1035156e-05, %s7580_s19 }
0x119f   : > { %s7582_s17 = spop %7581 }
0x11a0   : > { %s5793_s23 = smul.f32 %s5791_s24, %s5791_s24  ;;  %v12292_v7 = vstv %s5791_s24 }
0x11a1   : > { %s5792_s18 = smul.f32 6.1035156e-05, %s7582_s17  ;;  %v5811_v45 = vsub.f32 %v12232_v40, %v12292_v7  ;;  %v5810_v18 = vsub.f32 %v12235_v36, %v12292_v7  ;;  %v5809_v14 = vsub.f32 %v12218_v62, %v12292_v7  ;;  %v5808_v46 = vsub.f32 %v12223_v15, %v12292_v7  ;;  %s13038_s17 = sld [smem:[#allocation143_spill]] }
0x11a2   : > { %v5807_v4 = vsub.f32 %v12208_v28, %v12292_v7  ;;  %v5806_v27 = vsub.f32 %v12211_v54, %v12292_v7  ;;  %v5805_v60 = vsub.f32 %v12194_v19, %v12292_v7  ;;  %v5804_v31 = vsub.f32 %v12199_v48, %v12292_v7 }
0x11a3   : > { %s5794_s30 = ssub.f32 %s5792_s18, %s5793_s23  ;;  %s8416_s18 = scalar_lea.vmem %s12385_s22, 2048 }
0x11a4   : > { %p8417_p8 = scmp.ne.s32.totalorder %s12385_s22, %s8416_s18 }
0x11a5   : > { %s5812_s0 = sadd.f32 1e-05, %s5794_s30  ;;  %s8528_s30 = smov [#allocation20]  }
0x11a6   : > { %p8418_p11 = pnand %p8417_p8, %p8659_p5 }
0x11a7   : > { %v5813_v33 = vstv %s5812_s0  ;;  %s12383_s23 = scalar_lea.hbm %s13038_s17, %s6504_s21  ;;  %s8420_s0 = sshll.u32 %s8528_s30, 4  ;;  %s8421_s0 = int_to_ptr.vmem [resolvable:$false] %s8420_s0 }
0x11a8   : > { %8122 = vrsqrt.f32 %v5813_v33  ;;  %p8419_p7 = pneg %p8418_p11  ;;  %p8423_p0 = scmp.lt.s32.totalorder %s12385_s22, %s8421_s0 }
0x11b5   : > { %v8123_v56 = vpop.eup %8122 }
0x11b6   : > { %7583 = vpush %v8123_v56  ;;  %v5720_v56 = vld [vmem:[#allocation17 + $0x48] sm:$0xff] }
0x11e7   : > { %s7584_s27 = spop %7583 }
0x11e8   : > { %v12294_v42 = vstv %s7584_s27  ;;  %s8422_s27 = scalar_lea.vmem %s8421_s0, 4096 }
0x11e9   : > { %v5832_v25 = vmul.f32 %v12294_v42, %v5710_v63  ;;  %v5831_v41 = vmul.f32 %v12294_v42, %v5709_v6  ;;  %v5830_v47 = vmul.f32 %v12294_v42, %v5708_v58  ;;  %v5829_v50 = vmul.f32 %v12294_v42, %v5707_v20  ;;  %v5700_v63 = vld [vmem:[#allocation16 + $0x28] sm:$0xff]  ;;  %p8424_p12 = scmp.lt.s32.totalorder %s8422_s27, %s8416_s18 }
0x11ea   : > { %v5828_v51 = vmul.f32 %v12294_v42, %v5706_v3  ;;  %v5827_v37 = vmul.f32 %v12294_v42, %v5705_v43  ;;  %v5826_v59 = vmul.f32 %v12294_v42, %v5704_v32  ;;  %v5825_v23 = vmul.f32 %v12294_v42, %v5703_v17 }
0x11eb   : > { %v5848_v34 = vmul.f32 %v5832_v25, %v5811_v45  ;;  %v5847_v9 = vmul.f32 %v5831_v41, %v5810_v18  ;;  %v5846_v22 = vmul.f32 %v5830_v47, %v5809_v14  ;;  %v5845_v61 = vmul.f32 %v5829_v50, %v5808_v46  ;;  %v5719_v25 = vld [vmem:[#allocation17 + $0x40] sm:$0xff]  ;;  %p8425_p10 = por %p8424_p12, %p8423_p0 }
0x11ec   : > { %v5844_v30 = vmul.f32 %v5828_v51, %v5807_v4  ;;  %v5843_v29 = vmul.f32 %v5827_v37, %v5806_v27  ;;  %v5842_v57 = vmul.f32 %v5826_v59, %v5805_v60  ;;  %v5824_v33 = vmul.f32 %v12294_v42, %v5702_v44  ;;  %v5699_v18 = vld [vmem:[#allocation16 + $0x20] sm:$0xff] }
0x11ed   : > { %v5864_v11 = vadd.f32 %v5848_v34, %v5726_v26  ;;  %v5863_v38 = vadd.f32 %v5847_v9, %v5725_v16  ;;  %v5862_v8 = vadd.f32 %v5846_v22, %v5724_v13  ;;  %v5861_v55 = vadd.f32 %v5845_v61, %v5723_v12  ;;  %v5718_v34 = vld [vmem:[#allocation17 + $0x38] sm:$0xff]  ;;  %v5697_v22 = vld [vmem:[#allocation16 + $0x10] sm:$0xff]  ;;  %v5696_v61 = vld [vmem:[#allocation16 + $0x8] sm:$0xff]  ;;  %p8426_p3 = pnand %p8425_p10, %p8419_p7 }
0x11ee   : > { %v5860_v5 = vadd.f32 %v5844_v30, %v5722_v35  ;;  %v5859_v6 = vadd.f32 %v5843_v29, %v5721_v53  ;;  %v5841_v58 = vmul.f32 %v5825_v23, %v5804_v31  ;;  %v5803_v45 = vsub.f32 %v12184_v0, %v12292_v7  ;;  %v5698_v9 = vld [vmem:[#allocation16 + $0x18] sm:$0xff]  ;;  %v5695_v30 = vld [vmem:[#allocation16] sm:$0xff] }
0x11ef   : > { %7505 = vmatprep.subr.mxu0 %v5864_v11  ;;  %v5823_v20 = vmul.f32 %v12294_v42, %v5701_v1  ;;  %v5858_v41 = vadd.f32 %v5842_v57, %v5720_v56  ;;  %v5802_v26 = vsub.f32 %v12187_v2, %v12292_v7  ;;  %v5822_v3 = vmul.f32 %v12294_v42, %v5700_v63  ;;  %v5713_v1 = vld [vmem:[#allocation17 + $0x10] sm:$0xff] }
0x11f0   : > { %7506 = vmatpush3.msra.mxu0 %v5864_v11  ;;  %v5840_v47 = vmul.f32 %v5824_v33, %v5803_v45  ;;  %v5857_v14 = vadd.f32 %v5841_v58, %v5719_v25  ;;  %v5801_v16 = vsub.f32 %v12170_v24, %v12292_v7  ;;  %v5821_v43 = vmul.f32 %v12294_v42, %v5699_v18  ;;  %v5717_v11 = vld [vmem:[#allocation17 + $0x30] sm:$0xff]  ;;  %v5712_v33 = vld [vmem:[#allocation17 + $0x8] sm:$0xff]  ;;  %v5869_v25 = vld [vmem:[#allocation19 + $0x20] sm:$0xff] }
0x11f1   : > { %7507 = vmatprep.subr.mxu0 %v5863_v38  ;;  %v5839_v50 = vmul.f32 %v5823_v20, %v5802_v26  ;;  %v5800_v13 = vsub.f32 %v12175_v21, %v12292_v7  ;;  %v5820_v32 = vmul.f32 %v12294_v42, %v5698_v9  ;;  %v5799_v12 = vsub.f32 %v12161_v52, %v12292_v7  ;;  %v5866_v45 = vld [vmem:[#allocation19 + $0x8] sm:$0xff]  ;;  %v5867_v20 = vld [vmem:[#allocation19 + $0x10] sm:$0xff]  ;;  %v5873_v26 = vld [vmem:[#allocation19 + $0x40] sm:$0xff] }
0x11f2   : > { %7508 = vmatpush3.msra.mxu0 %v5863_v38  ;;  %v5856_v46 = vadd.f32 %v5840_v47, %v5718_v34  ;;  %v5838_v51 = vmul.f32 %v5822_v3, %v5801_v16  ;;  %v5716_v38 = vld [vmem:[#allocation17 + $0x28] sm:$0xff]  ;;  %v5819_v17 = vmul.f32 %v12294_v42, %v5697_v22  ;;  %v5798_v35 = vsub.f32 %v12164_v39, %v12292_v7  ;;  %v5872_v47 = vld [vmem:[#allocation19 + $0x38] sm:$0xff]  ;;  %v5875_v34 = vld [vmem:[#allocation19 + $0x50] sm:$0xff] }
0x11f3   : > { %7509 = vmatprep.subr.mxu0 %v5862_v8  ;;  %v5855_v4 = vadd.f32 %v5839_v50, %v5717_v11  ;;  %v5837_v37 = vmul.f32 %v5821_v43, %v5800_v13  ;;  %v5836_v59 = vmul.f32 %v5820_v32, %v5799_v12  ;;  %v5818_v44 = vmul.f32 %v12294_v42, %v5696_v61  ;;  %v5870_v18 = vld [vmem:[#allocation19 + $0x28] sm:$0xff]  ;;  %v5876_v9 = vld [vmem:[#allocation19 + $0x58] sm:$0xff]  ;;  %v5879_v16 = vld [vmem:[#allocation19 + $0x70] sm:$0xff]  ;;  %v5905_v11 = vpop.permute.xlu1 %5904 }
0x11f4   : > { %7510 = vmatpush3.msra.mxu0 %v5862_v8  ;;  %v5715_v8 = vld [vmem:[#allocation17 + $0x20] sm:$0xff]  ;;  %v5854_v27 = vadd.f32 %v5838_v51, %v5716_v38  ;;  %v5835_v60 = vmul.f32 %v5819_v17, %v5798_v35  ;;  %v5797_v23 = vsub.f32 %v12149_v10, %v12292_v7  ;;  %v5817_v53 = vmul.f32 %v12294_v42, %v5695_v30  ;;  %v5874_v3 = vld [vmem:[#allocation19 + $0x48] sm:$0xff]  ;;  %v5880_v43 = vld [vmem:[#allocation19 + $0x78] sm:$0xff]  ;;  %v5900_v51 = vpop.permute.xlu0 %5899 }
0x11f5   : > { %7511 = vmatprep.subr.mxu0 %v5861_v55  ;;  %v5853_v29 = vadd.f32 %v5837_v37, %v5715_v8  ;;  %v5796_v31 = vsub.f32 %v12152_v49, %v12292_v7  ;;  %v5868_v7 = vld [vmem:[#allocation19 + $0x18] sm:$0xff]  ;;  %v5878_v50 = vld [vmem:[#allocation19 + $0x68] sm:$0xff] }
0x11f6   : > { %7512 = vmatpush3.msra.mxu0 %v5861_v55  ;;  %v5714_v55 = vld [vmem:[#allocation17 + $0x18] sm:$0xff]  ;;  %v5834_v57 = vmul.f32 %v5818_v44, %v5797_v23  ;;  %v5851_v56 = vadd.f32 %v5835_v60, %v5713_v1 }
0x11f7   : > { %7513 = vmatprep.subr.mxu0 %v5860_v5  ;;  %v5833_v63 = vmul.f32 %v5817_v53, %v5796_v31  ;;  %v5910_v22 = vpop.permute.xlu1 %5909 }
0x11f8   : > { %7514 = vmatpush3.msra.mxu0 %v5860_v5  ;;  %v5852_v5 = vadd.f32 %v5836_v59, %v5714_v55  ;;  %v5850_v58 = vadd.f32 %v5834_v57, %v5712_v33  ;;  %v5920_v32 = vpop.permute.xlu0 %5919 }
0x11f9   : > { %7515 = vmatprep.subr.mxu0 %v5859_v6 }
0x11fa   : > { %7516 = vmatpush3.msra.mxu0 %v5859_v6  ;;  %v5711_v6 = vld [vmem:[#allocation17] sm:$0xff] }
0x11fb   : > { %7517 = vmatprep.subr.mxu0 %v5858_v41  ;;  %v5849_v42 = vadd.f32 %v5833_v63, %v5711_v6 }
0x11fc   : > { %7518 = vmatpush3.msra.mxu0 %v5858_v41  ;;  %v5871_v41 = vld [vmem:[#allocation19 + $0x30] sm:$0xff]  ;;  %v5930_v35 = vpop.permute.xlu0 %5929 }
0x11fd   : > { %7519 = vmatprep.subr.mxu0 %v5857_v14 }
0x11fe   : > { %7520 = vmatpush3.msra.mxu0 %v5857_v14  ;;  %v5877_v14 = vld [vmem:[#allocation19 + $0x60] sm:$0xff] }
0x11ff   : > { %7521 = vmatprep.subr.mxu0 %v5856_v46 }
0x1200   : > { %7522 = vmatpush3.msra.mxu0 %v5856_v46  ;;  %v5915_v46 = vpop.permute.xlu1 %5914  ;;  %v5940_v63 = vpop.permute.xlu0 %5939 }
0x1201   : > { %7523 = vmatprep.subr.mxu0 %v5855_v4 }
0x1202   : > { %7524 = vmatpush3.msra.mxu0 %v5855_v4 }
0x1203   : > { %7525 = vmatprep.subr.mxu0 %v5854_v27 }
0x1204   : > { %7526 = vmatpush3.msra.mxu0 %v5854_v27  ;;  %v5925_v13 = vpop.permute.xlu1 %5924 }
0x1205   : > { %7527 = vmatprep.subr.mxu0 %v5853_v29 }
0x1206   : > { %7528 = vmatpush3.msra.mxu0 %v5853_v29 }
0x1207   : > { %7529 = vmatprep.subr.mxu0 %v5852_v5 }
0x1208   : > { %7530 = vmatpush3.msra.mxu0 %v5852_v5  ;;  %v5935_v17 = vpop.permute.xlu1 %5934 }
0x1209   : > { %7531 = vmatprep.subr.mxu0 %v5851_v56 }
0x120a   : > { %7532 = vmatpush3.msra.mxu0 %v5851_v56 }
0x120b   : > { %7533 = vmatprep.subr.mxu0 %v5850_v58 }
0x120c   : > { %7534 = vmatpush3.msra.mxu0 %v5850_v58  ;;  %v5945_v5 = vpop.permute.xlu1 %5944 }
0x120d   : > { %7535 = vmatprep.subr.mxu0 %v5849_v42 }
0x120e   : > { %7536 = vmatpush3.msra.mxu0 %v5849_v42 }
0x120f   : > { %7538 = vmatmul.mubr.f32.vlgmr.msra.gmra.mxu0 %v5866_v45 }
0x1210   : > { %7540 = vmatprep.mubr.f32.mxu0 %v5867_v20 }
0x1213   : > { %7541 = vmatmul.mubr.f32.gmra.mxu0 %v5868_v7 }
0x1214   : > { %7543 = vmatprep.mubr.f32.mxu0 %v5869_v25  ;;  %v5955_v25 = vpop.permute.xlu1 %5954 }
0x1217   : > { %7544 = vmatmul.mubr.f32.gmra.mxu0 %v5870_v18 }
0x1218   : > { %7546 = vmatprep.mubr.f32.mxu0 %v5871_v41 }
0x121b   : > { %7547 = vmatmul.mubr.f32.gmra.mxu0 %v5872_v47 }
0x121c   : > { %7549 = vmatprep.mubr.f32.mxu0 %v5873_v26  ;;  %v5950_v26 = vpop.permute.xlu0 %5949 }
0x121f   : > { %7550 = vmatmul.mubr.f32.gmra.mxu0 %v5874_v3 }
0x1220   : > { %7552 = vmatprep.mubr.f32.mxu0 %v5875_v34 }
0x1223   : > { %7553 = vmatmul.mubr.f32.gmra.mxu0 %v5876_v9 }
0x1224   : > { %7555 = vmatprep.mubr.f32.mxu0 %v5877_v14 }
0x1227   : > { %7556 = vmatmul.mubr.f32.gmra.mxu0 %v5878_v50 }
0x1228   : > { %7558 = vmatprep.mubr.f32.mxu0 %v5879_v16 }
0x122b   : > { %7559 = vmatmul.mubr.f32.gmra.mxu0 %v5880_v43  ;;  %v5965_v43 = vpop.permute.xlu1 %5964 }
0x12cf   : > { %v7539_v38 = vpop.f32.mrf.mxu0 }
0x12d0   : > { %v6049_v61 = vadd.f32 %v7539_v38, %v5905_v11 }
0x12d1   : > { %v6043_v4 = vpop.f32.mrf.mxu0 }
0x12d2   : > { %v6123_v37 = vmax.f32 %v6049_v61, 0.0  ;;  %v6044_v12 = vadd.f32 %v6043_v4, %v5900_v51  ;;  %v5960_v51 = vpop.permute.xlu0 %5959 }
0x12d3   : > { %v7542_v8 = vpop.f32.mrf.mxu0 }
0x12d4   : > { %v6139_v30 = vadd.f32 %v6123_v37, %v12149_v10  ;;  %v6122_v27 = vmax.f32 %v6044_v12, 0.0  ;;  %v6059_v59 = vadd.f32 %v7542_v8, %v5915_v46  ;;  %v5975_v37 = vpop.permute.xlu1 %5974 }
0x12d5   : > { %v6053_v44 = vpop.f32.mrf.mxu0 }
0x12d6   : > { %6155 = vst [vmem:[%s12348_s20 + $0x8] sm:$0xff] %v6139_v30  ;;  %v6138_v55 = vadd.f32 %v6122_v27, %v12152_v49  ;;  %v6125_v29 = vmax.f32 %v6059_v59, 0.0  ;;  %v6054_v60 = vadd.f32 %v6053_v44, %v5910_v22  ;;  %v5970_v30 = vpop.permute.xlu0 %5969 }
0x12d7   : > { %v7545_v23 = vpop.f32.mrf.mxu0 }
0x12d8   : > { %6154 = vst [vmem:[%s12348_s20] sm:$0xff] %v6138_v55  ;;  %v6141_v53 = vadd.f32 %v6125_v29, %v12161_v52  ;;  %v6124_v10 = vmax.f32 %v6054_v60, 0.0  ;;  %v6069_v1 = vadd.f32 %v7545_v23, %v5925_v13 }
0x12d9   : > { %v6063_v57 = vpop.f32.mrf.mxu0 }
0x12da   : > { %6157 = vst [vmem:[%s12348_s20 + $0x18] sm:$0xff] %v6141_v53  ;;  %v6140_v31 = vadd.f32 %v6124_v10, %v12164_v39  ;;  %v6127_v33 = vmax.f32 %v6069_v1, 0.0  ;;  %v6064_v56 = vadd.f32 %v6063_v57, %v5920_v32 }
0x12db   : > { %v7548_v49 = vpop.f32.mrf.mxu0 }
0x12dc   : > { %6156 = vst [vmem:[%s12348_s20 + $0x10] sm:$0xff] %v6140_v31  ;;  %v6143_v6 = vadd.f32 %v6127_v33, %v12170_v24  ;;  %v6126_v58 = vmax.f32 %v6064_v56, 0.0  ;;  %v6079_v42 = vadd.f32 %v7548_v49, %v5935_v17 }
0x12dd   : > { %v6073_v52 = vpop.f32.mrf.mxu0 }
0x12de   : > { %6159 = vst [vmem:[%s12348_s20 + $0x28] sm:$0xff] %v6143_v6  ;;  %v6142_v45 = vadd.f32 %v6126_v58, %v12175_v21  ;;  %v6129_v20 = vmax.f32 %v6079_v42, 0.0  ;;  %v6074_v7 = vadd.f32 %v6073_v52, %v5930_v35 }
0x12df   : > { %v7551_v39 = vpop.f32.mrf.mxu0 }
0x12e0   : > { %6158 = vst [vmem:[%s12348_s20 + $0x20] sm:$0xff] %v6142_v45  ;;  %v6145_v18 = vadd.f32 %v6129_v20, %v12184_v0  ;;  %v6128_v41 = vmax.f32 %v6074_v7, 0.0  ;;  %v6089_v47 = vadd.f32 %v7551_v39, %v5945_v5 }
0x12e1   : > { %v6083_v24 = vpop.f32.mrf.mxu0 }
0x12e2   : > { %6161 = vst [vmem:[%s12348_s20 + $0x38] sm:$0xff] %v6145_v18  ;;  %v6144_v3 = vadd.f32 %v6128_v41, %v12187_v2  ;;  %v6131_v34 = vmax.f32 %v6089_v47, 0.0  ;;  %v6084_v9 = vadd.f32 %v6083_v24, %v5940_v63 }
0x12e3   : > { %v7554_v21 = vpop.f32.mrf.mxu0 }
0x12e4   : > { %6160 = vst [vmem:[%s12348_s20 + $0x30] sm:$0xff] %v6144_v3  ;;  %v6147_v14 = vadd.f32 %v6131_v34, %v12194_v19  ;;  %v6130_v50 = vmax.f32 %v6084_v9, 0.0  ;;  %v6099_v16 = vadd.f32 %v7554_v21, %v5955_v25 }
0x12e5   : > { %v6093_v0 = vpop.f32.mrf.mxu0 }
0x12e6   : > { %6163 = vst [vmem:[%s12348_s20 + $0x48] sm:$0xff] %v6147_v14  ;;  %v6146_v11 = vadd.f32 %v6130_v50, %v12199_v48  ;;  %v6133_v22 = vmax.f32 %v6099_v16, 0.0  ;;  %v6094_v46 = vadd.f32 %v6093_v0, %v5950_v26 }
0x12e7   : > { %v7557_v2 = vpop.f32.mrf.mxu0 }
0x12e8   : > { %6162 = vst [vmem:[%s12348_s20 + $0x40] sm:$0xff] %v6146_v11  ;;  %v6149_v13 = vadd.f32 %v6133_v22, %v12208_v28  ;;  %v6132_v32 = vmax.f32 %v6094_v46, 0.0  ;;  %v6109_v38 = vadd.f32 %v7557_v2, %v5965_v43 }
0x12e9   : > { %v6103_v19 = vpop.f32.mrf.mxu0 }
0x12ea   : > { %6165 = vst [vmem:[%s12348_s20 + $0x58] sm:$0xff] %v6149_v13  ;;  %v6148_v61 = vadd.f32 %v6132_v32, %v12211_v54  ;;  %v6135_v4 = vmax.f32 %v6109_v38, 0.0  ;;  %v6104_v48 = vadd.f32 %v6103_v19, %v5960_v51 }
0x12eb   : > { %v7560_v12 = vpop.f32.mrf.mxu0 }
0x12ec   : > { %6164 = vst [vmem:[%s12348_s20 + $0x50] sm:$0xff] %v6148_v61  ;;  %v6151_v17 = vadd.f32 %v6135_v4, %v12218_v62  ;;  %v6134_v8 = vmax.f32 %v6104_v48, 0.0  ;;  %v6119_v28 = vadd.f32 %v7560_v12, %v5975_v37 }
0x12ed   : > { %v6113_v27 = vpop.f32.mrf.mxu0 }
0x12ee   : > { %6167 = vst [vmem:[%s12348_s20 + $0x68] sm:$0xff] %v6151_v17  ;;  %v6150_v59 = vadd.f32 %v6134_v8, %v12223_v15  ;;  %v6137_v54 = vmax.f32 %v6119_v28, 0.0  ;;  %v6114_v35 = vadd.f32 %v6113_v27, %v5970_v30 }
0x12f0   : > { %6166 = vst [vmem:[%s12348_s20 + $0x60] sm:$0xff] %v6150_v59  ;;  %v6153_v44 = vadd.f32 %v6137_v54, %v12232_v40  ;;  %v6136_v55 = vmax.f32 %v6114_v35, 0.0 }
0x12f2   : > { %6169 = vst [vmem:[%s12348_s20 + $0x78] sm:$0xff] %v6153_v44  ;;  %v6152_v62 = vadd.f32 %v6136_v55, %v12235_v36 }
0x12f4   : > { %6168 = vst [vmem:[%s12348_s20 + $0x70] sm:$0xff] %v6152_v62 }
0x12f5   : > { %8429 = shalt.err (!%p8426_p3)
}
0x12f6   : > { %s8430_s26 = scalar_lea.hbm %s12383_s23, 2048  ;;  %s8434_s21 = scalar_lea.hbm %s13038_s17, 4096 }
0x12f7   : > { %p8431_p2 = scmp.ne.s32.totalorder %s12383_s23, %s8430_s26  ;;  %p8435_p9 = scmp.lt.s32.totalorder %s12383_s23, %s13038_s17 }
0x12f8   : > { %p8436_p13 = scmp.lt.s32.totalorder %s8434_s21, %s8430_s26 }
0x12f9   : > { %p8432_p4 = pnand %p8431_p2, %p8659_p5 }
0x12fa   : > { %p8437_p8 = por %p8436_p13, %p8435_p9 }
0x12fb   : > { %p8433_p1 = pneg %p8432_p4 }
0x12fd   : > { %p8438_p11 = pnand %p8437_p8, %p8433_p1 }
0x12ff   : > { %8441 = shalt.err (!%p8438_p11)
}
0x1300   : > { %s8529_s18 = smov 128   ;;  %s8530_s30 = smov 8  }
0x1301   : > { %7629 = dma.vmem_to_hbm [thread:$0]  (%p8659_p5), %s12385_s22, 2048, %s12383_s23, %s12392_s28, %s8529_s18, %s8529_s18, %s8530_s30  }
0x1302 PF: > { %s13039_s0 = sld [smem:[#allocation30_spill]] }
0x1303   : > { %s13040_s27 = sld [smem:[#allocation28_spill]] }
0x1308   : > { %p7691_p7 = scmp.ge.s32.totalorder %s13039_s0, 2 }
0x1309   : > { %s6199_s20 = sand.u32 1, %s13040_s27  }
0x130a   : > { %p7666_p0 = pnand %p7691_p7, %p8663_p6  ;;  %s6200_s26 = scalar_lea.sflag [#allocation4], %s6199_s20 }
0x130c   : > { %p7667_p12 = pneg %p7666_p0 }
0x130e   : > { %8483 = dma.done.wait (%p7667_p12), %s6200_s26, 2048  }
0x130f   : > { %8485 = vsyncadd (%p7667_p12), %s6200_s26, 4294965248  ;;  %s13042_s27 = sld [smem:[#allocation31_spill]]  ;;  %s13045_s24 = smov %s8492_s25 }
0x1310   : > { %s13043_s21 = sld [smem:[#allocation29_spill]] }
0x1311   : > { %s13044_s26 = sld [smem:[#allocation32_spill]] }
0x1315   : > { %p33_p10 = scmp.ge.s32.totalorder %s13042_s27, 4  }
0x1316   : > { %s13046_s25 = smov %s13043_s21 }
0x1317   :  { %35 = sbr.rel (!%p33_p10) target bundleno = 14 (0xe), region = 173 }
0x131c   :  { %6205 = vsyncpa [#allocation3], 1 }
0x131d   :  { %6207 = vsyncpa [#allocation3 + $0x1], 1 }
0x131e   :  { %6208 = vsyncpa [#allocation6], 1 }
0x131f   :  { %6209 = vsyncpa [#allocation9], 1 }
0x1320   :  { %6210 = vsyncpa [#allocation12], 1 }
0x1321   :  { %6211 = vsyncpa [#allocation15], 1 }
0x1322   :  { %6212 = vsyncpa [#allocation18], 1 }
0x1323   :  { %6213 = vsyncpa [#allocation4], 1 }
0x1324   :  { %6215 = vsyncpa [#allocation4 + $0x1], 1 }

</bundles_post_ra>
